<compile_context>
chip_gen: v7x
topology: tpu7x:2x2x1
jax: 0.10.0
libtpu: 0.0.40
codegen_flags: <defaults>
</compile_context>

<pallas_src>
import jax
import jax.numpy as jnp
from jax.experimental import pallas as pl
from jax.experimental.pallas import tpu as pltpu

K = 5            # conv kernel size
PAD = 2          # "same" padding for 5x5
OC = 30          # number of HPF filters
THRESHOLD = 3.0  # TLU threshold


# ---------------------------------------------------------------------------
# Deterministic synthetic HPF weights.
# TODO(synk): the original module hard-codes the 30 SRM filters
# (all_normalized_hpf_list); those constants are not bundled here, so we build
# deterministic stand-ins with the same structure (8 filters are 3x3 zero-
# padded to 5x5, 22 are native 5x5; each zero-mean and max-abs normalized).
# The kernel is agnostic to the actual tap values.
# ---------------------------------------------------------------------------
def make_hpf_weight(key):
    k3, k5 = jax.random.split(key)
    f3 = jax.random.normal(k3, (8, 3, 3), dtype=jnp.float32)
    f5 = jax.random.normal(k5, (22, 5, 5), dtype=jnp.float32)
    f3 = f3 - f3.mean(axis=(1, 2), keepdims=True)
    f5 = f5 - f5.mean(axis=(1, 2), keepdims=True)
    f3 = f3 / jnp.max(jnp.abs(f3), axis=(1, 2), keepdims=True)
    f5 = f5 / jnp.max(jnp.abs(f5), axis=(1, 2), keepdims=True)
    f3p = jnp.pad(f3, ((0, 0), (1, 1), (1, 1)))          # 3x3 -> 5x5
    w = jnp.concatenate([f3p, f5], axis=0)               # (30, 5, 5)
    return w.reshape(OC, 1, K, K)                        # Conv2d weight (O, I, kH, kW)


# ---------------------------------------------------------------------------
# Pallas kernel: NB samples per grid step.
#   xflat_ref : (NB, (H+4)*(W+4) + 2*PAD)  flattened zero-padded samples
#                                          (+2*PAD tail so the largest tap
#                                           window stays in bounds)
#   w_ref     : (OC, 25)                   filter taps (VMEM-resident)
#   o_ref     : (NB, OC, H, W)             clamped conv output, NCHW
#   patch_ref : (25, H*(W+4))              im2col scratch (VMEM)
#   wide_ref  : (OC, H*(W+4))              clamped matmul result scratch (VMEM)
# ---------------------------------------------------------------------------
def hpf_kernel(xflat_ref, w_ref, o_ref, patch_ref, wide_ref):
    nb, _, H, W = o_ref.shape
    Wp = W + 2 * PAD              # padded row width
    PW = H * Wp                   # patch length (incl. Wp - W wrap cols / row)

    for b in range(nb):
        # im2col: for tap (dy, dx) the patch is a *contiguous* window of the
        # row-major flattened padded image -> plain lane-offset loads, no
        # in-kernel reshapes.
        for dy in range(K):
            for dx in range(K):
                t = dy * K + dx
                patch_ref[t, :] = xflat_ref[b, pl.ds(dy * Wp + dx, PW)]

        # (30, 25) @ (25, H*Wp) on the MXU with f32 accumulation; fuse the TLU
        # clamp on the VPU.  HIGHEST precision keeps full f32 accuracy.
        wide = jnp.dot(w_ref[...], patch_ref[...],
                       preferred_element_type=jnp.float32,
                       precision=jax.lax.Precision.HIGHEST)
        wide_ref[...] = jnp.clip(wide, -THRESHOLD, THRESHOLD)

        # Output row y lives in columns [y*Wp, y*Wp + W) of the wide slab; the
        # remaining Wp - W wrap columns are garbage and dropped here.
        for y in range(H):
            o_ref[b, :, y, :] = wide_ref[:, pl.ds(y * Wp, W)].astype(o_ref.dtype)


@jax.jit
def hpf_forward(x, hpf_weight):
    """x: (N, 1, H, W) float32, hpf_weight: (30, 1, 5, 5) -> (N, 30, H, W)."""
    N, C, H, W = x.shape
    assert C == 1
    Wp = W + 2 * PAD
    Lp = (H + 2 * PAD) * Wp

    # Zero-pad spatially, flatten row-major (free reshape), append 2*PAD zeros
    # so the last tap's window is in bounds.  Fused into this jit.
    xpad = jnp.pad(x[:, 0], ((0, 0), (PAD, PAD), (PAD, PAD)))     # (N, H+4, W+4)
    xflat = jnp.pad(xpad.reshape(N, Lp), ((0, 0), (0, 2 * PAD)))  # (N, Lp+4)
    w_flat = hpf_weight[:, 0].reshape(OC, K * K)                  # (30, 25)

    # Batch several samples per grid step to amortize per-step overhead while
    # honoring the (8, 128)-divisibility rule on the block's leading pair.
    NB = 8 if N % 8 == 0 else N
    # TODO(synk): for large images (e.g. 512x512) add an H-tile grid axis with a
    # 2*PAD-row halo so the per-step output block stays within the VMEM limit.
    return pl.pallas_call(
        hpf_kernel,
        out_shape=jax.ShapeDtypeStruct((N, OC, H, W), x.dtype),
        grid=(N // NB,),
        in_specs=[
            pl.BlockSpec((NB, Lp + 2 * PAD), lambda n: (n, 0)),
            pl.BlockSpec((OC, K * K), lambda n: (0, 0)),   # resident weights
        ],
        out_specs=pl.BlockSpec((NB, OC, H, W), lambda n: (n, 0, 0, 0)),
        scratch_shapes=[
            pltpu.VMEM((K * K, H * Wp), jnp.float32),      # im2col slab
            pltpu.VMEM((OC, H * Wp), jnp.float32),         # clamped wide result
        ],
        compiler_params=pltpu.CompilerParams(
            dimension_semantics=("parallel",)),
    )(xflat, w_flat)


# ---------------------------------------------------------------------------
# Pure-JAX reference (matches the PyTorch module semantics).
# ---------------------------------------------------------------------------
def hpf_reference(x, hpf_weight):
    out = jax.lax.conv_general_dilated(
        x, hpf_weight,
        window_strides=(1, 1),
        padding=((PAD, PAD), (PAD, PAD)),
        dimension_numbers=("NCHW", "OIHW", "NCHW"),
        precision=jax.lax.Precision.HIGHEST,
    )
    return jnp.clip(out, -THRESHOLD, THRESHOLD)


if __name__ == "__main__":
    N, C, H, W = 2, 1, 16, 16
    key = jax.random.PRNGKey(0)
    kx, kw = jax.random.split(key)
    x = jax.random.normal(kx, (N, C, H, W), dtype=jnp.float32) * 4.0
    w = make_hpf_weight(kw)

    out = jax.block_until_ready(hpf_forward(x, w))
    ref = hpf_reference(x, w)

    assert out.shape == (N, OC, H, W)
    err = float(jnp.max(jnp.abs(out - ref)))
    # f32 multi-pass MXU matmul vs XLA conv: tiny numerical slack.
    assert err < 1e-4, err
    print("KERNEL_OK")
</pallas_src>

<mosaic_0001>
module attributes {stable_mosaic.version = 11 : i64} {
  func.func @hpf_kernel(%arg0: i32, %arg1: memref<2x404xf32, #tpu.memory_space<vmem>>, %arg2: memref<30x25xf32, #tpu.memory_space<vmem>>, %arg3: memref<2x30x16x16xf32, #tpu.memory_space<vmem>>, %arg4: memref<25x320xf32, #tpu.memory_space<vmem>>, %arg5: memref<30x320xf32, #tpu.memory_space<vmem>>) attributes {dimension_semantics = [#tpu.dimension_semantics<parallel>], iteration_bounds = array<i64: 1>, scalar_prefetch = 0 : i64, scratch_operands = 2 : i64, tpu.core_type = #tpu.core_type<tc>, window_params = [{transform_indices = @transform_0, window_bounds = array<i64: 2, 404>}, {pipeline_mode = #tpu.pipeline_mode<synchronous>, transform_indices = @transform_1, window_bounds = array<i64: 30, 25>}, {transform_indices = @transform_2, window_bounds = array<i64: 2, 30, 16, 16>}]} {
    %c0 = arith.constant 0 : index
    %c0_0 = arith.constant 0 : index
    %0 = vector.load %arg1[%c0, %c0_0] : memref<2x404xf32, #tpu.memory_space<vmem>>, vector<1x320xf32>
    %1 = vector.shape_cast %0 : vector<1x320xf32> to vector<320xf32>
    %c0_1 = arith.constant 0 : index
    %c0_2 = arith.constant 0 : index
    %2 = vector.load %arg4[%c0_1, %c0_2] : memref<25x320xf32, #tpu.memory_space<vmem>>, vector<1x320xf32>
    %3 = vector.shape_cast %2 : vector<1x320xf32> to vector<320xf32>
    %4 = vector.shape_cast %1 : vector<320xf32> to vector<1x320xf32>
    tpu.vector_store %arg4[%c0_1, %c0_2], %4 {strides = array<i32>} : memref<25x320xf32, #tpu.memory_space<vmem>>, vector<1x320xf32>,
    %c0_3 = arith.constant 0 : index
    %c1 = arith.constant 1 : index
    %5 = vector.load %arg1[%c0_3, %c1] : memref<2x404xf32, #tpu.memory_space<vmem>>, vector<1x320xf32>
    %6 = vector.shape_cast %5 : vector<1x320xf32> to vector<320xf32>
    %c1_4 = arith.constant 1 : index
    %c0_5 = arith.constant 0 : index
    %7 = vector.load %arg4[%c1_4, %c0_5] : memref<25x320xf32, #tpu.memory_space<vmem>>, vector<1x320xf32>
    %8 = vector.shape_cast %7 : vector<1x320xf32> to vector<320xf32>
    %9 = vector.shape_cast %6 : vector<320xf32> to vector<1x320xf32>
    tpu.vector_store %arg4[%c1_4, %c0_5], %9 {strides = array<i32>} : memref<25x320xf32, #tpu.memory_space<vmem>>, vector<1x320xf32>,
    %c0_6 = arith.constant 0 : index
    %c2 = arith.constant 2 : index
    %10 = vector.load %arg1[%c0_6, %c2] : memref<2x404xf32, #tpu.memory_space<vmem>>, vector<1x320xf32>
    %11 = vector.shape_cast %10 : vector<1x320xf32> to vector<320xf32>
    %c2_7 = arith.constant 2 : index
    %c0_8 = arith.constant 0 : index
    %12 = vector.load %arg4[%c2_7, %c0_8] : memref<25x320xf32, #tpu.memory_space<vmem>>, vector<1x320xf32>
    %13 = vector.shape_cast %12 : vector<1x320xf32> to vector<320xf32>
    %14 = vector.shape_cast %11 : vector<320xf32> to vector<1x320xf32>
    tpu.vector_store %arg4[%c2_7, %c0_8], %14 {strides = array<i32>} : memref<25x320xf32, #tpu.memory_space<vmem>>, vector<1x320xf32>,
    %c0_9 = arith.constant 0 : index
    %c3 = arith.constant 3 : index
    %15 = vector.load %arg1[%c0_9, %c3] : memref<2x404xf32, #tpu.memory_space<vmem>>, vector<1x320xf32>
    %16 = vector.shape_cast %15 : vector<1x320xf32> to vector<320xf32>
    %c3_10 = arith.constant 3 : index
    %c0_11 = arith.constant 0 : index
    %17 = vector.load %arg4[%c3_10, %c0_11] : memref<25x320xf32, #tpu.memory_space<vmem>>, vector<1x320xf32>
    %18 = vector.shape_cast %17 : vector<1x320xf32> to vector<320xf32>
    %19 = vector.shape_cast %16 : vector<320xf32> to vector<1x320xf32>
    tpu.vector_store %arg4[%c3_10, %c0_11], %19 {strides = array<i32>} : memref<25x320xf32, #tpu.memory_space<vmem>>, vector<1x320xf32>,
    %c0_12 = arith.constant 0 : index
    %c4 = arith.constant 4 : index
    %20 = vector.load %arg1[%c0_12, %c4] : memref<2x404xf32, #tpu.memory_space<vmem>>, vector<1x320xf32>
    %21 = vector.shape_cast %20 : vector<1x320xf32> to vector<320xf32>
    %c4_13 = arith.constant 4 : index
    %c0_14 = arith.constant 0 : index
    %22 = vector.load %arg4[%c4_13, %c0_14] : memref<25x320xf32, #tpu.memory_space<vmem>>, vector<1x320xf32>
    %23 = vector.shape_cast %22 : vector<1x320xf32> to vector<320xf32>
    %24 = vector.shape_cast %21 : vector<320xf32> to vector<1x320xf32>
    tpu.vector_store %arg4[%c4_13, %c0_14], %24 {strides = array<i32>} : memref<25x320xf32, #tpu.memory_space<vmem>>, vector<1x320xf32>,
    %c0_15 = arith.constant 0 : index
    %c20 = arith.constant 20 : index
    %25 = vector.load %arg1[%c0_15, %c20] : memref<2x404xf32, #tpu.memory_space<vmem>>, vector<1x320xf32>
    %26 = vector.shape_cast %25 : vector<1x320xf32> to vector<320xf32>
    %c5 = arith.constant 5 : index
    %c0_16 = arith.constant 0 : index
    %27 = vector.load %arg4[%c5, %c0_16] : memref<25x320xf32, #tpu.memory_space<vmem>>, vector<1x320xf32>
    %28 = vector.shape_cast %27 : vector<1x320xf32> to vector<320xf32>
    %29 = vector.shape_cast %26 : vector<320xf32> to vector<1x320xf32>
    tpu.vector_store %arg4[%c5, %c0_16], %29 {strides = array<i32>} : memref<25x320xf32, #tpu.memory_space<vmem>>, vector<1x320xf32>,
    %c0_17 = arith.constant 0 : index
    %c21 = arith.constant 21 : index
    %30 = vector.load %arg1[%c0_17, %c21] : memref<2x404xf32, #tpu.memory_space<vmem>>, vector<1x320xf32>
    %31 = vector.shape_cast %30 : vector<1x320xf32> to vector<320xf32>
    %c6 = arith.constant 6 : index
    %c0_18 = arith.constant 0 : index
    %32 = vector.load %arg4[%c6, %c0_18] : memref<25x320xf32, #tpu.memory_space<vmem>>, vector<1x320xf32>
    %33 = vector.shape_cast %32 : vector<1x320xf32> to vector<320xf32>
    %34 = vector.shape_cast %31 : vector<320xf32> to vector<1x320xf32>
    tpu.vector_store %arg4[%c6, %c0_18], %34 {strides = array<i32>} : memref<25x320xf32, #tpu.memory_space<vmem>>, vector<1x320xf32>,
    %c0_19 = arith.constant 0 : index
    %c22 = arith.constant 22 : index
    %35 = vector.load %arg1[%c0_19, %c22] : memref<2x404xf32, #tpu.memory_space<vmem>>, vector<1x320xf32>
    %36 = vector.shape_cast %35 : vector<1x320xf32> to vector<320xf32>
    %c7 = arith.constant 7 : index
    %c0_20 = arith.constant 0 : index
    %37 = vector.load %arg4[%c7, %c0_20] : memref<25x320xf32, #tpu.memory_space<vmem>>, vector<1x320xf32>
    %38 = vector.shape_cast %37 : vector<1x320xf32> to vector<320xf32>
    %39 = vector.shape_cast %36 : vector<320xf32> to vector<1x320xf32>
    tpu.vector_store %arg4[%c7, %c0_20], %39 {strides = array<i32>} : memref<25x320xf32, #tpu.memory_space<vmem>>, vector<1x320xf32>,
    %c0_21 = arith.constant 0 : index
    %c23 = arith.constant 23 : index
    %40 = vector.load %arg1[%c0_21, %c23] : memref<2x404xf32, #tpu.memory_space<vmem>>, vector<1x320xf32>
    %41 = vector.shape_cast %40 : vector<1x320xf32> to vector<320xf32>
    %c8 = arith.constant 8 : index
    %c0_22 = arith.constant 0 : index
    %42 = vector.load %arg4[%c8, %c0_22] : memref<25x320xf32, #tpu.memory_space<vmem>>, vector<1x320xf32>
    %43 = vector.shape_cast %42 : vector<1x320xf32> to vector<320xf32>
    %44 = vector.shape_cast %41 : vector<320xf32> to vector<1x320xf32>
    tpu.vector_store %arg4[%c8, %c0_22], %44 {strides = array<i32>} : memref<25x320xf32, #tpu.memory_space<vmem>>, vector<1x320xf32>,
    %c0_23 = arith.constant 0 : index
    %c24 = arith.constant 24 : index
    %45 = vector.load %arg1[%c0_23, %c24] : memref<2x404xf32, #tpu.memory_space<vmem>>, vector<1x320xf32>
    %46 = vector.shape_cast %45 : vector<1x320xf32> to vector<320xf32>
    %c9 = arith.constant 9 : index
    %c0_24 = arith.constant 0 : index
    %47 = vector.load %arg4[%c9, %c0_24] : memref<25x320xf32, #tpu.memory_space<vmem>>, vector<1x320xf32>
    %48 = vector.shape_cast %47 : vector<1x320xf32> to vector<320xf32>
    %49 = vector.shape_cast %46 : vector<320xf32> to vector<1x320xf32>
    tpu.vector_store %arg4[%c9, %c0_24], %49 {strides = array<i32>} : memref<25x320xf32, #tpu.memory_space<vmem>>, vector<1x320xf32>,
    %c0_25 = arith.constant 0 : index
    %c40 = arith.constant 40 : index
    %50 = vector.load %arg1[%c0_25, %c40] : memref<2x404xf32, #tpu.memory_space<vmem>>, vector<1x320xf32>
    %51 = vector.shape_cast %50 : vector<1x320xf32> to vector<320xf32>
    %c10 = arith.constant 10 : index
    %c0_26 = arith.constant 0 : index
    %52 = vector.load %arg4[%c10, %c0_26] : memref<25x320xf32, #tpu.memory_space<vmem>>, vector<1x320xf32>
    %53 = vector.shape_cast %52 : vector<1x320xf32> to vector<320xf32>
    %54 = vector.shape_cast %51 : vector<320xf32> to vector<1x320xf32>
    tpu.vector_store %arg4[%c10, %c0_26], %54 {strides = array<i32>} : memref<25x320xf32, #tpu.memory_space<vmem>>, vector<1x320xf32>,
    %c0_27 = arith.constant 0 : index
    %c41 = arith.constant 41 : index
    %55 = vector.load %arg1[%c0_27, %c41] : memref<2x404xf32, #tpu.memory_space<vmem>>, vector<1x320xf32>
    %56 = vector.shape_cast %55 : vector<1x320xf32> to vector<320xf32>
    %c11 = arith.constant 11 : index
    %c0_28 = arith.constant 0 : index
    %57 = vector.load %arg4[%c11, %c0_28] : memref<25x320xf32, #tpu.memory_space<vmem>>, vector<1x320xf32>
    %58 = vector.shape_cast %57 : vector<1x320xf32> to vector<320xf32>
    %59 = vector.shape_cast %56 : vector<320xf32> to vector<1x320xf32>
    tpu.vector_store %arg4[%c11, %c0_28], %59 {strides = array<i32>} : memref<25x320xf32, #tpu.memory_space<vmem>>, vector<1x320xf32>,
    %c0_29 = arith.constant 0 : index
    %c42 = arith.constant 42 : index
    %60 = vector.load %arg1[%c0_29, %c42] : memref<2x404xf32, #tpu.memory_space<vmem>>, vector<1x320xf32>
    %61 = vector.shape_cast %60 : vector<1x320xf32> to vector<320xf32>
    %c12 = arith.constant 12 : index
    %c0_30 = arith.constant 0 : index
    %62 = vector.load %arg4[%c12, %c0_30] : memref<25x320xf32, #tpu.memory_space<vmem>>, vector<1x320xf32>
    %63 = vector.shape_cast %62 : vector<1x320xf32> to vector<320xf32>
    %64 = vector.shape_cast %61 : vector<320xf32> to vector<1x320xf32>
    tpu.vector_store %arg4[%c12, %c0_30], %64 {strides = array<i32>} : memref<25x320xf32, #tpu.memory_space<vmem>>, vector<1x320xf32>,
    %c0_31 = arith.constant 0 : index
    %c43 = arith.constant 43 : index
    %65 = vector.load %arg1[%c0_31, %c43] : memref<2x404xf32, #tpu.memory_space<vmem>>, vector<1x320xf32>
    %66 = vector.shape_cast %65 : vector<1x320xf32> to vector<320xf32>
    %c13 = arith.constant 13 : index
    %c0_32 = arith.constant 0 : index
    %67 = vector.load %arg4[%c13, %c0_32] : memref<25x320xf32, #tpu.memory_space<vmem>>, vector<1x320xf32>
    %68 = vector.shape_cast %67 : vector<1x320xf32> to vector<320xf32>
    %69 = vector.shape_cast %66 : vector<320xf32> to vector<1x320xf32>
    tpu.vector_store %arg4[%c13, %c0_32], %69 {strides = array<i32>} : memref<25x320xf32, #tpu.memory_space<vmem>>, vector<1x320xf32>,
    %c0_33 = arith.constant 0 : index
    %c44 = arith.constant 44 : index
    %70 = vector.load %arg1[%c0_33, %c44] : memref<2x404xf32, #tpu.memory_space<vmem>>, vector<1x320xf32>
    %71 = vector.shape_cast %70 : vector<1x320xf32> to vector<320xf32>
    %c14 = arith.constant 14 : index
    %c0_34 = arith.constant 0 : index
    %72 = vector.load %arg4[%c14, %c0_34] : memref<25x320xf32, #tpu.memory_space<vmem>>, vector<1x320xf32>
    %73 = vector.shape_cast %72 : vector<1x320xf32> to vector<320xf32>
    %74 = vector.shape_cast %71 : vector<320xf32> to vector<1x320xf32>
    tpu.vector_store %arg4[%c14, %c0_34], %74 {strides = array<i32>} : memref<25x320xf32, #tpu.memory_space<vmem>>, vector<1x320xf32>,
    %c0_35 = arith.constant 0 : index
    %c60 = arith.constant 60 : index
    %75 = vector.load %arg1[%c0_35, %c60] : memref<2x404xf32, #tpu.memory_space<vmem>>, vector<1x320xf32>
    %76 = vector.shape_cast %75 : vector<1x320xf32> to vector<320xf32>
    %c15 = arith.constant 15 : index
    %c0_36 = arith.constant 0 : index
    %77 = vector.load %arg4[%c15, %c0_36] : memref<25x320xf32, #tpu.memory_space<vmem>>, vector<1x320xf32>
    %78 = vector.shape_cast %77 : vector<1x320xf32> to vector<320xf32>
    %79 = vector.shape_cast %76 : vector<320xf32> to vector<1x320xf32>
    tpu.vector_store %arg4[%c15, %c0_36], %79 {strides = array<i32>} : memref<25x320xf32, #tpu.memory_space<vmem>>, vector<1x320xf32>,
    %c0_37 = arith.constant 0 : index
    %c61 = arith.constant 61 : index
    %80 = vector.load %arg1[%c0_37, %c61] : memref<2x404xf32, #tpu.memory_space<vmem>>, vector<1x320xf32>
    %81 = vector.shape_cast %80 : vector<1x320xf32> to vector<320xf32>
    %c16 = arith.constant 16 : index
    %c0_38 = arith.constant 0 : index
    %82 = vector.load %arg4[%c16, %c0_38] : memref<25x320xf32, #tpu.memory_space<vmem>>, vector<1x320xf32>
    %83 = vector.shape_cast %82 : vector<1x320xf32> to vector<320xf32>
    %84 = vector.shape_cast %81 : vector<320xf32> to vector<1x320xf32>
    tpu.vector_store %arg4[%c16, %c0_38], %84 {strides = array<i32>} : memref<25x320xf32, #tpu.memory_space<vmem>>, vector<1x320xf32>,
    %c0_39 = arith.constant 0 : index
    %c62 = arith.constant 62 : index
    %85 = vector.load %arg1[%c0_39, %c62] : memref<2x404xf32, #tpu.memory_space<vmem>>, vector<1x320xf32>
    %86 = vector.shape_cast %85 : vector<1x320xf32> to vector<320xf32>
    %c17 = arith.constant 17 : index
    %c0_40 = arith.constant 0 : index
    %87 = vector.load %arg4[%c17, %c0_40] : memref<25x320xf32, #tpu.memory_space<vmem>>, vector<1x320xf32>
    %88 = vector.shape_cast %87 : vector<1x320xf32> to vector<320xf32>
    %89 = vector.shape_cast %86 : vector<320xf32> to vector<1x320xf32>
    tpu.vector_store %arg4[%c17, %c0_40], %89 {strides = array<i32>} : memref<25x320xf32, #tpu.memory_space<vmem>>, vector<1x320xf32>,
    %c0_41 = arith.constant 0 : index
    %c63 = arith.constant 63 : index
    %90 = vector.load %arg1[%c0_41, %c63] : memref<2x404xf32, #tpu.memory_space<vmem>>, vector<1x320xf32>
    %91 = vector.shape_cast %90 : vector<1x320xf32> to vector<320xf32>
    %c18 = arith.constant 18 : index
    %c0_42 = arith.constant 0 : index
    %92 = vector.load %arg4[%c18, %c0_42] : memref<25x320xf32, #tpu.memory_space<vmem>>, vector<1x320xf32>
    %93 = vector.shape_cast %92 : vector<1x320xf32> to vector<320xf32>
    %94 = vector.shape_cast %91 : vector<320xf32> to vector<1x320xf32>
    tpu.vector_store %arg4[%c18, %c0_42], %94 {strides = array<i32>} : memref<25x320xf32, #tpu.memory_space<vmem>>, vector<1x320xf32>,
    %c0_43 = arith.constant 0 : index
    %c64 = arith.constant 64 : index
    %95 = vector.load %arg1[%c0_43, %c64] : memref<2x404xf32, #tpu.memory_space<vmem>>, vector<1x320xf32>
    %96 = vector.shape_cast %95 : vector<1x320xf32> to vector<320xf32>
    %c19 = arith.constant 19 : index
    %c0_44 = arith.constant 0 : index
    %97 = vector.load %arg4[%c19, %c0_44] : memref<25x320xf32, #tpu.memory_space<vmem>>, vector<1x320xf32>
    %98 = vector.shape_cast %97 : vector<1x320xf32> to vector<320xf32>
    %99 = vector.shape_cast %96 : vector<320xf32> to vector<1x320xf32>
    tpu.vector_store %arg4[%c19, %c0_44], %99 {strides = array<i32>} : memref<25x320xf32, #tpu.memory_space<vmem>>, vector<1x320xf32>,
    %c0_45 = arith.constant 0 : index
    %c80 = arith.constant 80 : index
    %100 = vector.load %arg1[%c0_45, %c80] : memref<2x404xf32, #tpu.memory_space<vmem>>, vector<1x320xf32>
    %101 = vector.shape_cast %100 : vector<1x320xf32> to vector<320xf32>
    %c20_46 = arith.constant 20 : index
    %c0_47 = arith.constant 0 : index
    %102 = vector.load %arg4[%c20_46, %c0_47] : memref<25x320xf32, #tpu.memory_space<vmem>>, vector<1x320xf32>
    %103 = vector.shape_cast %102 : vector<1x320xf32> to vector<320xf32>
    %104 = vector.shape_cast %101 : vector<320xf32> to vector<1x320xf32>
    tpu.vector_store %arg4[%c20_46, %c0_47], %104 {strides = array<i32>} : memref<25x320xf32, #tpu.memory_space<vmem>>, vector<1x320xf32>,
    %c0_48 = arith.constant 0 : index
    %c81 = arith.constant 81 : index
    %105 = vector.load %arg1[%c0_48, %c81] : memref<2x404xf32, #tpu.memory_space<vmem>>, vector<1x320xf32>
    %106 = vector.shape_cast %105 : vector<1x320xf32> to vector<320xf32>
    %c21_49 = arith.constant 21 : index
    %c0_50 = arith.constant 0 : index
    %107 = vector.load %arg4[%c21_49, %c0_50] : memref<25x320xf32, #tpu.memory_space<vmem>>, vector<1x320xf32>
    %108 = vector.shape_cast %107 : vector<1x320xf32> to vector<320xf32>
    %109 = vector.shape_cast %106 : vector<320xf32> to vector<1x320xf32>
    tpu.vector_store %arg4[%c21_49, %c0_50], %109 {strides = array<i32>} : memref<25x320xf32, #tpu.memory_space<vmem>>, vector<1x320xf32>,
    %c0_51 = arith.constant 0 : index
    %c82 = arith.constant 82 : index
    %110 = vector.load %arg1[%c0_51, %c82] : memref<2x404xf32, #tpu.memory_space<vmem>>, vector<1x320xf32>
    %111 = vector.shape_cast %110 : vector<1x320xf32> to vector<320xf32>
    %c22_52 = arith.constant 22 : index
    %c0_53 = arith.constant 0 : index
    %112 = vector.load %arg4[%c22_52, %c0_53] : memref<25x320xf32, #tpu.memory_space<vmem>>, vector<1x320xf32>
    %113 = vector.shape_cast %112 : vector<1x320xf32> to vector<320xf32>
    %114 = vector.shape_cast %111 : vector<320xf32> to vector<1x320xf32>
    tpu.vector_store %arg4[%c22_52, %c0_53], %114 {strides = array<i32>} : memref<25x320xf32, #tpu.memory_space<vmem>>, vector<1x320xf32>,
    %c0_54 = arith.constant 0 : index
    %c83 = arith.constant 83 : index
    %115 = vector.load %arg1[%c0_54, %c83] : memref<2x404xf32, #tpu.memory_space<vmem>>, vector<1x320xf32>
    %116 = vector.shape_cast %115 : vector<1x320xf32> to vector<320xf32>
    %c23_55 = arith.constant 23 : index
    %c0_56 = arith.constant 0 : index
    %117 = vector.load %arg4[%c23_55, %c0_56] : memref<25x320xf32, #tpu.memory_space<vmem>>, vector<1x320xf32>
    %118 = vector.shape_cast %117 : vector<1x320xf32> to vector<320xf32>
    %119 = vector.shape_cast %116 : vector<320xf32> to vector<1x320xf32>
    tpu.vector_store %arg4[%c23_55, %c0_56], %119 {strides = array<i32>} : memref<25x320xf32, #tpu.memory_space<vmem>>, vector<1x320xf32>,
    %c0_57 = arith.constant 0 : index
    %c84 = arith.constant 84 : index
    %120 = vector.load %arg1[%c0_57, %c84] : memref<2x404xf32, #tpu.memory_space<vmem>>, vector<1x320xf32>
    %121 = vector.shape_cast %120 : vector<1x320xf32> to vector<320xf32>
    %c24_58 = arith.constant 24 : index
    %c0_59 = arith.constant 0 : index
    %122 = vector.load %arg4[%c24_58, %c0_59] : memref<25x320xf32, #tpu.memory_space<vmem>>, vector<1x320xf32>
    %123 = vector.shape_cast %122 : vector<1x320xf32> to vector<320xf32>
    %124 = vector.shape_cast %121 : vector<320xf32> to vector<1x320xf32>
    tpu.vector_store %arg4[%c24_58, %c0_59], %124 {strides = array<i32>} : memref<25x320xf32, #tpu.memory_space<vmem>>, vector<1x320xf32>,
    %c0_60 = arith.constant 0 : index
    %c0_61 = arith.constant 0 : index
    %125 = vector.load %arg2[%c0_60, %c0_61] : memref<30x25xf32, #tpu.memory_space<vmem>>, vector<30x25xf32>
    %c0_62 = arith.constant 0 : index
    %c0_63 = arith.constant 0 : index
    %126 = vector.load %arg4[%c0_62, %c0_63] : memref<25x320xf32, #tpu.memory_space<vmem>>, vector<25x320xf32>
    %cst = arith.constant dense<0.000000e+00> : vector<30x320xf32>
    %127 = tpu.matmul %125, %126, %cst {dimension_numbers = #tpu.dot_dimension_numbers<[1], [0], [0], [1], [0, 0, 1, 1], [], []>, precision = #tpu.contract_precision<fp32>} : vector<30x25xf32>, vector<25x320xf32>, vector<30x320xf32> -> vector<30x320xf32>
    %cst_64 = arith.constant -3.000000e+00 : f32
    %cst_65 = arith.constant 3.000000e+00 : f32
    %128 = vector.broadcast %cst_64 : f32 to vector<30x320xf32>
    %129 = arith.maximumf %128, %127 : vector<30x320xf32>
    %130 = vector.broadcast %cst_65 : f32 to vector<30x320xf32>
    %131 = arith.minimumf %130, %129 : vector<30x320xf32>
    %c0_66 = arith.constant 0 : index
    %c0_67 = arith.constant 0 : index
    %132 = vector.load %arg5[%c0_66, %c0_67] : memref<30x320xf32, #tpu.memory_space<vmem>>, vector<30x320xf32>
    tpu.vector_store %arg5[%c0_66, %c0_67], %131 {strides = array<i32>} : memref<30x320xf32, #tpu.memory_space<vmem>>, vector<30x320xf32>,
    %c0_68 = arith.constant 0 : index
    %c0_69 = arith.constant 0 : index
    %133 = vector.load %arg5[%c0_68, %c0_69] : memref<30x320xf32, #tpu.memory_space<vmem>>, vector<30x16xf32>
    %c0_70 = arith.constant 0 : index
    %c0_71 = arith.constant 0 : index
    %c0_72 = arith.constant 0 : index
    %c0_73 = arith.constant 0 : index
    %134 = vector.load %arg3[%c0_70, %c0_71, %c0_72, %c0_73] : memref<2x30x16x16xf32, #tpu.memory_space<vmem>>, vector<1x30x1x16xf32>
    %135 = vector.shape_cast %134 : vector<1x30x1x16xf32> to vector<30x16xf32>
    %136 = vector.shape_cast %133 : vector<30x16xf32> to vector<1x30x1x16xf32>
    tpu.vector_store %arg3[%c0_70, %c0_71, %c0_72, %c0_73], %136 {strides = array<i32>} : memref<2x30x16x16xf32, #tpu.memory_space<vmem>>, vector<1x30x1x16xf32>,
    %c0_74 = arith.constant 0 : index
    %c20_75 = arith.constant 20 : index
    %137 = vector.load %arg5[%c0_74, %c20_75] : memref<30x320xf32, #tpu.memory_space<vmem>>, vector<30x16xf32>
    %c0_76 = arith.constant 0 : index
    %c0_77 = arith.constant 0 : index
    %c1_78 = arith.constant 1 : index
    %c0_79 = arith.constant 0 : index
    %138 = vector.load %arg3[%c0_76, %c0_77, %c1_78, %c0_79] : memref<2x30x16x16xf32, #tpu.memory_space<vmem>>, vector<1x30x1x16xf32>
    %139 = vector.shape_cast %138 : vector<1x30x1x16xf32> to vector<30x16xf32>
    %140 = vector.shape_cast %137 : vector<30x16xf32> to vector<1x30x1x16xf32>
    tpu.vector_store %arg3[%c0_76, %c0_77, %c1_78, %c0_79], %140 {strides = array<i32>} : memref<2x30x16x16xf32, #tpu.memory_space<vmem>>, vector<1x30x1x16xf32>,
    %c0_80 = arith.constant 0 : index
    %c40_81 = arith.constant 40 : index
    %141 = vector.load %arg5[%c0_80, %c40_81] : memref<30x320xf32, #tpu.memory_space<vmem>>, vector<30x16xf32>
    %c0_82 = arith.constant 0 : index
    %c0_83 = arith.constant 0 : index
    %c2_84 = arith.constant 2 : index
    %c0_85 = arith.constant 0 : index
    %142 = vector.load %arg3[%c0_82, %c0_83, %c2_84, %c0_85] : memref<2x30x16x16xf32, #tpu.memory_space<vmem>>, vector<1x30x1x16xf32>
    %143 = vector.shape_cast %142 : vector<1x30x1x16xf32> to vector<30x16xf32>
    %144 = vector.shape_cast %141 : vector<30x16xf32> to vector<1x30x1x16xf32>
    tpu.vector_store %arg3[%c0_82, %c0_83, %c2_84, %c0_85], %144 {strides = array<i32>} : memref<2x30x16x16xf32, #tpu.memory_space<vmem>>, vector<1x30x1x16xf32>,
    %c0_86 = arith.constant 0 : index
    %c60_87 = arith.constant 60 : index
    %145 = vector.load %arg5[%c0_86, %c60_87] : memref<30x320xf32, #tpu.memory_space<vmem>>, vector<30x16xf32>
    %c0_88 = arith.constant 0 : index
    %c0_89 = arith.constant 0 : index
    %c3_90 = arith.constant 3 : index
    %c0_91 = arith.constant 0 : index
    %146 = vector.load %arg3[%c0_88, %c0_89, %c3_90, %c0_91] : memref<2x30x16x16xf32, #tpu.memory_space<vmem>>, vector<1x30x1x16xf32>
    %147 = vector.shape_cast %146 : vector<1x30x1x16xf32> to vector<30x16xf32>
    %148 = vector.shape_cast %145 : vector<30x16xf32> to vector<1x30x1x16xf32>
    tpu.vector_store %arg3[%c0_88, %c0_89, %c3_90, %c0_91], %148 {strides = array<i32>} : memref<2x30x16x16xf32, #tpu.memory_space<vmem>>, vector<1x30x1x16xf32>,
    %c0_92 = arith.constant 0 : index
    %c80_93 = arith.constant 80 : index
    %149 = vector.load %arg5[%c0_92, %c80_93] : memref<30x320xf32, #tpu.memory_space<vmem>>, vector<30x16xf32>
    %c0_94 = arith.constant 0 : index
    %c0_95 = arith.constant 0 : index
    %c4_96 = arith.constant 4 : index
    %c0_97 = arith.constant 0 : index
    %150 = vector.load %arg3[%c0_94, %c0_95, %c4_96, %c0_97] : memref<2x30x16x16xf32, #tpu.memory_space<vmem>>, vector<1x30x1x16xf32>
    %151 = vector.shape_cast %150 : vector<1x30x1x16xf32> to vector<30x16xf32>
    %152 = vector.shape_cast %149 : vector<30x16xf32> to vector<1x30x1x16xf32>
    tpu.vector_store %arg3[%c0_94, %c0_95, %c4_96, %c0_97], %152 {strides = array<i32>} : memref<2x30x16x16xf32, #tpu.memory_space<vmem>>, vector<1x30x1x16xf32>,
    %c0_98 = arith.constant 0 : index
    %c100 = arith.constant 100 : index
    %153 = vector.load %arg5[%c0_98, %c100] : memref<30x320xf32, #tpu.memory_space<vmem>>, vector<30x16xf32>
    %c0_99 = arith.constant 0 : index
    %c0_100 = arith.constant 0 : index
    %c5_101 = arith.constant 5 : index
    %c0_102 = arith.constant 0 : index
    %154 = vector.load %arg3[%c0_99, %c0_100, %c5_101, %c0_102] : memref<2x30x16x16xf32, #tpu.memory_space<vmem>>, vector<1x30x1x16xf32>
    %155 = vector.shape_cast %154 : vector<1x30x1x16xf32> to vector<30x16xf32>
    %156 = vector.shape_cast %153 : vector<30x16xf32> to vector<1x30x1x16xf32>
    tpu.vector_store %arg3[%c0_99, %c0_100, %c5_101, %c0_102], %156 {strides = array<i32>} : memref<2x30x16x16xf32, #tpu.memory_space<vmem>>, vector<1x30x1x16xf32>,
    %c0_103 = arith.constant 0 : index
    %c120 = arith.constant 120 : index
    %157 = vector.load %arg5[%c0_103, %c120] : memref<30x320xf32, #tpu.memory_space<vmem>>, vector<30x16xf32>
    %c0_104 = arith.constant 0 : index
    %c0_105 = arith.constant 0 : index
    %c6_106 = arith.constant 6 : index
    %c0_107 = arith.constant 0 : index
    %158 = vector.load %arg3[%c0_104, %c0_105, %c6_106, %c0_107] : memref<2x30x16x16xf32, #tpu.memory_space<vmem>>, vector<1x30x1x16xf32>
    %159 = vector.shape_cast %158 : vector<1x30x1x16xf32> to vector<30x16xf32>
    %160 = vector.shape_cast %157 : vector<30x16xf32> to vector<1x30x1x16xf32>
    tpu.vector_store %arg3[%c0_104, %c0_105, %c6_106, %c0_107], %160 {strides = array<i32>} : memref<2x30x16x16xf32, #tpu.memory_space<vmem>>, vector<1x30x1x16xf32>,
    %c0_108 = arith.constant 0 : index
    %c140 = arith.constant 140 : index
    %161 = vector.load %arg5[%c0_108, %c140] : memref<30x320xf32, #tpu.memory_space<vmem>>, vector<30x16xf32>
    %c0_109 = arith.constant 0 : index
    %c0_110 = arith.constant 0 : index
    %c7_111 = arith.constant 7 : index
    %c0_112 = arith.constant 0 : index
    %162 = vector.load %arg3[%c0_109, %c0_110, %c7_111, %c0_112] : memref<2x30x16x16xf32, #tpu.memory_space<vmem>>, vector<1x30x1x16xf32>
    %163 = vector.shape_cast %162 : vector<1x30x1x16xf32> to vector<30x16xf32>
    %164 = vector.shape_cast %161 : vector<30x16xf32> to vector<1x30x1x16xf32>
    tpu.vector_store %arg3[%c0_109, %c0_110, %c7_111, %c0_112], %164 {strides = array<i32>} : memref<2x30x16x16xf32, #tpu.memory_space<vmem>>, vector<1x30x1x16xf32>,
    %c0_113 = arith.constant 0 : index
    %c160 = arith.constant 160 : index
    %165 = vector.load %arg5[%c0_113, %c160] : memref<30x320xf32, #tpu.memory_space<vmem>>, vector<30x16xf32>
    %c0_114 = arith.constant 0 : index
    %c0_115 = arith.constant 0 : index
    %c8_116 = arith.constant 8 : index
    %c0_117 = arith.constant 0 : index
    %166 = vector.load %arg3[%c0_114, %c0_115, %c8_116, %c0_117] : memref<2x30x16x16xf32, #tpu.memory_space<vmem>>, vector<1x30x1x16xf32>
    %167 = vector.shape_cast %166 : vector<1x30x1x16xf32> to vector<30x16xf32>
    %168 = vector.shape_cast %165 : vector<30x16xf32> to vector<1x30x1x16xf32>
    tpu.vector_store %arg3[%c0_114, %c0_115, %c8_116, %c0_117], %168 {strides = array<i32>} : memref<2x30x16x16xf32, #tpu.memory_space<vmem>>, vector<1x30x1x16xf32>,
    %c0_118 = arith.constant 0 : index
    %c180 = arith.constant 180 : index
    %169 = vector.load %arg5[%c0_118, %c180] : memref<30x320xf32, #tpu.memory_space<vmem>>, vector<30x16xf32>
    %c0_119 = arith.constant 0 : index
    %c0_120 = arith.constant 0 : index
    %c9_121 = arith.constant 9 : index
    %c0_122 = arith.constant 0 : index
    %170 = vector.load %arg3[%c0_119, %c0_120, %c9_121, %c0_122] : memref<2x30x16x16xf32, #tpu.memory_space<vmem>>, vector<1x30x1x16xf32>
    %171 = vector.shape_cast %170 : vector<1x30x1x16xf32> to vector<30x16xf32>
    %172 = vector.shape_cast %169 : vector<30x16xf32> to vector<1x30x1x16xf32>
    tpu.vector_store %arg3[%c0_119, %c0_120, %c9_121, %c0_122], %172 {strides = array<i32>} : memref<2x30x16x16xf32, #tpu.memory_space<vmem>>, vector<1x30x1x16xf32>,
    %c0_123 = arith.constant 0 : index
    %c200 = arith.constant 200 : index
    %173 = vector.load %arg5[%c0_123, %c200] : memref<30x320xf32, #tpu.memory_space<vmem>>, vector<30x16xf32>
    %c0_124 = arith.constant 0 : index
    %c0_125 = arith.constant 0 : index
    %c10_126 = arith.constant 10 : index
    %c0_127 = arith.constant 0 : index
    %174 = vector.load %arg3[%c0_124, %c0_125, %c10_126, %c0_127] : memref<2x30x16x16xf32, #tpu.memory_space<vmem>>, vector<1x30x1x16xf32>
    %175 = vector.shape_cast %174 : vector<1x30x1x16xf32> to vector<30x16xf32>
    %176 = vector.shape_cast %173 : vector<30x16xf32> to vector<1x30x1x16xf32>
    tpu.vector_store %arg3[%c0_124, %c0_125, %c10_126, %c0_127], %176 {strides = array<i32>} : memref<2x30x16x16xf32, #tpu.memory_space<vmem>>, vector<1x30x1x16xf32>,
    %c0_128 = arith.constant 0 : index
    %c220 = arith.constant 220 : index
    %177 = vector.load %arg5[%c0_128, %c220] : memref<30x320xf32, #tpu.memory_space<vmem>>, vector<30x16xf32>
    %c0_129 = arith.constant 0 : index
    %c0_130 = arith.constant 0 : index
    %c11_131 = arith.constant 11 : index
    %c0_132 = arith.constant 0 : index
    %178 = vector.load %arg3[%c0_129, %c0_130, %c11_131, %c0_132] : memref<2x30x16x16xf32, #tpu.memory_space<vmem>>, vector<1x30x1x16xf32>
    %179 = vector.shape_cast %178 : vector<1x30x1x16xf32> to vector<30x16xf32>
    %180 = vector.shape_cast %177 : vector<30x16xf32> to vector<1x30x1x16xf32>
    tpu.vector_store %arg3[%c0_129, %c0_130, %c11_131, %c0_132], %180 {strides = array<i32>} : memref<2x30x16x16xf32, #tpu.memory_space<vmem>>, vector<1x30x1x16xf32>,
    %c0_133 = arith.constant 0 : index
    %c240 = arith.constant 240 : index
    %181 = vector.load %arg5[%c0_133, %c240] : memref<30x320xf32, #tpu.memory_space<vmem>>, vector<30x16xf32>
    %c0_134 = arith.constant 0 : index
    %c0_135 = arith.constant 0 : index
    %c12_136 = arith.constant 12 : index
    %c0_137 = arith.constant 0 : index
    %182 = vector.load %arg3[%c0_134, %c0_135, %c12_136, %c0_137] : memref<2x30x16x16xf32, #tpu.memory_space<vmem>>, vector<1x30x1x16xf32>
    %183 = vector.shape_cast %182 : vector<1x30x1x16xf32> to vector<30x16xf32>
    %184 = vector.shape_cast %181 : vector<30x16xf32> to vector<1x30x1x16xf32>
    tpu.vector_store %arg3[%c0_134, %c0_135, %c12_136, %c0_137], %184 {strides = array<i32>} : memref<2x30x16x16xf32, #tpu.memory_space<vmem>>, vector<1x30x1x16xf32>,
    %c0_138 = arith.constant 0 : index
    %c260 = arith.constant 260 : index
    %185 = vector.load %arg5[%c0_138, %c260] : memref<30x320xf32, #tpu.memory_space<vmem>>, vector<30x16xf32>
    %c0_139 = arith.constant 0 : index
    %c0_140 = arith.constant 0 : index
    %c13_141 = arith.constant 13 : index
    %c0_142 = arith.constant 0 : index
    %186 = vector.load %arg3[%c0_139, %c0_140, %c13_141, %c0_142] : memref<2x30x16x16xf32, #tpu.memory_space<vmem>>, vector<1x30x1x16xf32>
    %187 = vector.shape_cast %186 : vector<1x30x1x16xf32> to vector<30x16xf32>
    %188 = vector.shape_cast %185 : vector<30x16xf32> to vector<1x30x1x16xf32>
    tpu.vector_store %arg3[%c0_139, %c0_140, %c13_141, %c0_142], %188 {strides = array<i32>} : memref<2x30x16x16xf32, #tpu.memory_space<vmem>>, vector<1x30x1x16xf32>,
    %c0_143 = arith.constant 0 : index
    %c280 = arith.constant 280 : index
    %189 = vector.load %arg5[%c0_143, %c280] : memref<30x320xf32, #tpu.memory_space<vmem>>, vector<30x16xf32>
    %c0_144 = arith.constant 0 : index
    %c0_145 = arith.constant 0 : index
    %c14_146 = arith.constant 14 : index
    %c0_147 = arith.constant 0 : index
    %190 = vector.load %arg3[%c0_144, %c0_145, %c14_146, %c0_147] : memref<2x30x16x16xf32, #tpu.memory_space<vmem>>, vector<1x30x1x16xf32>
    %191 = vector.shape_cast %190 : vector<1x30x1x16xf32> to vector<30x16xf32>
    %192 = vector.shape_cast %189 : vector<30x16xf32> to vector<1x30x1x16xf32>
    tpu.vector_store %arg3[%c0_144, %c0_145, %c14_146, %c0_147], %192 {strides = array<i32>} : memref<2x30x16x16xf32, #tpu.memory_space<vmem>>, vector<1x30x1x16xf32>,
    %c0_148 = arith.constant 0 : index
    %c300 = arith.constant 300 : index
    %193 = vector.load %arg5[%c0_148, %c300] : memref<30x320xf32, #tpu.memory_space<vmem>>, vector<30x16xf32>
    %c0_149 = arith.constant 0 : index
    %c0_150 = arith.constant 0 : index
    %c15_151 = arith.constant 15 : index
    %c0_152 = arith.constant 0 : index
    %194 = vector.load %arg3[%c0_149, %c0_150, %c15_151, %c0_152] : memref<2x30x16x16xf32, #tpu.memory_space<vmem>>, vector<1x30x1x16xf32>
    %195 = vector.shape_cast %194 : vector<1x30x1x16xf32> to vector<30x16xf32>
    %196 = vector.shape_cast %193 : vector<30x16xf32> to vector<1x30x1x16xf32>
    tpu.vector_store %arg3[%c0_149, %c0_150, %c15_151, %c0_152], %196 {strides = array<i32>} : memref<2x30x16x16xf32, #tpu.memory_space<vmem>>, vector<1x30x1x16xf32>,
    %c1_153 = arith.constant 1 : index
    %c0_154 = arith.constant 0 : index
    %197 = vector.load %arg1[%c1_153, %c0_154] : memref<2x404xf32, #tpu.memory_space<vmem>>, vector<1x320xf32>
    %198 = vector.shape_cast %197 : vector<1x320xf32> to vector<320xf32>
    %c0_155 = arith.constant 0 : index
    %c0_156 = arith.constant 0 : index
    %199 = vector.load %arg4[%c0_155, %c0_156] : memref<25x320xf32, #tpu.memory_space<vmem>>, vector<1x320xf32>
    %200 = vector.shape_cast %199 : vector<1x320xf32> to vector<320xf32>
    %201 = vector.shape_cast %198 : vector<320xf32> to vector<1x320xf32>
    tpu.vector_store %arg4[%c0_155, %c0_156], %201 {strides = array<i32>} : memref<25x320xf32, #tpu.memory_space<vmem>>, vector<1x320xf32>,
    %c1_157 = arith.constant 1 : index
    %c1_158 = arith.constant 1 : index
    %202 = vector.load %arg1[%c1_157, %c1_158] : memref<2x404xf32, #tpu.memory_space<vmem>>, vector<1x320xf32>
    %203 = vector.shape_cast %202 : vector<1x320xf32> to vector<320xf32>
    %c1_159 = arith.constant 1 : index
    %c0_160 = arith.constant 0 : index
    %204 = vector.load %arg4[%c1_159, %c0_160] : memref<25x320xf32, #tpu.memory_space<vmem>>, vector<1x320xf32>
    %205 = vector.shape_cast %204 : vector<1x320xf32> to vector<320xf32>
    %206 = vector.shape_cast %203 : vector<320xf32> to vector<1x320xf32>
    tpu.vector_store %arg4[%c1_159, %c0_160], %206 {strides = array<i32>} : memref<25x320xf32, #tpu.memory_space<vmem>>, vector<1x320xf32>,
    %c1_161 = arith.constant 1 : index
    %c2_162 = arith.constant 2 : index
    %207 = vector.load %arg1[%c1_161, %c2_162] : memref<2x404xf32, #tpu.memory_space<vmem>>, vector<1x320xf32>
    %208 = vector.shape_cast %207 : vector<1x320xf32> to vector<320xf32>
    %c2_163 = arith.constant 2 : index
    %c0_164 = arith.constant 0 : index
    %209 = vector.load %arg4[%c2_163, %c0_164] : memref<25x320xf32, #tpu.memory_space<vmem>>, vector<1x320xf32>
    %210 = vector.shape_cast %209 : vector<1x320xf32> to vector<320xf32>
    %211 = vector.shape_cast %208 : vector<320xf32> to vector<1x320xf32>
    tpu.vector_store %arg4[%c2_163, %c0_164], %211 {strides = array<i32>} : memref<25x320xf32, #tpu.memory_space<vmem>>, vector<1x320xf32>,
    %c1_165 = arith.constant 1 : index
    %c3_166 = arith.constant 3 : index
    %212 = vector.load %arg1[%c1_165, %c3_166] : memref<2x404xf32, #tpu.memory_space<vmem>>, vector<1x320xf32>
    %213 = vector.shape_cast %212 : vector<1x320xf32> to vector<320xf32>
    %c3_167 = arith.constant 3 : index
    %c0_168 = arith.constant 0 : index
    %214 = vector.load %arg4[%c3_167, %c0_168] : memref<25x320xf32, #tpu.memory_space<vmem>>, vector<1x320xf32>
    %215 = vector.shape_cast %214 : vector<1x320xf32> to vector<320xf32>
    %216 = vector.shape_cast %213 : vector<320xf32> to vector<1x320xf32>
    tpu.vector_store %arg4[%c3_167, %c0_168], %216 {strides = array<i32>} : memref<25x320xf32, #tpu.memory_space<vmem>>, vector<1x320xf32>,
    %c1_169 = arith.constant 1 : index
    %c4_170 = arith.constant 4 : index
    %217 = vector.load %arg1[%c1_169, %c4_170] : memref<2x404xf32, #tpu.memory_space<vmem>>, vector<1x320xf32>
    %218 = vector.shape_cast %217 : vector<1x320xf32> to vector<320xf32>
    %c4_171 = arith.constant 4 : index
    %c0_172 = arith.constant 0 : index
    %219 = vector.load %arg4[%c4_171, %c0_172] : memref<25x320xf32, #tpu.memory_space<vmem>>, vector<1x320xf32>
    %220 = vector.shape_cast %219 : vector<1x320xf32> to vector<320xf32>
    %221 = vector.shape_cast %218 : vector<320xf32> to vector<1x320xf32>
    tpu.vector_store %arg4[%c4_171, %c0_172], %221 {strides = array<i32>} : memref<25x320xf32, #tpu.memory_space<vmem>>, vector<1x320xf32>,
    %c1_173 = arith.constant 1 : index
    %c20_174 = arith.constant 20 : index
    %222 = vector.load %arg1[%c1_173, %c20_174] : memref<2x404xf32, #tpu.memory_space<vmem>>, vector<1x320xf32>
    %223 = vector.shape_cast %222 : vector<1x320xf32> to vector<320xf32>
    %c5_175 = arith.constant 5 : index
    %c0_176 = arith.constant 0 : index
    %224 = vector.load %arg4[%c5_175, %c0_176] : memref<25x320xf32, #tpu.memory_space<vmem>>, vector<1x320xf32>
    %225 = vector.shape_cast %224 : vector<1x320xf32> to vector<320xf32>
    %226 = vector.shape_cast %223 : vector<320xf32> to vector<1x320xf32>
    tpu.vector_store %arg4[%c5_175, %c0_176], %226 {strides = array<i32>} : memref<25x320xf32, #tpu.memory_space<vmem>>, vector<1x320xf32>,
    %c1_177 = arith.constant 1 : index
    %c21_178 = arith.constant 21 : index
    %227 = vector.load %arg1[%c1_177, %c21_178] : memref<2x404xf32, #tpu.memory_space<vmem>>, vector<1x320xf32>
    %228 = vector.shape_cast %227 : vector<1x320xf32> to vector<320xf32>
    %c6_179 = arith.constant 6 : index
    %c0_180 = arith.constant 0 : index
    %229 = vector.load %arg4[%c6_179, %c0_180] : memref<25x320xf32, #tpu.memory_space<vmem>>, vector<1x320xf32>
    %230 = vector.shape_cast %229 : vector<1x320xf32> to vector<320xf32>
    %231 = vector.shape_cast %228 : vector<320xf32> to vector<1x320xf32>
    tpu.vector_store %arg4[%c6_179, %c0_180], %231 {strides = array<i32>} : memref<25x320xf32, #tpu.memory_space<vmem>>, vector<1x320xf32>,
    %c1_181 = arith.constant 1 : index
    %c22_182 = arith.constant 22 : index
    %232 = vector.load %arg1[%c1_181, %c22_182] : memref<2x404xf32, #tpu.memory_space<vmem>>, vector<1x320xf32>
    %233 = vector.shape_cast %232 : vector<1x320xf32> to vector<320xf32>
    %c7_183 = arith.constant 7 : index
    %c0_184 = arith.constant 0 : index
    %234 = vector.load %arg4[%c7_183, %c0_184] : memref<25x320xf32, #tpu.memory_space<vmem>>, vector<1x320xf32>
    %235 = vector.shape_cast %234 : vector<1x320xf32> to vector<320xf32>
    %236 = vector.shape_cast %233 : vector<320xf32> to vector<1x320xf32>
    tpu.vector_store %arg4[%c7_183, %c0_184], %236 {strides = array<i32>} : memref<25x320xf32, #tpu.memory_space<vmem>>, vector<1x320xf32>,
    %c1_185 = arith.constant 1 : index
    %c23_186 = arith.constant 23 : index
    %237 = vector.load %arg1[%c1_185, %c23_186] : memref<2x404xf32, #tpu.memory_space<vmem>>, vector<1x320xf32>
    %238 = vector.shape_cast %237 : vector<1x320xf32> to vector<320xf32>
    %c8_187 = arith.constant 8 : index
    %c0_188 = arith.constant 0 : index
    %239 = vector.load %arg4[%c8_187, %c0_188] : memref<25x320xf32, #tpu.memory_space<vmem>>, vector<1x320xf32>
    %240 = vector.shape_cast %239 : vector<1x320xf32> to vector<320xf32>
    %241 = vector.shape_cast %238 : vector<320xf32> to vector<1x320xf32>
    tpu.vector_store %arg4[%c8_187, %c0_188], %241 {strides = array<i32>} : memref<25x320xf32, #tpu.memory_space<vmem>>, vector<1x320xf32>,
    %c1_189 = arith.constant 1 : index
    %c24_190 = arith.constant 24 : index
    %242 = vector.load %arg1[%c1_189, %c24_190] : memref<2x404xf32, #tpu.memory_space<vmem>>, vector<1x320xf32>
    %243 = vector.shape_cast %242 : vector<1x320xf32> to vector<320xf32>
    %c9_191 = arith.constant 9 : index
    %c0_192 = arith.constant 0 : index
    %244 = vector.load %arg4[%c9_191, %c0_192] : memref<25x320xf32, #tpu.memory_space<vmem>>, vector<1x320xf32>
    %245 = vector.shape_cast %244 : vector<1x320xf32> to vector<320xf32>
    %246 = vector.shape_cast %243 : vector<320xf32> to vector<1x320xf32>
    tpu.vector_store %arg4[%c9_191, %c0_192], %246 {strides = array<i32>} : memref<25x320xf32, #tpu.memory_space<vmem>>, vector<1x320xf32>,
    %c1_193 = arith.constant 1 : index
    %c40_194 = arith.constant 40 : index
    %247 = vector.load %arg1[%c1_193, %c40_194] : memref<2x404xf32, #tpu.memory_space<vmem>>, vector<1x320xf32>
    %248 = vector.shape_cast %247 : vector<1x320xf32> to vector<320xf32>
    %c10_195 = arith.constant 10 : index
    %c0_196 = arith.constant 0 : index
    %249 = vector.load %arg4[%c10_195, %c0_196] : memref<25x320xf32, #tpu.memory_space<vmem>>, vector<1x320xf32>
    %250 = vector.shape_cast %249 : vector<1x320xf32> to vector<320xf32>
    %251 = vector.shape_cast %248 : vector<320xf32> to vector<1x320xf32>
    tpu.vector_store %arg4[%c10_195, %c0_196], %251 {strides = array<i32>} : memref<25x320xf32, #tpu.memory_space<vmem>>, vector<1x320xf32>,
    %c1_197 = arith.constant 1 : index
    %c41_198 = arith.constant 41 : index
    %252 = vector.load %arg1[%c1_197, %c41_198] : memref<2x404xf32, #tpu.memory_space<vmem>>, vector<1x320xf32>
    %253 = vector.shape_cast %252 : vector<1x320xf32> to vector<320xf32>
    %c11_199 = arith.constant 11 : index
    %c0_200 = arith.constant 0 : index
    %254 = vector.load %arg4[%c11_199, %c0_200] : memref<25x320xf32, #tpu.memory_space<vmem>>, vector<1x320xf32>
    %255 = vector.shape_cast %254 : vector<1x320xf32> to vector<320xf32>
    %256 = vector.shape_cast %253 : vector<320xf32> to vector<1x320xf32>
    tpu.vector_store %arg4[%c11_199, %c0_200], %256 {strides = array<i32>} : memref<25x320xf32, #tpu.memory_space<vmem>>, vector<1x320xf32>,
    %c1_201 = arith.constant 1 : index
    %c42_202 = arith.constant 42 : index
    %257 = vector.load %arg1[%c1_201, %c42_202] : memref<2x404xf32, #tpu.memory_space<vmem>>, vector<1x320xf32>
    %258 = vector.shape_cast %257 : vector<1x320xf32> to vector<320xf32>
    %c12_203 = arith.constant 12 : index
    %c0_204 = arith.constant 0 : index
    %259 = vector.load %arg4[%c12_203, %c0_204] : memref<25x320xf32, #tpu.memory_space<vmem>>, vector<1x320xf32>
    %260 = vector.shape_cast %259 : vector<1x320xf32> to vector<320xf32>
    %261 = vector.shape_cast %258 : vector<320xf32> to vector<1x320xf32>
    tpu.vector_store %arg4[%c12_203, %c0_204], %261 {strides = array<i32>} : memref<25x320xf32, #tpu.memory_space<vmem>>, vector<1x320xf32>,
    %c1_205 = arith.constant 1 : index
    %c43_206 = arith.constant 43 : index
    %262 = vector.load %arg1[%c1_205, %c43_206] : memref<2x404xf32, #tpu.memory_space<vmem>>, vector<1x320xf32>
    %263 = vector.shape_cast %262 : vector<1x320xf32> to vector<320xf32>
    %c13_207 = arith.constant 13 : index
    %c0_208 = arith.constant 0 : index
    %264 = vector.load %arg4[%c13_207, %c0_208] : memref<25x320xf32, #tpu.memory_space<vmem>>, vector<1x320xf32>
    %265 = vector.shape_cast %264 : vector<1x320xf32> to vector<320xf32>
    %266 = vector.shape_cast %263 : vector<320xf32> to vector<1x320xf32>
    tpu.vector_store %arg4[%c13_207, %c0_208], %266 {strides = array<i32>} : memref<25x320xf32, #tpu.memory_space<vmem>>, vector<1x320xf32>,
    %c1_209 = arith.constant 1 : index
    %c44_210 = arith.constant 44 : index
    %267 = vector.load %arg1[%c1_209, %c44_210] : memref<2x404xf32, #tpu.memory_space<vmem>>, vector<1x320xf32>
    %268 = vector.shape_cast %267 : vector<1x320xf32> to vector<320xf32>
    %c14_211 = arith.constant 14 : index
    %c0_212 = arith.constant 0 : index
    %269 = vector.load %arg4[%c14_211, %c0_212] : memref<25x320xf32, #tpu.memory_space<vmem>>, vector<1x320xf32>
    %270 = vector.shape_cast %269 : vector<1x320xf32> to vector<320xf32>
    %271 = vector.shape_cast %268 : vector<320xf32> to vector<1x320xf32>
    tpu.vector_store %arg4[%c14_211, %c0_212], %271 {strides = array<i32>} : memref<25x320xf32, #tpu.memory_space<vmem>>, vector<1x320xf32>,
    %c1_213 = arith.constant 1 : index
    %c60_214 = arith.constant 60 : index
    %272 = vector.load %arg1[%c1_213, %c60_214] : memref<2x404xf32, #tpu.memory_space<vmem>>, vector<1x320xf32>
    %273 = vector.shape_cast %272 : vector<1x320xf32> to vector<320xf32>
    %c15_215 = arith.constant 15 : index
    %c0_216 = arith.constant 0 : index
    %274 = vector.load %arg4[%c15_215, %c0_216] : memref<25x320xf32, #tpu.memory_space<vmem>>, vector<1x320xf32>
    %275 = vector.shape_cast %274 : vector<1x320xf32> to vector<320xf32>
    %276 = vector.shape_cast %273 : vector<320xf32> to vector<1x320xf32>
    tpu.vector_store %arg4[%c15_215, %c0_216], %276 {strides = array<i32>} : memref<25x320xf32, #tpu.memory_space<vmem>>, vector<1x320xf32>,
    %c1_217 = arith.constant 1 : index
    %c61_218 = arith.constant 61 : index
    %277 = vector.load %arg1[%c1_217, %c61_218] : memref<2x404xf32, #tpu.memory_space<vmem>>, vector<1x320xf32>
    %278 = vector.shape_cast %277 : vector<1x320xf32> to vector<320xf32>
    %c16_219 = arith.constant 16 : index
    %c0_220 = arith.constant 0 : index
    %279 = vector.load %arg4[%c16_219, %c0_220] : memref<25x320xf32, #tpu.memory_space<vmem>>, vector<1x320xf32>
    %280 = vector.shape_cast %279 : vector<1x320xf32> to vector<320xf32>
    %281 = vector.shape_cast %278 : vector<320xf32> to vector<1x320xf32>
    tpu.vector_store %arg4[%c16_219, %c0_220], %281 {strides = array<i32>} : memref<25x320xf32, #tpu.memory_space<vmem>>, vector<1x320xf32>,
    %c1_221 = arith.constant 1 : index
    %c62_222 = arith.constant 62 : index
    %282 = vector.load %arg1[%c1_221, %c62_222] : memref<2x404xf32, #tpu.memory_space<vmem>>, vector<1x320xf32>
    %283 = vector.shape_cast %282 : vector<1x320xf32> to vector<320xf32>
    %c17_223 = arith.constant 17 : index
    %c0_224 = arith.constant 0 : index
    %284 = vector.load %arg4[%c17_223, %c0_224] : memref<25x320xf32, #tpu.memory_space<vmem>>, vector<1x320xf32>
    %285 = vector.shape_cast %284 : vector<1x320xf32> to vector<320xf32>
    %286 = vector.shape_cast %283 : vector<320xf32> to vector<1x320xf32>
    tpu.vector_store %arg4[%c17_223, %c0_224], %286 {strides = array<i32>} : memref<25x320xf32, #tpu.memory_space<vmem>>, vector<1x320xf32>,
    %c1_225 = arith.constant 1 : index
    %c63_226 = arith.constant 63 : index
    %287 = vector.load %arg1[%c1_225, %c63_226] : memref<2x404xf32, #tpu.memory_space<vmem>>, vector<1x320xf32>
    %288 = vector.shape_cast %287 : vector<1x320xf32> to vector<320xf32>
    %c18_227 = arith.constant 18 : index
    %c0_228 = arith.constant 0 : index
    %289 = vector.load %arg4[%c18_227, %c0_228] : memref<25x320xf32, #tpu.memory_space<vmem>>, vector<1x320xf32>
    %290 = vector.shape_cast %289 : vector<1x320xf32> to vector<320xf32>
    %291 = vector.shape_cast %288 : vector<320xf32> to vector<1x320xf32>
    tpu.vector_store %arg4[%c18_227, %c0_228], %291 {strides = array<i32>} : memref<25x320xf32, #tpu.memory_space<vmem>>, vector<1x320xf32>,
    %c1_229 = arith.constant 1 : index
    %c64_230 = arith.constant 64 : index
    %292 = vector.load %arg1[%c1_229, %c64_230] : memref<2x404xf32, #tpu.memory_space<vmem>>, vector<1x320xf32>
    %293 = vector.shape_cast %292 : vector<1x320xf32> to vector<320xf32>
    %c19_231 = arith.constant 19 : index
    %c0_232 = arith.constant 0 : index
    %294 = vector.load %arg4[%c19_231, %c0_232] : memref<25x320xf32, #tpu.memory_space<vmem>>, vector<1x320xf32>
    %295 = vector.shape_cast %294 : vector<1x320xf32> to vector<320xf32>
    %296 = vector.shape_cast %293 : vector<320xf32> to vector<1x320xf32>
    tpu.vector_store %arg4[%c19_231, %c0_232], %296 {strides = array<i32>} : memref<25x320xf32, #tpu.memory_space<vmem>>, vector<1x320xf32>,
    %c1_233 = arith.constant 1 : index
    %c80_234 = arith.constant 80 : index
    %297 = vector.load %arg1[%c1_233, %c80_234] : memref<2x404xf32, #tpu.memory_space<vmem>>, vector<1x320xf32>
    %298 = vector.shape_cast %297 : vector<1x320xf32> to vector<320xf32>
    %c20_235 = arith.constant 20 : index
    %c0_236 = arith.constant 0 : index
    %299 = vector.load %arg4[%c20_235, %c0_236] : memref<25x320xf32, #tpu.memory_space<vmem>>, vector<1x320xf32>
    %300 = vector.shape_cast %299 : vector<1x320xf32> to vector<320xf32>
    %301 = vector.shape_cast %298 : vector<320xf32> to vector<1x320xf32>
    tpu.vector_store %arg4[%c20_235, %c0_236], %301 {strides = array<i32>} : memref<25x320xf32, #tpu.memory_space<vmem>>, vector<1x320xf32>,
    %c1_237 = arith.constant 1 : index
    %c81_238 = arith.constant 81 : index
    %302 = vector.load %arg1[%c1_237, %c81_238] : memref<2x404xf32, #tpu.memory_space<vmem>>, vector<1x320xf32>
    %303 = vector.shape_cast %302 : vector<1x320xf32> to vector<320xf32>
    %c21_239 = arith.constant 21 : index
    %c0_240 = arith.constant 0 : index
    %304 = vector.load %arg4[%c21_239, %c0_240] : memref<25x320xf32, #tpu.memory_space<vmem>>, vector<1x320xf32>
    %305 = vector.shape_cast %304 : vector<1x320xf32> to vector<320xf32>
    %306 = vector.shape_cast %303 : vector<320xf32> to vector<1x320xf32>
    tpu.vector_store %arg4[%c21_239, %c0_240], %306 {strides = array<i32>} : memref<25x320xf32, #tpu.memory_space<vmem>>, vector<1x320xf32>,
    %c1_241 = arith.constant 1 : index
    %c82_242 = arith.constant 82 : index
    %307 = vector.load %arg1[%c1_241, %c82_242] : memref<2x404xf32, #tpu.memory_space<vmem>>, vector<1x320xf32>
    %308 = vector.shape_cast %307 : vector<1x320xf32> to vector<320xf32>
    %c22_243 = arith.constant 22 : index
    %c0_244 = arith.constant 0 : index
    %309 = vector.load %arg4[%c22_243, %c0_244] : memref<25x320xf32, #tpu.memory_space<vmem>>, vector<1x320xf32>
    %310 = vector.shape_cast %309 : vector<1x320xf32> to vector<320xf32>
    %311 = vector.shape_cast %308 : vector<320xf32> to vector<1x320xf32>
    tpu.vector_store %arg4[%c22_243, %c0_244], %311 {strides = array<i32>} : memref<25x320xf32, #tpu.memory_space<vmem>>, vector<1x320xf32>,
    %c1_245 = arith.constant 1 : index
    %c83_246 = arith.constant 83 : index
    %312 = vector.load %arg1[%c1_245, %c83_246] : memref<2x404xf32, #tpu.memory_space<vmem>>, vector<1x320xf32>
    %313 = vector.shape_cast %312 : vector<1x320xf32> to vector<320xf32>
    %c23_247 = arith.constant 23 : index
    %c0_248 = arith.constant 0 : index
    %314 = vector.load %arg4[%c23_247, %c0_248] : memref<25x320xf32, #tpu.memory_space<vmem>>, vector<1x320xf32>
    %315 = vector.shape_cast %314 : vector<1x320xf32> to vector<320xf32>
    %316 = vector.shape_cast %313 : vector<320xf32> to vector<1x320xf32>
    tpu.vector_store %arg4[%c23_247, %c0_248], %316 {strides = array<i32>} : memref<25x320xf32, #tpu.memory_space<vmem>>, vector<1x320xf32>,
    %c1_249 = arith.constant 1 : index
    %c84_250 = arith.constant 84 : index
    %317 = vector.load %arg1[%c1_249, %c84_250] : memref<2x404xf32, #tpu.memory_space<vmem>>, vector<1x320xf32>
    %318 = vector.shape_cast %317 : vector<1x320xf32> to vector<320xf32>
    %c24_251 = arith.constant 24 : index
    %c0_252 = arith.constant 0 : index
    %319 = vector.load %arg4[%c24_251, %c0_252] : memref<25x320xf32, #tpu.memory_space<vmem>>, vector<1x320xf32>
    %320 = vector.shape_cast %319 : vector<1x320xf32> to vector<320xf32>
    %321 = vector.shape_cast %318 : vector<320xf32> to vector<1x320xf32>
    tpu.vector_store %arg4[%c24_251, %c0_252], %321 {strides = array<i32>} : memref<25x320xf32, #tpu.memory_space<vmem>>, vector<1x320xf32>,
    %c0_253 = arith.constant 0 : index
    %c0_254 = arith.constant 0 : index
    %322 = vector.load %arg2[%c0_253, %c0_254] : memref<30x25xf32, #tpu.memory_space<vmem>>, vector<30x25xf32>
    %c0_255 = arith.constant 0 : index
    %c0_256 = arith.constant 0 : index
    %323 = vector.load %arg4[%c0_255, %c0_256] : memref<25x320xf32, #tpu.memory_space<vmem>>, vector<25x320xf32>
    %cst_257 = arith.constant dense<0.000000e+00> : vector<30x320xf32>
    %324 = tpu.matmul %322, %323, %cst_257 {dimension_numbers = #tpu.dot_dimension_numbers<[1], [0], [0], [1], [0, 0, 1, 1], [], []>, precision = #tpu.contract_precision<fp32>} : vector<30x25xf32>, vector<25x320xf32>, vector<30x320xf32> -> vector<30x320xf32>
    %cst_258 = arith.constant -3.000000e+00 : f32
    %cst_259 = arith.constant 3.000000e+00 : f32
    %325 = vector.broadcast %cst_258 : f32 to vector<30x320xf32>
    %326 = arith.maximumf %325, %324 : vector<30x320xf32>
    %327 = vector.broadcast %cst_259 : f32 to vector<30x320xf32>
    %328 = arith.minimumf %327, %326 : vector<30x320xf32>
    %c0_260 = arith.constant 0 : index
    %c0_261 = arith.constant 0 : index
    %329 = vector.load %arg5[%c0_260, %c0_261] : memref<30x320xf32, #tpu.memory_space<vmem>>, vector<30x320xf32>
    tpu.vector_store %arg5[%c0_260, %c0_261], %328 {strides = array<i32>} : memref<30x320xf32, #tpu.memory_space<vmem>>, vector<30x320xf32>,
    %c0_262 = arith.constant 0 : index
    %c0_263 = arith.constant 0 : index
    %330 = vector.load %arg5[%c0_262, %c0_263] : memref<30x320xf32, #tpu.memory_space<vmem>>, vector<30x16xf32>
    %c1_264 = arith.constant 1 : index
    %c0_265 = arith.constant 0 : index
    %c0_266 = arith.constant 0 : index
    %c0_267 = arith.constant 0 : index
    %331 = vector.load %arg3[%c1_264, %c0_265, %c0_266, %c0_267] : memref<2x30x16x16xf32, #tpu.memory_space<vmem>>, vector<1x30x1x16xf32>
    %332 = vector.shape_cast %331 : vector<1x30x1x16xf32> to vector<30x16xf32>
    %333 = vector.shape_cast %330 : vector<30x16xf32> to vector<1x30x1x16xf32>
    tpu.vector_store %arg3[%c1_264, %c0_265, %c0_266, %c0_267], %333 {strides = array<i32>} : memref<2x30x16x16xf32, #tpu.memory_space<vmem>>, vector<1x30x1x16xf32>,
    %c0_268 = arith.constant 0 : index
    %c20_269 = arith.constant 20 : index
    %334 = vector.load %arg5[%c0_268, %c20_269] : memref<30x320xf32, #tpu.memory_space<vmem>>, vector<30x16xf32>
    %c1_270 = arith.constant 1 : index
    %c0_271 = arith.constant 0 : index
    %c1_272 = arith.constant 1 : index
    %c0_273 = arith.constant 0 : index
    %335 = vector.load %arg3[%c1_270, %c0_271, %c1_272, %c0_273] : memref<2x30x16x16xf32, #tpu.memory_space<vmem>>, vector<1x30x1x16xf32>
    %336 = vector.shape_cast %335 : vector<1x30x1x16xf32> to vector<30x16xf32>
    %337 = vector.shape_cast %334 : vector<30x16xf32> to vector<1x30x1x16xf32>
    tpu.vector_store %arg3[%c1_270, %c0_271, %c1_272, %c0_273], %337 {strides = array<i32>} : memref<2x30x16x16xf32, #tpu.memory_space<vmem>>, vector<1x30x1x16xf32>,
    %c0_274 = arith.constant 0 : index
    %c40_275 = arith.constant 40 : index
    %338 = vector.load %arg5[%c0_274, %c40_275] : memref<30x320xf32, #tpu.memory_space<vmem>>, vector<30x16xf32>
    %c1_276 = arith.constant 1 : index
    %c0_277 = arith.constant 0 : index
    %c2_278 = arith.constant 2 : index
    %c0_279 = arith.constant 0 : index
    %339 = vector.load %arg3[%c1_276, %c0_277, %c2_278, %c0_279] : memref<2x30x16x16xf32, #tpu.memory_space<vmem>>, vector<1x30x1x16xf32>
    %340 = vector.shape_cast %339 : vector<1x30x1x16xf32> to vector<30x16xf32>
    %341 = vector.shape_cast %338 : vector<30x16xf32> to vector<1x30x1x16xf32>
    tpu.vector_store %arg3[%c1_276, %c0_277, %c2_278, %c0_279], %341 {strides = array<i32>} : memref<2x30x16x16xf32, #tpu.memory_space<vmem>>, vector<1x30x1x16xf32>,
    %c0_280 = arith.constant 0 : index
    %c60_281 = arith.constant 60 : index
    %342 = vector.load %arg5[%c0_280, %c60_281] : memref<30x320xf32, #tpu.memory_space<vmem>>, vector<30x16xf32>
    %c1_282 = arith.constant 1 : index
    %c0_283 = arith.constant 0 : index
    %c3_284 = arith.constant 3 : index
    %c0_285 = arith.constant 0 : index
    %343 = vector.load %arg3[%c1_282, %c0_283, %c3_284, %c0_285] : memref<2x30x16x16xf32, #tpu.memory_space<vmem>>, vector<1x30x1x16xf32>
    %344 = vector.shape_cast %343 : vector<1x30x1x16xf32> to vector<30x16xf32>
    %345 = vector.shape_cast %342 : vector<30x16xf32> to vector<1x30x1x16xf32>
    tpu.vector_store %arg3[%c1_282, %c0_283, %c3_284, %c0_285], %345 {strides = array<i32>} : memref<2x30x16x16xf32, #tpu.memory_space<vmem>>, vector<1x30x1x16xf32>,
    %c0_286 = arith.constant 0 : index
    %c80_287 = arith.constant 80 : index
    %346 = vector.load %arg5[%c0_286, %c80_287] : memref<30x320xf32, #tpu.memory_space<vmem>>, vector<30x16xf32>
    %c1_288 = arith.constant 1 : index
    %c0_289 = arith.constant 0 : index
    %c4_290 = arith.constant 4 : index
    %c0_291 = arith.constant 0 : index
    %347 = vector.load %arg3[%c1_288, %c0_289, %c4_290, %c0_291] : memref<2x30x16x16xf32, #tpu.memory_space<vmem>>, vector<1x30x1x16xf32>
    %348 = vector.shape_cast %347 : vector<1x30x1x16xf32> to vector<30x16xf32>
    %349 = vector.shape_cast %346 : vector<30x16xf32> to vector<1x30x1x16xf32>
    tpu.vector_store %arg3[%c1_288, %c0_289, %c4_290, %c0_291], %349 {strides = array<i32>} : memref<2x30x16x16xf32, #tpu.memory_space<vmem>>, vector<1x30x1x16xf32>,
    %c0_292 = arith.constant 0 : index
    %c100_293 = arith.constant 100 : index
    %350 = vector.load %arg5[%c0_292, %c100_293] : memref<30x320xf32, #tpu.memory_space<vmem>>, vector<30x16xf32>
    %c1_294 = arith.constant 1 : index
    %c0_295 = arith.constant 0 : index
    %c5_296 = arith.constant 5 : index
    %c0_297 = arith.constant 0 : index
    %351 = vector.load %arg3[%c1_294, %c0_295, %c5_296, %c0_297] : memref<2x30x16x16xf32, #tpu.memory_space<vmem>>, vector<1x30x1x16xf32>
    %352 = vector.shape_cast %351 : vector<1x30x1x16xf32> to vector<30x16xf32>
    %353 = vector.shape_cast %350 : vector<30x16xf32> to vector<1x30x1x16xf32>
    tpu.vector_store %arg3[%c1_294, %c0_295, %c5_296, %c0_297], %353 {strides = array<i32>} : memref<2x30x16x16xf32, #tpu.memory_space<vmem>>, vector<1x30x1x16xf32>,
    %c0_298 = arith.constant 0 : index
    %c120_299 = arith.constant 120 : index
    %354 = vector.load %arg5[%c0_298, %c120_299] : memref<30x320xf32, #tpu.memory_space<vmem>>, vector<30x16xf32>
    %c1_300 = arith.constant 1 : index
    %c0_301 = arith.constant 0 : index
    %c6_302 = arith.constant 6 : index
    %c0_303 = arith.constant 0 : index
    %355 = vector.load %arg3[%c1_300, %c0_301, %c6_302, %c0_303] : memref<2x30x16x16xf32, #tpu.memory_space<vmem>>, vector<1x30x1x16xf32>
    %356 = vector.shape_cast %355 : vector<1x30x1x16xf32> to vector<30x16xf32>
    %357 = vector.shape_cast %354 : vector<30x16xf32> to vector<1x30x1x16xf32>
    tpu.vector_store %arg3[%c1_300, %c0_301, %c6_302, %c0_303], %357 {strides = array<i32>} : memref<2x30x16x16xf32, #tpu.memory_space<vmem>>, vector<1x30x1x16xf32>,
    %c0_304 = arith.constant 0 : index
    %c140_305 = arith.constant 140 : index
    %358 = vector.load %arg5[%c0_304, %c140_305] : memref<30x320xf32, #tpu.memory_space<vmem>>, vector<30x16xf32>
    %c1_306 = arith.constant 1 : index
    %c0_307 = arith.constant 0 : index
    %c7_308 = arith.constant 7 : index
    %c0_309 = arith.constant 0 : index
    %359 = vector.load %arg3[%c1_306, %c0_307, %c7_308, %c0_309] : memref<2x30x16x16xf32, #tpu.memory_space<vmem>>, vector<1x30x1x16xf32>
    %360 = vector.shape_cast %359 : vector<1x30x1x16xf32> to vector<30x16xf32>
    %361 = vector.shape_cast %358 : vector<30x16xf32> to vector<1x30x1x16xf32>
    tpu.vector_store %arg3[%c1_306, %c0_307, %c7_308, %c0_309], %361 {strides = array<i32>} : memref<2x30x16x16xf32, #tpu.memory_space<vmem>>, vector<1x30x1x16xf32>,
    %c0_310 = arith.constant 0 : index
    %c160_311 = arith.constant 160 : index
    %362 = vector.load %arg5[%c0_310, %c160_311] : memref<30x320xf32, #tpu.memory_space<vmem>>, vector<30x16xf32>
    %c1_312 = arith.constant 1 : index
    %c0_313 = arith.constant 0 : index
    %c8_314 = arith.constant 8 : index
    %c0_315 = arith.constant 0 : index
    %363 = vector.load %arg3[%c1_312, %c0_313, %c8_314, %c0_315] : memref<2x30x16x16xf32, #tpu.memory_space<vmem>>, vector<1x30x1x16xf32>
    %364 = vector.shape_cast %363 : vector<1x30x1x16xf32> to vector<30x16xf32>
    %365 = vector.shape_cast %362 : vector<30x16xf32> to vector<1x30x1x16xf32>
    tpu.vector_store %arg3[%c1_312, %c0_313, %c8_314, %c0_315], %365 {strides = array<i32>} : memref<2x30x16x16xf32, #tpu.memory_space<vmem>>, vector<1x30x1x16xf32>,
    %c0_316 = arith.constant 0 : index
    %c180_317 = arith.constant 180 : index
    %366 = vector.load %arg5[%c0_316, %c180_317] : memref<30x320xf32, #tpu.memory_space<vmem>>, vector<30x16xf32>
    %c1_318 = arith.constant 1 : index
    %c0_319 = arith.constant 0 : index
    %c9_320 = arith.constant 9 : index
    %c0_321 = arith.constant 0 : index
    %367 = vector.load %arg3[%c1_318, %c0_319, %c9_320, %c0_321] : memref<2x30x16x16xf32, #tpu.memory_space<vmem>>, vector<1x30x1x16xf32>
    %368 = vector.shape_cast %367 : vector<1x30x1x16xf32> to vector<30x16xf32>
    %369 = vector.shape_cast %366 : vector<30x16xf32> to vector<1x30x1x16xf32>
    tpu.vector_store %arg3[%c1_318, %c0_319, %c9_320, %c0_321], %369 {strides = array<i32>} : memref<2x30x16x16xf32, #tpu.memory_space<vmem>>, vector<1x30x1x16xf32>,
    %c0_322 = arith.constant 0 : index
    %c200_323 = arith.constant 200 : index
    %370 = vector.load %arg5[%c0_322, %c200_323] : memref<30x320xf32, #tpu.memory_space<vmem>>, vector<30x16xf32>
    %c1_324 = arith.constant 1 : index
    %c0_325 = arith.constant 0 : index
    %c10_326 = arith.constant 10 : index
    %c0_327 = arith.constant 0 : index
    %371 = vector.load %arg3[%c1_324, %c0_325, %c10_326, %c0_327] : memref<2x30x16x16xf32, #tpu.memory_space<vmem>>, vector<1x30x1x16xf32>
    %372 = vector.shape_cast %371 : vector<1x30x1x16xf32> to vector<30x16xf32>
    %373 = vector.shape_cast %370 : vector<30x16xf32> to vector<1x30x1x16xf32>
    tpu.vector_store %arg3[%c1_324, %c0_325, %c10_326, %c0_327], %373 {strides = array<i32>} : memref<2x30x16x16xf32, #tpu.memory_space<vmem>>, vector<1x30x1x16xf32>,
    %c0_328 = arith.constant 0 : index
    %c220_329 = arith.constant 220 : index
    %374 = vector.load %arg5[%c0_328, %c220_329] : memref<30x320xf32, #tpu.memory_space<vmem>>, vector<30x16xf32>
    %c1_330 = arith.constant 1 : index
    %c0_331 = arith.constant 0 : index
    %c11_332 = arith.constant 11 : index
    %c0_333 = arith.constant 0 : index
    %375 = vector.load %arg3[%c1_330, %c0_331, %c11_332, %c0_333] : memref<2x30x16x16xf32, #tpu.memory_space<vmem>>, vector<1x30x1x16xf32>
    %376 = vector.shape_cast %375 : vector<1x30x1x16xf32> to vector<30x16xf32>
    %377 = vector.shape_cast %374 : vector<30x16xf32> to vector<1x30x1x16xf32>
    tpu.vector_store %arg3[%c1_330, %c0_331, %c11_332, %c0_333], %377 {strides = array<i32>} : memref<2x30x16x16xf32, #tpu.memory_space<vmem>>, vector<1x30x1x16xf32>,
    %c0_334 = arith.constant 0 : index
    %c240_335 = arith.constant 240 : index
    %378 = vector.load %arg5[%c0_334, %c240_335] : memref<30x320xf32, #tpu.memory_space<vmem>>, vector<30x16xf32>
    %c1_336 = arith.constant 1 : index
    %c0_337 = arith.constant 0 : index
    %c12_338 = arith.constant 12 : index
    %c0_339 = arith.constant 0 : index
    %379 = vector.load %arg3[%c1_336, %c0_337, %c12_338, %c0_339] : memref<2x30x16x16xf32, #tpu.memory_space<vmem>>, vector<1x30x1x16xf32>
    %380 = vector.shape_cast %379 : vector<1x30x1x16xf32> to vector<30x16xf32>
    %381 = vector.shape_cast %378 : vector<30x16xf32> to vector<1x30x1x16xf32>
    tpu.vector_store %arg3[%c1_336, %c0_337, %c12_338, %c0_339], %381 {strides = array<i32>} : memref<2x30x16x16xf32, #tpu.memory_space<vmem>>, vector<1x30x1x16xf32>,
    %c0_340 = arith.constant 0 : index
    %c260_341 = arith.constant 260 : index
    %382 = vector.load %arg5[%c0_340, %c260_341] : memref<30x320xf32, #tpu.memory_space<vmem>>, vector<30x16xf32>
    %c1_342 = arith.constant 1 : index
    %c0_343 = arith.constant 0 : index
    %c13_344 = arith.constant 13 : index
    %c0_345 = arith.constant 0 : index
    %383 = vector.load %arg3[%c1_342, %c0_343, %c13_344, %c0_345] : memref<2x30x16x16xf32, #tpu.memory_space<vmem>>, vector<1x30x1x16xf32>
    %384 = vector.shape_cast %383 : vector<1x30x1x16xf32> to vector<30x16xf32>
    %385 = vector.shape_cast %382 : vector<30x16xf32> to vector<1x30x1x16xf32>
    tpu.vector_store %arg3[%c1_342, %c0_343, %c13_344, %c0_345], %385 {strides = array<i32>} : memref<2x30x16x16xf32, #tpu.memory_space<vmem>>, vector<1x30x1x16xf32>,
    %c0_346 = arith.constant 0 : index
    %c280_347 = arith.constant 280 : index
    %386 = vector.load %arg5[%c0_346, %c280_347] : memref<30x320xf32, #tpu.memory_space<vmem>>, vector<30x16xf32>
    %c1_348 = arith.constant 1 : index
    %c0_349 = arith.constant 0 : index
    %c14_350 = arith.constant 14 : index
    %c0_351 = arith.constant 0 : index
    %387 = vector.load %arg3[%c1_348, %c0_349, %c14_350, %c0_351] : memref<2x30x16x16xf32, #tpu.memory_space<vmem>>, vector<1x30x1x16xf32>
    %388 = vector.shape_cast %387 : vector<1x30x1x16xf32> to vector<30x16xf32>
    %389 = vector.shape_cast %386 : vector<30x16xf32> to vector<1x30x1x16xf32>
    tpu.vector_store %arg3[%c1_348, %c0_349, %c14_350, %c0_351], %389 {strides = array<i32>} : memref<2x30x16x16xf32, #tpu.memory_space<vmem>>, vector<1x30x1x16xf32>,
    %c0_352 = arith.constant 0 : index
    %c300_353 = arith.constant 300 : index
    %390 = vector.load %arg5[%c0_352, %c300_353] : memref<30x320xf32, #tpu.memory_space<vmem>>, vector<30x16xf32>
    %c1_354 = arith.constant 1 : index
    %c0_355 = arith.constant 0 : index
    %c15_356 = arith.constant 15 : index
    %c0_357 = arith.constant 0 : index
    %391 = vector.load %arg3[%c1_354, %c0_355, %c15_356, %c0_357] : memref<2x30x16x16xf32, #tpu.memory_space<vmem>>, vector<1x30x1x16xf32>
    %392 = vector.shape_cast %391 : vector<1x30x1x16xf32> to vector<30x16xf32>
    %393 = vector.shape_cast %390 : vector<30x16xf32> to vector<1x30x1x16xf32>
    tpu.vector_store %arg3[%c1_354, %c0_355, %c15_356, %c0_357], %393 {strides = array<i32>} : memref<2x30x16x16xf32, #tpu.memory_space<vmem>>, vector<1x30x1x16xf32>,
    return
  }
  func.func @transform_0(%arg0: i32) -> (i32, i32) {
    %c0_i32 = arith.constant 0 : i32
    %c0_i32_0 = arith.constant 0 : i32
    return %arg0, %c0_i32 : i32, i32
  }
  func.func @transform_1(%arg0: i32) -> (i32, i32) {
    %c0_i32 = arith.constant 0 : i32
    %c0_i32_0 = arith.constant 0 : i32
    %c0_i32_1 = arith.constant 0 : i32
    return %c0_i32, %c0_i32_0 : i32, i32
  }
  func.func @transform_2(%arg0: i32) -> (i32, i32, i32, i32) {
    %c0_i32 = arith.constant 0 : i32
    %c0_i32_0 = arith.constant 0 : i32
    %c0_i32_1 = arith.constant 0 : i32
    %c0_i32_2 = arith.constant 0 : i32
    return %arg0, %c0_i32, %c0_i32_0, %c0_i32_1 : i32, i32, i32, i32
  }
}

</mosaic_0001>

<bundles_post_ra>
// kernel: squeeze.3
= control target key start
LH: loop header
LB: loop body
LE: loop exit
PB: predicated region body
PF: predicated region fallthrough
CT: control target
= control target key end

     0   :  { %vm3_vm0 = vcmask 244736   ;;  %s73_s0 = inlined_call_operand.vmem [shape: f32[30,5,5], index: 0, kind: input, shape index: {}]   ;;  %s74_s1 = inlined_call_operand.vmem [shape: f32[30,25], index: 1, kind: output, shape index: {}]  }
   0x1   :  { %v2_v0 = vld [vmem:[%s73_s0] sm:$0x1f]   ;;  %v25_v1 = vld [vmem:[%s73_s0 + $0x8] sm:$0x1f]   ;;  %v27_v2 = vld [vmem:[%s73_s0 + $0x10] sm:$0x1f]  }
   0x2   :  { %4 = vst.msk [vmem:[%s74_s1] sm:$0x1f] %vm3_vm0, %v2_v0   ;;  %26 = vst.msk [vmem:[%s74_s1 + $0x5] sm:$0x1f] %vm3_vm0, %v25_v1   ;;  %v29_v3 = vld [vmem:[%s73_s0 + $0x18] sm:$0x1f]  }
   0x3   :  { %28 = vst.msk [vmem:[%s74_s1 + $0xa] sm:$0x1f] %vm3_vm0, %v27_v2   ;;  %v31_v4 = vld [vmem:[%s73_s0 + $0x20] sm:$0x1f]   ;;  %30 = vst.msk [vmem:[%s74_s1 + $0xf] sm:$0x1f] %vm3_vm0, %v29_v3  }
   0x4   :  { %32 = vst.msk [vmem:[%s74_s1 + $0x14] sm:$0x1f] %vm3_vm0, %v31_v4  }

// kernel: hpf_forward.1
= control target key start
LH: loop header
LB: loop body
LE: loop exit
PB: predicated region body
PF: predicated region fallthrough
CT: control target
= control target key end

     0   :  { %s18640_s13 = smov 125   ;;  %s18641_s14 = smov 127   ;;  %v26977_v8 = vlaneseq  ;;  %vm298_vm1 = vcmask 203776   ;;  %v18664_v33 = vmov 0.0   ;;  %vm45_vm2 = vcmask 1022976   ;;  %s26961_s0 = inlined_call_operand.vmem [shape: f32[2,404], index: 0, kind: input, shape index: {}]   ;;  %s26962_s1 = inlined_call_operand.vmem [shape: f32[30,25], index: 1, kind: input, shape index: {}]   ;;  %s26963_s2 = inlined_call_operand.vmem [shape: f32[2,30,16,16], index: 2, kind: output, shape index: {}]  }
   0x1   :  { %v40_v0 = vld [vmem:[%s26961_s0] ss:$2 sm:$0x7]  ;;  %s18642_s19 = smov 124   ;;  %s18643_s20 = smov 126   ;;  %393 = vmatprep.mubr.f32.mxu0 %v18664_v33  ;;  %vm23_vm3 = vcmask 1039360  }
   0x2   :  { %v18_v1 = vld [vmem:[%s26961_s0] ss:$2 sm:$0x7]  ;;  %42 = vrot.lane.b32.xlu1 %v40_v0, %s18640_s13  ;;  %s18644_s25 = smov 107   ;;  %s18645_s26 = smov 108   ;;  %vm18728_vm0 = vcmp.lt.s32.totalorder %v26977_v8, 320 }
   0x3   :  { %20 = vrot.lane.b32.xlu0 %v18_v1, %s18641_s14  ;;  %v51_v2 = vld [vmem:[%s26961_s0] ss:$2 sm:$0x7]  ;;  %s18646_s3 = smov 105   ;;  %s18647_s4 = smov 106   ;;  %vm56_vm4 = vcmask 1014784  }
   0x4   :  { %v29_v3 = vld [vmem:[%s26961_s0] ss:$2 sm:$0x7]  ;;  %s18648_s9 = smov 88   ;;  %s18649_s10 = smov 104   ;;  %vm34_vm5 = vcmask 1031168  }
   0x5   :  { %v73_v4 = vld [vmem:[%s26961_s0] ss:$2 sm:$0x7]  ;;  %s18650_s21 = smov 86   ;;  %s18651_s22 = smov 87   ;;  %vm78_vm6 = vcmask 875520  }
   0x6   :  { %53 = vrot.lane.b32.xlu1 %v51_v2, %s18642_s19  ;;  %v62_v5 = vld [vmem:[%s26961_s0] ss:$2 sm:$0x7]  ;;  %s18652_s29 = smov 84   ;;  %s18653_s30 = smov 85   ;;  %vm67_vm7 = vcmask 883712  }
   0x7   :  { %31 = vrot.lane.b32.xlu0 %v29_v3, %s18643_s20  ;;  %v95_v6 = vld [vmem:[%s26961_s0] ss:$2 sm:$0x7]  ;;  %s18654_s11 = smov 67   ;;  %s18655_s12 = smov 68   ;;  %vm100_vm8 = vcmask 859136  }
   0x8   :  { %v84_v7 = vld [vmem:[%s26961_s0] ss:$2 sm:$0x7]  ;;  %s26964_s23 = smov 65   ;;  %s18657_s24 = smov 66   ;;  %vm89_vm9 = vcmask 867328  }
   0x9   :  { %v117_v9 = vld [vmem:[%s26961_s0] ss:$2 sm:$0x7]  ;;  %s18658_s7 = smov 48   ;;  %s26965_s8 = smov 64   ;;  %vm26975_vm10 = vcmask 719872  }
   0xa   :  { %75 = vrot.lane.b32.xlu1 %v73_v4, %s18644_s25  ;;  %v106_v10 = vld [vmem:[%s26961_s0] ss:$2 sm:$0x7]  ;;  %s26981_s27 = smov 46   ;;  %s18661_s28 = smov 47   ;;  %vm111_vm11 = vcmask 850944  }
   0xb   :  { %64 = vrot.lane.b32.xlu0 %v62_v5, %s18645_s26  ;;  %v139_v12 = vld [vmem:[%s26961_s0] ss:$2 sm:$0x7]  ;;  %s26979_s17 = smov 44   ;;  %s26980_s18 = smov 45   ;;  %vm26966_vm12 = vcmask 703488  }
   0xc   :  { %v11_v13 = vld [vmem:[%s26961_s0] ss:$2 sm:$0x7]  ;;  %vm26967_vm13 = vcmask 711680   ;;  %vm26968_vm14 = vcmask 687104   ;;  %vm26969_vm15 = vcmask 695296  }
   0xd   :  { %v128_v14 = vld [vmem:[%s26961_s0] ss:$2 sm:$0x7]  ;;  %16 = vst.msk [vmem:[#allocation2] ss:$8 sm:$0x7] %vm18728_vm0, %v11_v13 }
   0xe   :  { %97 = vrot.lane.b32.xlu1 %v95_v6, %s18646_s3  ;;  %v161_v15 = vld [vmem:[%s26961_s0] ss:$2 sm:$0x7]  ;;  %s18666_s5 = smov 28   ;;  %s26983_s16 = smov 8  }
   0xf   :  { %86 = vrot.lane.b32.xlu0 %v84_v7, %s18647_s4  ;;  %v150_v16 = vld [vmem:[%s26961_s0] ss:$2 sm:$0x7]  ;;  %s26988_s15 = smov 76  }
  0x10   :  { %v183_v17 = vld [vmem:[%s26961_s0] ss:$2 sm:$0x7] }
  0x11   :  { %v172_v18 = vld [vmem:[%s26961_s0] ss:$2 sm:$0x7] }
  0x12   :  { %119 = vrot.lane.b32.xlu1 %v117_v9, %s18648_s9  ;;  %v205_v19 = vld [vmem:[%s26961_s0] ss:$2 sm:$0x7] }
  0x13   :  { %108 = vrot.lane.b32.xlu0 %v106_v10, %s18649_s10  ;;  %v194_v20 = vld [vmem:[%s26961_s0] ss:$2 sm:$0x7] }
  0x14   :  { %v227_v21 = vld [vmem:[%s26961_s0] ss:$2 sm:$0xf] }
  0x15   :  { %v216_v22 = vld [vmem:[%s26961_s0] ss:$2 sm:$0x7] }
  0x16   :  { %141 = vrot.lane.b32.xlu1 %v139_v12, %s18650_s21  ;;  %v249_v23 = vld [vmem:[%s26961_s0] ss:$2 sm:$0xf] }
  0x17   :  { %130 = vrot.lane.b32.xlu0 %v128_v14, %s18651_s22  ;;  %v238_v24 = vld [vmem:[%s26961_s0] ss:$2 sm:$0xf] }
  0x18   :  { %v271_v25 = vld [vmem:[%s26961_s0] ss:$2 sm:$0xf] }
  0x19   :  { %v260_v26 = vld [vmem:[%s26961_s0] ss:$2 sm:$0xf] }
  0x1a   :  { %163 = vrot.lane.b32.xlu1 %v161_v15, %s18652_s29  ;;  %v282_v27 = vld [vmem:[%s26962_s1] sm:$0xff] }
  0x1b   :  { %152 = vrot.lane.b32.xlu0 %v150_v16, %s18653_s30  ;;  %v300_v28 = vsel %vm298_vm1, %v282_v27, 0  ;;  %v284_v27 = vld [vmem:[%s26962_s1 + $0x10] sm:$0xff] }
  0x1c   :  { %v18797_v29 = vand.u32 4294901760, %v300_v28 }
  0x1e   :  { %185 = vrot.lane.b32.xlu1 %v183_v17, %s18654_s11  ;;  %v18802_v30 = vsub.f32 %v300_v28, %v18797_v29  ;;  %v283_v17 = vld [vmem:[%s26962_s1 + $0x8] sm:$0xff]  ;;  %v285_v28 = vld [vmem:[%s26962_s1 + $0x18] sm:$0x3f] }
  0x1f   :  { %174 = vrot.lane.b32.xlu0 %v172_v18, %s18655_s12 }
  0x20   :  { %v18805_v31 = vand.u32 4294901760, %v18802_v30 }
  0x22   :  { %207 = vrot.lane.b32.xlu1 %v205_v19, %s26964_s23  ;;  %v397_v32 = vsub.f32 %v18802_v30, %v18805_v31  ;;  %s26990_s23 = smov 96  }
  0x23   :  { %196 = vrot.lane.b32.xlu0 %v194_v20, %s18657_s24 }
  0x24   :  { %v18810_v34 = vand.u32 4294901760, %v397_v32 }
  0x26   :  { %229 = vrot.lane.b32.xlu1 %v227_v21, %s18658_s7  ;;  %18127 = vmatprep.mubr.f32.mxu1 %v18810_v34 }
  0x27   :  { %218 = vrot.lane.b32.xlu0 %v216_v22, %s26965_s8  ;;  %v303_v22 = vsel %vm298_vm1, %v283_v17, 0  ;;  %s27048_s8 = smov 96  }
  0x2a   :  { %251 = vrot.lane.b32.xlu1 %v249_v23, %s26981_s27 }
  0x2b   :  { %240 = vrot.lane.b32.xlu0 %v238_v24, %s18661_s28 }
  0x2e   :  { %273 = vrot.lane.b32.xlu1 %v271_v25, %s26979_s17  ;;  %s26996_s17 = smov 36  }
  0x2f   :  { %262 = vrot.lane.b32.xlu0 %v260_v26, %s26980_s18  ;;  %s26985_s18 = smov 116  }
  0x74   :  { %v43_v35 = vpop.permute.xlu1 %42 }
  0x75   :  { %v21_v36 = vpop.permute.xlu0 %20  ;;  %v44_v37 = vrot.slane %v43_v35, 1 }
  0x76   :  { %v22_v38 = vrot.slane %v21_v36, 1 }
  0x77   :  { %v46_v39 = vsel %vm45_vm2, %v43_v35, %v44_v37 }
  0x78   :  { %v24_v40 = vsel %vm23_vm3, %v21_v36, %v22_v38  ;;  %49 = vst.msk [vmem:[#allocation2 + $0x3] ss:$8 sm:$0x7] %vm18728_vm0, %v46_v39  ;;  %v54_v41 = vpop.permute.xlu1 %53  ;;  %v18871_v36 = vand.u32 4294901760, %v303_v22 }
  0x79   :  { %27 = vst.msk [vmem:[#allocation2 + $0x1] ss:$8 sm:$0x7] %vm18728_vm0, %v24_v40  ;;  %v32_v42 = vpop.permute.xlu0 %31  ;;  %v55_v43 = vrot.slane %v54_v41, 1 }
  0x7a   :  { %v33_v44 = vrot.slane %v32_v42, 1 }
  0x7b   :  { %v57_v45 = vsel %vm56_vm4, %v54_v41, %v55_v43  ;;  %v306_v41 = vsel %vm298_vm1, %v284_v27, 0 }
  0x7c   :  { %v35_v46 = vsel %vm34_vm5, %v32_v42, %v33_v44  ;;  %60 = vst.msk [vmem:[#allocation2 + $0x4] ss:$8 sm:$0x7] %vm18728_vm0, %v57_v45  ;;  %v76_v47 = vpop.permute.xlu1 %75  ;;  %v309_v42 = vsel %vm298_vm1, %v285_v28, 0 }
  0x7d   :  { %38 = vst.msk [vmem:[#allocation2 + $0x2] ss:$8 sm:$0x7] %vm18728_vm0, %v35_v46  ;;  %v65_v48 = vpop.permute.xlu0 %64  ;;  %v77_v49 = vrot.slane %v76_v47, 1 }
  0x7e   :  { %v66_v50 = vrot.slane %v65_v48, 1 }
  0x7f   :  { %v79_v51 = vsel %vm78_vm6, %v76_v47, %v77_v49 }
  0x80   :  { %v68_v52 = vsel %vm67_vm7, %v65_v48, %v66_v50  ;;  %82 = vst.msk [vmem:[#allocation2 + $0x6] ss:$8 sm:$0x7] %vm18728_vm0, %v79_v51  ;;  %v98_v53 = vpop.permute.xlu1 %97  ;;  %v18882_v48 = vsub.f32 %v303_v22, %v18871_v36 }
  0x81   :  { %71 = vst.msk [vmem:[#allocation2 + $0x5] ss:$8 sm:$0x7] %vm18728_vm0, %v68_v52  ;;  %v87_v54 = vpop.permute.xlu0 %86  ;;  %v99_v55 = vrot.slane %v98_v53, 1 }
  0x82   :  { %v88_v56 = vrot.slane %v87_v54, 1  ;;  %v18922_v17 = vand.u32 4294901760, %v18882_v48 }
  0x83   :  { %v101_v57 = vsel %vm100_vm8, %v98_v53, %v99_v55  ;;  %v18888_v55 = vand.u32 4294901760, %v309_v42 }
  0x84   :  { %v90_v58 = vsel %vm89_vm9, %v87_v54, %v88_v56  ;;  %104 = vst.msk [vmem:[#allocation2 + $0x18] ss:$8 sm:$0x7] %vm18728_vm0, %v101_v57  ;;  %v120_v59 = vpop.permute.xlu1 %119  ;;  %v18886_v54 = vand.u32 4294901760, %v306_v41 }
  0x85   :  { %93 = vst.msk [vmem:[#allocation2 + $0x7] ss:$8 sm:$0x7] %vm18728_vm0, %v90_v58  ;;  %v109_v60 = vpop.permute.xlu0 %108  ;;  %v121_v61 = vrot.slane %v120_v59, 1 }
  0x86   :  { %v110_v62 = vrot.slane %v109_v60, 1 }
  0x87   :  { %v123_v63 = vsel %vm26975_vm10, %v120_v59, %v121_v61  ;;  %vm26982_vm10 = vcmask 367616  }
  0x88   :  { %v112_v0 = vsel %vm111_vm11, %v109_v60, %v110_v62  ;;  %126 = vst.msk [vmem:[#allocation2 + $0x1a] ss:$8 sm:$0x7] %vm18728_vm0, %v123_v63  ;;  %v142_v1 = vpop.permute.xlu1 %141 }
  0x89   :  { %115 = vst.msk [vmem:[#allocation2 + $0x19] ss:$8 sm:$0x7] %vm18728_vm0, %v112_v0  ;;  %v131_v2 = vpop.permute.xlu0 %130  ;;  %v143_v3 = vrot.slane %v142_v1, 1 }
  0x8a   :  { %v132_v4 = vrot.slane %v131_v2, 1 }
  0x8b   :  { %v145_v5 = vsel %vm26966_vm12, %v142_v1, %v143_v3  ;;  %vm26970_vm12 = vcmask 547840  }
  0x8c   :  { %v134_v6 = vsel %vm26967_vm13, %v131_v2, %v132_v4  ;;  %148 = vst.msk [vmem:[#allocation2 + $0x1c] ss:$8 sm:$0x7] %vm18728_vm0, %v145_v5  ;;  %v164_v7 = vpop.permute.xlu1 %163  ;;  %vm26971_vm13 = vcmask 556032   ;;  %v288_v32 = vld [vmem:[#allocation2 + $0x10] sm:$0xff]  ;;  %v287_v35 = vld [vmem:[#allocation2 + $0x8] sm:$0xff] }
  0x8d   :  { %137 = vst.msk [vmem:[#allocation2 + $0x1b] ss:$8 sm:$0x7] %vm18728_vm0, %v134_v6  ;;  %v153_v9 = vpop.permute.xlu0 %152  ;;  %v165_v10 = vrot.slane %v164_v7, 1  ;;  %v321_v45 = vand.u32 4294901760, %v287_v35  ;;  %v1012_v46 = vand.u32 4294901760, %v288_v32 }
  0x8e   :  { %v154_v12 = vrot.slane %v153_v9, 1  ;;  %v286_v47 = vld [vmem:[#allocation2] sm:$0xff] }
  0x8f   :  { %v167_v13 = vsel %vm26968_vm14, %v164_v7, %v165_v10  ;;  %vm26972_vm14 = vcmask 531456   ;;  %v323_v60 = vand.u32 4294901760, %v286_v47  ;;  %v18894_v0 = vsub.f32 %v287_v35, %v321_v45 }
  0x90   :  { %v156_v14 = vsel %vm26969_vm15, %v153_v9, %v154_v12  ;;  %170 = vst.msk [vmem:[#allocation2 + $0x1e] ss:$8 sm:$0x7] %vm18728_vm0, %v167_v13  ;;  %v186_v15 = vpop.permute.xlu1 %185  ;;  %vm26973_vm15 = vcmask 539648   ;;  %v18896_v1 = vsub.f32 %v288_v32, %v1012_v46  ;;  %v408_v35 = vsub.f32 %v18882_v48, %v18922_v17 }
  0x91   :  { %159 = vst.msk [vmem:[#allocation2 + $0x1d] ss:$8 sm:$0x7] %vm18728_vm0, %v156_v14  ;;  %v175_v16 = vpop.permute.xlu0 %174  ;;  %v187_v18 = vrot.slane %v186_v15, 1 }
  0x92   :  { %v176_v19 = vrot.slane %v175_v16, 1 }
  0x93   :  { %v189_v20 = vsel %vm26970_vm12, %v186_v15, %v187_v18  ;;  %vm26974_vm12 = vcmask 392192   ;;  %v440_v18 = vand.u32 4294901760, %v18894_v0 }
  0x94   :  { %v178_v21 = vsel %vm26971_vm13, %v175_v16, %v176_v19  ;;  %192 = vst.msk [vmem:[#allocation2 + $0x30] ss:$8 sm:$0x7] %vm18728_vm0, %v189_v20  ;;  %v208_v23 = vpop.permute.xlu1 %207  ;;  %vm221_vm13 = vcmask 523264   ;;  %v1123_v19 = vand.u32 4294901760, %v18896_v1  ;;  %v18927_v20 = vsub.f32 %v306_v41, %v18886_v54 }
  0x95   :  { %181 = vst.msk [vmem:[#allocation2 + $0x1f] ss:$8 sm:$0x7] %vm18728_vm0, %v178_v21  ;;  %v197_v24 = vpop.permute.xlu0 %196  ;;  %v209_v25 = vrot.slane %v208_v23, 1  ;;  %v18930_v21 = vsub.f32 %v309_v42, %v18888_v55  ;;  %v441_v28 = vsub.f32 %v18894_v0, %v440_v18 }
  0x96   :  { %v198_v26 = vrot.slane %v197_v24, 1  ;;  %v1124_v32 = vsub.f32 %v18896_v1, %v1123_v19 }
  0x97   :  { %v211_v37 = vsel %vm26972_vm14, %v208_v23, %v209_v25  ;;  %vm254_vm14 = vcmask 375808  }
  0x98   :  { %v200_v38 = vsel %vm26973_vm15, %v197_v24, %v198_v26  ;;  %214 = vst.msk [vmem:[#allocation2 + $0x32] ss:$8 sm:$0x7] %vm18728_vm0, %v211_v37  ;;  %v230_v39 = vpop.permute.xlu1 %229  ;;  %vm243_vm15 = vcmask 384000   ;;  %v18940_v26 = vsub.f32 %v286_v47, %v323_v60 }
  0x99   :  { %203 = vst.msk [vmem:[#allocation2 + $0x31] ss:$8 sm:$0x7] %vm18728_vm0, %v200_v38  ;;  %v219_v40 = vpop.permute.xlu0 %218  ;;  %v231_v43 = vrot.slane %v230_v39, 1 }
  0x9a   :  { %v220_v44 = vrot.slane %v219_v40, 1  ;;  %v446_v41 = vand.u32 4294901760, %v18940_v26 }
  0x9b   :  { %v233_v50 = vsel %vm26974_vm12, %v230_v39, %v231_v43  ;;  %vm26976_vm12 = vcmask 359424   ;;  %v18960_v39 = vand.u32 4294901760, %v18927_v20  ;;  %v442_v43 = vand.u32 4294901760, %v441_v28 }
  0x9c   :  { %v291_v49 = vld [vmem:[#allocation2 + $0x28] sm:$0xff]  ;;  %v222_v51 = vsel %vm221_vm13, %v219_v40, %v220_v44  ;;  %v290_v52 = vld [vmem:[#allocation2 + $0x20] sm:$0xff]  ;;  %v289_v53 = vld [vmem:[#allocation2 + $0x18] sm:$0xff]  ;;  %236 = vst.msk [vmem:[#allocation2 + $0x34] ss:$8 sm:$0x7] %vm18728_vm0, %v233_v50  ;;  %v252_v56 = vpop.permute.xlu1 %251 }
  0x9d   :  { %225 = vst.msk [vmem:[#allocation2 + $0x33] ss:$8 sm:$0x7] %vm18728_vm0, %v222_v51  ;;  %v241_v57 = vpop.permute.xlu0 %240  ;;  %v325_v58 = vand.u32 4294901760, %v290_v52  ;;  %v1015_v59 = vand.u32 4294901760, %v291_v49  ;;  %v327_v61 = vand.u32 4294901760, %v289_v53 }
  0x9e   :  { %v253_v62 = vrot.slane %v252_v56, 1  ;;  %v242_v63 = vrot.slane %v241_v57, 1  ;;  %v18963_v40 = vand.u32 4294901760, %v18930_v21  ;;  %v1125_v44 = vand.u32 4294901760, %v1124_v32 }
  0x9f   :  { %v18898_v2 = vpack.c.bf16 %v325_v58, %v321_v45  ;;  %v18900_v3 = vsub.f32 %v290_v52, %v325_v58  ;;  %v18902_v4 = vpack.c.bf16 %v1015_v59, %v1012_v46  ;;  %v18904_v5 = vpack.c.bf16 %v327_v61, %v323_v60 }
  0xa0   :  { %v255_v6 = vsel %vm254_vm14, %v252_v56, %v253_v62  ;;  %v244_v7 = vsel %vm243_vm15, %v241_v57, %v242_v63  ;;  %v18908_v9 = vsub.f32 %v289_v53, %v327_v61  ;;  %v18910_v10 = vsub.f32 %v291_v49, %v1015_v59  ;;  %v274_v12 = vpop.permute.xlu1 %273 }
  0xa1   :  { %258 = vst.msk [vmem:[#allocation2 + $0x36] ss:$8 sm:$0x7] %vm18728_vm0, %v255_v6  ;;  %247 = vst.msk [vmem:[#allocation2 + $0x35] ss:$8 sm:$0x7] %vm18728_vm0, %v244_v7  ;;  %v263_v13 = vpop.permute.xlu0 %262  ;;  %18288 = vmatprep.subr.bf16.mxu0 %v18898_v2  ;;  %18336 = vmatprep.subr.bf16.mxu1 %v18902_v4  ;;  %v419_v52 = vsub.f32 %v18927_v20, %v18960_v39  ;;  %v430_v53 = vsub.f32 %v18930_v21, %v18963_v40 }
  0xa2   :  { %v275_v14 = vrot.slane %v274_v12, 1  ;;  %v264_v15 = vrot.slane %v263_v13, 1  ;;  %18290 = vmatpush1.bf16.msra.mxu0 %v18904_v5  ;;  %18338 = vmatpush3.bf16.msra.mxu1 %v18902_v4  ;;  %v452_v16 = vand.u32 4294901760, %v18900_v3  ;;  %v1130_v24 = vand.u32 4294901760, %v18910_v10 }
  0xa3   :  { %v458_v25 = vand.u32 4294901760, %v18908_v9  ;;  %v18966_v45 = vand.u32 4294901760, %v408_v35  ;;  %v447_v61 = vsub.f32 %v18940_v26, %v446_v41 }
  0xa4   :  { %v277_v22 = vsel %vm26976_vm12, %v274_v12, %v275_v14  ;;  %v266_v23 = vsel %vm26982_vm10, %v263_v13, %v264_v15  ;;  %v453_v27 = vsub.f32 %v18900_v3, %v452_v16  ;;  %v1131_v37 = vsub.f32 %v18910_v10, %v1130_v24 }
  0xa5   :  { %280 = vst.msk [vmem:[#allocation2 + $0x48] ss:$8 sm:$0x7] %vm18728_vm0, %v277_v22  ;;  %269 = vst.msk [vmem:[#allocation2 + $0x37] ss:$8 sm:$0x7] %vm18728_vm0, %v266_v23  ;;  %v459_v38 = vsub.f32 %v18908_v9, %v458_v25 }
  0xa6   :  { %vm26978_vm12 = vcmask 1040384   ;;  %v454_v42 = vand.u32 4294901760, %v453_v27  ;;  %v1132_v50 = vand.u32 4294901760, %v1131_v37  ;;  %vm26987_vm10 = vcmask 64512  }
  0xa7   :  { %v460_v51 = vand.u32 4294901760, %v459_v38 }
  0xa8   :  { %v18295_v12 = vpack.c.bf16 %v454_v42, %v442_v43 }
  0xac   :  { %v294_v46 = vld [vmem:[#allocation2 + $0x40] sm:$0xff]  ;;  %v293_v47 = vld [vmem:[#allocation2 + $0x38] sm:$0xff]  ;;  %v296_v49 = vld [vmem:[#allocation2 + $0x50] sm:$0x1] }
  0xad   :  { %v316_v56 = vsel %vm26978_vm12, %v296_v49, 0  ;;  %v329_v57 = vand.u32 4294901760, %v293_v47  ;;  %v297_v58 = vld [vmem:[#allocation2 + $0x58] sm:$0x1]  ;;  %v1018_v59 = vand.u32 4294901760, %v294_v46  ;;  %v292_v60 = vld [vmem:[#allocation2 + $0x30] sm:$0xff] }
  0xae   :  { %v333_v62 = vand.u32 4294901760, %v316_v56  ;;  %v319_v63 = vsel %vm26978_vm12, %v297_v58, 0  ;;  %v295_v6 = vld [vmem:[#allocation2 + $0x48] sm:$0x1]  ;;  %v331_v7 = vand.u32 4294901760, %v292_v60 }
  0xaf   :  { %v18977_v13 = vsub.f32 %v293_v47, %v329_v57  ;;  %v1021_v14 = vand.u32 4294901760, %v319_v63  ;;  %v313_v15 = vsel %vm26978_vm12, %v295_v6, 0  ;;  %v18980_v22 = vsub.f32 %v294_v46, %v1018_v59 }
  0xb0   :  { %v18982_v23 = vpack.c.bf16 %v333_v62, %v329_v57  ;;  %v18984_v27 = vsub.f32 %v316_v56, %v333_v62  ;;  %v335_v28 = vand.u32 4294901760, %v313_v15  ;;  %v18986_v32 = vsub.f32 %v292_v60, %v331_v7 }
  0xb1   :  { %v18988_v35 = vpack.c.bf16 %v1021_v14, %v1018_v59  ;;  %v464_v37 = vand.u32 4294901760, %v18977_v13  ;;  %v1137_v38 = vand.u32 4294901760, %v18980_v22  ;;  %v18992_v42 = vsub.f32 %v319_v63, %v1021_v14 }
  0xb2   :  { %18292 = vmatprep.subr.bf16.mxu0 %v18982_v23  ;;  %v18995_v43 = vpack.c.bf16 %v335_v28, %v331_v7  ;;  %v18997_v46 = vsub.f32 %v313_v15, %v335_v28  ;;  %v476_v47 = vand.u32 4294901760, %v18984_v27  ;;  %v470_v49 = vand.u32 4294901760, %v18986_v32 }
  0xb3   :  { %18340 = vmatprep.subr.bf16.mxu1 %v18988_v35  ;;  %v18343_v56 = vpack.c.bf16 %v1132_v50, %v1125_v44  ;;  %v465_v57 = vsub.f32 %v18977_v13, %v464_v37  ;;  %v1138_v58 = vsub.f32 %v18980_v22, %v1137_v38  ;;  %v1144_v59 = vand.u32 4294901760, %v18992_v42 }
  0xb4   :  { %18294 = vmatpush1.bf16.msra.mxu0 %v18995_v43  ;;  %18342 = vmatpush3.bf16.msra.mxu1 %v18988_v35  ;;  %v448_v60 = vand.u32 4294901760, %v447_v61  ;;  %v477_v62 = vsub.f32 %v18984_v27, %v476_v47  ;;  %v471_v44 = vsub.f32 %v18986_v32, %v470_v49  ;;  %v482_v50 = vand.u32 4294901760, %v18997_v46 }
  0xb5   :  { %18296 = vmatprep.subr.bf16.mxu0 %v18295_v12  ;;  %18344 = vmatprep.subr.bf16.mxu1 %v18343_v56  ;;  %v466_v63 = vand.u32 4294901760, %v465_v57  ;;  %v420_v6 = vand.u32 4294901760, %v419_v52  ;;  %v1139_v7 = vand.u32 4294901760, %v1138_v58  ;;  %v1145_v14 = vsub.f32 %v18992_v42, %v1144_v59 }
  0xb6   :  { %v18297_v61 = vpack.c.bf16 %v460_v51, %v448_v60  ;;  %v478_v15 = vand.u32 4294901760, %v477_v62  ;;  %v472_v28 = vand.u32 4294901760, %v471_v44  ;;  %v483_v8 = vsub.f32 %v18997_v46, %v482_v50 }
  0xb7   :  { %399 = vmatmul.mubr.f32.vlgmr.msra.gmra.mrb[0].mxu0 %v18810_v34  ;;  %18128 = vmatmul.mubr.f32.vlgmr.msra.gmra.mrb[0].mxu1 %v18966_v45  ;;  %v1146_v12 = vand.u32 4294901760, %v1145_v14  ;;  %v431_v58 = vand.u32 4294901760, %v430_v53  ;;  %v18303_v34 = vpack.c.bf16 %v18900_v3, %v18894_v0  ;;  %v18307_v53 = vpack.c.bf16 %v18984_v27, %v18977_v13 }
  0xb8   :  { %18298 = vmatpush1.bf16.msra.mxu0 %v18297_v61  ;;  %18346 = vmatpush3.bf16.msra.mxu1 %v18343_v56  ;;  %v18299_v52 = vpack.c.bf16 %v478_v15, %v466_v63  ;;  %v484_v57 = vand.u32 4294901760, %v483_v8  ;;  %v18351_v56 = vpack.c.bf16 %v18910_v10, %v18896_v1  ;;  %v18355_v8 = vpack.c.bf16 %v18992_v42, %v18980_v22 }
  0xb9   :  { %404 = vmatprep.mubr.f32.mxu0 %v18664_v33  ;;  %18130 = vmatprep.mubr.f32.mxu1 %v420_v6  ;;  %v18347_v51 = vpack.c.bf16 %v1146_v12, %v1139_v7  ;;  %v18309_v62 = vpack.c.bf16 %v18997_v46, %v18986_v32  ;;  %v18367_v44 = vpack.c.bf16 %v1130_v24, %v1123_v19  ;;  %vm1894_vm12 = vcmask 122880  }
  0xba   :  { %18300 = vmatprep.subr.bf16.mxu0 %v18299_v52  ;;  %v18301_v60 = vpack.c.bf16 %v484_v57, %v472_v28  ;;  %v18371_v1 = vpack.c.bf16 %v1144_v59, %v1137_v38  ;;  %v18319_v10 = vpack.c.bf16 %v452_v16, %v440_v18  ;;  %v18325_v0 = vpack.c.bf16 %v482_v50, %v470_v49 }
  0xbb   :  { %410 = vmatmul.mubr.f32.gmra.mrb[2].mxu0 %v18966_v45  ;;  %18348 = vmatprep.subr.bf16.mxu1 %v18347_v51  ;;  %v18305_v45 = vpack.c.bf16 %v18908_v9, %v18940_v26 }
  0xbc   :  { %18302 = vmatpush1.bf16.msra.mxu0 %v18301_v60  ;;  %18131 = vmatmul.mubr.f32.gmra.mrb[2].mxu1 %v431_v58 }
  0xbd   :  { %18350 = vmatpush3.bf16.msra.mxu1 %v18347_v51  ;;  %18304 = vmatprep.subr.bf16.mxu0 %v18303_v34 }
  0xbe   :  { %18352 = vmatprep.subr.bf16.mxu1 %v18351_v56  ;;  %415 = vmatprep.mubr.f32.mxu0 %v18664_v33 }
  0xbf   :  { %421 = vmatmul.mubr.f32.gmra.mrb[4].mxu0 %v420_v6  ;;  %18141 = vmatprep.mubr.f32.mxu1 %v18797_v29 }
  0xc0   :  { %18142 = vmatmul.mubr.f32.vlgmr.msra.gmra.mrb[0].mxu1 %v18871_v36  ;;  %426 = vmatprep.mubr.f32.mxu0 %v18664_v33 }
  0xc1   :  { %18354 = vmatpush3.bf16.msra.mxu1 %v18351_v56  ;;  %18144 = vmatprep.mubr.f32.mxu1 %v18886_v54 }
  0xc2   :  { %18356 = vmatprep.subr.bf16.mxu1 %v18355_v8 }
  0xc3   :  { %432 = vmatmul.mubr.f32.gmra.mrb[6].mxu0 %v431_v58 }
  0xc4   :  { %18145 = vmatmul.mubr.f32.gmra.mrb[2].mxu1 %v18888_v55  ;;  %542 = vmatprep.mubr.f32.mxu0 %v18664_v33 }
  0xc5   :  { %18358 = vmatpush3.bf16.msra.mxu1 %v18355_v8  ;;  %18155 = vmatprep.mubr.f32.mxu1 %v18802_v30 }
  0xc6   :  { %18360 = vmatprep.subr.bf16.mxu1 %v18902_v4 }
  0xc7   :  { %544 = vmatmul.mubr.f32.vlgmr.msra.gmra.mrb[0].mxu0 %v18797_v29 }
  0xc8   :  { %18306 = vmatpush1.bf16.msra.mxu0 %v18305_v45  ;;  %18156 = vmatmul.mubr.f32.vlgmr.msra.gmra.mrb[0].mxu1 %v18882_v48 }
  0xc9   :  { %18308 = vmatprep.subr.bf16.mxu0 %v18307_v53  ;;  %18362 = vmatpush3.bf16.msra.mxu1 %v18902_v4 }
  0xca   :  { %18364 = vmatprep.subr.bf16.mxu1 %v18988_v35  ;;  %549 = vmatprep.mubr.f32.mxu0 %v18664_v33 }
  0xcb   :  { %551 = vmatmul.mubr.f32.gmra.mrb[2].mxu0 %v18871_v36  ;;  %18158 = vmatprep.mubr.f32.mxu1 %v18927_v20 }
  0xcc   :  { %18310 = vmatpush1.bf16.msra.mxu0 %v18309_v62  ;;  %18159 = vmatmul.mubr.f32.gmra.mrb[2].mxu1 %v18930_v21 }
  0xcd   :  { %18312 = vmatprep.subr.bf16.mxu0 %v18898_v2  ;;  %18366 = vmatpush3.bf16.msra.mxu1 %v18988_v35 }
  0xce   :  { %18368 = vmatprep.subr.bf16.mxu1 %v18367_v44  ;;  %556 = vmatprep.mubr.f32.mxu0 %v18664_v33 }
  0xcf   :  { %558 = vmatmul.mubr.f32.gmra.mrb[4].mxu0 %v18886_v54  ;;  %18169 = vmatprep.mubr.f32.mxu1 %v18805_v31 }
  0xd0   :  { %18170 = vmatmul.mubr.f32.vlgmr.msra.gmra.mrb[0].mxu1 %v18922_v17  ;;  %563 = vmatprep.mubr.f32.mxu0 %v18664_v33 }
  0xd1   :  { %18370 = vmatpush3.bf16.msra.mxu1 %v18367_v44  ;;  %18172 = vmatprep.mubr.f32.mxu1 %v18960_v39 }
  0xd2   :  { %18372 = vmatprep.subr.bf16.mxu1 %v18371_v1 }
  0xd3   :  { %565 = vmatmul.mubr.f32.gmra.mrb[6].mxu0 %v18888_v55 }
  0xd4   :  { %18173 = vmatmul.mubr.f32.gmra.mrb[2].mxu1 %v18963_v40  ;;  %651 = vmatprep.mubr.f32.mxu0 %v18664_v33 }
  0xd5   :  { %18374 = vmatpush3.bf16.msra.mxu1 %v18371_v1  ;;  %18183 = vmatprep.mubr.f32.mxu1 %v18797_v29 }
  0xd6   :  { %18376 = vmatprep.subr.bf16.mxu1 %v18902_v4 }
  0xd7   :  { %654 = vmatmul.mubr.f32.vlgmr.msra.gmra.mrb[0].mxu0 %v18802_v30  ;;  %v18321_v30 = vpack.c.bf16 %v458_v25, %v446_v41 }
  0xd8   :  { %18314 = vmatpush1.bf16.msra.mxu0 %v18904_v5  ;;  %18184 = vmatmul.mubr.f32.vlgmr.msra.gmra.mrb[0].mxu1 %v18871_v36 }
  0xd9   :  { %18316 = vmatprep.subr.bf16.mxu0 %v18982_v23  ;;  %18378 = vmatpush3.bf16.msra.mxu1 %v18902_v4  ;;  %v27004_v4 = vlaneseq }
  0xda   :  { %18380 = vmatprep.subr.bf16.mxu1 %v18988_v35  ;;  %659 = vmatprep.mubr.f32.mxu0 %v18664_v33 }
  0xdb   :  { %662 = vmatmul.mubr.f32.gmra.mrb[2].mxu0 %v18882_v48  ;;  %18186 = vmatprep.mubr.f32.mxu1 %v18886_v54  ;;  %v18323_v48 = vpack.c.bf16 %v476_v47, %v464_v37 }
  0xdc   :  { %18318 = vmatpush1.bf16.msra.mxu0 %v18995_v43  ;;  %667 = vmatprep.mubr.f32.mxu0 %v18664_v33 }
  0xdd   :  { %18320 = vmatprep.subr.bf16.mxu0 %v18319_v10  ;;  %18382 = vmatpush3.bf16.msra.mxu1 %v18988_v35 }
  0xde   :  { %18187 = vmatmul.mubr.f32.gmra.mrb[2].mxu1 %v18888_v55 }
  0xdf   :  { %670 = vmatmul.mubr.f32.gmra.mrb[4].mxu0 %v18927_v20  ;;  %18197 = vmatprep.mubr.f32.mxu1 %v18797_v29 }
  0xe0   :  { %675 = vmatprep.mubr.f32.mxu0 %v18664_v33 }
  0xe2   :  { %18198 = vmatmul.mubr.f32.vlgmr.msra.gmra.mrb[0].mxu1 %v18871_v36 }
  0xe3   :  { %678 = vmatmul.mubr.f32.gmra.mrb[6].mxu0 %v18930_v21  ;;  %18200 = vmatprep.mubr.f32.mxu1 %v18886_v54 }
  0xe4   :  { %756 = vmatprep.mubr.f32.mxu0 %v18664_v33 }
  0xe6   :  { %18201 = vmatmul.mubr.f32.gmra.mrb[2].mxu1 %v18888_v55 }
  0xe7   :  { %760 = vmatmul.mubr.f32.vlgmr.msra.gmra.mrb[0].mxu0 %v18805_v31  ;;  %9107 = vmatprep.mubr.f32.mxu1 %v18664_v33  ;;  %v18665_v31 = vmov 1966171168  }
  0xe8   :  { %18322 = vmatpush1.bf16.msra.mxu0 %v18321_v30  ;;  %765 = vmatprep.mubr.f32.mxu0 %v18664_v33 }
  0xe9   :  { %18324 = vmatprep.subr.bf16.mxu0 %v18323_v48 }
  0xeb   :  { %769 = vmatmul.mubr.f32.gmra.mrb[2].mxu0 %v18922_v17 }
  0xec   :  { %18326 = vmatpush1.bf16.msra.mxu0 %v18325_v0  ;;  %774 = vmatprep.mubr.f32.mxu0 %v18664_v33 }
  0xed   :  { %18328 = vmatprep.subr.bf16.mxu0 %v18898_v2  ;;  %v1672_v2 = vunpack.c.l.s4 %v18665_v31 }
  0xef   :  { %778 = vmatmul.mubr.f32.gmra.mrb[4].mxu0 %v18960_v39  ;;  %v1673_v3 = vunpack.c.0.s8 %v1672_v2 }
  0xf0   :  { %783 = vmatprep.mubr.f32.mxu0 %v18664_v33 }
  0xf3   :  { %787 = vmatmul.mubr.f32.gmra.mrb[6].mxu0 %v18963_v40 }
  0xf4   :  { %881 = vmatprep.mubr.f32.mxu0 %v18664_v33 }
  0xf7   :  { %883 = vmatmul.mubr.f32.vlgmr.msra.gmra.mrb[0].mxu0 %v18797_v29 }
  0xf8   :  { %18330 = vmatpush1.bf16.msra.mxu0 %v18904_v5  ;;  %888 = vmatprep.mubr.f32.mxu0 %v18664_v33  ;;  %v19144_v5 = vshrl.u32 %v27004_v4, 7 }
  0xf9   :  { %18332 = vmatprep.subr.bf16.mxu0 %v18982_v23 }
  0xfa   :  { %v19158_v18 = vsub.s32 0, %v19144_v5 }
  0xfb   :  { %890 = vmatmul.mubr.f32.gmra.mrb[2].mxu0 %v18871_v36 }
  0xfc   :  { %18334 = vmatpush1.bf16.msra.mxu0 %v18995_v43  ;;  %895 = vmatprep.mubr.f32.mxu0 %v18664_v33 }
  0xff   :  { %897 = vmatmul.mubr.f32.gmra.mrb[4].mxu0 %v18886_v54 }
 0x100   :  { %902 = vmatprep.mubr.f32.mxu0 %v18664_v33 }
 0x103   :  { %904 = vmatmul.mubr.f32.gmra.mrb[6].mxu0 %v18888_v55 }
 0x104   :  { %982 = vmatprep.mubr.f32.mxu0 %v18664_v33 }
 0x107   :  { %984 = vmatmul.mubr.f32.vlgmr.msra.gmra.mrb[0].mxu0 %v18797_v29  ;;  %v19147_v29 = vsub.s32 %v1673_v3, %v19144_v5 }
 0x108   :  { %989 = vmatprep.mubr.f32.mxu0 %v18664_v33 }
 0x10b   :  { %991 = vmatmul.mubr.f32.gmra.mrb[2].mxu0 %v18871_v36 }
 0x10c   :  { %996 = vmatprep.mubr.f32.mxu0 %v18664_v33 }
 0x10f   :  { %998 = vmatmul.mubr.f32.gmra.mrb[4].mxu0 %v18886_v54 }
 0x110   :  { %1003 = vmatprep.mubr.f32.mxu0 %v18664_v33 }
 0x113   :  { %1005 = vmatmul.mubr.f32.gmra.mrb[6].mxu0 %v18888_v55 }
 0x1da   :  { %v985_v9 = vpop.f32.mrb[0].mxu0 }
 0x1db   :  { %v19149_v16 = vclamps-f32 %v985_v9, 3.0  ;;  %v987_v36 = vpop.f32.mrb[1].mxu0 }
 0x1dc   :  { %v19151_v17 = vclamps-f32 %v987_v36, 3.0 }
 0x1dd   :  { %v1670_v54 = vcombine.high %v19149_v16, %v19149_v16  ;;  %v1677_v55 = vrot.slane %v19149_v16, %v19147_v29 }
 0x1de   :  { %1650 = vst [vmem:[#allocation3 + $0x8] sm:$0xff] %v19151_v17  ;;  %v992_v19 = vpop.f32.mrb[2].mxu0  ;;  %v4151_v20 = vcombine.low %v19149_v16, %v19151_v17  ;;  %v4152_v21 = vcombine.high %v19149_v16, %v19151_v17 }
 0x1df   :  { %v1684_v24 = vrot.slane %v1670_v54, %v19147_v29  ;;  %v1685_v25 = vcombine.high %v1677_v55, %v1677_v55  ;;  %v1693_v26 = vrot.slane %v1677_v55, %v19147_v29  ;;  %v19167_v39 = vclamps-f32 %v992_v19, 3.0  ;;  %v994_v40 = vpop.f32.mrb[3].mxu0 }
 0x1e0   :  { %v19169_v41 = vclamps-f32 %v994_v40, 3.0  ;;  %v4159_v55 = vrot.slane %v4151_v20, %v19147_v29 }
 0x1e1   :  { %v1686_v13 = vcombine.high %v1684_v24, %v1684_v24  ;;  %v19172_v22 = vrot.slane %v1684_v24, %v19147_v29  ;;  %v1707_v23 = vrot.slane %v1685_v25, %v19147_v29  ;;  %v19175_v27 = vcombine.high %v1693_v26, %v1693_v26  ;;  %1895 = vst.msk [vmem:[%s26963_s2] sm:$0x1] %vm1894_vm12, %v1693_v26 }
 0x1e2   :  { %v1719_v32 = vcombine.high %v19167_v39, %v19167_v39  ;;  %v1726_v35 = vrot.slane %v19167_v39, %v19147_v29  ;;  %1653 = vst [vmem:[#allocation3 + $0x20] sm:$0xff] %v19169_v41  ;;  %v999_v37 = vpop.f32.mrb[4].mxu0  ;;  %v19187_v38 = vrot.slane %v1693_v26, %v19158_v18  ;;  %v19400_v26 = vsub.s32 1, %v19144_v5 }
 0x1e3   :  { %v19190_v42 = vrot.slane %v1686_v13, %v19147_v29  ;;  %v19194_v43 = vcombine.high %v19172_v22, %v19172_v22  ;;  %v19196_v46 = vcombine.high %v1707_v23, %v1707_v23  ;;  %1896 = vst.msk [vmem:[%s26963_s2 + $0x10] sm:$0x1] %vm1894_vm12, %v1707_v23  ;;  %1897 = vst.msk [vmem:[%s26963_s2 + $0x20] sm:$0x1] %vm1894_vm12, %v19175_v27  ;;  %v17500_v47 = vclamps-f32 %v999_v37, 3.0  ;;  %v1001_v49 = vpop.f32.mrb[5].mxu0 }
 0x1e4   :  { %1899 = vst.msk [vmem:[%s26963_s2 + $0x40] sm:$0x1] %vm1894_vm12, %v19172_v22  ;;  %v1733_v59 = vrot.slane %v1719_v32, %v19147_v29  ;;  %v1734_v50 = vcombine.high %v1726_v35, %v1726_v35  ;;  %v19214_v63 = vrot.slane %v1726_v35, %v19147_v29  ;;  %v17501_v6 = vclamps-f32 %v1001_v49, 3.0  ;;  %2247 = vrot.lane.b32.xlu0 %v19187_v38, %s18645_s26 }
 0x1e5   :  { %v19220_v7 = vcombine.high %v19190_v42, %v19190_v42  ;;  %1898 = vst.msk [vmem:[%s26963_s2 + $0x30] sm:$0x1] %vm1894_vm12, %v19196_v46  ;;  %1900 = vst.msk [vmem:[%s26963_s2 + $0x50] sm:$0x1] %vm1894_vm12, %v19190_v42  ;;  %v1768_v14 = vcombine.high %v17500_v47, %v17500_v47  ;;  %v1775_v61 = vrot.slane %v17500_v47, %v19147_v29 }
 0x1e6   :  { %1901 = vst.msk [vmem:[%s26963_s2 + $0x60] sm:$0x1] %vm1894_vm12, %v19194_v43  ;;  %1655 = vst [vmem:[#allocation3 + $0x30] sm:$0xff] %v17500_v47  ;;  %v19239_v15 = vrot.slane %v1707_v23, %v19158_v18  ;;  %v1735_v28 = vcombine.high %v1733_v59, %v1733_v59  ;;  %v19242_v12 = vrot.slane %v1733_v59, %v19147_v29  ;;  %v1006_v58 = vpop.f32.mrb[6].mxu0 }
 0x1e7   :  { %v19245_v52 = vrot.slane %v1734_v50, %v19147_v29  ;;  %v19249_v57 = vcombine.high %v19214_v63, %v19214_v63  ;;  %1903 = vst.msk [vmem:[%s26963_s2 + $0x80] sm:$0x1] %vm1894_vm12, %v19214_v63  ;;  %1656 = vst [vmem:[#allocation3 + $0x38] sm:$0xff] %v17501_v6  ;;  %v1782_v51 = vrot.slane %v1768_v14, %v19147_v29  ;;  %v17503_v56 = vclamps-f32 %v1006_v58, 3.0  ;;  %v1008_v8 = vpop.f32.mrb[7].mxu0 }
 0x1e8   :  { %1902 = vst.msk [vmem:[%s26963_s2 + $0x70] sm:$0x1] %vm1894_vm12, %v19220_v7  ;;  %v1783_v60 = vcombine.high %v1775_v61, %v1775_v61  ;;  %v19263_v34 = vrot.slane %v1775_v61, %v19147_v29  ;;  %2249 = vrot.lane.b32.xlu1 %v19239_v15, %s18645_s26  ;;  %v19268_v45 = vrot.slane %v1735_v28, %v19147_v29  ;;  %1907 = vst.msk [vmem:[%s26963_s2 + $0xc0] sm:$0x1] %vm1894_vm12, %v19242_v12 }
 0x1e9   :  { %v19272_v53 = vcombine.high %v19242_v12, %v19242_v12  ;;  %v19276_v62 = vcombine.high %v19245_v52, %v19245_v52  ;;  %1904 = vst.msk [vmem:[%s26963_s2 + $0x90] sm:$0x1] %vm1894_vm12, %v19245_v52  ;;  %1905 = vst.msk [vmem:[%s26963_s2 + $0xa0] sm:$0x1] %vm1894_vm12, %v19249_v57  ;;  %v17504_v44 = vclamps-f32 %v1008_v8, 3.0  ;;  %2689 = vrot.lane.b32.xlu0 %v19187_v38, %s18648_s9 }
 0x1ea   :  { %v1784_v1 = vcombine.high %v1782_v51, %v1782_v51  ;;  %v19296_v10 = vrot.slane %v1782_v51, %v19147_v29  ;;  %v19299_v30 = vrot.slane %v1783_v60, %v19147_v29  ;;  %v19303_v48 = vcombine.high %v19263_v34, %v19263_v34  ;;  %1911 = vst.msk [vmem:[%s26963_s2 + $0x100] sm:$0x1] %vm1894_vm12, %v19263_v34 }
 0x1eb   :  { %1658 = vst [vmem:[#allocation3 + $0x48] sm:$0x3f] %v17503_v56  ;;  %v19312_v0 = vcombine.high %v19268_v45, %v19268_v45  ;;  %1906 = vst.msk [vmem:[%s26963_s2 + $0xb0] sm:$0x1] %vm1894_vm12, %v19276_v62  ;;  %v2138_v5 = vrot.slane %v19175_v27, %v19158_v18  ;;  %v4175_v32 = vrot.slane %v4159_v55, %v19147_v29 }
 0x1ec   :  { %1908 = vst.msk [vmem:[%s26963_s2 + $0xd0] sm:$0x1] %vm1894_vm12, %v19268_v45  ;;  %1909 = vst.msk [vmem:[%s26963_s2 + $0xe0] sm:$0x1] %vm1894_vm12, %v19272_v53  ;;  %v19330_v31 = vrot.slane %v1784_v1, %v19147_v29  ;;  %v19334_v2 = vcombine.high %v19296_v10, %v19296_v10  ;;  %v19338_v3 = vcombine.high %v19299_v30, %v19299_v30  ;;  %2691 = vrot.lane.b32.xlu1 %v19239_v15, %s18648_s9 }
 0x1ed   :  { %1659 = vst [vmem:[#allocation3 + $0x50] sm:$0x3f] %v17504_v44  ;;  %1912 = vst.msk [vmem:[%s26963_s2 + $0x110] sm:$0x1] %vm1894_vm12, %v19299_v30  ;;  %3131 = vrot.lane.b32.xlu0 %v19187_v38, %s18655_s12  ;;  %v4166_v35 = vrot.slane %v4152_v21, %v19147_v29  ;;  %v4356_v16 = vrot.slane %v4175_v32, %v19400_v26  ;;  %v2146_v17 = vrot.slane %v19172_v22, %v19158_v18 }
 0x1ee   :  { %1913 = vst.msk [vmem:[%s26963_s2 + $0x120] sm:$0x1] %vm1894_vm12, %v19303_v48  ;;  %1915 = vst.msk [vmem:[%s26963_s2 + $0x140] sm:$0x1] %vm1894_vm12, %v19296_v10  ;;  %v19366_v4 = vcombine.high %v19330_v31, %v19330_v31  ;;  %v4201_v47 = vcombine.low %v19167_v39, %v19169_v41  ;;  %v2142_v49 = vrot.slane %v19196_v46, %v19158_v18 }
 0x1ef   :  { %1910 = vst.msk [vmem:[%s26963_s2 + $0xf0] sm:$0x1] %vm1894_vm12, %v19312_v0  ;;  %1914 = vst.msk [vmem:[%s26963_s2 + $0x130] sm:$0x1] %vm1894_vm12, %v19338_v3  ;;  %v4182_v21 = vrot.slane %v4166_v35, %v19147_v29  ;;  %v4202_v22 = vcombine.high %v19167_v39, %v19169_v41  ;;  %v2150_v59 = vrot.slane %v19190_v42, %v19158_v18 }
 0x1f0   :  { %1916 = vst.msk [vmem:[%s26963_s2 + $0x150] sm:$0x1] %vm1894_vm12, %v19330_v31  ;;  %1917 = vst.msk [vmem:[%s26963_s2 + $0x160] sm:$0x1] %vm1894_vm12, %v19334_v2  ;;  %3133 = vrot.lane.b32.xlu1 %v19239_v15, %s18655_s12  ;;  %v4352_v42 = vrot.slane %v4175_v32, %v19158_v18  ;;  %v4167_v50 = vcombine.high %v4159_v55, %v4159_v55  ;;  %v2154_v6 = vrot.slane %v19194_v43, %v19158_v18 }
 0x1f1   :  { %1918 = vst.msk [vmem:[%s26963_s2 + $0x170] sm:$0x1] %vm1894_vm12, %v19366_v4  ;;  %3573 = vrot.lane.b32.xlu0 %v19187_v38, %s18658_s7  ;;  %v4388_v27 = vrot.slane %v4182_v21, %v19400_v26  ;;  %v4384_v46 = vrot.slane %v4182_v21, %v19158_v18  ;;  %v4197_v28 = vcombine.high %v4175_v32, %v4175_v32 }
 0x1f2   :  { %v1665_v9 = vld [vmem:[#allocation3 + $0x48] sm:$0x3f]  ;;  %v4189_v14 = vrot.slane %v4167_v50, %v19147_v29  ;;  %v4168_v58 = vcombine.high %v4166_v35, %v4166_v35  ;;  %v4198_v56 = vcombine.high %v4182_v21, %v4182_v21  ;;  %v2158_v8 = vrot.slane %v19220_v7, %v19158_v18 }
 0x1f3   :  { %v1817_v36 = vcombine.high %v1665_v9, %v1665_v9  ;;  %v1824_v54 = vrot.slane %v1665_v9, %v19147_v29  ;;  %v4372_v51 = vrot.slane %v4197_v28, %v19400_v26  ;;  %v2166_v44 = vrot.slane %v19245_v52, %v19158_v18 }
 0x1f4   :  { %3575 = vrot.lane.b32.xlu1 %v19239_v15, %s18658_s7  ;;  %v4364_v61 = vrot.slane %v4189_v14, %v19400_v26  ;;  %v4196_v43 = vrot.slane %v4168_v58, %v19147_v29  ;;  %v4360_v7 = vrot.slane %v4189_v14, %v19158_v18  ;;  %v4368_v52 = vrot.slane %v4197_v28, %v19158_v18 }
 0x1f5   :  { %v1831_v19 = vrot.slane %v1817_v36, %v19147_v29  ;;  %v1832_v24 = vcombine.high %v1824_v54, %v1824_v54  ;;  %v1840_v25 = vrot.slane %v1824_v54, %v19147_v29  ;;  %4015 = vrot.lane.b32.xlu0 %v19187_v38, %s18666_s5  ;;  %v4400_v55 = vrot.slane %v4198_v56, %v19158_v18 }
 0x1f6   :  { %v4396_v60 = vrot.slane %v4196_v43, %v19400_v26  ;;  %v4392_v9 = vrot.slane %v4196_v43, %v19158_v18  ;;  %v19562_v32 = vrot.slane %v4201_v47, %v19147_v29 }
 0x1f7   :  { %v1833_v40 = vcombine.high %v1831_v19, %v1831_v19  ;;  %v1847_v13 = vrot.slane %v1831_v19, %v19147_v29  ;;  %v1854_v20 = vrot.slane %v1832_v24, %v19147_v29  ;;  %v1862_v23 = vcombine.high %v1840_v25, %v1840_v25  ;;  %1919 = vst.msk [vmem:[%s26963_s2 + $0x180] sm:$0x1] %vm1894_vm12, %v1840_v25 }
 0x1f8   :  { %4017 = vrot.lane.b32.xlu1 %v19239_v15, %s18666_s5  ;;  %v2162_v15 = vrot.slane %v19214_v63, %v19158_v18  ;;  %v4404_v63 = vrot.slane %v4198_v56, %v19400_v26  ;;  %v2170_v25 = vrot.slane %v19249_v57, %v19158_v18 }
 0x1f9   :  { %v1861_v37 = vrot.slane %v1833_v40, %v19147_v29  ;;  %v1863_v38 = vcombine.high %v1854_v20, %v1854_v20  ;;  %1920 = vst.msk [vmem:[%s26963_s2 + $0x190] sm:$0x1] %vm1894_vm12, %v1854_v20  ;;  %1921 = vst.msk [vmem:[%s26963_s2 + $0x1a0] sm:$0x1] %vm1894_vm12, %v1862_v23  ;;  %2251 = vrot.lane.b32.xlu0 %v2138_v5, %s18645_s26  ;;  %v19540_v40 = vcombine.high %v4189_v14, %v4189_v14 }
 0x1fa   :  { %1923 = vst.msk [vmem:[%s26963_s2 + $0x1c0] sm:$0x1] %vm1894_vm12, %v1847_v13  ;;  %v2178_v23 = vrot.slane %v19242_v12, %v19158_v18 }
 0x1fb   :  { %1922 = vst.msk [vmem:[%s26963_s2 + $0x1b0] sm:$0x1] %vm1894_vm12, %v1863_v38  ;;  %1924 = vst.msk [vmem:[%s26963_s2 + $0x1d0] sm:$0x1] %vm1894_vm12, %v1861_v37  ;;  %v4380_v57 = vrot.slane %v19540_v40, %v19400_v26  ;;  %v19578_v38 = vrot.slane %v19562_v32, %v19147_v29 }
 0x1fc   :  { %4591 = vrot.lane.b32.xlu1 %v4356_v16, %s26983_s16  ;;  %v19584_v16 = vrot.slane %v4202_v22, %v19147_v29 }
 0x1fd   :  { %2255 = vrot.lane.b32.xlu0 %v2146_v17, %s18645_s26  ;;  %v4420_v39 = vrot.slane %v19578_v38, %v19400_v26 }
 0x1fe   :  { %v19600_v41 = vrot.slane %v19584_v16, %v19147_v29 }
 0x200   :  { %4607 = vrot.lane.b32.xlu1 %v4388_v27, %s26983_s16 }
 0x201   :  { %2693 = vrot.lane.b32.xlu0 %v2138_v5, %s18648_s9 }
 0x204   :  { %2253 = vrot.lane.b32.xlu1 %v2142_v49, %s18645_s26 }
 0x205   :  { %2697 = vrot.lane.b32.xlu0 %v2146_v17, %s18648_s9 }
 0x208   :  { %2257 = vrot.lane.b32.xlu1 %v2150_v59, %s18645_s26 }
 0x209   :  { %3135 = vrot.lane.b32.xlu0 %v2138_v5, %s18655_s12 }
 0x20c   :  { %2695 = vrot.lane.b32.xlu1 %v2142_v49, %s18648_s9 }
 0x20d   :  { %3139 = vrot.lane.b32.xlu0 %v2146_v17, %s18655_s12 }
 0x210   :  { %2699 = vrot.lane.b32.xlu1 %v2150_v59, %s18648_s9 }
 0x211   :  { %3577 = vrot.lane.b32.xlu0 %v2138_v5, %s18658_s7 }
 0x214   :  { %3137 = vrot.lane.b32.xlu1 %v2142_v49, %s18655_s12 }
 0x215   :  { %3581 = vrot.lane.b32.xlu0 %v2146_v17, %s18658_s7 }
 0x218   :  { %3141 = vrot.lane.b32.xlu1 %v2150_v59, %s18655_s12 }
 0x219   :  { %4019 = vrot.lane.b32.xlu0 %v2138_v5, %s18666_s5  ;;  %v19556_v5 = vcombine.high %v4196_v43, %v4196_v43  ;;  %v4376_v43 = vrot.slane %v19540_v40, %v19158_v18 }
 0x21b   :  { %v4412_v37 = vrot.slane %v19556_v5, %v19400_v26 }
 0x21c   :  { %3579 = vrot.lane.b32.xlu1 %v2142_v49, %s18658_s7 }
 0x21d   :  { %4023 = vrot.lane.b32.xlu0 %v2146_v17, %s18666_s5 }
 0x220   :  { %3583 = vrot.lane.b32.xlu1 %v2150_v59, %s18658_s7 }
 0x221   :  { %4589 = vrot.lane.b32.xlu0 %v4352_v42, %s26983_s16  ;;  %v2174_v42 = vrot.slane %v19276_v62, %v19158_v18 }
 0x224   :  { %4021 = vrot.lane.b32.xlu1 %v2142_v49, %s18666_s5  ;;  %v4452_v49 = vrot.slane %v19600_v41, %v19400_v26 }
 0x225   :  { %4605 = vrot.lane.b32.xlu0 %v4384_v46, %s26983_s16 }
 0x228   :  { %4025 = vrot.lane.b32.xlu1 %v2150_v59, %s18666_s5 }
 0x229   :  { %2259 = vrot.lane.b32.xlu0 %v2154_v6, %s18645_s26 }
 0x22c   :  { %4595 = vrot.lane.b32.xlu1 %v4364_v61, %s26983_s16 }
 0x22d   :  { %2263 = vrot.lane.b32.xlu0 %v2162_v15, %s18645_s26 }
 0x230   :  { %4599 = vrot.lane.b32.xlu1 %v4372_v51, %s26983_s16 }
 0x231   :  { %2701 = vrot.lane.b32.xlu0 %v2154_v6, %s18648_s9 }
 0x234   :  { %4611 = vrot.lane.b32.xlu1 %v4396_v60, %s26983_s16 }
 0x235   :  { %2705 = vrot.lane.b32.xlu0 %v2162_v15, %s18648_s9 }
 0x238   :  { %4615 = vrot.lane.b32.xlu1 %v4404_v63, %s26983_s16  ;;  %v4408_v63 = vrot.slane %v19556_v5, %v19158_v18  ;;  %v19754_v5 = vcombine.high %v19578_v38, %v19578_v38 }
 0x239   :  { %3143 = vrot.lane.b32.xlu0 %v2154_v6, %s18655_s12 }
 0x23c   :  { %2261 = vrot.lane.b32.xlu1 %v2158_v8, %s18645_s26 }
 0x23d   :  { %3147 = vrot.lane.b32.xlu0 %v2162_v15, %s18655_s12 }
 0x240   :  { %2265 = vrot.lane.b32.xlu1 %v2166_v44, %s18645_s26 }
 0x241   :  { %3585 = vrot.lane.b32.xlu0 %v2154_v6, %s18658_s7 }
 0x244   :  { %2703 = vrot.lane.b32.xlu1 %v2158_v8, %s18648_s9 }
 0x245   :  { %3589 = vrot.lane.b32.xlu0 %v2162_v15, %s18658_s7 }
 0x248   :  { %2707 = vrot.lane.b32.xlu1 %v2166_v44, %s18648_s9 }
 0x249   :  { %4027 = vrot.lane.b32.xlu0 %v2154_v6, %s18666_s5  ;;  %v2182_v6 = vrot.slane %v19268_v45, %v19158_v18 }
 0x24c   :  { %3145 = vrot.lane.b32.xlu1 %v2158_v8, %s18655_s12 }
 0x24d   :  { %4031 = vrot.lane.b32.xlu0 %v2162_v15, %s18666_s5 }
 0x250   :  { %3149 = vrot.lane.b32.xlu1 %v2166_v44, %s18655_s12 }
 0x251   :  { %4593 = vrot.lane.b32.xlu0 %v4360_v7, %s26983_s16  ;;  %v4416_v7 = vrot.slane %v19578_v38, %v19158_v18 }
 0x254   :  { %3587 = vrot.lane.b32.xlu1 %v2158_v8, %s18658_s7 }
 0x255   :  { %4597 = vrot.lane.b32.xlu0 %v4368_v52, %s26983_s16  ;;  %v4217_v52 = vcombine.high %v19562_v32, %v19562_v32 }
 0x256   :  { %v2248_v1 = vpop.permute.xlu0 %2247 }
 0x257   :  { %2337 = vst.msk [vmem:[%s26963_s2 + $0x1] sm:$0x1] %vm1894_vm12, %v2248_v1 }
 0x258   :  { %3591 = vrot.lane.b32.xlu1 %v2166_v44, %s18658_s7 }
 0x259   :  { %4609 = vrot.lane.b32.xlu0 %v4392_v9, %s26983_s16 }
 0x25a   :  { %v2250_v36 = vpop.permute.xlu1 %2249 }
 0x25b   :  { %2338 = vst.msk [vmem:[%s26963_s2 + $0x11] sm:$0x1] %vm1894_vm12, %v2250_v36  ;;  %v2690_v54 = vpop.permute.xlu0 %2689  ;;  %v4448_v36 = vrot.slane %v19600_v41, %v19158_v18 }
 0x25c   :  { %2779 = vst.msk [vmem:[%s26963_s2 + $0x2] sm:$0x1] %vm1894_vm12, %v2690_v54  ;;  %4029 = vrot.lane.b32.xlu1 %v2158_v8, %s18666_s5 }
 0x25d   :  { %4613 = vrot.lane.b32.xlu0 %v4400_v55, %s26983_s16 }
 0x25e   :  { %v2692_v19 = vpop.permute.xlu1 %2691 }
 0x25f   :  { %v3132_v24 = vpop.permute.xlu0 %3131  ;;  %2780 = vst.msk [vmem:[%s26963_s2 + $0x12] sm:$0x1] %vm1894_vm12, %v2692_v19 }
 0x260   :  { %3221 = vst.msk [vmem:[%s26963_s2 + $0x3] sm:$0x1] %vm1894_vm12, %v3132_v24  ;;  %4033 = vrot.lane.b32.xlu1 %v2166_v44, %s18666_s5  ;;  %v19728_v24 = vrot.slane %v19272_v53, %v19158_v18  ;;  %v4218_v53 = vcombine.high %v19584_v16, %v19584_v16 }
 0x261   :  { %2267 = vrot.lane.b32.xlu0 %v2170_v25, %s18645_s26 }
 0x262   :  { %v3134_v13 = vpop.permute.xlu1 %3133 }
 0x263   :  { %v3574_v20 = vpop.permute.xlu0 %3573  ;;  %3222 = vst.msk [vmem:[%s26963_s2 + $0x13] sm:$0x1] %vm1894_vm12, %v3134_v13 }
 0x264   :  { %3663 = vst.msk [vmem:[%s26963_s2 + $0x4] sm:$0x1] %vm1894_vm12, %v3574_v20  ;;  %4603 = vrot.lane.b32.xlu1 %v4380_v57, %s26983_s16 }
 0x265   :  { %2271 = vrot.lane.b32.xlu0 %v2178_v23, %s18645_s26 }
 0x266   :  { %v3576_v12 = vpop.permute.xlu1 %3575 }
 0x267   :  { %v4016_v35 = vpop.permute.xlu0 %4015  ;;  %3664 = vst.msk [vmem:[%s26963_s2 + $0x14] sm:$0x1] %vm1894_vm12, %v3576_v12  ;;  %v4436_v12 = vrot.slane %v19754_v5, %v19400_v26 }
 0x268   :  { %4105 = vst.msk [vmem:[%s26963_s2 + $0x5] sm:$0x1] %vm1894_vm12, %v4016_v35  ;;  %4619 = vrot.lane.b32.xlu1 %v4412_v37, %s26983_s16  ;;  %v19771_v35 = vrot.slane %v4218_v53, %v19147_v29 }
 0x269   :  { %2709 = vrot.lane.b32.xlu0 %v2170_v25, %s18648_s9 }
 0x26a   :  { %v4018_v17 = vpop.permute.xlu1 %4017  ;;  %v4460_v16 = vrot.slane %v19771_v35, %v19400_v26 }
 0x26b   :  { %v2252_v21 = vpop.permute.xlu0 %2251  ;;  %4106 = vst.msk [vmem:[%s26963_s2 + $0x15] sm:$0x1] %vm1894_vm12, %v4018_v17  ;;  %v19786_v17 = vcombine.high %v19600_v41, %v19600_v41  ;;  %v19802_v41 = vld [vmem:[#allocation3 + $0x30] sm:$0xff] }
 0x26c   :  { %2339 = vst.msk [vmem:[%s26963_s2 + $0x21] sm:$0x1] %vm1894_vm12, %v2252_v21  ;;  %4623 = vrot.lane.b32.xlu1 %v4420_v39, %s26983_s16 }
 0x26d   :  { %2713 = vrot.lane.b32.xlu0 %v2178_v23, %s18648_s9 }
 0x26e   :  { %v19612_v27 = vpop.permute.xlu1 %4591 }
 0x26f   :  { %v2256_v47 = vpop.permute.xlu0 %2255 }
 0x270   :  { %2341 = vst.msk [vmem:[%s26963_s2 + $0x41] sm:$0x1] %vm1894_vm12, %v2256_v47  ;;  %4639 = vrot.lane.b32.xlu1 %v4452_v49, %s26983_s16 }
 0x271   :  { %3151 = vrot.lane.b32.xlu0 %v2170_v25, %s18655_s12 }
 0x272   :  { %v19622_v22 = vpop.permute.xlu1 %4607 }
 0x273   :  { %v2694_v59 = vpop.permute.xlu0 %2693 }
 0x274   :  { %2781 = vst.msk [vmem:[%s26963_s2 + $0x22] sm:$0x1] %vm1894_vm12, %v2694_v59  ;;  %2269 = vrot.lane.b32.xlu1 %v2174_v42, %s18645_s26  ;;  %v3364_v59 = vrot.slane %v19802_v41, %v19147_v29 }
 0x275   :  { %3155 = vrot.lane.b32.xlu0 %v2178_v23, %s18655_s12 }
 0x276   :  { %v2254_v46 = vpop.permute.xlu1 %2253 }
 0x277   :  { %v2698_v50 = vpop.permute.xlu0 %2697  ;;  %2340 = vst.msk [vmem:[%s26963_s2 + $0x31] sm:$0x1] %vm1894_vm12, %v2254_v46 }
 0x278   :  { %2783 = vst.msk [vmem:[%s26963_s2 + $0x42] sm:$0x1] %vm1894_vm12, %v2698_v50  ;;  %2273 = vrot.lane.b32.xlu1 %v2182_v6, %s18645_s26 }
 0x279   :  { %3593 = vrot.lane.b32.xlu0 %v2170_v25, %s18658_s7 }
 0x27a   :  { %v2258_v62 = vpop.permute.xlu1 %2257 }
 0x27b   :  { %v3136_v14 = vpop.permute.xlu0 %3135  ;;  %2342 = vst.msk [vmem:[%s26963_s2 + $0x51] sm:$0x1] %vm1894_vm12, %v2258_v62 }
 0x27c   :  { %3223 = vst.msk [vmem:[%s26963_s2 + $0x23] sm:$0x1] %vm1894_vm12, %v3136_v14  ;;  %2711 = vrot.lane.b32.xlu1 %v2174_v42, %s18648_s9 }
 0x27d   :  { %3597 = vrot.lane.b32.xlu0 %v2178_v23, %s18658_s7 }
 0x27e   :  { %v2696_v45 = vpop.permute.xlu1 %2695 }
 0x27f   :  { %v3140_v61 = vpop.permute.xlu0 %3139  ;;  %2782 = vst.msk [vmem:[%s26963_s2 + $0x32] sm:$0x1] %vm1894_vm12, %v2696_v45 }
 0x280   :  { %3225 = vst.msk [vmem:[%s26963_s2 + $0x43] sm:$0x1] %vm1894_vm12, %v3140_v61  ;;  %2715 = vrot.lane.b32.xlu1 %v2182_v6, %s18648_s9 }
 0x281   :  { %4035 = vrot.lane.b32.xlu0 %v2170_v25, %s18666_s5  ;;  %v19731_v25 = vrot.slane %v4217_v52, %v19147_v29 }
 0x282   :  { %v2700_v15 = vpop.permute.xlu1 %2699 }
 0x283   :  { %v3578_v28 = vpop.permute.xlu0 %3577  ;;  %2784 = vst.msk [vmem:[%s26963_s2 + $0x52] sm:$0x1] %vm1894_vm12, %v2700_v15  ;;  %v4428_v57 = vrot.slane %v19731_v25, %v19400_v26 }
 0x284   :  { %3665 = vst.msk [vmem:[%s26963_s2 + $0x24] sm:$0x1] %vm1894_vm12, %v3578_v28  ;;  %3153 = vrot.lane.b32.xlu1 %v2174_v42, %s18655_s12 }
 0x285   :  { %4039 = vrot.lane.b32.xlu0 %v2178_v23, %s18666_s5  ;;  %v2194_v23 = vrot.slane %v19263_v34, %v19158_v18 }
 0x286   :  { %v3138_v58 = vpop.permute.xlu1 %3137 }
 0x287   :  { %v3582_v51 = vpop.permute.xlu0 %3581  ;;  %3224 = vst.msk [vmem:[%s26963_s2 + $0x33] sm:$0x1] %vm1894_vm12, %v3138_v58 }
 0x288   :  { %3667 = vst.msk [vmem:[%s26963_s2 + $0x44] sm:$0x1] %vm1894_vm12, %v3582_v51  ;;  %3157 = vrot.lane.b32.xlu1 %v2182_v6, %s18655_s12  ;;  %v4424_v51 = vrot.slane %v19731_v25, %v19158_v18 }
 0x289   :  { %4601 = vrot.lane.b32.xlu0 %v4376_v43, %s26983_s16  ;;  %v3372_v43 = vcombine.high %v3364_v59, %v3364_v59 }
 0x28a   :  { %v3142_v60 = vpop.permute.xlu1 %3141 }
 0x28b   :  { %v4020_v56 = vpop.permute.xlu0 %4019  ;;  %3226 = vst.msk [vmem:[%s26963_s2 + $0x53] sm:$0x1] %vm1894_vm12, %v3142_v60 }
 0x28c   :  { %4107 = vst.msk [vmem:[%s26963_s2 + $0x25] sm:$0x1] %vm1894_vm12, %v4020_v56  ;;  %3595 = vrot.lane.b32.xlu1 %v2174_v42, %s18658_s7 }
 0x28d   :  { %4617 = vrot.lane.b32.xlu0 %v4408_v63, %s26983_s16  ;;  %v4432_v63 = vrot.slane %v19754_v5, %v19158_v18 }
 0x28e   :  { %v3580_v8 = vpop.permute.xlu1 %3579 }
 0x28f   :  { %v4024_v44 = vpop.permute.xlu0 %4023  ;;  %3666 = vst.msk [vmem:[%s26963_s2 + $0x34] sm:$0x1] %vm1894_vm12, %v3580_v8  ;;  %v19888_v8 = vrot.slane %v3372_v43, %v19147_v29 }
 0x290   :  { %4109 = vst.msk [vmem:[%s26963_s2 + $0x45] sm:$0x1] %vm1894_vm12, %v4024_v44  ;;  %3599 = vrot.lane.b32.xlu1 %v2182_v6, %s18658_s7 }
 0x291   :  { %4621 = vrot.lane.b32.xlu0 %v4416_v7, %s26983_s16 }
 0x292   :  { %v3584_v1 = vpop.permute.xlu1 %3583 }
 0x293   :  { %v4590_v9 = vpop.permute.xlu0 %4589  ;;  %3668 = vst.msk [vmem:[%s26963_s2 + $0x54] sm:$0x1] %vm1894_vm12, %v3584_v1  ;;  %v3524_v1 = vrot.slane %v19888_v8, %v19158_v18 }
 0x294   :  { %v4710_v54 = vsel %vm26987_vm10, %v4590_v9, %v19612_v27  ;;  %4037 = vrot.lane.b32.xlu1 %v2174_v42, %s18666_s5  ;;  %v4468_v27 = vrot.slane %v19786_v17, %v19400_v26  ;;  %v2198_v42 = vrot.slane %v19299_v30, %v19158_v18  ;;  %v4456_v9 = vrot.slane %v19771_v35, %v19158_v18 }
 0x295   :  { %4770 = vst.msk [vmem:[%s26963_s2 + $0x6] sm:$0x1] %vm1894_vm12, %v4710_v54  ;;  %4637 = vrot.lane.b32.xlu0 %v4448_v36, %s26983_s16 }
 0x296   :  { %v4022_v55 = vpop.permute.xlu1 %4021 }
 0x297   :  { %v4606_v19 = vpop.permute.xlu0 %4605  ;;  %4108 = vst.msk [vmem:[%s26963_s2 + $0x35] sm:$0x1] %vm1894_vm12, %v4022_v55 }
 0x298   :  { %v4714_v40 = vsel %vm26987_vm10, %v4606_v19, %v19622_v22  ;;  %4041 = vrot.lane.b32.xlu1 %v2182_v6, %s18666_s5  ;;  %v19811_v22 = vrot.slane %v19312_v0, %v19158_v18  ;;  %v19825_v0 = vrot.slane %v3364_v59, %v19147_v29  ;;  %v4464_v19 = vrot.slane %v19786_v17, %v19158_v18 }
 0x299   :  { %4774 = vst.msk [vmem:[%s26963_s2 + $0x46] sm:$0x1] %vm1894_vm12, %v4714_v40  ;;  %2275 = vrot.lane.b32.xlu0 %v19728_v24, %s18645_s26  ;;  %v4140_v40 = vld [vmem:[#allocation3 + $0x38] sm:$0xff] }
 0x29a   :  { %v4026_v13 = vpop.permute.xlu1 %4025  ;;  %v3520_v62 = vrot.slane %v19825_v0, %v19158_v18 }
 0x29b   :  { %v2260_v20 = vpop.permute.xlu0 %2259  ;;  %4110 = vst.msk [vmem:[%s26963_s2 + $0x55] sm:$0x1] %vm1894_vm12, %v4026_v13 }
 0x29c   :  { %2343 = vst.msk [vmem:[%s26963_s2 + $0x61] sm:$0x1] %vm1894_vm12, %v2260_v20  ;;  %4627 = vrot.lane.b32.xlu1 %v4428_v57, %s26983_s16  ;;  %v2202_v20 = vrot.slane %v19303_v48, %v19158_v18  ;;  %v19938_v57 = vcombine.high %v19731_v25, %v19731_v25  ;;  %v19955_v48 = vcombine.high %v19771_v35, %v19771_v35 }
 0x29d   :  { %2279 = vrot.lane.b32.xlu0 %v2194_v23, %s18645_s26 }
 0x29e   :  { %v19766_v32 = vpop.permute.xlu1 %4595 }
 0x29f   :  { %v2264_v34 = vpop.permute.xlu0 %2263 }
 0x2a0   :  { %2345 = vst.msk [vmem:[%s26963_s2 + $0x81] sm:$0x1] %vm1894_vm12, %v2264_v34  ;;  %4631 = vrot.lane.b32.xlu1 %v4436_v12, %s26983_s16  ;;  %v4444_v34 = vrot.slane %v19938_v57, %v19400_v26  ;;  %v2210_v12 = vrot.slane %v19296_v10, %v19158_v18 }
 0x2a1   :  { %2717 = vrot.lane.b32.xlu0 %v19728_v24, %s18648_s9 }
 0x2a2   :  { %v19780_v37 = vpop.permute.xlu1 %4599 }
 0x2a3   :  { %v2702_v38 = vpop.permute.xlu0 %2701 }
 0x2a4   :  { %2785 = vst.msk [vmem:[%s26963_s2 + $0x62] sm:$0x1] %vm1894_vm12, %v2702_v38  ;;  %4643 = vrot.lane.b32.xlu1 %v4460_v16, %s26983_s16  ;;  %v4252_v38 = vcombine.high %v19802_v41, %v4140_v40  ;;  %v4476_v16 = vrot.slane %v19955_v48, %v19400_v26 }
 0x2a5   :  { %2721 = vrot.lane.b32.xlu0 %v2194_v23, %s18648_s9 }
 0x2a6   :  { %v19794_v21 = vpop.permute.xlu1 %4611 }
 0x2a7   :  { %v2706_v39 = vpop.permute.xlu0 %2705 }
 0x2a8   :  { %2787 = vst.msk [vmem:[%s26963_s2 + $0x82] sm:$0x1] %vm1894_vm12, %v2706_v39  ;;  %4647 = vrot.lane.b32.xlu1 %v4468_v27, %s26983_s16 }
 0x2a9   :  { %3159 = vrot.lane.b32.xlu0 %v19728_v24, %s18655_s12 }
 0x2aa   :  { %v19807_v47 = vpop.permute.xlu1 %4615 }
 0x2ab   :  { %v3144_v49 = vpop.permute.xlu0 %3143 }
 0x2ac   :  { %3227 = vst.msk [vmem:[%s26963_s2 + $0x63] sm:$0x1] %vm1894_vm12, %v3144_v49  ;;  %2277 = vrot.lane.b32.xlu1 %v19811_v22, %s18645_s26 }
 0x2ad   :  { %3163 = vrot.lane.b32.xlu0 %v2194_v23, %s18655_s12  ;;  %v4251_v23 = vcombine.low %v19802_v41, %v4140_v40 }
 0x2ae   :  { %v2262_v46 = vpop.permute.xlu1 %2261 }
 0x2af   :  { %v3148_v50 = vpop.permute.xlu0 %3147  ;;  %2344 = vst.msk [vmem:[%s26963_s2 + $0x71] sm:$0x1] %vm1894_vm12, %v2262_v46  ;;  %v3357_v46 = vcombine.high %v19802_v41, %v19802_v41 }
 0x2b0   :  { %3229 = vst.msk [vmem:[%s26963_s2 + $0x83] sm:$0x1] %vm1894_vm12, %v3148_v50  ;;  %2281 = vrot.lane.b32.xlu1 %v2198_v42, %s18645_s26 }
 0x2b1   :  { %3601 = vrot.lane.b32.xlu0 %v19728_v24, %s18658_s7  ;;  %v3371_v41 = vrot.slane %v3357_v46, %v19147_v29 }
 0x2b2   :  { %v2266_v30 = vpop.permute.xlu1 %2265 }
 0x2b3   :  { %v3586_v6 = vpop.permute.xlu0 %3585  ;;  %2346 = vst.msk [vmem:[%s26963_s2 + $0x91] sm:$0x1] %vm1894_vm12, %v2266_v30 }
 0x2b4   :  { %3669 = vst.msk [vmem:[%s26963_s2 + $0x64] sm:$0x1] %vm1894_vm12, %v3586_v6  ;;  %2719 = vrot.lane.b32.xlu1 %v19811_v22, %s18648_s9  ;;  %v2206_v6 = vrot.slane %v19338_v3, %v19158_v18 }
 0x2b5   :  { %3605 = vrot.lane.b32.xlu0 %v3520_v62, %s18658_s7 }
 0x2b6   :  { %v2704_v14 = vpop.permute.xlu1 %2703 }
 0x2b7   :  { %v3590_v45 = vpop.permute.xlu0 %3589  ;;  %2786 = vst.msk [vmem:[%s26963_s2 + $0x72] sm:$0x1] %vm1894_vm12, %v2704_v14 }
 0x2b8   :  { %3671 = vst.msk [vmem:[%s26963_s2 + $0x84] sm:$0x1] %vm1894_vm12, %v3590_v45  ;;  %2723 = vrot.lane.b32.xlu1 %v2198_v42, %s18648_s9 }
 0x2b9   :  { %4043 = vrot.lane.b32.xlu0 %v19728_v24, %s18666_s5 }
 0x2ba   :  { %v2708_v61 = vpop.permute.xlu1 %2707 }
 0x2bb   :  { %v4028_v15 = vpop.permute.xlu0 %4027  ;;  %2788 = vst.msk [vmem:[%s26963_s2 + $0x92] sm:$0x1] %vm1894_vm12, %v2708_v61  ;;  %v2214_v61 = vrot.slane %v19330_v31, %v19158_v18 }
 0x2bc   :  { %4111 = vst.msk [vmem:[%s26963_s2 + $0x65] sm:$0x1] %vm1894_vm12, %v4028_v15  ;;  %3161 = vrot.lane.b32.xlu1 %v19811_v22, %s18655_s12 }
 0x2bd   :  { %4047 = vrot.lane.b32.xlu0 %v3520_v62, %s18666_s5  ;;  %v3402_v62 = vcombine.high %v19825_v0, %v19825_v0  ;;  %v20035_v0 = vrot.slane %v3371_v41, %v19147_v29 }
 0x2be   :  { %v3146_v28 = vpop.permute.xlu1 %3145 }
 0x2bf   :  { %v4032_v58 = vpop.permute.xlu0 %4031  ;;  %3228 = vst.msk [vmem:[%s26963_s2 + $0x73] sm:$0x1] %vm1894_vm12, %v3146_v28  ;;  %v3528_v3 = vrot.slane %v3402_v62, %v19158_v18  ;;  %v3536_v28 = vrot.slane %v20035_v0, %v19158_v18 }
 0x2c0   :  { %4113 = vst.msk [vmem:[%s26963_s2 + $0x85] sm:$0x1] %vm1894_vm12, %v4032_v58  ;;  %3165 = vrot.lane.b32.xlu1 %v2198_v42, %s18655_s12 }
 0x2c1   :  { %4625 = vrot.lane.b32.xlu0 %v4424_v51, %s26983_s16 }
 0x2c2   :  { %v3150_v60 = vpop.permute.xlu1 %3149 }
 0x2c3   :  { %v4594_v56 = vpop.permute.xlu0 %4593  ;;  %3230 = vst.msk [vmem:[%s26963_s2 + $0x93] sm:$0x1] %vm1894_vm12, %v3150_v60 }
 0x2c4   :  { %v4711_v44 = vsel %vm26987_vm10, %v4594_v56, %v19766_v32  ;;  %3603 = vrot.lane.b32.xlu1 %v19811_v22, %s18658_s7 }
 0x2c5   :  { %4771 = vst.msk [vmem:[%s26963_s2 + $0x16] sm:$0x1] %vm1894_vm12, %v4711_v44  ;;  %4629 = vrot.lane.b32.xlu0 %v4432_v63, %s26983_s16  ;;  %v4440_v44 = vrot.slane %v19938_v57, %v19158_v18 }
 0x2c6   :  { %v3588_v7 = vpop.permute.xlu1 %3587 }
 0x2c7   :  { %v4598_v52 = vpop.permute.xlu0 %4597  ;;  %3670 = vst.msk [vmem:[%s26963_s2 + $0x74] sm:$0x1] %vm1894_vm12, %v3588_v7  ;;  %v3404_v7 = vcombine.high %v19888_v8, %v19888_v8  ;;  %v4472_v8 = vrot.slane %v19955_v48, %v19158_v18 }
 0x2c8   :  { %v4712_v36 = vsel %vm26987_vm10, %v4598_v52, %v19780_v37  ;;  %3607 = vrot.lane.b32.xlu1 %v3524_v1, %s18658_s7  ;;  %v19962_v37 = vrot.slane %v4251_v23, %v19147_v29  ;;  %v3373_v52 = vcombine.high %v3371_v41, %v3371_v41 }
 0x2c9   :  { %4772 = vst.msk [vmem:[%s26963_s2 + $0x26] sm:$0x1] %vm1894_vm12, %v4712_v36  ;;  %4641 = vrot.lane.b32.xlu0 %v4456_v9, %s26983_s16  ;;  %v3532_v36 = vrot.slane %v3404_v7, %v19158_v18 }
 0x2ca   :  { %v3592_v54 = vpop.permute.xlu1 %3591  ;;  %v19981_v17 = vrot.slane %v19962_v37, %v19147_v29  ;;  %v4267_v48 = vcombine.high %v19962_v37, %v19962_v37  ;;  %v2218_v37 = vrot.slane %v19334_v2, %v19158_v18 }
 0x2cb   :  { %v4610_v55 = vpop.permute.xlu0 %4609  ;;  %3672 = vst.msk [vmem:[%s26963_s2 + $0x94] sm:$0x1] %vm1894_vm12, %v3592_v54  ;;  %v20097_v54 = vrot.slane %v3373_v52, %v19147_v29 }
 0x2cc   :  { %v4715_v24 = vsel %vm26987_vm10, %v4610_v55, %v19794_v21  ;;  %4045 = vrot.lane.b32.xlu1 %v19811_v22, %s18666_s5  ;;  %v19984_v21 = vrot.slane %v4252_v38, %v19147_v29  ;;  %v20150_v38 = vrot.slane %v4267_v48, %v19147_v29  ;;  %v20171_v2 = vcombine.high %v19981_v17, %v19981_v17 }
 0x2cd   :  { %4775 = vst.msk [vmem:[%s26963_s2 + $0x56] sm:$0x1] %vm1894_vm12, %v4715_v24  ;;  %4645 = vrot.lane.b32.xlu0 %v4464_v19, %s26983_s16  ;;  %v3540_v40 = vrot.slane %v20097_v54, %v19158_v18 }
 0x2ce   :  { %v4030_v53 = vpop.permute.xlu1 %4029  ;;  %v19998_v49 = vrot.slane %v19984_v21, %v19147_v29  ;;  %v4500_v46 = vrot.slane %v20171_v2, %v19400_v26 }
 0x2cf   :  { %v4614_v13 = vpop.permute.xlu0 %4613  ;;  %4112 = vst.msk [vmem:[%s26963_s2 + $0x75] sm:$0x1] %vm1894_vm12, %v4030_v53  ;;  %v4480_v53 = vrot.slane %v19981_v17, %v19158_v18 }
 0x2d0   :  { %v4716_v5 = vsel %vm26987_vm10, %v4614_v13, %v19807_v47  ;;  %4049 = vrot.lane.b32.xlu1 %v3524_v1, %s18666_s5  ;;  %v4484_v47 = vrot.slane %v19981_v17, %v19400_v26  ;;  %v4516_v42 = vrot.slane %v19998_v49, %v19400_v26 }
 0x2d1   :  { %4776 = vst.msk [vmem:[%s26963_s2 + $0x66] sm:$0x1] %vm1894_vm12, %v4716_v5  ;;  %2283 = vrot.lane.b32.xlu0 %v2202_v20, %s18645_s26  ;;  %v4512_v5 = vrot.slane %v19998_v49, %v19158_v18 }
 0x2d2   :  { %v4034_v25 = vpop.permute.xlu1 %4033 }
 0x2d3   :  { %v2268_v32 = vpop.permute.xlu0 %2267  ;;  %4114 = vst.msk [vmem:[%s26963_s2 + $0x95] sm:$0x1] %vm1894_vm12, %v4034_v25 }
 0x2d4   :  { %2347 = vst.msk [vmem:[%s26963_s2 + $0xa1] sm:$0x1] %vm1894_vm12, %v2268_v32  ;;  %4635 = vrot.lane.b32.xlu1 %v4444_v34, %s26983_s16 }
 0x2d5   :  { %2287 = vrot.lane.b32.xlu0 %v2210_v12, %s18645_s26 }
 0x2d6   :  { %v19975_v10 = vpop.permute.xlu1 %4603 }
 0x2d7   :  { %v2272_v35 = vpop.permute.xlu0 %2271 }
 0x2d8   :  { %2349 = vst.msk [vmem:[%s26963_s2 + $0xc1] sm:$0x1] %vm1894_vm12, %v2272_v35  ;;  %4651 = vrot.lane.b32.xlu1 %v4476_v16, %s26983_s16  ;;  %v20161_v16 = vld [vmem:[#allocation3 + $0x48] sm:$0x3f] }
 0x2d9   :  { %2725 = vrot.lane.b32.xlu0 %v2202_v20, %s18648_s9 }
 0x2da   :  { %v19992_v39 = vpop.permute.xlu1 %4619 }
 0x2db   :  { %v2710_v27 = vpop.permute.xlu0 %2709 }
 0x2dc   :  { %2789 = vst.msk [vmem:[%s26963_s2 + $0xa2] sm:$0x1] %vm1894_vm12, %v2710_v27  ;;  %4655 = vrot.lane.b32.xlu1 %v4484_v47, %s26983_s16  ;;  %v4492_v47 = vrot.slane %v20150_v38, %v19400_v26 }
 0x2dd   :  { %2729 = vrot.lane.b32.xlu0 %v2210_v12, %s18648_s9 }
 0x2de   :  { %v20006_v22 = vpop.permute.xlu1 %4623 }
 0x2df   :  { %v2714_v59 = vpop.permute.xlu0 %2713 }
 0x2e0   :  { %2791 = vst.msk [vmem:[%s26963_s2 + $0xc2] sm:$0x1] %vm1894_vm12, %v2714_v59  ;;  %4671 = vrot.lane.b32.xlu1 %v4516_v42, %s26983_s16  ;;  %v4268_v59 = vcombine.high %v19984_v21, %v19984_v21  ;;  %v2529_v42 = vrot.slane %v20161_v16, %v19147_v29 }
 0x2e1   :  { %3167 = vrot.lane.b32.xlu0 %v2202_v20, %s18655_s12  ;;  %v20121_v20 = vld [vmem:[#allocation3 + $0x48] sm:$0x3f] }
 0x2e2   :  { %v20018_v50 = vpop.permute.xlu1 %4639  ;;  %v2087_v25 = vrot.slane %v20121_v20, %v19147_v29 }
 0x2e3   :  { %v3152_v30 = vpop.permute.xlu0 %3151 }
 0x2e4   :  { %3231 = vst.msk [vmem:[%s26963_s2 + $0xa3] sm:$0x1] %vm1894_vm12, %v3152_v30  ;;  %2285 = vrot.lane.b32.xlu1 %v2206_v6, %s18645_s26  ;;  %v20199_v30 = vrot.slane %v2529_v42, %v19147_v29 }
 0x2e5   :  { %3171 = vrot.lane.b32.xlu0 %v2210_v12, %s18655_s12 }
 0x2e6   :  { %v2270_v14 = vpop.permute.xlu1 %2269 }
 0x2e7   :  { %v3156_v45 = vpop.permute.xlu0 %3155  ;;  %2348 = vst.msk [vmem:[%s26963_s2 + $0xb1] sm:$0x1] %vm1894_vm12, %v2270_v14 }
 0x2e8   :  { %3233 = vst.msk [vmem:[%s26963_s2 + $0xc3] sm:$0x1] %vm1894_vm12, %v3156_v45  ;;  %2289 = vrot.lane.b32.xlu1 %v2214_v61, %s18645_s26  ;;  %v2668_v45 = vrot.slane %v20199_v30, %v19158_v18 }
 0x2e9   :  { %3609 = vrot.lane.b32.xlu0 %v3528_v3, %s18658_s7 }
 0x2ea   :  { %v2274_v31 = vpop.permute.xlu1 %2273 }
 0x2eb   :  { %v3594_v15 = vpop.permute.xlu0 %3593  ;;  %2350 = vst.msk [vmem:[%s26963_s2 + $0xd1] sm:$0x1] %vm1894_vm12, %v2274_v31 }
 0x2ec   :  { %3673 = vst.msk [vmem:[%s26963_s2 + $0xa4] sm:$0x1] %vm1894_vm12, %v3594_v15  ;;  %2727 = vrot.lane.b32.xlu1 %v2206_v6, %s18648_s9 }
 0x2ed   :  { %3613 = vrot.lane.b32.xlu0 %v3536_v28, %s18658_s7 }
 0x2ee   :  { %v2712_v58 = vpop.permute.xlu1 %2711 }
 0x2ef   :  { %v3598_v51 = vpop.permute.xlu0 %3597  ;;  %2790 = vst.msk [vmem:[%s26963_s2 + $0xb2] sm:$0x1] %vm1894_vm12, %v2712_v58  ;;  %v2095_v58 = vcombine.high %v2087_v25, %v2087_v25 }
 0x2f0   :  { %3675 = vst.msk [vmem:[%s26963_s2 + $0xc4] sm:$0x1] %vm1894_vm12, %v3598_v51  ;;  %2731 = vrot.lane.b32.xlu1 %v2214_v61, %s18648_s9  ;;  %v20238_v51 = vld [vmem:[#allocation3 + $0x48] sm:$0x3f] }
 0x2f1   :  { %4051 = vrot.lane.b32.xlu0 %v3528_v3, %s18666_s5  ;;  %v20251_v7 = vrot.slane %v2095_v58, %v19147_v29  ;;  %v3413_v52 = vrot.slane %v20238_v51, %v19147_v29 }
 0x2f2   :  { %v2716_v43 = vpop.permute.xlu1 %2715 }
 0x2f3   :  { %v4036_v60 = vpop.permute.xlu0 %4035  ;;  %2792 = vst.msk [vmem:[%s26963_s2 + $0xd2] sm:$0x1] %vm1894_vm12, %v2716_v43  ;;  %v3403_v43 = vcombine.high %v20035_v0, %v20035_v0 }
 0x2f4   :  { %4115 = vst.msk [vmem:[%s26963_s2 + $0xa5] sm:$0x1] %vm1894_vm12, %v4036_v60  ;;  %3169 = vrot.lane.b32.xlu1 %v2206_v6, %s18655_s12  ;;  %v20205_v6 = vld [vmem:[#allocation3 + $0x48] sm:$0x3f] }
 0x2f5   :  { %4055 = vrot.lane.b32.xlu0 %v3536_v28, %s18666_s5  ;;  %v2971_v3 = vrot.slane %v20205_v6, %v19147_v29 }
 0x2f6   :  { %v3154_v56 = vpop.permute.xlu1 %3153 }
 0x2f7   :  { %v4040_v63 = vpop.permute.xlu0 %4039  ;;  %3232 = vst.msk [vmem:[%s26963_s2 + $0xb3] sm:$0x1] %vm1894_vm12, %v3154_v56 }
 0x2f8   :  { %4117 = vst.msk [vmem:[%s26963_s2 + $0xc5] sm:$0x1] %vm1894_vm12, %v4040_v63  ;;  %3173 = vrot.lane.b32.xlu1 %v2214_v61, %s18655_s12  ;;  %v20217_v61 = vcombine.high %v19998_v49, %v19998_v49  ;;  %v20232_v49 = vrot.slane %v2971_v3, %v19147_v29  ;;  %v2222_v63 = vrot.slane %v19366_v4, %v19158_v18 }
 0x2f9   :  { %4633 = vrot.lane.b32.xlu0 %v4440_v44, %s26983_s16 }
 0x2fa   :  { %v3158_v1 = vpop.permute.xlu1 %3157  ;;  %v4532_v28 = vrot.slane %v20217_v61, %v19400_v26  ;;  %v3110_v44 = vrot.slane %v20232_v49, %v19158_v18 }
 0x2fb   :  { %v4602_v9 = vpop.permute.xlu0 %4601  ;;  %3234 = vst.msk [vmem:[%s26963_s2 + $0xd3] sm:$0x1] %vm1894_vm12, %v3158_v1  ;;  %v2230_v1 = vrot.slane %v20251_v7, %v19158_v18 }
 0x2fc   :  { %v4713_v55 = vsel %vm26987_vm10, %v4602_v9, %v19975_v10  ;;  %3611 = vrot.lane.b32.xlu1 %v3532_v36, %s18658_s7  ;;  %v20153_v10 = vrot.slane %v2087_v25, %v19147_v29  ;;  %v3544_v9 = vrot.slane %v3403_v43, %v19158_v18  ;;  %v2979_v25 = vcombine.high %v2971_v3, %v2971_v3 }
 0x2fd   :  { %4773 = vst.msk [vmem:[%s26963_s2 + $0x36] sm:$0x1] %vm1894_vm12, %v4713_v55  ;;  %4649 = vrot.lane.b32.xlu0 %v4472_v8, %s26983_s16  ;;  %v2537_v8 = vcombine.high %v2529_v42, %v2529_v42  ;;  %v20275_v55 = vld [vmem:[#allocation3 + $0x48] sm:$0x3f] }
 0x2fe   :  { %v3596_v19 = vpop.permute.xlu1 %3595 }
 0x2ff   :  { %v4618_v24 = vpop.permute.xlu0 %4617  ;;  %3674 = vst.msk [vmem:[%s26963_s2 + $0xb4] sm:$0x1] %vm1894_vm12, %v3596_v19 }
 0x300   :  { %v4717_v13 = vsel %vm26987_vm10, %v4618_v24, %v19992_v39  ;;  %3615 = vrot.lane.b32.xlu1 %v3540_v40, %s18658_s7 }
 0x301   :  { %4777 = vst.msk [vmem:[%s26963_s2 + $0x76] sm:$0x1] %vm1894_vm12, %v4717_v13  ;;  %4653 = vrot.lane.b32.xlu0 %v4480_v53, %s26983_s16  ;;  %v20282_v53 = vrot.slane %v2537_v8, %v19147_v29  ;;  %v3855_v13 = vrot.slane %v20275_v55, %v19147_v29  ;;  %v2522_v8 = vcombine.high %v20161_v16, %v20161_v16 }
 0x302   :  { %v3600_v57 = vpop.permute.xlu1 %3599 }
 0x303   :  { %v4622_v23 = vpop.permute.xlu0 %4621  ;;  %3676 = vst.msk [vmem:[%s26963_s2 + $0xd4] sm:$0x1] %vm1894_vm12, %v3600_v57  ;;  %v20299_v48 = vrot.slane %v3855_v13, %v19147_v29 }
 0x304   :  { %v4718_v32 = vsel %vm26987_vm10, %v4622_v23, %v20006_v22  ;;  %4053 = vrot.lane.b32.xlu1 %v3532_v36, %s18666_s5  ;;  %v2226_v22 = vrot.slane %v20153_v10, %v19158_v18  ;;  %v20265_v36 = vrot.slane %v3413_v52, %v19147_v29 }
 0x305   :  { %4778 = vst.msk [vmem:[%s26963_s2 + $0x86] sm:$0x1] %vm1894_vm12, %v4718_v32  ;;  %4669 = vrot.lane.b32.xlu0 %v4512_v5, %s26983_s16  ;;  %v2672_v5 = vrot.slane %v20282_v53, %v19158_v18 }
 0x306   :  { %v4038_v34 = vpop.permute.xlu1 %4037 }
 0x307   :  { %v4638_v12 = vpop.permute.xlu0 %4637  ;;  %4116 = vst.msk [vmem:[%s26963_s2 + $0xb5] sm:$0x1] %vm1894_vm12, %v4038_v34 }
 0x308   :  { %v4722_v35 = vsel %vm26987_vm10, %v4638_v12, %v20018_v50  ;;  %4057 = vrot.lane.b32.xlu1 %v3540_v40, %s18666_s5  ;;  %v20196_v50 = vrot.slane %v4268_v59, %v19147_v29  ;;  %v3552_v40 = vrot.slane %v20265_v36, %v19158_v18  ;;  %v3994_v12 = vrot.slane %v20299_v48, %v19158_v18 }
 0x309   :  { %4782 = vst.msk [vmem:[%s26963_s2 + $0xc6] sm:$0x1] %vm1894_vm12, %v4722_v35  ;;  %2291 = vrot.lane.b32.xlu0 %v2218_v37, %s18645_s26  ;;  %v3421_v59 = vcombine.high %v3413_v52, %v3413_v52 }
 0x30a   :  { %v4042_v39 = vpop.permute.xlu1 %4041  ;;  %v4524_v14 = vrot.slane %v20196_v50, %v19400_v26 }
 0x30b   :  { %v2276_v27 = vpop.permute.xlu0 %2275  ;;  %4118 = vst.msk [vmem:[%s26963_s2 + $0xd5] sm:$0x1] %vm1894_vm12, %v4042_v39 }
 0x30c   :  { %2351 = vst.msk [vmem:[%s26963_s2 + $0xe1] sm:$0x1] %vm1894_vm12, %v2276_v27  ;;  %4659 = vrot.lane.b32.xlu1 %v4492_v47, %s26983_s16  ;;  %v4488_v47 = vrot.slane %v20150_v38, %v19158_v18 }
 0x30d   :  { %2295 = vrot.lane.b32.xlu0 %v2226_v22, %s18645_s26  ;;  %v3405_v22 = vcombine.high %v20097_v54, %v20097_v54  ;;  %v4496_v54 = vrot.slane %v20171_v2, %v19158_v18 }
 0x30e   :  { %v20191_v17 = vpop.permute.xlu1 %4627 }
 0x30f   :  { %v2280_v21 = vpop.permute.xlu0 %2279 }
 0x310   :  { %2353 = vst.msk [vmem:[%s26963_s2 + $0x101] sm:$0x1] %vm1894_vm12, %v2280_v21  ;;  %4663 = vrot.lane.b32.xlu1 %v4500_v46, %s26983_s16  ;;  %v3548_v46 = vrot.slane %v3405_v22, %v19158_v18  ;;  %v3009_v22 = vcombine.high %v20232_v49, %v20232_v49 }
 0x311   :  { %2733 = vrot.lane.b32.xlu0 %v2218_v37, %s18648_s9 }
 0x312   :  { %v20209_v62 = vpop.permute.xlu1 %4631  ;;  %v3118_v49 = vrot.slane %v3009_v22, %v19158_v18 }
 0x313   :  { %v2718_v41 = vpop.permute.xlu0 %2717 }
 0x314   :  { %2793 = vst.msk [vmem:[%s26963_s2 + $0xe2] sm:$0x1] %vm1894_vm12, %v2718_v41  ;;  %4675 = vrot.lane.b32.xlu1 %v4524_v14, %s26983_s16  ;;  %v20346_v41 = vrot.slane %v3421_v59, %v19147_v29 }
 0x315   :  { %2737 = vrot.lane.b32.xlu0 %v2668_v45, %s18648_s9 }
 0x316   :  { %v20227_v31 = vpop.permute.xlu1 %4643  ;;  %v3556_v3 = vrot.slane %v20346_v41, %v19158_v18 }
 0x317   :  { %v2722_v15 = vpop.permute.xlu0 %2721 }
 0x318   :  { %2795 = vst.msk [vmem:[%s26963_s2 + $0x102] sm:$0x1] %vm1894_vm12, %v2722_v15  ;;  %4679 = vrot.lane.b32.xlu1 %v4532_v28, %s26983_s16  ;;  %v4520_v15 = vrot.slane %v20196_v50, %v19158_v18  ;;  %v3863_v28 = vcombine.high %v3855_v13, %v3855_v13 }
 0x319   :  { %3175 = vrot.lane.b32.xlu0 %v2218_v37, %s18655_s12  ;;  %v20314_v37 = vrot.slane %v2979_v25, %v19147_v29  ;;  %v20436_v25 = vrot.slane %v2522_v8, %v19147_v29 }
 0x31a   :  { %v20244_v60 = vpop.permute.xlu1 %4647 }
 0x31b   :  { %v3160_v56 = vpop.permute.xlu0 %3159  ;;  %v3114_v27 = vrot.slane %v20314_v37, %v19158_v18 }
 0x31c   :  { %3235 = vst.msk [vmem:[%s26963_s2 + $0xe3] sm:$0x1] %vm1894_vm12, %v3160_v56  ;;  %2293 = vrot.lane.b32.xlu1 %v2222_v63, %s18645_s26 }
 0x31d   :  { %3179 = vrot.lane.b32.xlu0 %v3110_v44, %s18655_s12 }
 0x31e   :  { %v2278_v0 = vpop.permute.xlu1 %2277 }
 0x31f   :  { %v3164_v4 = vpop.permute.xlu0 %3163  ;;  %2352 = vst.msk [vmem:[%s26963_s2 + $0xf1] sm:$0x1] %vm1894_vm12, %v2278_v0 }
 0x320   :  { %3237 = vst.msk [vmem:[%s26963_s2 + $0x103] sm:$0x1] %vm1894_vm12, %v3164_v4  ;;  %2297 = vrot.lane.b32.xlu1 %v2230_v1, %s18645_s26 }
 0x321   :  { %3617 = vrot.lane.b32.xlu0 %v3544_v9, %s18658_s7 }
 0x322   :  { %v2282_v19 = vpop.permute.xlu1 %2281 }
 0x323   :  { %v3602_v24 = vpop.permute.xlu0 %3601  ;;  %2354 = vst.msk [vmem:[%s26963_s2 + $0x111] sm:$0x1] %vm1894_vm12, %v2282_v19  ;;  %v4141_v19 = vld [vmem:[#allocation3 + $0x48] sm:$0x3f] }
 0x324   :  { %3677 = vst.msk [vmem:[%s26963_s2 + $0xe4] sm:$0x1] %vm1894_vm12, %v3602_v24  ;;  %2735 = vrot.lane.b32.xlu1 %v2222_v63, %s18648_s9  ;;  %v4142_v24 = vld [vmem:[#allocation3 + $0x50] sm:$0x3f] }
 0x325   :  { %3621 = vrot.lane.b32.xlu0 %v3552_v40, %s18658_s7  ;;  %v20427_v40 = vcombine.high %v20196_v50, %v20196_v50 }
 0x326   :  { %v2720_v57 = vpop.permute.xlu1 %2719 }
 0x327   :  { %v3606_v23 = vpop.permute.xlu0 %3605  ;;  %2794 = vst.msk [vmem:[%s26963_s2 + $0xf2] sm:$0x1] %vm1894_vm12, %v2720_v57  ;;  %v4540_v50 = vrot.slane %v20427_v40, %v19400_v26 }
 0x328   :  { %3679 = vst.msk [vmem:[%s26963_s2 + $0x104] sm:$0x1] %vm1894_vm12, %v3606_v23  ;;  %2739 = vrot.lane.b32.xlu1 %v2672_v5, %s18648_s9 }
 0x329   :  { %4059 = vrot.lane.b32.xlu0 %v3544_v9, %s18666_s5  ;;  %v18634_v9 = vld [vmem:[#allocation3 + $0x48] ss:$8 sps:$4 sm:$0xff]  }
 0x32a   :  { %v2724_v32 = vpop.permute.xlu1 %2723  ;;  %v20433_v5 = vrot.slane %v18634_v9, %v19147_v29 }
 0x32b   :  { %v4044_v34 = vpop.permute.xlu0 %4043  ;;  %2796 = vst.msk [vmem:[%s26963_s2 + $0x112] sm:$0x1] %vm1894_vm12, %v2724_v32  ;;  %v4302_v32 = vcombine.high %v4141_v19, %v4142_v24  ;;  %v3893_v19 = vcombine.high %v20299_v48, %v20299_v48 }
 0x32c   :  { %4119 = vst.msk [vmem:[%s26963_s2 + $0xe5] sm:$0x1] %vm1894_vm12, %v4044_v34  ;;  %3177 = vrot.lane.b32.xlu1 %v2222_v63, %s18655_s12  ;;  %v20381_v63 = vrot.slane %v3863_v28, %v19147_v29 }
 0x32d   :  { %4063 = vrot.lane.b32.xlu0 %v3994_v12, %s18666_s5 }
 0x32e   :  { %v3162_v35 = vpop.permute.xlu1 %3161  ;;  %v3998_v4 = vrot.slane %v20381_v63, %v19158_v18 }
 0x32f   :  { %v4048_v39 = vpop.permute.xlu0 %4047  ;;  %3236 = vst.msk [vmem:[%s26963_s2 + $0xf3] sm:$0x1] %vm1894_vm12, %v3162_v35  ;;  %v20455_v35 = vrot.slane %v20433_v5, %v19147_v29 }
 0x330   :  { %4121 = vst.msk [vmem:[%s26963_s2 + $0x105] sm:$0x1] %vm1894_vm12, %v4048_v39  ;;  %3181 = vrot.lane.b32.xlu1 %v3114_v27, %s18655_s12  ;;  %v2552_v39 = vrot.slane %v20436_v25, %v19147_v29  ;;  %v20460_v27 = vrot.slane %v4302_v32, %v19147_v29 }
 0x331   :  { %4657 = vrot.lane.b32.xlu0 %v4488_v47, %s26983_s16  ;;  %v2964_v47 = vcombine.high %v20205_v6, %v20205_v6 }
 0x332   :  { %v3166_v42 = vpop.permute.xlu1 %3165  ;;  %v2684_v6 = vrot.slane %v2552_v39, %v19158_v18 }
 0x333   :  { %v4626_v21 = vpop.permute.xlu0 %4625  ;;  %3238 = vst.msk [vmem:[%s26963_s2 + $0x113] sm:$0x1] %vm1894_vm12, %v3166_v42 }
 0x334   :  { %v4719_v14 = vsel %vm26987_vm10, %v4626_v21, %v20191_v17  ;;  %3619 = vrot.lane.b32.xlu1 %v3548_v46, %s18658_s7  ;;  %v2080_v17 = vcombine.high %v20121_v20, %v20121_v20  ;;  %v4528_v20 = vrot.slane %v20217_v61, %v19158_v18  ;;  %v4548_v21 = vrot.slane %v20455_v35, %v19400_v26 }
 0x335   :  { %4779 = vst.msk [vmem:[%s26963_s2 + $0x96] sm:$0x1] %vm1894_vm12, %v4719_v14  ;;  %4661 = vrot.lane.b32.xlu0 %v4496_v54, %s26983_s16  ;;  %v20482_v54 = vrot.slane %v2964_v47, %v19147_v29  ;;  %v2126_v14 = vcombine.high %v20251_v7, %v20251_v7  ;;  %v3451_v7 = vcombine.high %v20265_v36, %v20265_v36 }
 0x336   :  { %v3604_v2 = vpop.permute.xlu1 %3603  ;;  %v20386_v44 = vrot.slane %v2080_v17, %v19147_v29  ;;  %v3406_v17 = vcombine.high %v20238_v51, %v20238_v51 }
 0x337   :  { %v4630_v45 = vpop.permute.xlu0 %4629  ;;  %3678 = vst.msk [vmem:[%s26963_s2 + $0xf4] sm:$0x1] %vm1894_vm12, %v3604_v2  ;;  %v3560_v36 = vrot.slane %v3451_v7, %v19158_v18  ;;  %v4317_v7 = vcombine.high %v20433_v5, %v20433_v5 }
 0x338   :  { %v4720_v58 = vsel %vm26987_vm10, %v4630_v45, %v20209_v62  ;;  %3623 = vrot.lane.b32.xlu1 %v3556_v3, %s18658_s7  ;;  %v2125_v62 = vcombine.high %v20153_v10, %v20153_v10  ;;  %v20402_v10 = vcombine.high %v20150_v38, %v20150_v38  ;;  %v2110_v1 = vrot.slane %v20386_v44, %v19147_v29 }
 0x339   :  { %4780 = vst.msk [vmem:[%s26963_s2 + $0xa6] sm:$0x1] %vm1894_vm12, %v4720_v58  ;;  %4673 = vrot.lane.b32.xlu0 %v4520_v15, %s26983_s16  ;;  %v2994_v15 = vrot.slane %v20482_v54, %v19147_v29  ;;  %v2096_v28 = vcombine.high %v20386_v44, %v20386_v44  ;;  %v2568_v44 = vcombine.high %v20282_v53, %v20282_v53 }
 0x33a   :  { %v3608_v43 = vpop.permute.xlu1 %3607  ;;  %v4508_v16 = vrot.slane %v20402_v10, %v19400_v26  ;;  %v2242_v23 = vrot.slane %v2110_v1, %v19158_v18  ;;  %v3848_v1 = vcombine.high %v20275_v55, %v20275_v55 }
 0x33b   :  { %v4642_v56 = vpop.permute.xlu0 %4641  ;;  %3680 = vst.msk [vmem:[%s26963_s2 + $0x114] sm:$0x1] %vm1894_vm12, %v3608_v43  ;;  %v2124_v51 = vrot.slane %v2096_v28, %v19147_v29  ;;  %v2680_v53 = vrot.slane %v2568_v44, %v19158_v18 }
 0x33c   :  { %v4723_v52 = vsel %vm26987_vm10, %v4642_v56, %v20227_v31  ;;  %4061 = vrot.lane.b32.xlu1 %v3548_v46, %s18666_s5  ;;  %v2234_v31 = vrot.slane %v2125_v62, %v19158_v18  ;;  %v20479_v46 = vrot.slane %v20460_v27, %v19147_v29  ;;  %v2238_v56 = vrot.slane %v2126_v14, %v19158_v18 }
 0x33d   :  { %4783 = vst.msk [vmem:[%s26963_s2 + $0xd6] sm:$0x1] %vm1894_vm12, %v4723_v52  ;;  %4677 = vrot.lane.b32.xlu0 %v4528_v20, %s26983_s16  ;;  %v3126_v20 = vrot.slane %v2994_v15, %v19158_v18  ;;  %v3420_v62 = vrot.slane %v3406_v17, %v19147_v29  ;;  %v3862_v24 = vrot.slane %v3848_v1, %v19147_v29 }
 0x33e   :  { %v4046_v61 = vpop.permute.xlu1 %4045  ;;  %v4580_v3 = vrot.slane %v20479_v46, %v19400_v26  ;;  %v3894_v17 = vcombine.high %v20381_v63, %v20381_v63 }
 0x33f   :  { %v4646_v0 = vpop.permute.xlu0 %4645  ;;  %4120 = vst.msk [vmem:[%s26963_s2 + $0xf5] sm:$0x1] %vm1894_vm12, %v4046_v61 }
 0x340   :  { %v4724_v38 = vsel %vm26987_vm10, %v4646_v0, %v20244_v60  ;;  %4065 = vrot.lane.b32.xlu1 %v3998_v4, %s18666_s5  ;;  %v2567_v60 = vcombine.high %v20199_v30, %v20199_v30  ;;  %v2246_v0 = vrot.slane %v2124_v51, %v19158_v18  ;;  %v3436_v4 = vrot.slane %v3420_v62, %v19147_v29 }
 0x341   :  { %4784 = vst.msk [vmem:[%s26963_s2 + $0xe6] sm:$0x1] %vm1894_vm12, %v4724_v38  ;;  %2299 = vrot.lane.b32.xlu0 %v2234_v31, %s18645_s26  ;;  %v2538_v31 = vcombine.high %v20436_v25, %v20436_v25  ;;  %v2980_v25 = vcombine.high %v20482_v54, %v20482_v54  ;;  %v4006_v5 = vrot.slane %v3894_v17, %v19158_v18 }
 0x342   :  { %v4050_v13 = vpop.permute.xlu1 %4049  ;;  %v2676_v30 = vrot.slane %v2567_v60, %v19158_v18  ;;  %v3568_v55 = vrot.slane %v3436_v4, %v19158_v18 }
 0x343   :  { %v2284_v57 = vpop.permute.xlu0 %2283  ;;  %4122 = vst.msk [vmem:[%s26963_s2 + $0x115] sm:$0x1] %vm1894_vm12, %v4050_v13  ;;  %v2566_v38 = vrot.slane %v2538_v31, %v19147_v29 }
 0x344   :  { %2355 = vst.msk [vmem:[%s26963_s2 + $0x121] sm:$0x1] %vm1894_vm12, %v2284_v57  ;;  %4667 = vrot.lane.b32.xlu1 %v4508_v16, %s26983_s16  ;;  %v3010_v16 = vcombine.high %v20314_v37, %v20314_v37  ;;  %v4002_v57 = vrot.slane %v3893_v19, %v19158_v18 }
 0x345   :  { %2303 = vrot.lane.b32.xlu0 %v2242_v23, %s18645_s26  ;;  %v2688_v13 = vrot.slane %v2566_v38, %v19158_v18  ;;  %v3878_v23 = vrot.slane %v3862_v24, %v19147_v29 }
 0x346   :  { %v20451_v34 = vpop.permute.xlu1 %4635 }
 0x347   :  { %v2288_v12 = vpop.permute.xlu0 %2287 }
 0x348   :  { %2357 = vst.msk [vmem:[%s26963_s2 + $0x141] sm:$0x1] %vm1894_vm12, %v2288_v12  ;;  %4683 = vrot.lane.b32.xlu1 %v4540_v50, %s26983_s16  ;;  %v3122_v50 = vrot.slane %v3010_v16, %v19158_v18  ;;  %v3008_v12 = vrot.slane %v2980_v25, %v19147_v29 }
 0x349   :  { %2741 = vrot.lane.b32.xlu0 %v2676_v30, %s18648_s9  ;;  %v4010_v30 = vrot.slane %v3878_v23, %v19158_v18 }
 0x34a   :  { %v20472_v59 = vpop.permute.xlu1 %4651  ;;  %v3130_v22 = vrot.slane %v3008_v12, %v19158_v18 }
 0x34b   :  { %v2726_v42 = vpop.permute.xlu0 %2725 }
 0x34c   :  { %2797 = vst.msk [vmem:[%s26963_s2 + $0x122] sm:$0x1] %vm1894_vm12, %v2726_v42  ;;  %4687 = vrot.lane.b32.xlu1 %v4548_v21, %s26983_s16  ;;  %v4504_v42 = vrot.slane %v20402_v10, %v19158_v18  ;;  %v3452_v21 = vcombine.high %v20346_v41, %v20346_v41  ;;  %v4536_v41 = vrot.slane %v20427_v40, %v19158_v18 }
 0x34d   :  { %2745 = vrot.lane.b32.xlu0 %v2684_v6, %s18648_s9  ;;  %v3422_v6 = vcombine.high %v3420_v62, %v3420_v62  ;;  %v4544_v40 = vrot.slane %v20455_v35, %v19158_v18 }
 0x34e   :  { %v20493_v2 = vpop.permute.xlu1 %4655 }
 0x34f   :  { %v2730_v45 = vpop.permute.xlu0 %2729  ;;  %v3450_v14 = vrot.slane %v3422_v6, %v19147_v29 }
 0x350   :  { %2799 = vst.msk [vmem:[%s26963_s2 + $0x142] sm:$0x1] %vm1894_vm12, %v2730_v45  ;;  %4703 = vrot.lane.b32.xlu1 %v4580_v3, %s26983_s16 }
 0x351   :  { %3183 = vrot.lane.b32.xlu0 %v3118_v49, %s18655_s12  ;;  %v3564_v49 = vrot.slane %v3452_v21, %v19158_v18  ;;  %v3572_v28 = vrot.slane %v3450_v14, %v19158_v18 }
 0x352   :  { %v20511_v58 = vpop.permute.xlu1 %4671 }
 0x353   :  { %v3168_v43 = vpop.permute.xlu0 %3167 }
 0x354   :  { %3239 = vst.msk [vmem:[%s26963_s2 + $0x123] sm:$0x1] %vm1894_vm12, %v3168_v43  ;;  %2301 = vrot.lane.b32.xlu1 %v2238_v56, %s18645_s26 }
 0x355   :  { %3187 = vrot.lane.b32.xlu0 %v3126_v20, %s18655_s12  ;;  %v4576_v20 = vrot.slane %v20479_v46, %v19158_v18 }
 0x356   :  { %v2286_v52 = vpop.permute.xlu1 %2285 }
 0x357   :  { %v3172_v61 = vpop.permute.xlu0 %3171  ;;  %2356 = vst.msk [vmem:[%s26963_s2 + $0x131] sm:$0x1] %vm1894_vm12, %v2286_v52 }
 0x358   :  { %3241 = vst.msk [vmem:[%s26963_s2 + $0x143] sm:$0x1] %vm1894_vm12, %v3172_v61  ;;  %2305 = vrot.lane.b32.xlu1 %v2246_v0, %s18645_s26  ;;  %v4347_v61 = vcombine.high %v20455_v35, %v20455_v35 }
 0x359   :  { %3625 = vrot.lane.b32.xlu0 %v3560_v36, %s18658_s7 }
 0x35a   :  { %v2290_v9 = vpop.permute.xlu1 %2289  ;;  %v4560_v31 = vrot.slane %v4347_v61, %v19158_v18 }
 0x35b   :  { %v3610_v8 = vpop.permute.xlu0 %3609  ;;  %2358 = vst.msk [vmem:[%s26963_s2 + $0x151] sm:$0x1] %vm1894_vm12, %v2290_v9 }
 0x35c   :  { %3681 = vst.msk [vmem:[%s26963_s2 + $0x124] sm:$0x1] %vm1894_vm12, %v3610_v8  ;;  %2743 = vrot.lane.b32.xlu1 %v2680_v53, %s18648_s9  ;;  %v4800_v53 = vld [vmem:[#allocation3 + $0x8] sm:$0xff] }
 0x35d   :  { %3629 = vrot.lane.b32.xlu0 %v3568_v55, %s18658_s7  ;;  %v4564_v55 = vrot.slane %v4347_v61, %v19400_v26  ;;  %v4808_v23 = vcombine.high %v4800_v53, %v4800_v53 }
 0x35e   :  { %v2728_v48 = vpop.permute.xlu1 %2727 }
 0x35f   :  { %v3614_v60 = vpop.permute.xlu0 %3613  ;;  %2798 = vst.msk [vmem:[%s26963_s2 + $0x132] sm:$0x1] %vm1894_vm12, %v2728_v48 }
 0x360   :  { %3683 = vst.msk [vmem:[%s26963_s2 + $0x144] sm:$0x1] %vm1894_vm12, %v3614_v60  ;;  %2747 = vrot.lane.b32.xlu1 %v2688_v13, %s18648_s9 }
 0x361   :  { %4067 = vrot.lane.b32.xlu0 %v4002_v57, %s18666_s5 }
 0x362   :  { %v2732_v37 = vpop.permute.xlu1 %2731 }
 0x363   :  { %v4052_v32 = vpop.permute.xlu0 %4051  ;;  %2800 = vst.msk [vmem:[%s26963_s2 + $0x152] sm:$0x1] %vm1894_vm12, %v2732_v37 }
 0x364   :  { %4123 = vst.msk [vmem:[%s26963_s2 + $0x125] sm:$0x1] %vm1894_vm12, %v4052_v32  ;;  %3185 = vrot.lane.b32.xlu1 %v3122_v50, %s18655_s12 }
 0x365   :  { %4071 = vrot.lane.b32.xlu0 %v4010_v30, %s18666_s5 }
 0x366   :  { %v3170_v39 = vpop.permute.xlu1 %3169 }
 0x367   :  { %v4056_v47 = vpop.permute.xlu0 %4055  ;;  %3240 = vst.msk [vmem:[%s26963_s2 + $0x133] sm:$0x1] %vm1894_vm12, %v3170_v39  ;;  %v4822_v39 = vrot.slane %v4808_v23, %v19147_v29 }
 0x368   :  { %4125 = vst.msk [vmem:[%s26963_s2 + $0x145] sm:$0x1] %vm1894_vm12, %v4056_v47  ;;  %3189 = vrot.lane.b32.xlu1 %v3130_v22, %s18655_s12 }
 0x369   :  { %4665 = vrot.lane.b32.xlu0 %v4504_v42, %s26983_s16 }
 0x36a   :  { %v3174_v54 = vpop.permute.xlu1 %3173 }
 0x36b   :  { %v4634_v10 = vpop.permute.xlu0 %4633  ;;  %3242 = vst.msk [vmem:[%s26963_s2 + $0x153] sm:$0x1] %vm1894_vm12, %v3174_v54  ;;  %v4838_v54 = vrot.slane %v4822_v39, %v19147_v29 }
 0x36c   :  { %v4721_v45 = vsel %vm26987_vm10, %v4634_v10, %v20451_v34  ;;  %3627 = vrot.lane.b32.xlu1 %v3564_v49, %s18658_s7  ;;  %v3864_v34 = vcombine.high %v3862_v24, %v3862_v24  ;;  %v4824_v10 = vcombine.high %v4822_v39, %v4822_v39  ;;  %v4801_v49 = vld [vmem:[#allocation3 + $0x20] sm:$0xff] }
 0x36d   :  { %4781 = vst.msk [vmem:[%s26963_s2 + $0xb6] sm:$0x1] %vm1894_vm12, %v4721_v45  ;;  %4681 = vrot.lane.b32.xlu0 %v4536_v41, %s26983_s16  ;;  %v4864_v41 = vrot.slane %v4801_v49, %v19147_v29 }
 0x36e   :  { %v3612_v3 = vpop.permute.xlu1 %3611  ;;  %v3892_v51 = vrot.slane %v3864_v34, %v19147_v29  ;;  %v4857_v34 = vcombine.high %v4801_v49, %v4801_v49 }
 0x36f   :  { %v4650_v15 = vpop.permute.xlu0 %4649  ;;  %3682 = vst.msk [vmem:[%s26963_s2 + $0x134] sm:$0x1] %vm1894_vm12, %v3612_v3  ;;  %v20745_v3 = vrot.slane %v4838_v54, %v19158_v18  ;;  %v4880_v17 = vrot.slane %v4864_v41, %v19147_v29 }
 0x370   :  { %v4725_v43 = vsel %vm26987_vm10, %v4650_v15, %v20472_v59  ;;  %3631 = vrot.lane.b32.xlu1 %v3572_v28, %s18658_s7  ;;  %v4339_v59 = vrot.slane %v4317_v7, %v19147_v29  ;;  %v4014_v44 = vrot.slane %v3892_v51, %v19158_v18  ;;  %v4852_v15 = vrot.slane %v4824_v10, %v19147_v29 }
 0x371   :  { %4785 = vst.msk [vmem:[%s26963_s2 + $0xf6] sm:$0x1] %vm1894_vm12, %v4725_v43  ;;  %4685 = vrot.lane.b32.xlu0 %v4544_v40, %s26983_s16  ;;  %v4854_v28 = vcombine.high %v4838_v54, %v4838_v54  ;;  %v4871_v51 = vrot.slane %v4857_v34, %v19147_v29 }
 0x372   :  { %v3616_v63 = vpop.permute.xlu1 %3615  ;;  %v4552_v52 = vrot.slane %v4339_v59, %v19158_v18  ;;  %v4348_v19 = vcombine.high %v4339_v59, %v4339_v59 }
 0x373   :  { %v4654_v56 = vpop.permute.xlu0 %4653  ;;  %3684 = vst.msk [vmem:[%s26963_s2 + $0x154] sm:$0x1] %vm1894_vm12, %v3616_v63  ;;  %v20762_v63 = vrot.slane %v4852_v15, %v19158_v18  ;;  %v4887_v61 = vrot.slane %v4871_v51, %v19147_v29 }
 0x374   :  { %v4726_v62 = vsel %vm26987_vm10, %v4654_v56, %v20493_v2  ;;  %4069 = vrot.lane.b32.xlu1 %v4006_v5, %s18666_s5  ;;  %v4318_v2 = vcombine.high %v20460_v27, %v20460_v27  ;;  %v4556_v27 = vrot.slane %v4339_v59, %v19400_v26  ;;  %v4568_v13 = vrot.slane %v4348_v19, %v19158_v18 }
 0x375   :  { %4786 = vst.msk [vmem:[%s26963_s2 + $0x106] sm:$0x1] %vm1894_vm12, %v4726_v62  ;;  %4701 = vrot.lane.b32.xlu0 %v4576_v20, %s26983_s16  ;;  %v4572_v50 = vrot.slane %v4348_v19, %v19400_v26  ;;  %v20765_v56 = vrot.slane %v4854_v28, %v19158_v18  ;;  %v4856_v5 = vcombine.high %v4852_v15, %v4852_v15 }
 0x376   :  { %v4054_v46 = vpop.permute.xlu1 %4053  ;;  %v4346_v1 = vrot.slane %v4318_v2, %v19147_v29  ;;  %v4872_v20 = vcombine.high %v4864_v41, %v4864_v41 }
 0x377   :  { %v4670_v36 = vpop.permute.xlu0 %4669  ;;  %4124 = vst.msk [vmem:[%s26963_s2 + $0x135] sm:$0x1] %vm1894_vm12, %v4054_v46  ;;  %v20781_v46 = vrot.slane %v4856_v5, %v19158_v18 }
 0x378   :  { %v4730_v0 = vsel %vm26987_vm10, %v4670_v36, %v20511_v58  ;;  %4073 = vrot.lane.b32.xlu1 %v4014_v44, %s18666_s5  ;;  %v4815_v58 = vrot.slane %v4800_v53, %v19147_v29  ;;  %v4584_v38 = vrot.slane %v4346_v1, %v19158_v18  ;;  %v4588_v60 = vrot.slane %v4346_v1, %v19400_v26  ;;  %v4802_v1 = vld [vmem:[#allocation3 + $0x38] sm:$0xff] }
 0x379   :  { %4790 = vst.msk [vmem:[%s26963_s2 + $0x146] sm:$0x1] %vm1894_vm12, %v4730_v0  ;;  %4689 = vrot.lane.b32.xlu0 %v4552_v52, %s26983_s16  ;;  %v20784_v36 = vrot.slane %v4880_v17, %v19158_v18  ;;  %v4894_v44 = vrot.slane %v4872_v20, %v19147_v29  ;;  %v4902_v52 = vcombine.high %v4880_v17, %v4880_v17 }
 0x37a   :  { %v4058_v35 = vpop.permute.xlu1 %4057  ;;  %v4823_v24 = vcombine.high %v4815_v58, %v4815_v58  ;;  %v4831_v57 = vrot.slane %v4815_v58, %v19147_v29  ;;  %v4913_v53 = vrot.slane %v4802_v1, %v19147_v29 }
 0x37b   :  { %v2292_v4 = vpop.permute.xlu0 %2291  ;;  %4126 = vst.msk [vmem:[%s26963_s2 + $0x155] sm:$0x1] %vm1894_vm12, %v4058_v35  ;;  %v20801_v35 = vrot.slane %v4894_v44, %v19158_v18 }
 0x37c   :  { %2359 = vst.msk [vmem:[%s26963_s2 + $0x161] sm:$0x1] %vm1894_vm12, %v2292_v4  ;;  %4691 = vrot.lane.b32.xlu1 %v4556_v27, %s26983_s16  ;;  %v4845_v25 = vrot.slane %v4823_v24, %v19147_v29  ;;  %v20713_v30 = vrot.slane %v4831_v57, %v19158_v18  ;;  %v4853_v12 = vcombine.high %v4831_v57, %v4831_v57 }
 0x37d   :  { %4693 = vrot.lane.b32.xlu0 %v4560_v31, %s26983_s16  ;;  %v20804_v4 = vrot.slane %v4902_v52, %v19158_v18  ;;  %v4904_v27 = vcombine.high %v4894_v44, %v4894_v44  ;;  %v4873_v31 = vcombine.high %v4871_v51, %v4871_v51  ;;  %v4903_v24 = vcombine.high %v4887_v61, %v4887_v61 }
 0x37e   :  { %v20687_v9 = vpop.permute.xlu1 %4659  ;;  %v20724_v47 = vrot.slane %v4845_v25, %v19158_v18  ;;  %v20729_v21 = vrot.slane %v4853_v12, %v19158_v18  ;;  %v4855_v6 = vcombine.high %v4845_v25, %v4845_v25 }
 0x37f   :  { %v2296_v8 = vpop.permute.xlu0 %2295  ;;  %v4901_v19 = vrot.slane %v4873_v31, %v19147_v29  ;;  %v20843_v25 = vrot.slane %v4903_v24, %v19158_v18 }
 0x380   :  { %2361 = vst.msk [vmem:[%s26963_s2 + $0x181] sm:$0x1] %vm1894_vm12, %v2296_v8  ;;  %4695 = vrot.lane.b32.xlu1 %v4564_v55, %s26983_s16  ;;  %v20742_v40 = vrot.slane %v4855_v6, %v19158_v18  ;;  %v20820_v55 = vrot.slane %v4904_v27, %v19158_v18 }
 0x381   :  { %4705 = vrot.lane.b32.xlu0 %v4584_v38, %s26983_s16  ;;  %v20823_v38 = vrot.slane %v4887_v61, %v19158_v18  ;;  %v20840_v23 = vrot.slane %v4901_v19, %v19158_v18 }
 0x382   :  { %v20697_v16 = vpop.permute.xlu1 %4663 }
 0x383   :  { %v2734_v48 = vpop.permute.xlu0 %2733 }
 0x384   :  { %2801 = vst.msk [vmem:[%s26963_s2 + $0x162] sm:$0x1] %vm1894_vm12, %v2734_v48  ;;  %4707 = vrot.lane.b32.xlu1 %v4588_v60, %s26983_s16  ;;  %v4929_v48 = vrot.slane %v4913_v53, %v19147_v29  ;;  %v4921_v60 = vcombine.high %v4913_v53, %v4913_v53 }
 0x385   :  { %4697 = vrot.lane.b32.xlu0 %v4568_v13, %s26983_s16 }
 0x386   :  { %v20709_v37 = vpop.permute.xlu1 %4675  ;;  %v4943_v39 = vrot.slane %v4921_v60, %v19147_v29  ;;  %v4951_v10 = vcombine.high %v4929_v48, %v4929_v48 }
 0x387   :  { %v2738_v32 = vpop.permute.xlu0 %2737 }
 0x388   :  { %2803 = vst.msk [vmem:[%s26963_s2 + $0x182] sm:$0x1] %vm1894_vm12, %v2738_v32  ;;  %4699 = vrot.lane.b32.xlu1 %v4572_v50, %s26983_s16  ;;  %v4905_v32 = vcombine.high %v4901_v19, %v4901_v19  ;;  %v4906_v50 = vcombine.high %v4802_v1, %v4802_v1  ;;  %v20885_v28 = vrot.slane %v4951_v10, %v19158_v18 }
 0x389   :  { %5122 = vrot.lane.b32.xlu0 %v20713_v30, %s26985_s18 }
 0x38a   :  { %v20726_v22 = vpop.permute.xlu1 %4679  ;;  %v20861_v54 = vrot.slane %v4905_v32, %v19158_v18  ;;  %v4920_v49 = vrot.slane %v4906_v50, %v19147_v29 }
 0x38b   :  { %v3176_v42 = vpop.permute.xlu0 %3175 }
 0x38c   :  { %3243 = vst.msk [vmem:[%s26963_s2 + $0x163] sm:$0x1] %vm1894_vm12, %v3176_v42  ;;  %5124 = vrot.lane.b32.xlu1 %v20724_v47, %s26985_s18  ;;  %v4936_v17 = vrot.slane %v4920_v49, %v19147_v29  ;;  %v4922_v34 = vcombine.high %v4920_v49, %v4920_v49 }
 0x38d   :  { %5126 = vrot.lane.b32.xlu0 %v20729_v21, %s26985_s18 }
 0x38e   :  { %v2294_v14 = vpop.permute.xlu1 %2293  ;;  %v4952_v44 = vcombine.high %v4936_v17, %v4936_v17 }
 0x38f   :  { %v3180_v45 = vpop.permute.xlu0 %3179  ;;  %2360 = vst.msk [vmem:[%s26963_s2 + $0x171] sm:$0x1] %vm1894_vm12, %v2294_v14  ;;  %v20882_v14 = vrot.slane %v4943_v39, %v19158_v18 }
 0x390   :  { %3245 = vst.msk [vmem:[%s26963_s2 + $0x183] sm:$0x1] %vm1894_vm12, %v3180_v45  ;;  %5128 = vrot.lane.b32.xlu1 %v20742_v40, %s26985_s18 }
 0x391   :  { %5130 = vrot.lane.b32.xlu0 %v20745_v3, %s26985_s18 }
 0x392   :  { %v2298_v7 = vpop.permute.xlu1 %2297 }
 0x393   :  { %v3618_v43 = vpop.permute.xlu0 %3617  ;;  %2362 = vst.msk [vmem:[%s26963_s2 + $0x191] sm:$0x1] %vm1894_vm12, %v2298_v7  ;;  %v4803_v7 = vld [vmem:[#allocation3 + $0x50] sm:$0x3f] }
 0x394   :  { %3685 = vst.msk [vmem:[%s26963_s2 + $0x164] sm:$0x1] %vm1894_vm12, %v3618_v43  ;;  %5132 = vrot.lane.b32.xlu1 %v20762_v63, %s26985_s18  ;;  %v4962_v5 = vrot.slane %v4803_v7, %v19147_v29  ;;  %v4955_v53 = vcombine.high %v4803_v7, %v4803_v7 }
 0x395   :  { %5134 = vrot.lane.b32.xlu0 %v20765_v56, %s26985_s18 }
 0x396   :  { %v2736_v59 = vpop.permute.xlu1 %2735  ;;  %v4978_v61 = vrot.slane %v4962_v5, %v19147_v29 }
 0x397   :  { %v3622_v62 = vpop.permute.xlu0 %3621  ;;  %2802 = vst.msk [vmem:[%s26963_s2 + $0x172] sm:$0x1] %vm1894_vm12, %v2736_v59 }
 0x398   :  { %3687 = vst.msk [vmem:[%s26963_s2 + $0x184] sm:$0x1] %vm1894_vm12, %v3622_v62  ;;  %5136 = vrot.lane.b32.xlu1 %v20781_v46, %s26985_s18  ;;  %v4950_v62 = vrot.slane %v4922_v34, %v19147_v29  ;;  %v5000_v60 = vcombine.high %v4978_v61, %v4978_v61 }
 0x399   :  { %5138 = vrot.lane.b32.xlu0 %v20784_v36, %s26985_s18 }
 0x39a   :  { %v2740_v2 = vpop.permute.xlu1 %2739  ;;  %v20926_v31 = vrot.slane %v4950_v62, %v19158_v18  ;;  %v4954_v1 = vcombine.high %v4950_v62, %v4950_v62 }
 0x39b   :  { %v4060_v0 = vpop.permute.xlu0 %4059  ;;  %2804 = vst.msk [vmem:[%s26963_s2 + $0x192] sm:$0x1] %vm1894_vm12, %v2740_v2  ;;  %v4970_v2 = vcombine.high %v4962_v5, %v4962_v5 }
 0x39c   :  { %4127 = vst.msk [vmem:[%s26963_s2 + $0x165] sm:$0x1] %vm1894_vm12, %v4060_v0  ;;  %5140 = vrot.lane.b32.xlu1 %v20801_v35, %s26985_s18  ;;  %v20947_v24 = vrot.slane %v4954_v1, %v19158_v18 }
 0x39d   :  { %5142 = vrot.lane.b32.xlu0 %v20804_v4, %s26985_s18 }
 0x39e   :  { %v3178_v58 = vpop.permute.xlu1 %3177 }
 0x39f   :  { %v4064_v8 = vpop.permute.xlu0 %4063  ;;  %3244 = vst.msk [vmem:[%s26963_s2 + $0x173] sm:$0x1] %vm1894_vm12, %v3178_v58  ;;  %v4992_v58 = vrot.slane %v4970_v2, %v19147_v29 }
 0x3a0   :  { %4129 = vst.msk [vmem:[%s26963_s2 + $0x185] sm:$0x1] %vm1894_vm12, %v4064_v8  ;;  %5144 = vrot.lane.b32.xlu1 %v20820_v55, %s26985_s18 }
 0x3a1   :  { %5146 = vrot.lane.b32.xlu0 %v20823_v38, %s26985_s18 }
 0x3a2   :  { %v3182_v13 = vpop.permute.xlu1 %3181 }
 0x3a3   :  { %v4658_v57 = vpop.permute.xlu0 %4657  ;;  %3246 = vst.msk [vmem:[%s26963_s2 + $0x193] sm:$0x1] %vm1894_vm12, %v3182_v13  ;;  %v4969_v13 = vrot.slane %v4955_v53, %v19147_v29 }
 0x3a4   :  { %v4727_v12 = vsel %vm26987_vm10, %v4658_v57, %v20687_v9  ;;  %5148 = vrot.lane.b32.xlu1 %v20840_v23, %s26985_s18  ;;  %v20864_v9 = vrot.slane %v4929_v48, %v19158_v18  ;;  %v5101_v48 = vrot.slane %v4978_v61, %v19158_v18  ;;  %v5105_v57 = vrot.slane %v4992_v58, %v19158_v18 }
 0x3a5   :  { %4787 = vst.msk [vmem:[%s26963_s2 + $0x116] sm:$0x1] %vm1894_vm12, %v4727_v12  ;;  %5150 = vrot.lane.b32.xlu0 %v20843_v25, %s26985_s18  ;;  %v5109_v12 = vrot.slane %v5000_v60, %v19158_v18 }
 0x3a6   :  { %v3620_v42 = vpop.permute.xlu1 %3619 }
 0x3a7   :  { %v4662_v6 = vpop.permute.xlu0 %4661  ;;  %3686 = vst.msk [vmem:[%s26963_s2 + $0x174] sm:$0x1] %vm1894_vm12, %v3620_v42  ;;  %v4985_v42 = vrot.slane %v4969_v13, %v19147_v29 }
 0x3a8   :  { %v4728_v41 = vsel %vm26987_vm10, %v4662_v6, %v20697_v16  ;;  %5152 = vrot.lane.b32.xlu1 %v20861_v54, %s26985_s18  ;;  %v4953_v16 = vcombine.high %v4943_v39, %v4943_v39  ;;  %v5001_v39 = vcombine.high %v4992_v58, %v4992_v58  ;;  %v4971_v6 = vcombine.high %v4969_v13, %v4969_v13 }
 0x3a9   :  { %4788 = vst.msk [vmem:[%s26963_s2 + $0x126] sm:$0x1] %vm1894_vm12, %v4728_v41  ;;  %5154 = vrot.lane.b32.xlu0 %v20864_v9, %s26985_s18 }
 0x3aa   :  { %v3624_v45 = vpop.permute.xlu1 %3623  ;;  %v20904_v59 = vrot.slane %v4953_v16, %v19158_v18  ;;  %v5113_v41 = vrot.slane %v5001_v39, %v19158_v18 }
 0x3ab   :  { %v4674_v15 = vpop.permute.xlu0 %4673  ;;  %3688 = vst.msk [vmem:[%s26963_s2 + $0x194] sm:$0x1] %vm1894_vm12, %v3624_v45  ;;  %v5117_v45 = vrot.slane %v4985_v42, %v19158_v18 }
 0x3ac   :  { %v4731_v43 = vsel %vm26987_vm10, %v4674_v15, %v20709_v37  ;;  %5156 = vrot.lane.b32.xlu1 %v20882_v14, %s26985_s18  ;;  %v20907_v37 = vrot.slane %v4936_v17, %v19158_v18  ;;  %v4999_v15 = vrot.slane %v4971_v6, %v19147_v29 }
 0x3ad   :  { %4791 = vst.msk [vmem:[%s26963_s2 + $0x156] sm:$0x1] %vm1894_vm12, %v4731_v43  ;;  %5158 = vrot.lane.b32.xlu0 %v20885_v28, %s26985_s18 }
 0x3ae   :  { %v4062_v20 = vpop.permute.xlu1 %4061  ;;  %v5121_v34 = vrot.slane %v4999_v15, %v19158_v18 }
 0x3af   :  { %v4678_v51 = vpop.permute.xlu0 %4677  ;;  %4128 = vst.msk [vmem:[%s26963_s2 + $0x175] sm:$0x1] %vm1894_vm12, %v4062_v20 }
 0x3b0   :  { %v4732_v52 = vsel %vm26987_vm10, %v4678_v51, %v20726_v22  ;;  %5160 = vrot.lane.b32.xlu1 %v20904_v59, %s26985_s18  ;;  %v20929_v22 = vrot.slane %v4952_v44, %v19158_v18 }
 0x3b1   :  { %4792 = vst.msk [vmem:[%s26963_s2 + $0x166] sm:$0x1] %vm1894_vm12, %v4732_v52  ;;  %5162 = vrot.lane.b32.xlu0 %v20907_v37, %s26985_s18 }
 0x3b2   :  { %v4066_v0 = vpop.permute.xlu1 %4065 }
 0x3b3   :  { %v2300_v27 = vpop.permute.xlu0 %2299  ;;  %4130 = vst.msk [vmem:[%s26963_s2 + $0x195] sm:$0x1] %vm1894_vm12, %v4066_v0 }
 0x3b4   :  { %2363 = vst.msk [vmem:[%s26963_s2 + $0x1a1] sm:$0x1] %vm1894_vm12, %v2300_v27  ;;  %5164 = vrot.lane.b32.xlu1 %v20926_v31, %s26985_s18 }
 0x3b5   :  { %5166 = vrot.lane.b32.xlu0 %v20929_v22, %s26985_s18 }
 0x3b6   :  { %v20944_v8 = vpop.permute.xlu1 %4667 }
 0x3b7   :  { %v2304_v19 = vpop.permute.xlu0 %2303 }
 0x3b8   :  { %2365 = vst.msk [vmem:[%s26963_s2 + $0x1c1] sm:$0x1] %vm1894_vm12, %v2304_v19  ;;  %5168 = vrot.lane.b32.xlu1 %v20947_v24, %s26985_s18 }
 0x3b9   :  { %5170 = vrot.lane.b32.xlu0 %v5101_v48, %s26985_s18 }
 0x3ba   :  { %v20959_v32 = vpop.permute.xlu1 %4683 }
 0x3bb   :  { %v2742_v50 = vpop.permute.xlu0 %2741 }
 0x3bc   :  { %2805 = vst.msk [vmem:[%s26963_s2 + $0x1a2] sm:$0x1] %vm1894_vm12, %v2742_v50  ;;  %5172 = vrot.lane.b32.xlu1 %v5105_v57, %s26985_s18 }
 0x3bd   :  { %5174 = vrot.lane.b32.xlu0 %v5109_v12, %s26985_s18 }
 0x3be   :  { %v20969_v10 = vpop.permute.xlu1 %4687 }
 0x3bf   :  { %v2746_v49 = vpop.permute.xlu0 %2745 }
 0x3c0   :  { %2807 = vst.msk [vmem:[%s26963_s2 + $0x1c2] sm:$0x1] %vm1894_vm12, %v2746_v49  ;;  %5176 = vrot.lane.b32.xlu1 %v5113_v41, %s26985_s18 }
 0x3c1   :  { %5178 = vrot.lane.b32.xlu0 %v5117_v45, %s26985_s18 }
 0x3c2   :  { %v20980_v16 = vpop.permute.xlu1 %4703 }
 0x3c3   :  { %v3184_v17 = vpop.permute.xlu0 %3183 }
 0x3c4   :  { %3247 = vst.msk [vmem:[%s26963_s2 + $0x1a3] sm:$0x1] %vm1894_vm12, %v3184_v17  ;;  %5180 = vrot.lane.b32.xlu1 %v5121_v34, %s26985_s18  ;;  %s26992_s18 = smov 56  }
 0x3c5   :  { %5564 = vrot.lane.b32.xlu0 %v20713_v30, %s26990_s23 }
 0x3c6   :  { %v2302_v7 = vpop.permute.xlu1 %2301 }
 0x3c7   :  { %v3188_v43 = vpop.permute.xlu0 %3187  ;;  %2364 = vst.msk [vmem:[%s26963_s2 + $0x1b1] sm:$0x1] %vm1894_vm12, %v2302_v7 }
 0x3c8   :  { %3249 = vst.msk [vmem:[%s26963_s2 + $0x1c3] sm:$0x1] %vm1894_vm12, %v3188_v43  ;;  %5566 = vrot.lane.b32.xlu1 %v20724_v47, %s26990_s23 }
 0x3c9   :  { %5568 = vrot.lane.b32.xlu0 %v20729_v21, %s26990_s23 }
 0x3ca   :  { %v2306_v5 = vpop.permute.xlu1 %2305 }
 0x3cb   :  { %v3626_v20 = vpop.permute.xlu0 %3625  ;;  %2366 = vst.msk [vmem:[%s26963_s2 + $0x1d1] sm:$0x1] %vm1894_vm12, %v2306_v5 }
 0x3cc   :  { %3689 = vst.msk [vmem:[%s26963_s2 + $0x1a4] sm:$0x1] %vm1894_vm12, %v3626_v20  ;;  %5570 = vrot.lane.b32.xlu1 %v20742_v40, %s26990_s23 }
 0x3cd   :  { %5572 = vrot.lane.b32.xlu0 %v20745_v3, %s26990_s23 }
 0x3ce   :  { %v2744_v51 = vpop.permute.xlu1 %2743 }
 0x3cf   :  { %v3630_v62 = vpop.permute.xlu0 %3629  ;;  %2806 = vst.msk [vmem:[%s26963_s2 + $0x1b2] sm:$0x1] %vm1894_vm12, %v2744_v51 }
 0x3d0   :  { %3691 = vst.msk [vmem:[%s26963_s2 + $0x1c4] sm:$0x1] %vm1894_vm12, %v3630_v62  ;;  %5574 = vrot.lane.b32.xlu1 %v20762_v63, %s26990_s23 }
 0x3d1   :  { %5576 = vrot.lane.b32.xlu0 %v20765_v56, %s26990_s23 }
 0x3d2   :  { %v2748_v44 = vpop.permute.xlu1 %2747 }
 0x3d3   :  { %v4068_v52 = vpop.permute.xlu0 %4067  ;;  %2808 = vst.msk [vmem:[%s26963_s2 + $0x1d2] sm:$0x1] %vm1894_vm12, %v2748_v44 }
 0x3d4   :  { %4131 = vst.msk [vmem:[%s26963_s2 + $0x1a5] sm:$0x1] %vm1894_vm12, %v4068_v52  ;;  %5578 = vrot.lane.b32.xlu1 %v20781_v46, %s26990_s23 }
 0x3d5   :  { %5580 = vrot.lane.b32.xlu0 %v20784_v36, %s26990_s23 }
 0x3d6   :  { %v3186_v61 = vpop.permute.xlu1 %3185 }
 0x3d7   :  { %v4072_v2 = vpop.permute.xlu0 %4071  ;;  %3248 = vst.msk [vmem:[%s26963_s2 + $0x1b3] sm:$0x1] %vm1894_vm12, %v3186_v61 }
 0x3d8   :  { %4133 = vst.msk [vmem:[%s26963_s2 + $0x1c5] sm:$0x1] %vm1894_vm12, %v4072_v2  ;;  %5582 = vrot.lane.b32.xlu1 %v20801_v35, %s26990_s23 }
 0x3d9   :  { %5584 = vrot.lane.b32.xlu0 %v20804_v4, %s26990_s23 }
 0x3da   :  { %v3190_v0 = vpop.permute.xlu1 %3189 }
 0x3db   :  { %v4666_v27 = vpop.permute.xlu0 %4665  ;;  %3250 = vst.msk [vmem:[%s26963_s2 + $0x1d3] sm:$0x1] %vm1894_vm12, %v3190_v0 }
 0x3dc   :  { %v4729_v1 = vsel %vm26987_vm10, %v4666_v27, %v20944_v8  ;;  %5586 = vrot.lane.b32.xlu1 %v20820_v55, %s26990_s23 }
 0x3dd   :  { %4789 = vst.msk [vmem:[%s26963_s2 + $0x136] sm:$0x1] %vm1894_vm12, %v4729_v1  ;;  %5588 = vrot.lane.b32.xlu0 %v20823_v38, %s26990_s23 }
 0x3de   :  { %v3628_v53 = vpop.permute.xlu1 %3627 }
 0x3df   :  { %v4682_v58 = vpop.permute.xlu0 %4681  ;;  %3690 = vst.msk [vmem:[%s26963_s2 + $0x1b4] sm:$0x1] %vm1894_vm12, %v3628_v53 }
 0x3e0   :  { %v4733_v8 = vsel %vm26987_vm10, %v4682_v58, %v20959_v32  ;;  %5590 = vrot.lane.b32.xlu1 %v20840_v23, %s26990_s23  ;;  %v5245_v32 = vld [vmem:[#allocation3 + $0x50] sm:$0x3f] }
 0x3e1   :  { %4793 = vst.msk [vmem:[%s26963_s2 + $0x176] sm:$0x1] %vm1894_vm12, %v4733_v8  ;;  %5592 = vrot.lane.b32.xlu0 %v20843_v25, %s26990_s23  ;;  %v5404_v12 = vrot.slane %v5245_v32, %v19147_v29  ;;  %v5397_v45 = vcombine.high %v5245_v32, %v5245_v32 }
 0x3e2   :  { %v3632_v19 = vpop.permute.xlu1 %3631 }
 0x3e3   :  { %v4686_v48 = vpop.permute.xlu0 %4685  ;;  %3692 = vst.msk [vmem:[%s26963_s2 + $0x1d4] sm:$0x1] %vm1894_vm12, %v3632_v19  ;;  %v5412_v6 = vcombine.high %v5404_v12, %v5404_v12  ;;  %v5420_v41 = vrot.slane %v5404_v12, %v19147_v29  ;;  %v5411_v5 = vrot.slane %v5397_v45, %v19147_v29 }
 0x3e4   :  { %v4734_v60 = vsel %vm26987_vm10, %v4686_v48, %v20969_v10  ;;  %5594 = vrot.lane.b32.xlu1 %v20861_v54, %s26990_s23 }
 0x3e5   :  { %4794 = vst.msk [vmem:[%s26963_s2 + $0x186] sm:$0x1] %vm1894_vm12, %v4734_v60  ;;  %5596 = vrot.lane.b32.xlu0 %v20864_v9, %s26990_s23  ;;  %v5543_v7 = vrot.slane %v5420_v41, %v19158_v18  ;;  %v5442_v43 = vcombine.high %v5420_v41, %v5420_v41  ;;  %v5427_v2 = vrot.slane %v5411_v5, %v19147_v29 }
 0x3e6   :  { %v4070_v13 = vpop.permute.xlu1 %4069  ;;  %v5413_v0 = vcombine.high %v5411_v5, %v5411_v5 }
 0x3e7   :  { %v4702_v57 = vpop.permute.xlu0 %4701  ;;  %4132 = vst.msk [vmem:[%s26963_s2 + $0x1b5] sm:$0x1] %vm1894_vm12, %v4070_v13  ;;  %v5551_v52 = vrot.slane %v5442_v43, %v19158_v18  ;;  %v5559_v8 = vrot.slane %v5427_v2, %v19158_v18 }
 0x3e8   :  { %v4738_v50 = vsel %vm26987_vm10, %v4702_v57, %v20980_v16  ;;  %5598 = vrot.lane.b32.xlu1 %v20882_v14, %s26990_s23  ;;  %v5434_v16 = vrot.slane %v5412_v6, %v19147_v29  ;;  %v5441_v19 = vrot.slane %v5413_v0, %v19147_v29 }
 0x3e9   :  { %4798 = vst.msk [vmem:[%s26963_s2 + $0x1c6] sm:$0x1] %vm1894_vm12, %v4738_v50  ;;  %5600 = vrot.lane.b32.xlu0 %v20885_v28, %s26990_s23 }
 0x3ea   :  { %v4074_v39 = vpop.permute.xlu1 %4073  ;;  %v5547_v51 = vrot.slane %v5434_v16, %v19158_v18  ;;  %v5443_v61 = vcombine.high %v5434_v16, %v5434_v16  ;;  %v5563_v13 = vrot.slane %v5441_v19, %v19158_v18 }
 0x3eb   :  { %v4690_v42 = vpop.permute.xlu0 %4689  ;;  %4134 = vst.msk [vmem:[%s26963_s2 + $0x1d5] sm:$0x1] %vm1894_vm12, %v4074_v39  ;;  %v5687_v39 = vld [vmem:[#allocation3 + $0x50] sm:$0x3f] }
 0x3ec   :  { %5602 = vrot.lane.b32.xlu1 %v20904_v59, %s26990_s23  ;;  %v5555_v53 = vrot.slane %v5443_v61, %v19158_v18 }
 0x3ed   :  { %5604 = vrot.lane.b32.xlu0 %v20907_v37, %s26990_s23 }
 0x3ee   :  { %v4692_v10 = vpop.permute.xlu1 %4691 }
 0x3ef   :  { %v4694_v49 = vpop.permute.xlu0 %4693  ;;  %v4735_v15 = vsel %vm26987_vm10, %v4690_v42, %v4692_v10 }
 0x3f0   :  { %4795 = vst.msk [vmem:[%s26963_s2 + $0x196] sm:$0x1] %vm1894_vm12, %v4735_v15  ;;  %5606 = vrot.lane.b32.xlu1 %v20926_v31, %s26990_s23 }
 0x3f1   :  { %5608 = vrot.lane.b32.xlu0 %v20929_v22, %s26990_s23 }
 0x3f2   :  { %v4696_v17 = vpop.permute.xlu1 %4695 }
 0x3f3   :  { %v4706_v34 = vpop.permute.xlu0 %4705  ;;  %v4736_v20 = vsel %vm26987_vm10, %v4694_v49, %v4696_v17  ;;  %v5839_v49 = vcombine.high %v5687_v39, %v5687_v39  ;;  %v6126_v17 = vld [vmem:[#allocation3 + $0x8] sm:$0xff] }
 0x3f4   :  { %4796 = vst.msk [vmem:[%s26963_s2 + $0x1a6] sm:$0x1] %vm1894_vm12, %v4736_v20  ;;  %5610 = vrot.lane.b32.xlu1 %v20947_v24, %s26990_s23 }
 0x3f5   :  { %5612 = vrot.lane.b32.xlu0 %v5543_v7, %s26990_s23  ;;  %v5853_v16 = vrot.slane %v5839_v49, %v19147_v29 }
 0x3f6   :  { %v4708_v62 = vpop.permute.xlu1 %4707 }
 0x3f7   :  { %v4698_v44 = vpop.permute.xlu0 %4697  ;;  %v4739_v27 = vsel %vm26987_vm10, %v4706_v34, %v4708_v62  ;;  %v5869_v20 = vrot.slane %v5853_v16, %v19147_v29 }
 0x3f8   :  { %4799 = vst.msk [vmem:[%s26963_s2 + $0x1d6] sm:$0x1] %vm1894_vm12, %v4739_v27  ;;  %5614 = vrot.lane.b32.xlu1 %v5547_v51, %s26990_s23  ;;  %v5855_v51 = vcombine.high %v5853_v16, %v5853_v16  ;;  %v6134_v27 = vcombine.high %v6126_v17, %v6126_v17 }
 0x3f9   :  { %5616 = vrot.lane.b32.xlu0 %v5551_v52, %s26990_s23  ;;  %v6001_v2 = vrot.slane %v5869_v20, %v19158_v18 }
 0x3fa   :  { %v4700_v1 = vpop.permute.xlu1 %4699  ;;  %v5883_v0 = vrot.slane %v5855_v51, %v19147_v29 }
 0x3fb   :  { %v5123_v58 = vpop.permute.xlu0 %5122  ;;  %v4737_v48 = vsel %vm26987_vm10, %v4698_v44, %v4700_v1  ;;  %v18199_v1 = vpop.f32.mrb[0].mxu1  ;;  %vm1660_vm10 = vcmask 521216  }
 0x3fc   :  { %5212 = vst.msk [vmem:[%s26963_s2 + $0x7] sm:$0x1] %vm1894_vm12, %v5123_v58  ;;  %4797 = vst.msk [vmem:[%s26963_s2 + $0x1b6] sm:$0x1] %vm1894_vm12, %v4737_v48  ;;  %5618 = vrot.lane.b32.xlu1 %v5555_v53, %s26990_s23  ;;  %v17499_v53 = vclamps-f32 %v18199_v1, 3.0  ;;  %v1603_v58 = vpop.f32.mrb[1].mxu1 }
 0x3fd   :  { %5620 = vrot.lane.b32.xlu0 %v5559_v8, %s26990_s23  ;;  %v17496_v19 = vclamps-f32 %v1603_v58, 3.0 }
 0x3fe   :  { %v5125_v60 = vpop.permute.xlu1 %5124  ;;  %1654 = vst.msk [vmem:[#allocation3 + $0x28] sm:$0xff] %vm221_vm13, %v17499_v53 }
 0x3ff   :  { %v5127_v57 = vpop.permute.xlu0 %5126  ;;  %5213 = vst.msk [vmem:[%s26963_s2 + $0x17] sm:$0x1] %vm1894_vm12, %v5125_v60  ;;  %v6005_v60 = vrot.slane %v5883_v0, %v19158_v18 }
 0x400   :  { %5214 = vst.msk [vmem:[%s26963_s2 + $0x27] sm:$0x1] %vm1894_vm12, %v5127_v57  ;;  %5622 = vrot.lane.b32.xlu1 %v5563_v13, %s26990_s23  ;;  %s26994_s23 = smov 16  }
 0x401   :  { %6006 = vrot.lane.b32.xlu0 %v20713_v30, %s26988_s15  ;;  %1651 = vst.msk [vmem:[#allocation3 + $0x10] sm:$0xff] %vm221_vm13, %v17496_v19 }
 0x402   :  { %v5129_v32 = vpop.permute.xlu1 %5128 }
 0x403   :  { %v5131_v50 = vpop.permute.xlu0 %5130  ;;  %5215 = vst.msk [vmem:[%s26963_s2 + $0x37] sm:$0x1] %vm1894_vm12, %v5129_v32 }
 0x404   :  { %5216 = vst.msk [vmem:[%s26963_s2 + $0x47] sm:$0x1] %vm1894_vm12, %v5131_v50  ;;  %6008 = vrot.lane.b32.xlu1 %v20724_v47, %s26988_s15  ;;  %v6148_v50 = vrot.slane %v6134_v27, %v19147_v29 }
 0x405   :  { %6010 = vrot.lane.b32.xlu0 %v20729_v21, %s26988_s15 }
 0x406   :  { %v5133_v12 = vpop.permute.xlu1 %5132 }
 0x407   :  { %v5135_v30 = vpop.permute.xlu0 %5134  ;;  %5217 = vst.msk [vmem:[%s26963_s2 + $0x57] sm:$0x1] %vm1894_vm12, %v5133_v12  ;;  %v18202_v12 = vpop.f32.mrb[2].mxu1 }
 0x408   :  { %5218 = vst.msk [vmem:[%s26963_s2 + $0x67] sm:$0x1] %vm1894_vm12, %v5135_v30  ;;  %6012 = vrot.lane.b32.xlu1 %v20742_v40, %s26988_s15  ;;  %v17505_v30 = vclamps-f32 %v18202_v12, 3.0 }
 0x409   :  { %6014 = vrot.lane.b32.xlu0 %v20745_v3, %s26988_s15 }
 0x40a   :  { %v5137_v47 = vpop.permute.xlu1 %5136  ;;  %1661 = vst.msk [vmem:[#allocation3 + $0x58] sm:$0x3f] %vm1660_vm10, %v17505_v30 }
 0x40b   :  { %v5139_v21 = vpop.permute.xlu0 %5138  ;;  %5219 = vst.msk [vmem:[%s26963_s2 + $0x77] sm:$0x1] %vm1894_vm12, %v5137_v47  ;;  %v1615_v47 = vpop.f32.mrb[3].mxu1 }
 0x40c   :  { %5220 = vst.msk [vmem:[%s26963_s2 + $0x87] sm:$0x1] %vm1894_vm12, %v5139_v21  ;;  %6016 = vrot.lane.b32.xlu1 %v20762_v63, %s26988_s15 }
 0x40d   :  { %6018 = vrot.lane.b32.xlu0 %v20765_v56, %s26988_s15 }
 0x40e   :  { %v5141_v40 = vpop.permute.xlu1 %5140 }
 0x40f   :  { %v5143_v3 = vpop.permute.xlu0 %5142  ;;  %5221 = vst.msk [vmem:[%s26963_s2 + $0x97] sm:$0x1] %vm1894_vm12, %v5141_v40  ;;  %v17502_v40 = vclamps-f32 %v1615_v47, 3.0 }
 0x410   :  { %5222 = vst.msk [vmem:[%s26963_s2 + $0xa7] sm:$0x1] %vm1894_vm12, %v5143_v3  ;;  %6020 = vrot.lane.b32.xlu1 %v20781_v46, %s26988_s15 }
 0x411   :  { %6022 = vrot.lane.b32.xlu0 %v20784_v36, %s26988_s15  ;;  %1657 = vst.msk [vmem:[#allocation3 + $0x40] sm:$0xff] %vm221_vm13, %v17502_v40 }
 0x412   :  { %v5145_v63 = vpop.permute.xlu1 %5144 }
 0x413   :  { %v5147_v56 = vpop.permute.xlu0 %5146  ;;  %5223 = vst.msk [vmem:[%s26963_s2 + $0xb7] sm:$0x1] %vm1894_vm12, %v5145_v63 }
 0x414   :  { %5224 = vst.msk [vmem:[%s26963_s2 + $0xc7] sm:$0x1] %vm1894_vm12, %v5147_v56  ;;  %6024 = vrot.lane.b32.xlu1 %v20801_v35, %s26988_s15 }
 0x415   :  { %6026 = vrot.lane.b32.xlu0 %v20804_v4, %s26988_s15 }
 0x416   :  { %v5149_v46 = vpop.permute.xlu1 %5148 }
 0x417   :  { %v5151_v36 = vpop.permute.xlu0 %5150  ;;  %5225 = vst.msk [vmem:[%s26963_s2 + $0xd7] sm:$0x1] %vm1894_vm12, %v5149_v46 }
 0x418   :  { %5226 = vst.msk [vmem:[%s26963_s2 + $0xe7] sm:$0x1] %vm1894_vm12, %v5151_v36  ;;  %6028 = vrot.lane.b32.xlu1 %v20820_v55, %s26988_s15  ;;  %v6164_v36 = vrot.slane %v6148_v50, %v19147_v29 }
 0x419   :  { %6030 = vrot.lane.b32.xlu0 %v20823_v38, %s26988_s15 }
 0x41a   :  { %v5153_v35 = vpop.permute.xlu1 %5152 }
 0x41b   :  { %v5155_v4 = vpop.permute.xlu0 %5154  ;;  %5227 = vst.msk [vmem:[%s26963_s2 + $0xf7] sm:$0x1] %vm1894_vm12, %v5153_v35  ;;  %v6150_v35 = vcombine.high %v6148_v50, %v6148_v50 }
 0x41c   :  { %5228 = vst.msk [vmem:[%s26963_s2 + $0x107] sm:$0x1] %vm1894_vm12, %v5155_v4  ;;  %6032 = vrot.lane.b32.xlu1 %v20840_v23, %s26988_s15  ;;  %v6127_v4 = vld [vmem:[#allocation3 + $0x20] sm:$0xff] }
 0x41d   :  { %6034 = vrot.lane.b32.xlu0 %v20843_v25, %s26988_s15 }
 0x41e   :  { %v5157_v55 = vpop.permute.xlu1 %5156 }
 0x41f   :  { %v5159_v38 = vpop.permute.xlu0 %5158  ;;  %5229 = vst.msk [vmem:[%s26963_s2 + $0x117] sm:$0x1] %vm1894_vm12, %v5157_v55  ;;  %v6190_v55 = vrot.slane %v6127_v4, %v19147_v29 }
 0x420   :  { %5230 = vst.msk [vmem:[%s26963_s2 + $0x127] sm:$0x1] %vm1894_vm12, %v5159_v38  ;;  %6036 = vrot.lane.b32.xlu1 %v20861_v54, %s26988_s15  ;;  %v5846_v54 = vrot.slane %v5687_v39, %v19147_v29  ;;  %v21393_v39 = vrot.slane %v6164_v36, %v19158_v18 }
 0x421   :  { %6038 = vrot.lane.b32.xlu0 %v20864_v9, %s26988_s15 }
 0x422   :  { %v5161_v23 = vpop.permute.xlu1 %5160  ;;  %v5854_v10 = vcombine.high %v5846_v54, %v5846_v54 }
 0x423   :  { %v5163_v25 = vpop.permute.xlu0 %5162  ;;  %5231 = vst.msk [vmem:[%s26963_s2 + $0x137] sm:$0x1] %vm1894_vm12, %v5161_v23 }
 0x424   :  { %5232 = vst.msk [vmem:[%s26963_s2 + $0x147] sm:$0x1] %vm1894_vm12, %v5163_v25  ;;  %6040 = vrot.lane.b32.xlu1 %v20882_v14, %s26988_s15  ;;  %v5862_v14 = vrot.slane %v5846_v54, %v19147_v29  ;;  %v5876_v15 = vrot.slane %v5854_v10, %v19147_v29  ;;  %v6178_v54 = vrot.slane %v6150_v35, %v19147_v29 }
 0x425   :  { %6042 = vrot.lane.b32.xlu0 %v20885_v28, %s26988_s15 }
 0x426   :  { %v5165_v9 = vpop.permute.xlu1 %5164  ;;  %v5985_v45 = vrot.slane %v5862_v14, %v19158_v18  ;;  %v5989_v7 = vrot.slane %v5876_v15, %v19158_v18  ;;  %v5885_v5 = vcombine.high %v5876_v15, %v5876_v15 }
 0x427   :  { %v5167_v42 = vpop.permute.xlu0 %5166  ;;  %5233 = vst.msk [vmem:[%s26963_s2 + $0x157] sm:$0x1] %vm1894_vm12, %v5165_v9  ;;  %v6180_v9 = vcombine.high %v6164_v36, %v6164_v36 }
 0x428   :  { %5234 = vst.msk [vmem:[%s26963_s2 + $0x167] sm:$0x1] %vm1894_vm12, %v5167_v42  ;;  %6044 = vrot.lane.b32.xlu1 %v20904_v59, %s26988_s15  ;;  %v5884_v59 = vcombine.high %v5862_v14, %v5862_v14  ;;  %v5997_v52 = vrot.slane %v5885_v5, %v19158_v18  ;;  %v6206_v42 = vrot.slane %v6190_v55, %v19147_v29 }
 0x429   :  { %6046 = vrot.lane.b32.xlu0 %v20907_v37, %s26988_s15  ;;  %v6183_v14 = vcombine.high %v6127_v4, %v6127_v4  ;;  %v21413_v49 = vrot.slane %v6180_v9, %v19158_v18 }
 0x42a   :  { %v5169_v28 = vpop.permute.xlu1 %5168 }
 0x42b   :  { %v5171_v6 = vpop.permute.xlu0 %5170  ;;  %5235 = vst.msk [vmem:[%s26963_s2 + $0x177] sm:$0x1] %vm1894_vm12, %v5169_v28 }
 0x42c   :  { %5236 = vst.msk [vmem:[%s26963_s2 + $0x187] sm:$0x1] %vm1894_vm12, %v5171_v6  ;;  %6048 = vrot.lane.b32.xlu1 %v20926_v31, %s26988_s15  ;;  %v5993_v31 = vrot.slane %v5884_v59, %v19158_v18  ;;  %v21410_v6 = vrot.slane %v6178_v54, %v19158_v18  ;;  %v6182_v59 = vcombine.high %v6178_v54, %v6178_v54  ;;  %v6129_v54 = vld [vmem:[#allocation3 + $0x50] sm:$0x3f] }
 0x42d   :  { %6050 = vrot.lane.b32.xlu0 %v20929_v22, %s26988_s15  ;;  %v6141_v22 = vrot.slane %v6126_v17, %v19147_v29  ;;  %v21432_v17 = vrot.slane %v6206_v42, %v19158_v18  ;;  %v6288_v9 = vrot.slane %v6129_v54, %v19147_v29 }
 0x42e   :  { %v5173_v37 = vpop.permute.xlu1 %5172  ;;  %v21429_v15 = vrot.slane %v6182_v59, %v19158_v18 }
 0x42f   :  { %v5175_v41 = vpop.permute.xlu0 %5174  ;;  %5237 = vst.msk [vmem:[%s26963_s2 + $0x197] sm:$0x1] %vm1894_vm12, %v5173_v37  ;;  %v6149_v62 = vcombine.high %v6141_v22, %v6141_v22  ;;  %v6198_v37 = vcombine.high %v6190_v55, %v6190_v55 }
 0x430   :  { %5238 = vst.msk [vmem:[%s26963_s2 + $0x1a7] sm:$0x1] %vm1894_vm12, %v5175_v41  ;;  %6052 = vrot.lane.b32.xlu1 %v20947_v24, %s26988_s15  ;;  %v6157_v24 = vrot.slane %v6141_v22, %v19147_v29  ;;  %v6197_v41 = vrot.slane %v6183_v14, %v19147_v29  ;;  %v6228_v22 = vcombine.high %v6206_v42, %v6206_v42 }
 0x431   :  { %6054 = vrot.lane.b32.xlu0 %v5985_v45, %s26988_s15  ;;  %v6171_v8 = vrot.slane %v6149_v62, %v19147_v29  ;;  %v6128_v62 = vld [vmem:[#allocation3 + $0x38] sm:$0xff] }
 0x432   :  { %v5177_v34 = vpop.permute.xlu1 %5176  ;;  %v21351_v57 = vrot.slane %v6157_v24, %v19158_v18  ;;  %v6179_v32 = vcombine.high %v6157_v24, %v6157_v24  ;;  %v21452_v20 = vrot.slane %v6228_v22, %v19158_v18  ;;  %v6199_v24 = vcombine.high %v6197_v41, %v6197_v41 }
 0x433   :  { %v5179_v43 = vpop.permute.xlu0 %5178  ;;  %5239 = vst.msk [vmem:[%s26963_s2 + $0x1b7] sm:$0x1] %vm1894_vm12, %v5177_v34  ;;  %v21368_v21 = vrot.slane %v6171_v8, %v19158_v18  ;;  %v6181_v46 = vcombine.high %v6171_v8, %v6171_v8  ;;  %v6213_v34 = vrot.slane %v6197_v41, %v19147_v29  ;;  %v6304_v41 = vrot.slane %v6288_v9, %v19147_v29 }
 0x434   :  { %5240 = vst.msk [vmem:[%s26963_s2 + $0x1c7] sm:$0x1] %vm1894_vm12, %v5179_v43  ;;  %6056 = vrot.lane.b32.xlu1 %v5989_v7, %s26988_s15  ;;  %v21371_v56 = vrot.slane %v6179_v32, %v19158_v18  ;;  %v6227_v27 = vrot.slane %v6199_v24, %v19147_v29  ;;  %v6232_v32 = vcombine.high %v6128_v62, %v6128_v62 }
 0x435   :  { %6058 = vrot.lane.b32.xlu0 %v5993_v31, %s26988_s15  ;;  %v21390_v23 = vrot.slane %v6181_v46, %v19158_v18  ;;  %v6220_v31 = vrot.slane %v6198_v37, %v19147_v29  ;;  %v21471_v0 = vrot.slane %v6213_v34, %v19158_v18  ;;  %v6229_v1 = vcombine.high %v6213_v34, %v6213_v34 }
 0x436   :  { %v5181_v44 = vpop.permute.xlu1 %5180  ;;  %v21488_v19 = vrot.slane %v6227_v27, %v19158_v18 }
 0x437   :  { %v5565_v61 = vpop.permute.xlu0 %5564  ;;  %5241 = vst.msk [vmem:[%s26963_s2 + $0x1d7] sm:$0x1] %vm1894_vm12, %v5181_v44  ;;  %v21449_v43 = vrot.slane %v6220_v31, %v19158_v18  ;;  %v6230_v51 = vcombine.high %v6220_v31, %v6220_v31  ;;  %v6239_v44 = vrot.slane %v6128_v62, %v19147_v29 }
 0x438   :  { %5654 = vst.msk [vmem:[%s26963_s2 + $0x8] sm:$0x1] %vm1894_vm12, %v5565_v61  ;;  %6060 = vrot.lane.b32.xlu1 %v5997_v52, %s26988_s15 }
 0x439   :  { %6062 = vrot.lane.b32.xlu0 %v6001_v2, %s26988_s15  ;;  %v21468_v61 = vrot.slane %v6230_v51, %v19158_v18  ;;  %v6255_v53 = vrot.slane %v6239_v44, %v19147_v29  ;;  %v6247_v58 = vcombine.high %v6239_v44, %v6239_v44 }
 0x43a   :  { %v5567_v48 = vpop.permute.xlu1 %5566 }
 0x43b   :  { %v5569_v13 = vpop.permute.xlu0 %5568  ;;  %5655 = vst.msk [vmem:[%s26963_s2 + $0x18] sm:$0x1] %vm1894_vm12, %v5567_v48  ;;  %v6269_v50 = vrot.slane %v6247_v58, %v19147_v29  ;;  %v21510_v40 = vrot.slane %v6255_v53, %v19158_v18 }
 0x43c   :  { %5656 = vst.msk [vmem:[%s26963_s2 + $0x28] sm:$0x1] %vm1894_vm12, %v5569_v13  ;;  %6064 = vrot.lane.b32.xlu1 %v6005_v60, %s26988_s15  ;;  %v21491_v60 = vrot.slane %v6229_v1, %v19158_v18  ;;  %v6231_v13 = vcombine.high %v6227_v27, %v6227_v27  ;;  %v6326_v27 = vcombine.high %v6304_v41, %v6304_v41 }
 0x43d   :  { %6448 = vrot.lane.b32.xlu0 %v21351_v57, %s26992_s18  ;;  %v21526_v46 = vrot.slane %v6269_v50, %v19158_v18  ;;  %v6279_v55 = vcombine.high %v6269_v50, %v6269_v50 }
 0x43e   :  { %v5571_v3 = vpop.permute.xlu1 %5570  ;;  %v21507_v30 = vrot.slane %v6231_v13, %v19158_v18 }
 0x43f   :  { %v5573_v63 = vpop.permute.xlu0 %5572  ;;  %5657 = vst.msk [vmem:[%s26963_s2 + $0x38] sm:$0x1] %vm1894_vm12, %v5571_v3  ;;  %v6277_v3 = vcombine.high %v6255_v53, %v6255_v53  ;;  %v21546_v14 = vrot.slane %v6279_v55, %v19158_v18 }
 0x440   :  { %5658 = vst.msk [vmem:[%s26963_s2 + $0x48] sm:$0x1] %vm1894_vm12, %v5573_v63  ;;  %6450 = vrot.lane.b32.xlu1 %v21368_v21, %s26992_s18  ;;  %v6246_v63 = vrot.slane %v6232_v32, %v19147_v29 }
 0x441   :  { %6452 = vrot.lane.b32.xlu0 %v21371_v56, %s26992_s18  ;;  %v21529_v4 = vrot.slane %v6277_v3, %v19158_v18 }
 0x442   :  { %v5575_v38 = vpop.permute.xlu1 %5574 }
 0x443   :  { %v5577_v25 = vpop.permute.xlu0 %5576  ;;  %5659 = vst.msk [vmem:[%s26963_s2 + $0x58] sm:$0x1] %vm1894_vm12, %v5575_v38  ;;  %v6262_v38 = vrot.slane %v6246_v63, %v19147_v29 }
 0x444   :  { %5660 = vst.msk [vmem:[%s26963_s2 + $0x68] sm:$0x1] %vm1894_vm12, %v5577_v25  ;;  %6454 = vrot.lane.b32.xlu1 %v21390_v23, %s26992_s18  ;;  %v6248_v25 = vcombine.high %v6246_v63, %v6246_v63 }
 0x445   :  { %6456 = vrot.lane.b32.xlu0 %v21393_v39, %s26992_s18  ;;  %v6278_v37 = vcombine.high %v6262_v38, %v6262_v38 }
 0x446   :  { %v5579_v28 = vpop.permute.xlu1 %5578  ;;  %v6276_v59 = vrot.slane %v6248_v25, %v19147_v29 }
 0x447   :  { %v5581_v10 = vpop.permute.xlu0 %5580  ;;  %5661 = vst.msk [vmem:[%s26963_s2 + $0x78] sm:$0x1] %vm1894_vm12, %v5579_v28  ;;  %v21569_v34 = vrot.slane %v6278_v37, %v19158_v18 }
 0x448   :  { %5662 = vst.msk [vmem:[%s26963_s2 + $0x88] sm:$0x1] %vm1894_vm12, %v5581_v10  ;;  %6458 = vrot.lane.b32.xlu1 %v21410_v6, %s26992_s18  ;;  %v21549_v10 = vrot.slane %v6262_v38, %v19158_v18  ;;  %v21566_v31 = vrot.slane %v6276_v59, %v19158_v18 }
 0x449   :  { %6460 = vrot.lane.b32.xlu0 %v21413_v49, %s26992_s18 }
 0x44a   :  { %v5583_v45 = vpop.permute.xlu1 %5582 }
 0x44b   :  { %v5585_v16 = vpop.permute.xlu0 %5584  ;;  %5663 = vst.msk [vmem:[%s26963_s2 + $0x98] sm:$0x1] %vm1894_vm12, %v5583_v45  ;;  %v6281_v45 = vcombine.high %v6129_v54, %v6129_v54 }
 0x44c   :  { %5664 = vst.msk [vmem:[%s26963_s2 + $0xa8] sm:$0x1] %vm1894_vm12, %v5585_v16  ;;  %6462 = vrot.lane.b32.xlu1 %v21429_v15, %s26992_s18 }
 0x44d   :  { %6464 = vrot.lane.b32.xlu0 %v21432_v17, %s26992_s18  ;;  %v6295_v51 = vrot.slane %v6281_v45, %v19147_v29 }
 0x44e   :  { %v5587_v7 = vpop.permute.xlu1 %5586 }
 0x44f   :  { %v5589_v5 = vpop.permute.xlu0 %5588  ;;  %5665 = vst.msk [vmem:[%s26963_s2 + $0xb8] sm:$0x1] %vm1894_vm12, %v5587_v7  ;;  %v6280_v7 = vcombine.high %v6276_v59, %v6276_v59  ;;  %v6311_v1 = vrot.slane %v6295_v51, %v19147_v29  ;;  %v6297_v32 = vcombine.high %v6295_v51, %v6295_v51 }
 0x450   :  { %5666 = vst.msk [vmem:[%s26963_s2 + $0xc8] sm:$0x1] %vm1894_vm12, %v5589_v5  ;;  %6466 = vrot.lane.b32.xlu1 %v21449_v43, %s26992_s18  ;;  %v6296_v5 = vcombine.high %v6288_v9, %v6288_v9 }
 0x451   :  { %6468 = vrot.lane.b32.xlu0 %v21452_v20, %s26992_s18  ;;  %v21585_v62 = vrot.slane %v6280_v7, %v19158_v18  ;;  %v6443_v3 = vrot.slane %v6311_v1, %v19158_v18  ;;  %v6325_v63 = vrot.slane %v6297_v32, %v19147_v29 }
 0x452   :  { %v5591_v52 = vpop.permute.xlu1 %5590 }
 0x453   :  { %v5593_v2 = vpop.permute.xlu0 %5592  ;;  %5667 = vst.msk [vmem:[%s26963_s2 + $0xd8] sm:$0x1] %vm1894_vm12, %v5591_v52  ;;  %v6427_v52 = vrot.slane %v6304_v41, %v19158_v18 }
 0x454   :  { %5668 = vst.msk [vmem:[%s26963_s2 + $0xe8] sm:$0x1] %vm1894_vm12, %v5593_v2  ;;  %6470 = vrot.lane.b32.xlu1 %v21468_v61, %s26992_s18  ;;  %v6318_v2 = vrot.slane %v6296_v5, %v19147_v29 }
 0x455   :  { %6472 = vrot.lane.b32.xlu0 %v21471_v0, %s26992_s18 }
 0x456   :  { %v5595_v8 = vpop.permute.xlu1 %5594  ;;  %v6431_v58 = vrot.slane %v6318_v2, %v19158_v18  ;;  %v6327_v13 = vcombine.high %v6318_v2, %v6318_v2  ;;  %v6571_v2 = vld [vmem:[#allocation3 + $0x50] sm:$0x3f] }
 0x457   :  { %v5597_v48 = vpop.permute.xlu0 %5596  ;;  %5669 = vst.msk [vmem:[%s26963_s2 + $0xf8] sm:$0x1] %vm1894_vm12, %v5595_v8  ;;  %v6723_v32 = vcombine.high %v6571_v2, %v6571_v2 }
 0x458   :  { %5670 = vst.msk [vmem:[%s26963_s2 + $0x108] sm:$0x1] %vm1894_vm12, %v5597_v48  ;;  %6474 = vrot.lane.b32.xlu1 %v21488_v19, %s26992_s18  ;;  %v6435_v48 = vrot.slane %v6326_v27, %v19158_v18  ;;  %v6730_v27 = vrot.slane %v6571_v2, %v19147_v29 }
 0x459   :  { %6476 = vrot.lane.b32.xlu0 %v21491_v60, %s26992_s18 }
 0x45a   :  { %v5599_v12 = vpop.permute.xlu1 %5598 }
 0x45b   :  { %v5601_v47 = vpop.permute.xlu0 %5600  ;;  %5671 = vst.msk [vmem:[%s26963_s2 + $0x118] sm:$0x1] %vm1894_vm12, %v5599_v12  ;;  %v6439_v12 = vrot.slane %v6327_v13, %v19158_v18  ;;  %v6738_v13 = vcombine.high %v6730_v27, %v6730_v27 }
 0x45c   :  { %5672 = vst.msk [vmem:[%s26963_s2 + $0x128] sm:$0x1] %vm1894_vm12, %v5601_v47  ;;  %6478 = vrot.lane.b32.xlu1 %v21507_v30, %s26992_s18 }
 0x45d   :  { %6480 = vrot.lane.b32.xlu0 %v21510_v40, %s26992_s18 }
 0x45e   :  { %v5603_v36 = vpop.permute.xlu1 %5602 }
 0x45f   :  { %v5605_v35 = vpop.permute.xlu0 %5604  ;;  %5673 = vst.msk [vmem:[%s26963_s2 + $0x138] sm:$0x1] %vm1894_vm12, %v5603_v36 }
 0x460   :  { %5674 = vst.msk [vmem:[%s26963_s2 + $0x148] sm:$0x1] %vm1894_vm12, %v5605_v35  ;;  %6482 = vrot.lane.b32.xlu1 %v21526_v46, %s26992_s18  ;;  %v6447_v35 = vrot.slane %v6325_v63, %v19158_v18  ;;  %v6760_v63 = vrot.slane %v6738_v13, %v19147_v29 }
 0x461   :  { %6484 = vrot.lane.b32.xlu0 %v21529_v4, %s26992_s18 }
 0x462   :  { %v5607_v42 = vpop.permute.xlu1 %5606 }
 0x463   :  { %v5609_v28 = vpop.permute.xlu0 %5608  ;;  %5675 = vst.msk [vmem:[%s26963_s2 + $0x158] sm:$0x1] %vm1894_vm12, %v5607_v42 }
 0x464   :  { %5676 = vst.msk [vmem:[%s26963_s2 + $0x168] sm:$0x1] %vm1894_vm12, %v5609_v28  ;;  %6486 = vrot.lane.b32.xlu1 %v21546_v14, %s26992_s18 }
 0x465   :  { %6488 = vrot.lane.b32.xlu0 %v21549_v10, %s26992_s18 }
 0x466   :  { %v5611_v16 = vpop.permute.xlu1 %5610 }
 0x467   :  { %v5613_v22 = vpop.permute.xlu0 %5612  ;;  %5677 = vst.msk [vmem:[%s26963_s2 + $0x178] sm:$0x1] %vm1894_vm12, %v5611_v16 }
 0x468   :  { %5678 = vst.msk [vmem:[%s26963_s2 + $0x188] sm:$0x1] %vm1894_vm12, %v5613_v22  ;;  %6490 = vrot.lane.b32.xlu1 %v21566_v31, %s26992_s18 }
 0x469   :  { %6492 = vrot.lane.b32.xlu0 %v21569_v34, %s26992_s18 }
 0x46a   :  { %v5615_v24 = vpop.permute.xlu1 %5614 }
 0x46b   :  { %v5617_v44 = vpop.permute.xlu0 %5616  ;;  %5679 = vst.msk [vmem:[%s26963_s2 + $0x198] sm:$0x1] %vm1894_vm12, %v5615_v24 }
 0x46c   :  { %5680 = vst.msk [vmem:[%s26963_s2 + $0x1a8] sm:$0x1] %vm1894_vm12, %v5617_v44  ;;  %6494 = vrot.lane.b32.xlu1 %v21585_v62, %s26992_s18 }
 0x46d   :  { %6496 = vrot.lane.b32.xlu0 %v6427_v52, %s26992_s18 }
 0x46e   :  { %v5619_v53 = vpop.permute.xlu1 %5618 }
 0x46f   :  { %v5621_v8 = vpop.permute.xlu0 %5620  ;;  %5681 = vst.msk [vmem:[%s26963_s2 + $0x1b8] sm:$0x1] %vm1894_vm12, %v5619_v53 }
 0x470   :  { %5682 = vst.msk [vmem:[%s26963_s2 + $0x1c8] sm:$0x1] %vm1894_vm12, %v5621_v8  ;;  %6498 = vrot.lane.b32.xlu1 %v6431_v58, %s26992_s18  ;;  %v6746_v58 = vrot.slane %v6730_v27, %v19147_v29 }
 0x471   :  { %6500 = vrot.lane.b32.xlu0 %v6435_v48, %s26992_s18 }
 0x472   :  { %v5623_v50 = vpop.permute.xlu1 %5622 }
 0x473   :  { %v6007_v47 = vpop.permute.xlu0 %6006  ;;  %5683 = vst.msk [vmem:[%s26963_s2 + $0x1d8] sm:$0x1] %vm1894_vm12, %v5623_v50  ;;  %v6768_v50 = vcombine.high %v6746_v58, %v6746_v58 }
 0x474   :  { %6096 = vst.msk [vmem:[%s26963_s2 + $0x9] sm:$0x1] %vm1894_vm12, %v6007_v47  ;;  %6502 = vrot.lane.b32.xlu1 %v6439_v12, %s26992_s18 }
 0x475   :  { %6504 = vrot.lane.b32.xlu0 %v6443_v3, %s26992_s18  ;;  %v6869_v3 = vrot.slane %v6746_v58, %v19158_v18 }
 0x476   :  { %v6009_v36 = vpop.permute.xlu1 %6008 }
 0x477   :  { %v6011_v55 = vpop.permute.xlu0 %6010  ;;  %6097 = vst.msk [vmem:[%s26963_s2 + $0x19] sm:$0x1] %vm1894_vm12, %v6009_v36  ;;  %v6737_v36 = vrot.slane %v6723_v32, %v19147_v29 }
 0x478   :  { %6098 = vst.msk [vmem:[%s26963_s2 + $0x29] sm:$0x1] %vm1894_vm12, %v6011_v55  ;;  %6506 = vrot.lane.b32.xlu1 %v6447_v35, %s26992_s18  ;;  %v6877_v35 = vrot.slane %v6768_v50, %v19158_v18 }
 0x479   :  { %6890 = vrot.lane.b32.xlu0 %v21351_v57, %s26996_s17 }
 0x47a   :  { %v6013_v38 = vpop.permute.xlu1 %6012 }
 0x47b   :  { %v6015_v25 = vpop.permute.xlu0 %6014  ;;  %6099 = vst.msk [vmem:[%s26963_s2 + $0x39] sm:$0x1] %vm1894_vm12, %v6013_v38  ;;  %v6873_v38 = vrot.slane %v6760_v63, %v19158_v18 }
 0x47c   :  { %6100 = vst.msk [vmem:[%s26963_s2 + $0x49] sm:$0x1] %vm1894_vm12, %v6015_v25  ;;  %6892 = vrot.lane.b32.xlu1 %v21368_v21, %s26996_s17 }
 0x47d   :  { %6894 = vrot.lane.b32.xlu0 %v21371_v56, %s26996_s17 }
 0x47e   :  { %v6017_v54 = vpop.permute.xlu1 %6016 }
 0x47f   :  { %v6019_v9 = vpop.permute.xlu0 %6018  ;;  %6101 = vst.msk [vmem:[%s26963_s2 + $0x59] sm:$0x1] %vm1894_vm12, %v6017_v54  ;;  %v6769_v54 = vcombine.high %v6760_v63, %v6760_v63 }
 0x480   :  { %6102 = vst.msk [vmem:[%s26963_s2 + $0x69] sm:$0x1] %vm1894_vm12, %v6019_v9  ;;  %6896 = vrot.lane.b32.xlu1 %v21390_v23, %s26996_s17  ;;  %v6753_v9 = vrot.slane %v6737_v36, %v19147_v29 }
 0x481   :  { %6898 = vrot.lane.b32.xlu0 %v21393_v39, %s26996_s17 }
 0x482   :  { %v6021_v42 = vpop.permute.xlu1 %6020 }
 0x483   :  { %v6023_v28 = vpop.permute.xlu0 %6022  ;;  %6103 = vst.msk [vmem:[%s26963_s2 + $0x79] sm:$0x1] %vm1894_vm12, %v6021_v42  ;;  %v6739_v42 = vcombine.high %v6737_v36, %v6737_v36 }
 0x484   :  { %6104 = vst.msk [vmem:[%s26963_s2 + $0x89] sm:$0x1] %vm1894_vm12, %v6023_v28  ;;  %6900 = vrot.lane.b32.xlu1 %v21410_v6, %s26996_s17 }
 0x485   :  { %6902 = vrot.lane.b32.xlu0 %v21413_v49, %s26996_s17 }
 0x486   :  { %v6025_v59 = vpop.permute.xlu1 %6024 }
 0x487   :  { %v6027_v37 = vpop.permute.xlu0 %6026  ;;  %6105 = vst.msk [vmem:[%s26963_s2 + $0x99] sm:$0x1] %vm1894_vm12, %v6025_v59  ;;  %v6881_v59 = vrot.slane %v6769_v54, %v19158_v18 }
 0x488   :  { %6106 = vst.msk [vmem:[%s26963_s2 + $0xa9] sm:$0x1] %vm1894_vm12, %v6027_v37  ;;  %6904 = vrot.lane.b32.xlu1 %v21429_v15, %s26996_s17 }
 0x489   :  { %6906 = vrot.lane.b32.xlu0 %v21432_v17, %s26996_s17 }
 0x48a   :  { %v6029_v41 = vpop.permute.xlu1 %6028 }
 0x48b   :  { %v6031_v45 = vpop.permute.xlu0 %6030  ;;  %6107 = vst.msk [vmem:[%s26963_s2 + $0xb9] sm:$0x1] %vm1894_vm12, %v6029_v41  ;;  %v6885_v41 = vrot.slane %v6753_v9, %v19158_v18 }
 0x48c   :  { %6108 = vst.msk [vmem:[%s26963_s2 + $0xc9] sm:$0x1] %vm1894_vm12, %v6031_v45  ;;  %6908 = vrot.lane.b32.xlu1 %v21449_v43, %s26996_s17  ;;  %v6767_v45 = vrot.slane %v6739_v42, %v19147_v29 }
 0x48d   :  { %6910 = vrot.lane.b32.xlu0 %v21452_v20, %s26996_s17 }
 0x48e   :  { %v6033_v16 = vpop.permute.xlu1 %6032 }
 0x48f   :  { %v6035_v22 = vpop.permute.xlu0 %6034  ;;  %6109 = vst.msk [vmem:[%s26963_s2 + $0xd9] sm:$0x1] %vm1894_vm12, %v6033_v16 }
 0x490   :  { %6110 = vst.msk [vmem:[%s26963_s2 + $0xe9] sm:$0x1] %vm1894_vm12, %v6035_v22  ;;  %6912 = vrot.lane.b32.xlu1 %v21468_v61, %s26996_s17  ;;  %v6889_v22 = vrot.slane %v6767_v45, %v19158_v18 }
 0x491   :  { %6914 = vrot.lane.b32.xlu0 %v21471_v0, %s26996_s17 }
 0x492   :  { %v6037_v7 = vpop.permute.xlu1 %6036 }
 0x493   :  { %v6039_v5 = vpop.permute.xlu0 %6038  ;;  %6111 = vst.msk [vmem:[%s26963_s2 + $0xf9] sm:$0x1] %vm1894_vm12, %v6037_v7 }
 0x494   :  { %6112 = vst.msk [vmem:[%s26963_s2 + $0x109] sm:$0x1] %vm1894_vm12, %v6039_v5  ;;  %6916 = vrot.lane.b32.xlu1 %v21488_v19, %s26996_s17 }
 0x495   :  { %6918 = vrot.lane.b32.xlu0 %v21491_v60, %s26996_s17 }
 0x496   :  { %v6041_v51 = vpop.permute.xlu1 %6040 }
 0x497   :  { %v6043_v24 = vpop.permute.xlu0 %6042  ;;  %6113 = vst.msk [vmem:[%s26963_s2 + $0x119] sm:$0x1] %vm1894_vm12, %v6041_v51 }
 0x498   :  { %6114 = vst.msk [vmem:[%s26963_s2 + $0x129] sm:$0x1] %vm1894_vm12, %v6043_v24  ;;  %6920 = vrot.lane.b32.xlu1 %v21507_v30, %s26996_s17 }
 0x499   :  { %6922 = vrot.lane.b32.xlu0 %v21510_v40, %s26996_s17 }
 0x49a   :  { %v6045_v44 = vpop.permute.xlu1 %6044 }
 0x49b   :  { %v6047_v52 = vpop.permute.xlu0 %6046  ;;  %6115 = vst.msk [vmem:[%s26963_s2 + $0x139] sm:$0x1] %vm1894_vm12, %v6045_v44  ;;  %v7013_v44 = vld [vmem:[#allocation3 + $0x50] sm:$0x3f] }
 0x49c   :  { %6116 = vst.msk [vmem:[%s26963_s2 + $0x149] sm:$0x1] %vm1894_vm12, %v6047_v52  ;;  %6924 = vrot.lane.b32.xlu1 %v21526_v46, %s26996_s17 }
 0x49d   :  { %6926 = vrot.lane.b32.xlu0 %v21529_v4, %s26996_s17 }
 0x49e   :  { %v6049_v1 = vpop.permute.xlu1 %6048 }
 0x49f   :  { %v6051_v53 = vpop.permute.xlu0 %6050  ;;  %6117 = vst.msk [vmem:[%s26963_s2 + $0x159] sm:$0x1] %vm1894_vm12, %v6049_v1 }
 0x4a0   :  { %6118 = vst.msk [vmem:[%s26963_s2 + $0x169] sm:$0x1] %vm1894_vm12, %v6051_v53  ;;  %6928 = vrot.lane.b32.xlu1 %v21546_v14, %s26996_s17 }
 0x4a1   :  { %6930 = vrot.lane.b32.xlu0 %v21549_v10, %s26996_s17 }
 0x4a2   :  { %v6053_v8 = vpop.permute.xlu1 %6052 }
 0x4a3   :  { %v6055_v48 = vpop.permute.xlu0 %6054  ;;  %6119 = vst.msk [vmem:[%s26963_s2 + $0x179] sm:$0x1] %vm1894_vm12, %v6053_v8 }
 0x4a4   :  { %6120 = vst.msk [vmem:[%s26963_s2 + $0x189] sm:$0x1] %vm1894_vm12, %v6055_v48  ;;  %6932 = vrot.lane.b32.xlu1 %v21566_v31, %s26996_s17 }
 0x4a5   :  { %6934 = vrot.lane.b32.xlu0 %v21569_v34, %s26996_s17 }
 0x4a6   :  { %v6057_v12 = vpop.permute.xlu1 %6056 }
 0x4a7   :  { %v6059_v47 = vpop.permute.xlu0 %6058  ;;  %6121 = vst.msk [vmem:[%s26963_s2 + $0x199] sm:$0x1] %vm1894_vm12, %v6057_v12 }
 0x4a8   :  { %6122 = vst.msk [vmem:[%s26963_s2 + $0x1a9] sm:$0x1] %vm1894_vm12, %v6059_v47  ;;  %6936 = vrot.lane.b32.xlu1 %v21585_v62, %s26996_s17 }
 0x4a9   :  { %6938 = vrot.lane.b32.xlu0 %v6869_v3, %s26996_s17 }
 0x4aa   :  { %v6061_v55 = vpop.permute.xlu1 %6060 }
 0x4ab   :  { %v6063_v25 = vpop.permute.xlu0 %6062  ;;  %6123 = vst.msk [vmem:[%s26963_s2 + $0x1b9] sm:$0x1] %vm1894_vm12, %v6061_v55 }
 0x4ac   :  { %6124 = vst.msk [vmem:[%s26963_s2 + $0x1c9] sm:$0x1] %vm1894_vm12, %v6063_v25  ;;  %6940 = vrot.lane.b32.xlu1 %v6873_v38, %s26996_s17 }
 0x4ad   :  { %6942 = vrot.lane.b32.xlu0 %v6877_v35, %s26996_s17 }
 0x4ae   :  { %v6065_v28 = vpop.permute.xlu1 %6064 }
 0x4af   :  { %v6449_v37 = vpop.permute.xlu0 %6448  ;;  %6125 = vst.msk [vmem:[%s26963_s2 + $0x1d9] sm:$0x1] %vm1894_vm12, %v6065_v28 }
 0x4b0   :  { %6538 = vst.msk [vmem:[%s26963_s2 + $0xa] sm:$0x1] %vm1894_vm12, %v6449_v37  ;;  %6944 = vrot.lane.b32.xlu1 %v6881_v59, %s26996_s17 }
 0x4b1   :  { %6946 = vrot.lane.b32.xlu0 %v6885_v41, %s26996_s17 }
 0x4b2   :  { %v6451_v16 = vpop.permute.xlu1 %6450 }
 0x4b3   :  { %v6453_v7 = vpop.permute.xlu0 %6452  ;;  %6539 = vst.msk [vmem:[%s26963_s2 + $0x1a] sm:$0x1] %vm1894_vm12, %v6451_v16 }
 0x4b4   :  { %6540 = vst.msk [vmem:[%s26963_s2 + $0x2a] sm:$0x1] %vm1894_vm12, %v6453_v7  ;;  %6948 = vrot.lane.b32.xlu1 %v6889_v22, %s26996_s17  ;;  %s27063_s17 = smov 36  }
 0x4b5   :  { %7332 = vrot.lane.b32.xlu0 %v21351_v57, %s26994_s23 }
 0x4b6   :  { %v6455_v5 = vpop.permute.xlu1 %6454 }
 0x4b7   :  { %v6457_v51 = vpop.permute.xlu0 %6456  ;;  %6541 = vst.msk [vmem:[%s26963_s2 + $0x3a] sm:$0x1] %vm1894_vm12, %v6455_v5 }
 0x4b8   :  { %6542 = vst.msk [vmem:[%s26963_s2 + $0x4a] sm:$0x1] %vm1894_vm12, %v6457_v51  ;;  %7334 = vrot.lane.b32.xlu1 %v21368_v21, %s26994_s23 }
 0x4b9   :  { %7336 = vrot.lane.b32.xlu0 %v21371_v56, %s26994_s23 }
 0x4ba   :  { %v6459_v24 = vpop.permute.xlu1 %6458 }
 0x4bb   :  { %v6461_v57 = vpop.permute.xlu0 %6460  ;;  %6543 = vst.msk [vmem:[%s26963_s2 + $0x5a] sm:$0x1] %vm1894_vm12, %v6459_v24 }
 0x4bc   :  { %6544 = vst.msk [vmem:[%s26963_s2 + $0x6a] sm:$0x1] %vm1894_vm12, %v6461_v57  ;;  %7338 = vrot.lane.b32.xlu1 %v21390_v23, %s26994_s23 }
 0x4bd   :  { %7340 = vrot.lane.b32.xlu0 %v21393_v39, %s26994_s23 }
 0x4be   :  { %v6463_v21 = vpop.permute.xlu1 %6462 }
 0x4bf   :  { %v6465_v56 = vpop.permute.xlu0 %6464  ;;  %6545 = vst.msk [vmem:[%s26963_s2 + $0x7a] sm:$0x1] %vm1894_vm12, %v6463_v21 }
 0x4c0   :  { %6546 = vst.msk [vmem:[%s26963_s2 + $0x8a] sm:$0x1] %vm1894_vm12, %v6465_v56  ;;  %7342 = vrot.lane.b32.xlu1 %v21410_v6, %s26994_s23  ;;  %v7453_v56 = vld [vmem:[#allocation3 + $0x28] sm:$0xff] }
 0x4c1   :  { %7344 = vrot.lane.b32.xlu0 %v21413_v49, %s26994_s23 }
 0x4c2   :  { %v6467_v23 = vpop.permute.xlu1 %6466 }
 0x4c3   :  { %v6469_v39 = vpop.permute.xlu0 %6468  ;;  %6547 = vst.msk [vmem:[%s26963_s2 + $0x9a] sm:$0x1] %vm1894_vm12, %v6467_v23 }
 0x4c4   :  { %6548 = vst.msk [vmem:[%s26963_s2 + $0xaa] sm:$0x1] %vm1894_vm12, %v6469_v39  ;;  %7346 = vrot.lane.b32.xlu1 %v21429_v15, %s26994_s23 }
 0x4c5   :  { %7348 = vrot.lane.b32.xlu0 %v21432_v17, %s26994_s23 }
 0x4c6   :  { %v6471_v6 = vpop.permute.xlu1 %6470 }
 0x4c7   :  { %v6473_v49 = vpop.permute.xlu0 %6472  ;;  %6549 = vst.msk [vmem:[%s26963_s2 + $0xba] sm:$0x1] %vm1894_vm12, %v6471_v6 }
 0x4c8   :  { %6550 = vst.msk [vmem:[%s26963_s2 + $0xca] sm:$0x1] %vm1894_vm12, %v6473_v49  ;;  %7350 = vrot.lane.b32.xlu1 %v21449_v43, %s26994_s23 }
 0x4c9   :  { %7352 = vrot.lane.b32.xlu0 %v21452_v20, %s26994_s23 }
 0x4ca   :  { %v6475_v15 = vpop.permute.xlu1 %6474 }
 0x4cb   :  { %v6477_v17 = vpop.permute.xlu0 %6476  ;;  %6551 = vst.msk [vmem:[%s26963_s2 + $0xda] sm:$0x1] %vm1894_vm12, %v6475_v15 }
 0x4cc   :  { %6552 = vst.msk [vmem:[%s26963_s2 + $0xea] sm:$0x1] %vm1894_vm12, %v6477_v17  ;;  %7354 = vrot.lane.b32.xlu1 %v21468_v61, %s26994_s23 }
 0x4cd   :  { %7356 = vrot.lane.b32.xlu0 %v21471_v0, %s26994_s23 }
 0x4ce   :  { %v6479_v43 = vpop.permute.xlu1 %6478 }
 0x4cf   :  { %v6481_v20 = vpop.permute.xlu0 %6480  ;;  %6553 = vst.msk [vmem:[%s26963_s2 + $0xfa] sm:$0x1] %vm1894_vm12, %v6479_v43  ;;  %v7516_v43 = vrot.slane %v7453_v56, %v19147_v29 }
 0x4d0   :  { %6554 = vst.msk [vmem:[%s26963_s2 + $0x10a] sm:$0x1] %vm1894_vm12, %v6481_v20  ;;  %7358 = vrot.lane.b32.xlu1 %v21488_v19, %s26994_s23 }
 0x4d1   :  { %7360 = vrot.lane.b32.xlu0 %v21491_v60, %s26994_s23 }
 0x4d2   :  { %v6483_v61 = vpop.permute.xlu1 %6482 }
 0x4d3   :  { %v6485_v0 = vpop.permute.xlu0 %6484  ;;  %6555 = vst.msk [vmem:[%s26963_s2 + $0x11a] sm:$0x1] %vm1894_vm12, %v6483_v61  ;;  %v7509_v61 = vcombine.high %v7453_v56, %v7453_v56 }
 0x4d4   :  { %6556 = vst.msk [vmem:[%s26963_s2 + $0x12a] sm:$0x1] %vm1894_vm12, %v6485_v0  ;;  %7362 = vrot.lane.b32.xlu1 %v21507_v30, %s26994_s23  ;;  %v7172_v30 = vrot.slane %v7013_v44, %v19147_v29 }
 0x4d5   :  { %7364 = vrot.lane.b32.xlu0 %v21510_v40, %s26994_s23 }
 0x4d6   :  { %v6487_v19 = vpop.permute.xlu1 %6486  ;;  %v7188_v1 = vrot.slane %v7172_v30, %v19147_v29 }
 0x4d7   :  { %v6489_v60 = vpop.permute.xlu0 %6488  ;;  %6557 = vst.msk [vmem:[%s26963_s2 + $0x13a] sm:$0x1] %vm1894_vm12, %v6487_v19 }
 0x4d8   :  { %6558 = vst.msk [vmem:[%s26963_s2 + $0x14a] sm:$0x1] %vm1894_vm12, %v6489_v60  ;;  %7366 = vrot.lane.b32.xlu1 %v21526_v46, %s26994_s23  ;;  %v7180_v46 = vcombine.high %v7172_v30, %v7172_v30  ;;  %v7311_v8 = vrot.slane %v7188_v1, %v19158_v18  ;;  %v7210_v48 = vcombine.high %v7188_v1, %v7188_v1 }
 0x4d9   :  { %7368 = vrot.lane.b32.xlu0 %v21529_v4, %s26994_s23  ;;  %v7165_v4 = vcombine.high %v7013_v44, %v7013_v44  ;;  %v7532_v30 = vrot.slane %v7516_v43, %v19147_v29 }
 0x4da   :  { %v6491_v40 = vpop.permute.xlu1 %6490  ;;  %v7319_v12 = vrot.slane %v7210_v48, %v19158_v18 }
 0x4db   :  { %v6493_v52 = vpop.permute.xlu0 %6492  ;;  %6559 = vst.msk [vmem:[%s26963_s2 + $0x15a] sm:$0x1] %vm1894_vm12, %v6491_v40  ;;  %v7524_v40 = vcombine.high %v7516_v43, %v7516_v43 }
 0x4dc   :  { %6560 = vst.msk [vmem:[%s26963_s2 + $0x16a] sm:$0x1] %vm1894_vm12, %v6493_v52  ;;  %7370 = vrot.lane.b32.xlu1 %v21546_v14, %s26994_s23  ;;  %v7202_v14 = vrot.slane %v7180_v46, %v19147_v29  ;;  %v7523_v52 = vrot.slane %v7509_v61, %v19147_v29 }
 0x4dd   :  { %7372 = vrot.lane.b32.xlu0 %v21549_v10, %s26994_s23  ;;  %v7179_v10 = vrot.slane %v7165_v4, %v19147_v29  ;;  %v7546_v1 = vrot.slane %v7524_v40, %v19147_v29 }
 0x4de   :  { %v6495_v2 = vpop.permute.xlu1 %6494  ;;  %v7211_v47 = vcombine.high %v7202_v14, %v7202_v14 }
 0x4df   :  { %v6497_v27 = vpop.permute.xlu0 %6496  ;;  %6561 = vst.msk [vmem:[%s26963_s2 + $0x17a] sm:$0x1] %vm1894_vm12, %v6495_v2  ;;  %v7195_v13 = vrot.slane %v7179_v10, %v19147_v29  ;;  %v7181_v3 = vcombine.high %v7179_v10, %v7179_v10  ;;  %v7525_v10 = vcombine.high %v7523_v52, %v7523_v52 }
 0x4e0   :  { %6562 = vst.msk [vmem:[%s26963_s2 + $0x18a] sm:$0x1] %vm1894_vm12, %v6497_v27  ;;  %7374 = vrot.lane.b32.xlu1 %v21566_v31, %s26994_s23  ;;  %v7452_v31 = vld [vmem:[#allocation3 + $0x10] sm:$0xff]  ;;  %v7323_v55 = vrot.slane %v7211_v47, %v19158_v18  ;;  %v22080_v27 = vrot.slane %v7532_v30, %v19158_v18 }
 0x4e1   :  { %7376 = vrot.lane.b32.xlu0 %v21569_v34, %s26994_s23  ;;  %v7315_v34 = vrot.slane %v7202_v14, %v19158_v18  ;;  %v7467_v63 = vrot.slane %v7452_v31, %v19147_v29  ;;  %v7460_v36 = vcombine.high %v7452_v31, %v7452_v31  ;;  %v7209_v25 = vrot.slane %v7181_v3, %v19147_v29 }
 0x4e2   :  { %v6499_v53 = vpop.permute.xlu1 %6498  ;;  %v7554_v14 = vcombine.high %v7532_v30, %v7532_v30  ;;  %v7556_v31 = vcombine.high %v7546_v1, %v7546_v1 }
 0x4e3   :  { %v6501_v58 = vpop.permute.xlu0 %6500  ;;  %6563 = vst.msk [vmem:[%s26963_s2 + $0x19a] sm:$0x1] %vm1894_vm12, %v6499_v53  ;;  %v7483_v54 = vrot.slane %v7467_v63, %v19147_v29  ;;  %v7475_v9 = vcombine.high %v7467_v63, %v7467_v63  ;;  %v7474_v42 = vrot.slane %v7460_v36, %v19147_v29  ;;  %v7331_v59 = vrot.slane %v7209_v25, %v19158_v18 }
 0x4e4   :  { %6564 = vst.msk [vmem:[%s26963_s2 + $0x1aa] sm:$0x1] %vm1894_vm12, %v6501_v58  ;;  %7378 = vrot.lane.b32.xlu1 %v21585_v62, %s26994_s23  ;;  %v7327_v62 = vrot.slane %v7195_v13, %v19158_v18  ;;  %v22096_v58 = vrot.slane %v7546_v1, %v19158_v18  ;;  %v22099_v48 = vrot.slane %v7554_v14, %v19158_v18  ;;  %v7454_v13 = vld [vmem:[#allocation3 + $0x40] sm:$0xff] }
 0x4e5   :  { %7380 = vrot.lane.b32.xlu0 %v7311_v8, %s26994_s23  ;;  %v22003_v41 = vrot.slane %v7483_v54, %v19158_v18  ;;  %v7497_v45 = vrot.slane %v7475_v9, %v19147_v29  ;;  %v7505_v16 = vcombine.high %v7483_v54, %v7483_v54  ;;  %v7476_v22 = vcombine.high %v7474_v42, %v7474_v42 }
 0x4e6   :  { %v6503_v32 = vpop.permute.xlu1 %6502  ;;  %v7490_v21 = vrot.slane %v7474_v42, %v19147_v29 }
 0x4e7   :  { %v6505_v50 = vpop.permute.xlu0 %6504  ;;  %6565 = vst.msk [vmem:[%s26963_s2 + $0x1ba] sm:$0x1] %vm1894_vm12, %v6503_v32  ;;  %v22018_v5 = vrot.slane %v7497_v45, %v19158_v18  ;;  %v22021_v24 = vrot.slane %v7505_v16, %v19158_v18  ;;  %v7507_v57 = vcombine.high %v7497_v45, %v7497_v45  ;;  %v7504_v23 = vrot.slane %v7476_v22, %v19147_v29 }
 0x4e8   :  { %6566 = vst.msk [vmem:[%s26963_s2 + $0x1ca] sm:$0x1] %vm1894_vm12, %v6505_v50  ;;  %7382 = vrot.lane.b32.xlu1 %v7315_v34, %s26994_s23  ;;  %v22041_v15 = vrot.slane %v7490_v21, %v19158_v18  ;;  %v7506_v17 = vcombine.high %v7490_v21, %v7490_v21  ;;  %v7539_v34 = vrot.slane %v7523_v52, %v19147_v29 }
 0x4e9   :  { %7384 = vrot.lane.b32.xlu0 %v7319_v12, %s26994_s23  ;;  %v22038_v6 = vrot.slane %v7507_v57, %v19158_v18  ;;  %v22057_v20 = vrot.slane %v7504_v23, %v19158_v18  ;;  %v7508_v44 = vcombine.high %v7504_v23, %v7504_v23  ;;  %v7553_v32 = vrot.slane %v7525_v10, %v19147_v29 }
 0x4ea   :  { %v6507_v35 = vpop.permute.xlu1 %6506  ;;  %v22060_v60 = vrot.slane %v7506_v17, %v19158_v18  ;;  %v22116_v12 = vrot.slane %v7556_v31, %v19158_v18  ;;  %v22119_v3 = vrot.slane %v7539_v34, %v19158_v18  ;;  %v7555_v63 = vcombine.high %v7539_v34, %v7539_v34  ;;  %v7455_v17 = vld [vmem:[#allocation3 + $0x58] sm:$0x3f] }
 0x4eb   :  { %v6891_v38 = vpop.permute.xlu0 %6890  ;;  %6567 = vst.msk [vmem:[%s26963_s2 + $0x1da] sm:$0x1] %vm1894_vm12, %v6507_v35  ;;  %v22077_v4 = vrot.slane %v7508_v44, %v19158_v18  ;;  %v22135_v36 = vrot.slane %v7553_v32, %v19158_v18  ;;  %v7558_v35 = vcombine.high %v7454_v13, %v7454_v13  ;;  %v7557_v54 = vcombine.high %v7553_v32, %v7553_v32 }
 0x4ec   :  { %6980 = vst.msk [vmem:[%s26963_s2 + $0xb] sm:$0x1] %vm1894_vm12, %v6891_v38  ;;  %7386 = vrot.lane.b32.xlu1 %v7323_v55, %s26994_s23  ;;  %v22138_v25 = vrot.slane %v7555_v63, %v19158_v18  ;;  %v7614_v61 = vrot.slane %v7455_v17, %v19147_v29 }
 0x4ed   :  { %7388 = vrot.lane.b32.xlu0 %v7327_v62, %s26994_s23  ;;  %v7565_v62 = vrot.slane %v7454_v13, %v19147_v29 }
 0x4ee   :  { %v6893_v28 = vpop.permute.xlu1 %6892 }
 0x4ef   :  { %v6895_v37 = vpop.permute.xlu0 %6894  ;;  %6981 = vst.msk [vmem:[%s26963_s2 + $0x1b] sm:$0x1] %vm1894_vm12, %v6893_v28  ;;  %v7581_v9 = vrot.slane %v7565_v62, %v19147_v29  ;;  %v7573_v42 = vcombine.high %v7565_v62, %v7565_v62  ;;  %v7572_v28 = vrot.slane %v7558_v35, %v19147_v29 }
 0x4f0   :  { %6982 = vst.msk [vmem:[%s26963_s2 + $0x2b] sm:$0x1] %vm1894_vm12, %v6895_v37  ;;  %7390 = vrot.lane.b32.xlu1 %v7331_v59, %s26994_s23  ;;  %v22155_v37 = vrot.slane %v7557_v54, %v19158_v18 }
 0x4f1   :  { %7774 = vrot.lane.b32.xlu0 %v22003_v41, %s18642_s19  ;;  %v22158_v16 = vrot.slane %v7581_v9, %v19158_v18  ;;  %v7595_v22 = vrot.slane %v7573_v42, %v19147_v29 }
 0x4f2   :  { %v6897_v7 = vpop.permute.xlu1 %6896 }
 0x4f3   :  { %v6899_v51 = vpop.permute.xlu0 %6898  ;;  %6983 = vst.msk [vmem:[%s26963_s2 + $0x3b] sm:$0x1] %vm1894_vm12, %v6897_v7  ;;  %v7603_v7 = vcombine.high %v7581_v9, %v7581_v9  ;;  %v22174_v21 = vrot.slane %v7595_v22, %v19158_v18 }
 0x4f4   :  { %6984 = vst.msk [vmem:[%s26963_s2 + $0x4b] sm:$0x1] %vm1894_vm12, %v6899_v51  ;;  %7776 = vrot.lane.b32.xlu1 %v22018_v5, %s18642_s19  ;;  %v7574_v51 = vcombine.high %v7572_v28, %v7572_v28 }
 0x4f5   :  { %7778 = vrot.lane.b32.xlu0 %v22021_v24, %s18642_s19  ;;  %v22177_v23 = vrot.slane %v7603_v7, %v19158_v18 }
 0x4f6   :  { %v6901_v39 = vpop.permute.xlu1 %6900  ;;  %v7602_v43 = vrot.slane %v7574_v51, %v19147_v29 }
 0x4f7   :  { %v6903_v49 = vpop.permute.xlu0 %6902  ;;  %6985 = vst.msk [vmem:[%s26963_s2 + $0x5b] sm:$0x1] %vm1894_vm12, %v6901_v39  ;;  %v7605_v39 = vcombine.high %v7595_v22, %v7595_v22 }
 0x4f8   :  { %6986 = vst.msk [vmem:[%s26963_s2 + $0x6b] sm:$0x1] %vm1894_vm12, %v6903_v49  ;;  %7780 = vrot.lane.b32.xlu1 %v22038_v6, %s18642_s19  ;;  %v7588_v49 = vrot.slane %v7572_v28, %v19147_v29  ;;  %v22213_v52 = vrot.slane %v7602_v43, %v19158_v18  ;;  %v7606_v10 = vcombine.high %v7602_v43, %v7602_v43 }
 0x4f9   :  { %7782 = vrot.lane.b32.xlu0 %v22041_v15, %s18642_s19 }
 0x4fa   :  { %v6905_v0 = vpop.permute.xlu1 %6904  ;;  %v22198_v30 = vrot.slane %v7588_v49, %v19158_v18  ;;  %v7604_v40 = vcombine.high %v7588_v49, %v7588_v49  ;;  %v22233_v13 = vrot.slane %v7606_v10, %v19158_v18 }
 0x4fb   :  { %v6907_v19 = vpop.permute.xlu0 %6906  ;;  %6987 = vst.msk [vmem:[%s26963_s2 + $0x7b] sm:$0x1] %vm1894_vm12, %v6905_v0 }
 0x4fc   :  { %6988 = vst.msk [vmem:[%s26963_s2 + $0x8b] sm:$0x1] %vm1894_vm12, %v6907_v19  ;;  %7784 = vrot.lane.b32.xlu1 %v22057_v20, %s18642_s19  ;;  %v22195_v19 = vrot.slane %v7605_v39, %v19158_v18  ;;  %v22216_v14 = vrot.slane %v7604_v40, %v19158_v18 }
 0x4fd   :  { %7786 = vrot.lane.b32.xlu0 %v22060_v60, %s18642_s19 }
 0x4fe   :  { %v6909_v46 = vpop.permute.xlu1 %6908 }
 0x4ff   :  { %v6911_v2 = vpop.permute.xlu0 %6910  ;;  %6989 = vst.msk [vmem:[%s26963_s2 + $0x9b] sm:$0x1] %vm1894_vm12, %v6909_v46  ;;  %v7622_v46 = vcombine.high %v7614_v61, %v7614_v61 }
 0x500   :  { %6990 = vst.msk [vmem:[%s26963_s2 + $0xab] sm:$0x1] %vm1894_vm12, %v6911_v2  ;;  %7788 = vrot.lane.b32.xlu1 %v22077_v4, %s18642_s19 }
 0x501   :  { %7790 = vrot.lane.b32.xlu0 %v22080_v27, %s18642_s19  ;;  %v7644_v31 = vrot.slane %v7622_v46, %v19147_v29 }
 0x502   :  { %v6913_v53 = vpop.permute.xlu1 %6912 }
 0x503   :  { %v6915_v8 = vpop.permute.xlu0 %6914  ;;  %6991 = vst.msk [vmem:[%s26963_s2 + $0xbb] sm:$0x1] %vm1894_vm12, %v6913_v53  ;;  %v7630_v53 = vrot.slane %v7614_v61, %v19147_v29  ;;  %v7757_v62 = vrot.slane %v7644_v31, %v19158_v18  ;;  %v7653_v54 = vcombine.high %v7644_v31, %v7644_v31 }
 0x504   :  { %6992 = vst.msk [vmem:[%s26963_s2 + $0xcb] sm:$0x1] %vm1894_vm12, %v6915_v8  ;;  %7792 = vrot.lane.b32.xlu1 %v22096_v58, %s18642_s19  ;;  %v7607_v8 = vcombine.high %v7455_v17, %v7455_v17 }
 0x505   :  { %7794 = vrot.lane.b32.xlu0 %v22099_v48, %s18642_s19 }
 0x506   :  { %v6917_v50 = vpop.permute.xlu1 %6916  ;;  %v7621_v63 = vrot.slane %v7607_v8, %v19147_v29 }
 0x507   :  { %v6919_v47 = vpop.permute.xlu0 %6918  ;;  %6993 = vst.msk [vmem:[%s26963_s2 + $0xdb] sm:$0x1] %vm1894_vm12, %v6917_v50  ;;  %v7753_v50 = vrot.slane %v7630_v53, %v19158_v18 }
 0x508   :  { %6994 = vst.msk [vmem:[%s26963_s2 + $0xeb] sm:$0x1] %vm1894_vm12, %v6919_v47  ;;  %7796 = vrot.lane.b32.xlu1 %v22116_v12, %s18642_s19  ;;  %v7652_v47 = vcombine.high %v7630_v53, %v7630_v53  ;;  %v7637_v9 = vrot.slane %v7621_v63, %v19147_v29  ;;  %v7623_v42 = vcombine.high %v7621_v63, %v7621_v63 }
 0x509   :  { %7798 = vrot.lane.b32.xlu0 %v22119_v3, %s18642_s19 }
 0x50a   :  { %v6921_v55 = vpop.permute.xlu1 %6920  ;;  %v7769_v22 = vrot.slane %v7637_v9, %v19158_v18  ;;  %v7651_v7 = vrot.slane %v7623_v42, %v19147_v29 }
 0x50b   :  { %v6923_v38 = vpop.permute.xlu0 %6922  ;;  %6995 = vst.msk [vmem:[%s26963_s2 + $0xfb] sm:$0x1] %vm1894_vm12, %v6921_v55 }
 0x50c   :  { %6996 = vst.msk [vmem:[%s26963_s2 + $0x10b] sm:$0x1] %vm1894_vm12, %v6923_v38  ;;  %7800 = vrot.lane.b32.xlu1 %v22135_v36, %s18642_s19  ;;  %v7761_v38 = vrot.slane %v7652_v47, %v19158_v18  ;;  %v7897_v47 = vld [vmem:[#allocation3 + $0x58] sm:$0x3f] }
 0x50d   :  { %7802 = vrot.lane.b32.xlu0 %v22138_v25, %s18642_s19 }
 0x50e   :  { %v6925_v59 = vpop.permute.xlu1 %6924 }
 0x50f   :  { %v6927_v45 = vpop.permute.xlu0 %6926  ;;  %6997 = vst.msk [vmem:[%s26963_s2 + $0x11b] sm:$0x1] %vm1894_vm12, %v6925_v59  ;;  %v7765_v59 = vrot.slane %v7653_v54, %v19158_v18 }
 0x510   :  { %6998 = vst.msk [vmem:[%s26963_s2 + $0x12b] sm:$0x1] %vm1894_vm12, %v6927_v45  ;;  %7804 = vrot.lane.b32.xlu1 %v22155_v37, %s18642_s19 }
 0x511   :  { %7806 = vrot.lane.b32.xlu0 %v22158_v16, %s18642_s19 }
 0x512   :  { %v6929_v57 = vpop.permute.xlu1 %6928 }
 0x513   :  { %v6931_v56 = vpop.permute.xlu0 %6930  ;;  %6999 = vst.msk [vmem:[%s26963_s2 + $0x13b] sm:$0x1] %vm1894_vm12, %v6929_v57  ;;  %v7773_v57 = vrot.slane %v7651_v7, %v19158_v18 }
 0x514   :  { %7000 = vst.msk [vmem:[%s26963_s2 + $0x14b] sm:$0x1] %vm1894_vm12, %v6931_v56  ;;  %7808 = vrot.lane.b32.xlu1 %v22174_v21, %s18642_s19 }
 0x515   :  { %7810 = vrot.lane.b32.xlu0 %v22177_v23, %s18642_s19 }
 0x516   :  { %v6933_v0 = vpop.permute.xlu1 %6932 }
 0x517   :  { %v6935_v44 = vpop.permute.xlu0 %6934  ;;  %7001 = vst.msk [vmem:[%s26963_s2 + $0x15b] sm:$0x1] %vm1894_vm12, %v6933_v0 }
 0x518   :  { %7002 = vst.msk [vmem:[%s26963_s2 + $0x16b] sm:$0x1] %vm1894_vm12, %v6935_v44  ;;  %7812 = vrot.lane.b32.xlu1 %v22195_v19, %s18642_s19 }
 0x519   :  { %7814 = vrot.lane.b32.xlu0 %v22198_v30, %s18642_s19 }
 0x51a   :  { %v6937_v2 = vpop.permute.xlu1 %6936 }
 0x51b   :  { %v6939_v1 = vpop.permute.xlu0 %6938  ;;  %7003 = vst.msk [vmem:[%s26963_s2 + $0x17b] sm:$0x1] %vm1894_vm12, %v6937_v2 }
 0x51c   :  { %7004 = vst.msk [vmem:[%s26963_s2 + $0x18b] sm:$0x1] %vm1894_vm12, %v6939_v1  ;;  %7816 = vrot.lane.b32.xlu1 %v22213_v52, %s18642_s19 }
 0x51d   :  { %7818 = vrot.lane.b32.xlu0 %v22216_v14, %s18642_s19 }
 0x51e   :  { %v6941_v34 = vpop.permute.xlu1 %6940 }
 0x51f   :  { %v6943_v32 = vpop.permute.xlu0 %6942  ;;  %7005 = vst.msk [vmem:[%s26963_s2 + $0x19b] sm:$0x1] %vm1894_vm12, %v6941_v34 }
 0x520   :  { %7006 = vst.msk [vmem:[%s26963_s2 + $0x1ab] sm:$0x1] %vm1894_vm12, %v6943_v32  ;;  %7820 = vrot.lane.b32.xlu1 %v22233_v13, %s18642_s19 }
 0x521   :  { %7822 = vrot.lane.b32.xlu0 %v7753_v50, %s18642_s19 }
 0x522   :  { %v6945_v35 = vpop.permute.xlu1 %6944 }
 0x523   :  { %v6947_v55 = vpop.permute.xlu0 %6946  ;;  %7007 = vst.msk [vmem:[%s26963_s2 + $0x1bb] sm:$0x1] %vm1894_vm12, %v6945_v35  ;;  %v8056_v35 = vrot.slane %v7897_v47, %v19147_v29 }
 0x524   :  { %7008 = vst.msk [vmem:[%s26963_s2 + $0x1cb] sm:$0x1] %vm1894_vm12, %v6947_v55  ;;  %7824 = vrot.lane.b32.xlu1 %v7757_v62, %s18642_s19  ;;  %v8049_v55 = vcombine.high %v7897_v47, %v7897_v47 }
 0x525   :  { %7826 = vrot.lane.b32.xlu0 %v7761_v38, %s18642_s19  ;;  %v8072_v9 = vrot.slane %v8056_v35, %v19147_v29  ;;  %v8064_v42 = vcombine.high %v8056_v35, %v8056_v35 }
 0x526   :  { %v6949_v28 = vpop.permute.xlu1 %6948 }
 0x527   :  { %v7333_v45 = vpop.permute.xlu0 %7332  ;;  %7009 = vst.msk [vmem:[%s26963_s2 + $0x1db] sm:$0x1] %vm1894_vm12, %v6949_v28  ;;  %v8063_v28 = vrot.slane %v8049_v55, %v19147_v29  ;;  %v8086_v7 = vrot.slane %v8064_v42, %v19147_v29 }
 0x528   :  { %7422 = vst.msk [vmem:[%s26963_s2 + $0xc] sm:$0x1] %vm1894_vm12, %v7333_v45  ;;  %7828 = vrot.lane.b32.xlu1 %v7765_v59, %s18642_s19 }
 0x529   :  { %7830 = vrot.lane.b32.xlu0 %v7769_v22, %s18642_s19  ;;  %v8195_v22 = vrot.slane %v8072_v9, %v19158_v18 }
 0x52a   :  { %v7335_v51 = vpop.permute.xlu1 %7334 }
 0x52b   :  { %v7337_v56 = vpop.permute.xlu0 %7336  ;;  %7423 = vst.msk [vmem:[%s26963_s2 + $0x1c] sm:$0x1] %vm1894_vm12, %v7335_v51  ;;  %v8094_v51 = vcombine.high %v8072_v9, %v8072_v9 }
 0x52c   :  { %7424 = vst.msk [vmem:[%s26963_s2 + $0x2c] sm:$0x1] %vm1894_vm12, %v7337_v56  ;;  %7832 = vrot.lane.b32.xlu1 %v7773_v57, %s18642_s19  ;;  %v8079_v57 = vrot.slane %v8063_v28, %v19147_v29 }
 0x52d   :  { %8216 = vrot.lane.b32.xlu0 %v22003_v41, %s18649_s10 }
 0x52e   :  { %v7339_v39 = vpop.permute.xlu1 %7338 }
 0x52f   :  { %v7341_v49 = vpop.permute.xlu0 %7340  ;;  %7425 = vst.msk [vmem:[%s26963_s2 + $0x3c] sm:$0x1] %vm1894_vm12, %v7339_v39  ;;  %v8199_v39 = vrot.slane %v8086_v7, %v19158_v18 }
 0x530   :  { %7426 = vst.msk [vmem:[%s26963_s2 + $0x4c] sm:$0x1] %vm1894_vm12, %v7341_v49  ;;  %8218 = vrot.lane.b32.xlu1 %v22018_v5, %s18649_s10 }
 0x531   :  { %8220 = vrot.lane.b32.xlu0 %v22021_v24, %s18649_s10 }
 0x532   :  { %v7343_v17 = vpop.permute.xlu1 %7342 }
 0x533   :  { %v7345_v43 = vpop.permute.xlu0 %7344  ;;  %7427 = vst.msk [vmem:[%s26963_s2 + $0x5c] sm:$0x1] %vm1894_vm12, %v7343_v17  ;;  %v8203_v17 = vrot.slane %v8094_v51, %v19158_v18 }
 0x534   :  { %7428 = vst.msk [vmem:[%s26963_s2 + $0x6c] sm:$0x1] %vm1894_vm12, %v7345_v43  ;;  %8222 = vrot.lane.b32.xlu1 %v22038_v6, %s18649_s10  ;;  %v8095_v43 = vcombine.high %v8086_v7, %v8086_v7 }
 0x535   :  { %8224 = vrot.lane.b32.xlu0 %v22041_v15, %s18649_s10 }
 0x536   :  { %v7347_v61 = vpop.permute.xlu1 %7346 }
 0x537   :  { %v7349_v0 = vpop.permute.xlu0 %7348  ;;  %7429 = vst.msk [vmem:[%s26963_s2 + $0x7c] sm:$0x1] %vm1894_vm12, %v7347_v61  ;;  %v8065_v61 = vcombine.high %v8063_v28, %v8063_v28 }
 0x538   :  { %7430 = vst.msk [vmem:[%s26963_s2 + $0x8c] sm:$0x1] %vm1894_vm12, %v7349_v0  ;;  %8226 = vrot.lane.b32.xlu1 %v22057_v20, %s18649_s10 }
 0x539   :  { %8228 = vrot.lane.b32.xlu0 %v22060_v60, %s18649_s10 }
 0x53a   :  { %v7351_v44 = vpop.permute.xlu1 %7350 }
 0x53b   :  { %v7353_v40 = vpop.permute.xlu0 %7352  ;;  %7431 = vst.msk [vmem:[%s26963_s2 + $0x9c] sm:$0x1] %vm1894_vm12, %v7351_v44  ;;  %v8207_v44 = vrot.slane %v8095_v43, %v19158_v18  ;;  %v17508_v43 = vld [vmem:[%s26961_s0 + $0x1] ss:$2 sm:$0x7] }
 0x53c   :  { %7432 = vst.msk [vmem:[%s26963_s2 + $0xac] sm:$0x1] %vm1894_vm12, %v7353_v40  ;;  %8230 = vrot.lane.b32.xlu1 %v22077_v4, %s18649_s10 }
 0x53d   :  { %8232 = vrot.lane.b32.xlu0 %v22080_v27, %s18649_s10 }
 0x53e   :  { %v7355_v46 = vpop.permute.xlu1 %7354 }
 0x53f   :  { %v7357_v2 = vpop.permute.xlu0 %7356  ;;  %7433 = vst.msk [vmem:[%s26963_s2 + $0xbc] sm:$0x1] %vm1894_vm12, %v7355_v46  ;;  %v8211_v46 = vrot.slane %v8079_v57, %v19158_v18 }
 0x540   :  { %7434 = vst.msk [vmem:[%s26963_s2 + $0xcc] sm:$0x1] %vm1894_vm12, %v7357_v2  ;;  %8234 = vrot.lane.b32.xlu1 %v22096_v58, %s18649_s10  ;;  %v8093_v2 = vrot.slane %v8065_v61, %v19147_v29  ;;  %v17509_v61 = vld [vmem:[%s26961_s0 + $0x1] ss:$2 sm:$0x7] }
 0x541   :  { %8236 = vrot.lane.b32.xlu0 %v22099_v48, %s18649_s10 }
 0x542   :  { %v7359_v1 = vpop.permute.xlu1 %7358 }
 0x543   :  { %v7361_v10 = vpop.permute.xlu0 %7360  ;;  %7435 = vst.msk [vmem:[%s26963_s2 + $0xdc] sm:$0x1] %vm1894_vm12, %v7359_v1 }
 0x544   :  { %7436 = vst.msk [vmem:[%s26963_s2 + $0xec] sm:$0x1] %vm1894_vm12, %v7361_v10  ;;  %8238 = vrot.lane.b32.xlu1 %v22116_v12, %s18649_s10  ;;  %v8215_v10 = vrot.slane %v8093_v2, %v19158_v18 }
 0x545   :  { %8240 = vrot.lane.b32.xlu0 %v22119_v3, %s18649_s10 }
 0x546   :  { %v7363_v53 = vpop.permute.xlu1 %7362 }
 0x547   :  { %v7365_v8 = vpop.permute.xlu0 %7364  ;;  %7437 = vst.msk [vmem:[%s26963_s2 + $0xfc] sm:$0x1] %vm1894_vm12, %v7363_v53 }
 0x548   :  { %7438 = vst.msk [vmem:[%s26963_s2 + $0x10c] sm:$0x1] %vm1894_vm12, %v7365_v8  ;;  %8242 = vrot.lane.b32.xlu1 %v22135_v36, %s18649_s10 }
 0x549   :  { %8244 = vrot.lane.b32.xlu0 %v22138_v25, %s18649_s10 }
 0x54a   :  { %v7367_v31 = vpop.permute.xlu1 %7366 }
 0x54b   :  { %v7369_v34 = vpop.permute.xlu0 %7368  ;;  %7439 = vst.msk [vmem:[%s26963_s2 + $0x11c] sm:$0x1] %vm1894_vm12, %v7367_v31 }
 0x54c   :  { %7440 = vst.msk [vmem:[%s26963_s2 + $0x12c] sm:$0x1] %vm1894_vm12, %v7369_v34  ;;  %8246 = vrot.lane.b32.xlu1 %v22155_v37, %s18649_s10 }
 0x54d   :  { %8248 = vrot.lane.b32.xlu0 %v22158_v16, %s18649_s10 }
 0x54e   :  { %v7371_v32 = vpop.permute.xlu1 %7370 }
 0x54f   :  { %v7373_v50 = vpop.permute.xlu0 %7372  ;;  %7441 = vst.msk [vmem:[%s26963_s2 + $0x13c] sm:$0x1] %vm1894_vm12, %v7371_v32  ;;  %v8339_v32 = vld [vmem:[#allocation3 + $0x58] sm:$0x3f] }
 0x550   :  { %7442 = vst.msk [vmem:[%s26963_s2 + $0x14c] sm:$0x1] %vm1894_vm12, %v7373_v50  ;;  %8250 = vrot.lane.b32.xlu1 %v22174_v21, %s18649_s10 }
 0x551   :  { %8252 = vrot.lane.b32.xlu0 %v22177_v23, %s18649_s10 }
 0x552   :  { %v7375_v63 = vpop.permute.xlu1 %7374 }
 0x553   :  { %v7377_v62 = vpop.permute.xlu0 %7376  ;;  %7443 = vst.msk [vmem:[%s26963_s2 + $0x15c] sm:$0x1] %vm1894_vm12, %v7375_v63 }
 0x554   :  { %7444 = vst.msk [vmem:[%s26963_s2 + $0x16c] sm:$0x1] %vm1894_vm12, %v7377_v62  ;;  %8254 = vrot.lane.b32.xlu1 %v22195_v19, %s18649_s10  ;;  %v8491_v62 = vcombine.high %v8339_v32, %v8339_v32 }
 0x555   :  { %8256 = vrot.lane.b32.xlu0 %v22198_v30, %s18649_s10 }
 0x556   :  { %v7379_v38 = vpop.permute.xlu1 %7378 }
 0x557   :  { %v7381_v54 = vpop.permute.xlu0 %7380  ;;  %7445 = vst.msk [vmem:[%s26963_s2 + $0x17c] sm:$0x1] %vm1894_vm12, %v7379_v38 }
 0x558   :  { %7446 = vst.msk [vmem:[%s26963_s2 + $0x18c] sm:$0x1] %vm1894_vm12, %v7381_v54  ;;  %8258 = vrot.lane.b32.xlu1 %v22213_v52, %s18649_s10  ;;  %v8505_v54 = vrot.slane %v8491_v62, %v19147_v29  ;;  %v17506_v62 = vld [vmem:[%s26961_s0 + $0x1] ss:$2 sm:$0x7] }
 0x559   :  { %8260 = vrot.lane.b32.xlu0 %v22216_v14, %s18649_s10  ;;  %8780 = vst.msk [vmem:[#allocation2] ss:$8 sm:$0x7] %vm18728_vm0, %v17506_v62 }
 0x55a   :  { %v7383_v59 = vpop.permute.xlu1 %7382 }
 0x55b   :  { %v7385_v45 = vpop.permute.xlu0 %7384  ;;  %7447 = vst.msk [vmem:[%s26963_s2 + $0x19c] sm:$0x1] %vm1894_vm12, %v7383_v59  ;;  %v8521_v59 = vrot.slane %v8505_v54, %v19147_v29 }
 0x55c   :  { %7448 = vst.msk [vmem:[%s26963_s2 + $0x1ac] sm:$0x1] %vm1894_vm12, %v7385_v45  ;;  %8262 = vrot.lane.b32.xlu1 %v22233_v13, %s18649_s10  ;;  %v8507_v45 = vcombine.high %v8505_v54, %v8505_v54  ;;  %v17529_v54 = vld [vmem:[%s26961_s0 + $0x1] ss:$2 sm:$0xf] }
 0x55d   :  { %8264 = vrot.lane.b32.xlu0 %v8195_v22, %s18649_s10  ;;  %v8653_v51 = vrot.slane %v8521_v59, %v19158_v18 }
 0x55e   :  { %v7387_v56 = vpop.permute.xlu1 %7386  ;;  %v8535_v57 = vrot.slane %v8507_v45, %v19147_v29 }
 0x55f   :  { %v7389_v49 = vpop.permute.xlu0 %7388  ;;  %7449 = vst.msk [vmem:[%s26963_s2 + $0x1bc] sm:$0x1] %vm1894_vm12, %v7387_v56  ;;  %v17507_v56 = vld [vmem:[%s26961_s0 + $0x1] ss:$2 sm:$0x7] }
 0x560   :  { %7450 = vst.msk [vmem:[%s26963_s2 + $0x1cc] sm:$0x1] %vm1894_vm12, %v7389_v49  ;;  %8266 = vrot.lane.b32.xlu1 %v8199_v39, %s18649_s10  ;;  %v8657_v49 = vrot.slane %v8535_v57, %v19158_v18 }
 0x561   :  { %8268 = vrot.lane.b32.xlu0 %v8203_v17, %s18649_s10 }
 0x562   :  { %v7391_v0 = vpop.permute.xlu1 %7390 }
 0x563   :  { %v7775_v40 = vpop.permute.xlu0 %7774  ;;  %7451 = vst.msk [vmem:[%s26963_s2 + $0x1dc] sm:$0x1] %vm1894_vm12, %v7391_v0 }
 0x564   :  { %7864 = vst.msk [vmem:[%s26963_s2 + $0xd] sm:$0x1] %vm1894_vm12, %v7775_v40  ;;  %8270 = vrot.lane.b32.xlu1 %v8207_v44, %s18649_s10  ;;  %v17510_v40 = vld [vmem:[%s26961_s0 + $0x1] ss:$2 sm:$0x7] }
 0x565   :  { %8272 = vrot.lane.b32.xlu0 %v8211_v46, %s18649_s10  ;;  %v17511_v46 = vld [vmem:[%s26961_s0 + $0x1] ss:$2 sm:$0x7] }
 0x566   :  { %v7777_v1 = vpop.permute.xlu1 %7776 }
 0x567   :  { %v7779_v53 = vpop.permute.xlu0 %7778  ;;  %7865 = vst.msk [vmem:[%s26963_s2 + $0x1d] sm:$0x1] %vm1894_vm12, %v7777_v1 }
 0x568   :  { %7866 = vst.msk [vmem:[%s26963_s2 + $0x2d] sm:$0x1] %vm1894_vm12, %v7779_v53  ;;  %8274 = vrot.lane.b32.xlu1 %v8215_v10, %s18649_s10  ;;  %v17512_v10 = vld [vmem:[%s26961_s0 + $0x1] ss:$2 sm:$0x7] }
 0x569   :  { %8658 = vrot.lane.b32.xlu0 %v22003_v41, %s18652_s29  ;;  %v17513_v53 = vld [vmem:[%s26961_s0 + $0x1] ss:$2 sm:$0x7] }
 0x56a   :  { %v7781_v8 = vpop.permute.xlu1 %7780 }
 0x56b   :  { %v7783_v31 = vpop.permute.xlu0 %7782  ;;  %7867 = vst.msk [vmem:[%s26963_s2 + $0x3d] sm:$0x1] %vm1894_vm12, %v7781_v8 }
 0x56c   :  { %7868 = vst.msk [vmem:[%s26963_s2 + $0x4d] sm:$0x1] %vm1894_vm12, %v7783_v31  ;;  %8660 = vrot.lane.b32.xlu1 %v22018_v5, %s18652_s29 }
 0x56d   :  { %8662 = vrot.lane.b32.xlu0 %v22021_v24, %s18652_s29 }
 0x56e   :  { %v7785_v34 = vpop.permute.xlu1 %7784 }
 0x56f   :  { %v7787_v41 = vpop.permute.xlu0 %7786  ;;  %7869 = vst.msk [vmem:[%s26963_s2 + $0x5d] sm:$0x1] %vm1894_vm12, %v7785_v34  ;;  %v17514_v34 = vld [vmem:[%s26961_s0 + $0x1] ss:$2 sm:$0x7] }
 0x570   :  { %7870 = vst.msk [vmem:[%s26963_s2 + $0x6d] sm:$0x1] %vm1894_vm12, %v7787_v41  ;;  %8664 = vrot.lane.b32.xlu1 %v22038_v6, %s18652_s29  ;;  %v17515_v41 = vld [vmem:[%s26961_s0 + $0x1] ss:$2 sm:$0x7] }
 0x571   :  { %8666 = vrot.lane.b32.xlu0 %v22041_v15, %s18652_s29 }
 0x572   :  { %v7789_v5 = vpop.permute.xlu1 %7788 }
 0x573   :  { %v7791_v24 = vpop.permute.xlu0 %7790  ;;  %7871 = vst.msk [vmem:[%s26963_s2 + $0x7d] sm:$0x1] %vm1894_vm12, %v7789_v5 }
 0x574   :  { %7872 = vst.msk [vmem:[%s26963_s2 + $0x8d] sm:$0x1] %vm1894_vm12, %v7791_v24  ;;  %8668 = vrot.lane.b32.xlu1 %v22057_v20, %s18652_s29 }
 0x575   :  { %8670 = vrot.lane.b32.xlu0 %v22060_v60, %s18652_s29 }
 0x576   :  { %v7793_v6 = vpop.permute.xlu1 %7792 }
 0x577   :  { %v7795_v15 = vpop.permute.xlu0 %7794  ;;  %7873 = vst.msk [vmem:[%s26963_s2 + $0x9d] sm:$0x1] %vm1894_vm12, %v7793_v6  ;;  %v17516_v6 = vld [vmem:[%s26961_s0 + $0x1] ss:$2 sm:$0x7] }
 0x578   :  { %7874 = vst.msk [vmem:[%s26963_s2 + $0xad] sm:$0x1] %vm1894_vm12, %v7795_v15  ;;  %8672 = vrot.lane.b32.xlu1 %v22077_v4, %s18652_s29  ;;  %v17517_v15 = vld [vmem:[%s26961_s0 + $0x1] ss:$2 sm:$0x7] }
 0x579   :  { %8674 = vrot.lane.b32.xlu0 %v22080_v27, %s18652_s29 }
 0x57a   :  { %v7797_v20 = vpop.permute.xlu1 %7796 }
 0x57b   :  { %v7799_v60 = vpop.permute.xlu0 %7798  ;;  %7875 = vst.msk [vmem:[%s26963_s2 + $0xbd] sm:$0x1] %vm1894_vm12, %v7797_v20 }
 0x57c   :  { %7876 = vst.msk [vmem:[%s26963_s2 + $0xcd] sm:$0x1] %vm1894_vm12, %v7799_v60  ;;  %8676 = vrot.lane.b32.xlu1 %v22096_v58, %s18652_s29 }
 0x57d   :  { %8678 = vrot.lane.b32.xlu0 %v22099_v48, %s18652_s29 }
 0x57e   :  { %v7801_v4 = vpop.permute.xlu1 %7800 }
 0x57f   :  { %v7803_v27 = vpop.permute.xlu0 %7802  ;;  %7877 = vst.msk [vmem:[%s26963_s2 + $0xdd] sm:$0x1] %vm1894_vm12, %v7801_v4  ;;  %v17518_v4 = vld [vmem:[%s26961_s0 + $0x1] ss:$2 sm:$0x7] }
 0x580   :  { %7878 = vst.msk [vmem:[%s26963_s2 + $0xed] sm:$0x1] %vm1894_vm12, %v7803_v27  ;;  %8680 = vrot.lane.b32.xlu1 %v22116_v12, %s18652_s29  ;;  %v17519_v27 = vld [vmem:[%s26961_s0 + $0x1] ss:$2 sm:$0x7] }
 0x581   :  { %8682 = vrot.lane.b32.xlu0 %v22119_v3, %s18652_s29 }
 0x582   :  { %v7805_v58 = vpop.permute.xlu1 %7804 }
 0x583   :  { %v7807_v48 = vpop.permute.xlu0 %7806  ;;  %7879 = vst.msk [vmem:[%s26963_s2 + $0xfd] sm:$0x1] %vm1894_vm12, %v7805_v58 }
 0x584   :  { %7880 = vst.msk [vmem:[%s26963_s2 + $0x10d] sm:$0x1] %vm1894_vm12, %v7807_v48  ;;  %8684 = vrot.lane.b32.xlu1 %v22135_v36, %s18652_s29 }
 0x585   :  { %8686 = vrot.lane.b32.xlu0 %v22138_v25, %s18652_s29 }
 0x586   :  { %v7809_v12 = vpop.permute.xlu1 %7808 }
 0x587   :  { %v7811_v3 = vpop.permute.xlu0 %7810  ;;  %7881 = vst.msk [vmem:[%s26963_s2 + $0x11d] sm:$0x1] %vm1894_vm12, %v7809_v12  ;;  %v17520_v12 = vld [vmem:[%s26961_s0 + $0x1] ss:$2 sm:$0x7] }
 0x588   :  { %7882 = vst.msk [vmem:[%s26963_s2 + $0x12d] sm:$0x1] %vm1894_vm12, %v7811_v3  ;;  %8688 = vrot.lane.b32.xlu1 %v22155_v37, %s18652_s29  ;;  %v8498_v37 = vrot.slane %v8339_v32, %v19147_v29  ;;  %v17521_v3 = vld [vmem:[%s26961_s0 + $0x1] ss:$2 sm:$0x7] }
 0x589   :  { %8690 = vrot.lane.b32.xlu0 %v22158_v16, %s18652_s29  ;;  %v17522_v32 = vld [vmem:[%s26961_s0 + $0x1] ss:$2 sm:$0x7] }
 0x58a   :  { %v7813_v36 = vpop.permute.xlu1 %7812  ;;  %v8514_v63 = vrot.slane %v8498_v37, %v19147_v29 }
 0x58b   :  { %v7815_v25 = vpop.permute.xlu0 %7814  ;;  %7883 = vst.msk [vmem:[%s26963_s2 + $0x13d] sm:$0x1] %vm1894_vm12, %v7813_v36 }
 0x58c   :  { %7884 = vst.msk [vmem:[%s26963_s2 + $0x14d] sm:$0x1] %vm1894_vm12, %v7815_v25  ;;  %8692 = vrot.lane.b32.xlu1 %v22174_v21, %s18652_s29  ;;  %v8506_v21 = vcombine.high %v8498_v37, %v8498_v37  ;;  %v8637_v55 = vrot.slane %v8514_v63, %v19158_v18  ;;  %v8536_v38 = vcombine.high %v8514_v63, %v8514_v63  ;;  %v17523_v37 = vld [vmem:[%s26961_s0 + $0x1] ss:$2 sm:$0x7] }
 0x58d   :  { %8694 = vrot.lane.b32.xlu0 %v22177_v23, %s18652_s29 }
 0x58e   :  { %v7817_v16 = vpop.permute.xlu1 %7816  ;;  %v8645_v42 = vrot.slane %v8536_v38, %v19158_v18  ;;  %v17528_v38 = vld [vmem:[%s26961_s0 + $0x1] ss:$2 sm:$0xf] }
 0x58f   :  { %v7819_v50 = vpop.permute.xlu0 %7818  ;;  %7885 = vst.msk [vmem:[%s26963_s2 + $0x15d] sm:$0x1] %vm1894_vm12, %v7817_v16 }
 0x590   :  { %7886 = vst.msk [vmem:[%s26963_s2 + $0x16d] sm:$0x1] %vm1894_vm12, %v7819_v50  ;;  %8696 = vrot.lane.b32.xlu1 %v22195_v19, %s18652_s29  ;;  %v8528_v19 = vrot.slane %v8506_v21, %v19147_v29  ;;  %v17524_v21 = vld [vmem:[%s26961_s0 + $0x1] ss:$2 sm:$0x7] }
 0x591   :  { %8698 = vrot.lane.b32.xlu0 %v22198_v30, %s18652_s29 }
 0x592   :  { %v7821_v23 = vpop.permute.xlu1 %7820  ;;  %v8537_v28 = vcombine.high %v8528_v19, %v8528_v19 }
 0x593   :  { %v7823_v47 = vpop.permute.xlu0 %7822  ;;  %7887 = vst.msk [vmem:[%s26963_s2 + $0x17d] sm:$0x1] %vm1894_vm12, %v7821_v23  ;;  %v17525_v23 = vld [vmem:[%s26961_s0 + $0x1] ss:$2 sm:$0x7] }
 0x594   :  { %7888 = vst.msk [vmem:[%s26963_s2 + $0x18d] sm:$0x1] %vm1894_vm12, %v7823_v47  ;;  %8700 = vrot.lane.b32.xlu1 %v22213_v52, %s18652_s29  ;;  %v8641_v52 = vrot.slane %v8528_v19, %v19158_v18  ;;  %v8649_v22 = vrot.slane %v8537_v28, %v19158_v18  ;;  %v17526_v19 = vld [vmem:[%s26961_s0 + $0x1] ss:$2 sm:$0xf] }
 0x595   :  { %8702 = vrot.lane.b32.xlu0 %v22216_v14, %s18652_s29 }
 0x596   :  { %v7825_v30 = vpop.permute.xlu1 %7824 }
 0x597   :  { %v7827_v35 = vpop.permute.xlu0 %7826  ;;  %7889 = vst.msk [vmem:[%s26963_s2 + $0x19d] sm:$0x1] %vm1894_vm12, %v7825_v30  ;;  %v17527_v30 = vld [vmem:[%s26961_s0 + $0x1] ss:$2 sm:$0xf] }
 0x598   :  { %7890 = vst.msk [vmem:[%s26963_s2 + $0x1ad] sm:$0x1] %vm1894_vm12, %v7827_v35  ;;  %8704 = vrot.lane.b32.xlu1 %v22233_v13, %s18652_s29 }
 0x599   :  { %8706 = vrot.lane.b32.xlu0 %v8637_v55, %s18652_s29 }
 0x59a   :  { %v7829_v14 = vpop.permute.xlu1 %7828 }
 0x59b   :  { %v7831_v9 = vpop.permute.xlu0 %7830  ;;  %7891 = vst.msk [vmem:[%s26963_s2 + $0x1bd] sm:$0x1] %vm1894_vm12, %v7829_v14 }
 0x59c   :  { %7892 = vst.msk [vmem:[%s26963_s2 + $0x1cd] sm:$0x1] %vm1894_vm12, %v7831_v9  ;;  %8708 = vrot.lane.b32.xlu1 %v8641_v52, %s18652_s29  ;;  %v17530_v9 = vld [vmem:[%s26961_s0 + $0x1] ss:$2 sm:$0xf] }
 0x59d   :  { %8710 = vrot.lane.b32.xlu0 %v8645_v42, %s18652_s29 }
 0x59e   :  { %v7833_v13 = vpop.permute.xlu1 %7832 }
 0x59f   :  { %v8217_v7 = vpop.permute.xlu0 %8216  ;;  %7893 = vst.msk [vmem:[%s26963_s2 + $0x1dd] sm:$0x1] %vm1894_vm12, %v7833_v13  ;;  %v8998_v13 = vld [vmem:[%s26962_s1] sm:$0xff] }
 0x5a0   :  { %8306 = vst.msk [vmem:[%s26963_s2 + $0xe] sm:$0x1] %vm1894_vm12, %v8217_v7  ;;  %8712 = vrot.lane.b32.xlu1 %v8649_v22, %s18652_s29 }
 0x5a1   :  { %8714 = vrot.lane.b32.xlu0 %v8653_v51, %s18652_s29  ;;  %v9015_v51 = vsel %vm298_vm1, %v8998_v13, 0 }
 0x5a2   :  { %v8219_v39 = vpop.permute.xlu1 %8218  ;;  %v22873_v57 = vand.u32 4294901760, %v9015_v51 }
 0x5a3   :  { %v8221_v17 = vpop.permute.xlu0 %8220  ;;  %8307 = vst.msk [vmem:[%s26963_s2 + $0x1e] sm:$0x1] %vm1894_vm12, %v8219_v39 }
 0x5a4   :  { %8308 = vst.msk [vmem:[%s26963_s2 + $0x2e] sm:$0x1] %vm1894_vm12, %v8221_v17  ;;  %8716 = vrot.lane.b32.xlu1 %v8657_v49, %s18652_s29 }
 0x5a5   :  { %8784 = vrot.lane.b32.xlu0 %v17507_v56, %s18641_s14  ;;  %s27009_s14 = smov 44   ;;  %v22876_v56 = vsub.f32 %v9015_v51, %v22873_v57 }
 0x5a6   :  { %v8223_v0 = vpop.permute.xlu1 %8222 }
 0x5a7   :  { %v8225_v44 = vpop.permute.xlu0 %8224  ;;  %8309 = vst.msk [vmem:[%s26963_s2 + $0x3e] sm:$0x1] %vm1894_vm12, %v8223_v0  ;;  %v22887_v17 = vand.u32 4294901760, %v22876_v56 }
 0x5a8   :  { %8310 = vst.msk [vmem:[%s26963_s2 + $0x4e] sm:$0x1] %vm1894_vm12, %v8225_v44  ;;  %8793 = vrot.lane.b32.xlu1 %v17508_v43, %s18643_s20 }
 0x5a9   :  { %8802 = vrot.lane.b32.xlu0 %v17509_v61, %s18640_s13  ;;  %v9111_v43 = vsub.f32 %v22876_v56, %v22887_v17 }
 0x5aa   :  { %v8227_v2 = vpop.permute.xlu1 %8226 }
 0x5ab   :  { %v8229_v1 = vpop.permute.xlu0 %8228  ;;  %8311 = vst.msk [vmem:[%s26963_s2 + $0x5e] sm:$0x1] %vm1894_vm12, %v8227_v2  ;;  %v22899_v44 = vand.u32 4294901760, %v9111_v43 }
 0x5ac   :  { %8312 = vst.msk [vmem:[%s26963_s2 + $0x6e] sm:$0x1] %vm1894_vm12, %v8229_v1  ;;  %8811 = vrot.lane.b32.xlu1 %v17510_v40, %s18642_s19 }
 0x5ad   :  { %8820 = vrot.lane.b32.xlu0 %v17511_v46, %s18645_s26  ;;  %18211 = vmatprep.mubr.f32.mxu0 %v22899_v44 }
 0x5ae   :  { %v8231_v8 = vpop.permute.xlu1 %8230 }
 0x5af   :  { %v8233_v31 = vpop.permute.xlu0 %8232  ;;  %8313 = vst.msk [vmem:[%s26963_s2 + $0x7e] sm:$0x1] %vm1894_vm12, %v8231_v8 }
 0x5b0   :  { %8314 = vst.msk [vmem:[%s26963_s2 + $0x8e] sm:$0x1] %vm1894_vm12, %v8233_v31  ;;  %8829 = vrot.lane.b32.xlu1 %v17512_v10, %s18644_s25 }
 0x5b1   :  { %8838 = vrot.lane.b32.xlu0 %v17513_v53, %s18647_s4 }
 0x5b2   :  { %v8235_v5 = vpop.permute.xlu1 %8234 }
 0x5b3   :  { %v8237_v24 = vpop.permute.xlu0 %8236  ;;  %8315 = vst.msk [vmem:[%s26963_s2 + $0x9e] sm:$0x1] %vm1894_vm12, %v8235_v5 }
 0x5b4   :  { %8316 = vst.msk [vmem:[%s26963_s2 + $0xae] sm:$0x1] %vm1894_vm12, %v8237_v24  ;;  %8847 = vrot.lane.b32.xlu1 %v17514_v34, %s18646_s3 }
 0x5b5   :  { %8856 = vrot.lane.b32.xlu0 %v17515_v41, %s18649_s10 }
 0x5b6   :  { %v8239_v20 = vpop.permute.xlu1 %8238 }
 0x5b7   :  { %v8241_v60 = vpop.permute.xlu0 %8240  ;;  %8317 = vst.msk [vmem:[%s26963_s2 + $0xbe] sm:$0x1] %vm1894_vm12, %v8239_v20 }
 0x5b8   :  { %8318 = vst.msk [vmem:[%s26963_s2 + $0xce] sm:$0x1] %vm1894_vm12, %v8241_v60  ;;  %8865 = vrot.lane.b32.xlu1 %v17516_v6, %s18648_s9 }
 0x5b9   :  { %8874 = vrot.lane.b32.xlu0 %v17517_v15, %s18651_s22  ;;  %s27032_s22 = smov 116  }
 0x5ba   :  { %v8243_v58 = vpop.permute.xlu1 %8242 }
 0x5bb   :  { %v8245_v48 = vpop.permute.xlu0 %8244  ;;  %8319 = vst.msk [vmem:[%s26963_s2 + $0xde] sm:$0x1] %vm1894_vm12, %v8243_v58 }
 0x5bc   :  { %8320 = vst.msk [vmem:[%s26963_s2 + $0xee] sm:$0x1] %vm1894_vm12, %v8245_v48  ;;  %8883 = vrot.lane.b32.xlu1 %v17518_v4, %s18650_s21  ;;  %s27005_s21 = smov 65  }
 0x5bd   :  { %8892 = vrot.lane.b32.xlu0 %v17519_v27, %s18653_s30  ;;  %s27006_s30 = smov 64  }
 0x5be   :  { %v8247_v36 = vpop.permute.xlu1 %8246 }
 0x5bf   :  { %v8249_v25 = vpop.permute.xlu0 %8248  ;;  %8321 = vst.msk [vmem:[%s26963_s2 + $0xfe] sm:$0x1] %vm1894_vm12, %v8247_v36 }
 0x5c0   :  { %8322 = vst.msk [vmem:[%s26963_s2 + $0x10e] sm:$0x1] %vm1894_vm12, %v8249_v25  ;;  %8901 = vrot.lane.b32.xlu1 %v17520_v12, %s18652_s29 }
 0x5c1   :  { %8910 = vrot.lane.b32.xlu0 %v17521_v3, %s18655_s12 }
 0x5c2   :  { %v8251_v16 = vpop.permute.xlu1 %8250 }
 0x5c3   :  { %v8253_v50 = vpop.permute.xlu0 %8252  ;;  %8323 = vst.msk [vmem:[%s26963_s2 + $0x11e] sm:$0x1] %vm1894_vm12, %v8251_v16 }
 0x5c4   :  { %8324 = vst.msk [vmem:[%s26963_s2 + $0x12e] sm:$0x1] %vm1894_vm12, %v8253_v50  ;;  %8919 = vrot.lane.b32.xlu1 %v17522_v32, %s18654_s11 }
 0x5c5   :  { %8928 = vrot.lane.b32.xlu0 %v17523_v37, %s18657_s24  ;;  %s27008_s24 = smov 45  }
 0x5c6   :  { %v8255_v47 = vpop.permute.xlu1 %8254 }
 0x5c7   :  { %v8257_v63 = vpop.permute.xlu0 %8256  ;;  %8325 = vst.msk [vmem:[%s26963_s2 + $0x13e] sm:$0x1] %vm1894_vm12, %v8255_v47 }
 0x5c8   :  { %8326 = vst.msk [vmem:[%s26963_s2 + $0x14e] sm:$0x1] %vm1894_vm12, %v8257_v63  ;;  %8937 = vrot.lane.b32.xlu1 %v17524_v21, %s27005_s21  ;;  %s27029_s21 = smov 8  }
 0x5c9   :  { %8946 = vrot.lane.b32.xlu0 %v17525_v23, %s27006_s30 }
 0x5ca   :  { %v8259_v35 = vpop.permute.xlu1 %8258 }
 0x5cb   :  { %v8261_v55 = vpop.permute.xlu0 %8260  ;;  %8327 = vst.msk [vmem:[%s26963_s2 + $0x15e] sm:$0x1] %vm1894_vm12, %v8259_v35 }
 0x5cc   :  { %8328 = vst.msk [vmem:[%s26963_s2 + $0x16e] sm:$0x1] %vm1894_vm12, %v8261_v55  ;;  %8955 = vrot.lane.b32.xlu1 %v17526_v19, %s18658_s7 }
 0x5cd   :  { %8964 = vrot.lane.b32.xlu0 %v17527_v30, %s18661_s28  ;;  %s27007_s28 = smov 46  }
 0x5ce   :  { %v8263_v52 = vpop.permute.xlu1 %8262 }
 0x5cf   :  { %v8265_v14 = vpop.permute.xlu0 %8264  ;;  %8329 = vst.msk [vmem:[%s26963_s2 + $0x17e] sm:$0x1] %vm1894_vm12, %v8263_v52 }
 0x5d0   :  { %8330 = vst.msk [vmem:[%s26963_s2 + $0x18e] sm:$0x1] %vm1894_vm12, %v8265_v14  ;;  %8973 = vrot.lane.b32.xlu1 %v17528_v38, %s27007_s28 }
 0x5d1   :  { %8982 = vrot.lane.b32.xlu0 %v17529_v54, %s27008_s24 }
 0x5d2   :  { %v8267_v42 = vpop.permute.xlu1 %8266 }
 0x5d3   :  { %v8269_v28 = vpop.permute.xlu0 %8268  ;;  %8331 = vst.msk [vmem:[%s26963_s2 + $0x19e] sm:$0x1] %vm1894_vm12, %v8267_v42 }
 0x5d4   :  { %8332 = vst.msk [vmem:[%s26963_s2 + $0x1ae] sm:$0x1] %vm1894_vm12, %v8269_v28  ;;  %8991 = vrot.lane.b32.xlu1 %v17530_v9, %s27009_s14 }
 0x5d6   :  { %v8271_v59 = vpop.permute.xlu1 %8270 }
 0x5d7   :  { %v8273_v45 = vpop.permute.xlu0 %8272  ;;  %8333 = vst.msk [vmem:[%s26963_s2 + $0x1be] sm:$0x1] %vm1894_vm12, %v8271_v59 }
 0x5d8   :  { %8334 = vst.msk [vmem:[%s26963_s2 + $0x1ce] sm:$0x1] %vm1894_vm12, %v8273_v45 }
 0x5da   :  { %v8275_v22 = vpop.permute.xlu1 %8274 }
 0x5db   :  { %v8659_v7 = vpop.permute.xlu0 %8658  ;;  %8335 = vst.msk [vmem:[%s26963_s2 + $0x1de] sm:$0x1] %vm1894_vm12, %v8275_v22 }
 0x5dc   :  { %8748 = vst.msk [vmem:[%s26963_s2 + $0xf] sm:$0x1] %vm1894_vm12, %v8659_v7 }
 0x5de   :  { %v8661_v39 = vpop.permute.xlu1 %8660 }
 0x5df   :  { %v8663_v49 = vpop.permute.xlu0 %8662  ;;  %8749 = vst.msk [vmem:[%s26963_s2 + $0x1f] sm:$0x1] %vm1894_vm12, %v8661_v39 }
 0x5e0   :  { %8750 = vst.msk [vmem:[%s26963_s2 + $0x2f] sm:$0x1] %vm1894_vm12, %v8663_v49 }
 0x5e2   :  { %v8665_v61 = vpop.permute.xlu1 %8664 }
 0x5e3   :  { %v8667_v0 = vpop.permute.xlu0 %8666  ;;  %8751 = vst.msk [vmem:[%s26963_s2 + $0x3f] sm:$0x1] %vm1894_vm12, %v8665_v61 }
 0x5e4   :  { %8752 = vst.msk [vmem:[%s26963_s2 + $0x4f] sm:$0x1] %vm1894_vm12, %v8667_v0 }
 0x5e6   :  { %v8669_v40 = vpop.permute.xlu1 %8668 }
 0x5e7   :  { %v8671_v46 = vpop.permute.xlu0 %8670  ;;  %8753 = vst.msk [vmem:[%s26963_s2 + $0x5f] sm:$0x1] %vm1894_vm12, %v8669_v40 }
 0x5e8   :  { %8754 = vst.msk [vmem:[%s26963_s2 + $0x6f] sm:$0x1] %vm1894_vm12, %v8671_v46 }
 0x5ea   :  { %v8673_v2 = vpop.permute.xlu1 %8672 }
 0x5eb   :  { %v8675_v1 = vpop.permute.xlu0 %8674  ;;  %8755 = vst.msk [vmem:[%s26963_s2 + $0x7f] sm:$0x1] %vm1894_vm12, %v8673_v2 }
 0x5ec   :  { %8756 = vst.msk [vmem:[%s26963_s2 + $0x8f] sm:$0x1] %vm1894_vm12, %v8675_v1 }
 0x5ee   :  { %v8677_v10 = vpop.permute.xlu1 %8676 }
 0x5ef   :  { %v8679_v53 = vpop.permute.xlu0 %8678  ;;  %8757 = vst.msk [vmem:[%s26963_s2 + $0x9f] sm:$0x1] %vm1894_vm12, %v8677_v10 }
 0x5f0   :  { %8758 = vst.msk [vmem:[%s26963_s2 + $0xaf] sm:$0x1] %vm1894_vm12, %v8679_v53 }
 0x5f2   :  { %v8681_v8 = vpop.permute.xlu1 %8680 }
 0x5f3   :  { %v8683_v31 = vpop.permute.xlu0 %8682  ;;  %8759 = vst.msk [vmem:[%s26963_s2 + $0xbf] sm:$0x1] %vm1894_vm12, %v8681_v8 }
 0x5f4   :  { %8760 = vst.msk [vmem:[%s26963_s2 + $0xcf] sm:$0x1] %vm1894_vm12, %v8683_v31 }
 0x5f6   :  { %v8685_v34 = vpop.permute.xlu1 %8684 }
 0x5f7   :  { %v8687_v41 = vpop.permute.xlu0 %8686  ;;  %8761 = vst.msk [vmem:[%s26963_s2 + $0xdf] sm:$0x1] %vm1894_vm12, %v8685_v34 }
 0x5f8   :  { %8762 = vst.msk [vmem:[%s26963_s2 + $0xef] sm:$0x1] %vm1894_vm12, %v8687_v41 }
 0x5fa   :  { %v8689_v5 = vpop.permute.xlu1 %8688 }
 0x5fb   :  { %v8691_v24 = vpop.permute.xlu0 %8690  ;;  %8763 = vst.msk [vmem:[%s26963_s2 + $0xff] sm:$0x1] %vm1894_vm12, %v8689_v5 }
 0x5fc   :  { %8764 = vst.msk [vmem:[%s26963_s2 + $0x10f] sm:$0x1] %vm1894_vm12, %v8691_v24 }
 0x5fe   :  { %v8693_v6 = vpop.permute.xlu1 %8692 }
 0x5ff   :  { %v8695_v15 = vpop.permute.xlu0 %8694  ;;  %8765 = vst.msk [vmem:[%s26963_s2 + $0x11f] sm:$0x1] %vm1894_vm12, %v8693_v6 }
 0x600   :  { %8766 = vst.msk [vmem:[%s26963_s2 + $0x12f] sm:$0x1] %vm1894_vm12, %v8695_v15 }
 0x602   :  { %v8697_v20 = vpop.permute.xlu1 %8696 }
 0x603   :  { %v8699_v60 = vpop.permute.xlu0 %8698  ;;  %8767 = vst.msk [vmem:[%s26963_s2 + $0x13f] sm:$0x1] %vm1894_vm12, %v8697_v20 }
 0x604   :  { %8768 = vst.msk [vmem:[%s26963_s2 + $0x14f] sm:$0x1] %vm1894_vm12, %v8699_v60 }
 0x606   :  { %v8701_v4 = vpop.permute.xlu1 %8700 }
 0x607   :  { %v8703_v27 = vpop.permute.xlu0 %8702  ;;  %8769 = vst.msk [vmem:[%s26963_s2 + $0x15f] sm:$0x1] %vm1894_vm12, %v8701_v4 }
 0x608   :  { %8770 = vst.msk [vmem:[%s26963_s2 + $0x16f] sm:$0x1] %vm1894_vm12, %v8703_v27  ;;  %v8999_v27 = vld [vmem:[%s26962_s1 + $0x8] sm:$0xff] }
 0x60a   :  { %v8705_v58 = vpop.permute.xlu1 %8704 }
 0x60b   :  { %v8707_v48 = vpop.permute.xlu0 %8706  ;;  %8771 = vst.msk [vmem:[%s26963_s2 + $0x17f] sm:$0x1] %vm1894_vm12, %v8705_v58 }
 0x60c   :  { %8772 = vst.msk [vmem:[%s26963_s2 + $0x18f] sm:$0x1] %vm1894_vm12, %v8707_v48 }
 0x60e   :  { %v8709_v12 = vpop.permute.xlu1 %8708 }
 0x60f   :  { %v8711_v3 = vpop.permute.xlu0 %8710  ;;  %8773 = vst.msk [vmem:[%s26963_s2 + $0x19f] sm:$0x1] %vm1894_vm12, %v8709_v12 }
 0x610   :  { %8774 = vst.msk [vmem:[%s26963_s2 + $0x1af] sm:$0x1] %vm1894_vm12, %v8711_v3 }
 0x612   :  { %v8713_v36 = vpop.permute.xlu1 %8712 }
 0x613   :  { %v8715_v25 = vpop.permute.xlu0 %8714  ;;  %8775 = vst.msk [vmem:[%s26963_s2 + $0x1bf] sm:$0x1] %vm1894_vm12, %v8713_v36  ;;  %v9018_v36 = vsel %vm298_vm1, %v8999_v27, 0 }
 0x614   :  { %8776 = vst.msk [vmem:[%s26963_s2 + $0x1cf] sm:$0x1] %vm1894_vm12, %v8715_v25 }
 0x616   :  { %v8717_v32 = vpop.permute.xlu1 %8716 }
 0x617   :  { %v8785_v37 = vpop.permute.xlu0 %8784  ;;  %8777 = vst.msk [vmem:[%s26963_s2 + $0x1df] sm:$0x1] %vm1894_vm12, %v8717_v32 }
 0x618   :  { %v8786_v16 = vrot.slane %v8785_v37, 1 }
 0x61a   :  { %v8787_v50 = vsel %vm23_vm3, %v8785_v37, %v8786_v16  ;;  %v8794_v21 = vpop.permute.xlu1 %8793  ;;  %vm27011_vm3 = vcmask 711680  }
 0x61b   :  { %8789 = vst.msk [vmem:[#allocation2 + $0x1] ss:$8 sm:$0x7] %vm18728_vm0, %v8787_v50  ;;  %v8803_v23 = vpop.permute.xlu0 %8802  ;;  %v8795_v47 = vrot.slane %v8794_v21, 1 }
 0x61c   :  { %v8804_v63 = vrot.slane %v8803_v23, 1 }
 0x61d   :  { %v8796_v62 = vsel %vm34_vm5, %v8794_v21, %v8795_v47  ;;  %vm27013_vm5 = vcmask 695296   ;;  %v23057_v47 = vand.u32 4294901760, %v9018_v36 }
 0x61e   :  { %v8805_v19 = vsel %vm45_vm2, %v8803_v23, %v8804_v63  ;;  %8798 = vst.msk [vmem:[#allocation2 + $0x2] ss:$8 sm:$0x7] %vm18728_vm0, %v8796_v62  ;;  %v8812_v30 = vpop.permute.xlu1 %8811  ;;  %vm27010_vm2 = vcmask 719872  }
 0x61f   :  { %8807 = vst.msk [vmem:[#allocation2 + $0x3] ss:$8 sm:$0x7] %vm18728_vm0, %v8805_v19  ;;  %v8821_v35 = vpop.permute.xlu0 %8820  ;;  %v8813_v55 = vrot.slane %v8812_v30, 1 }
 0x620   :  { %v8822_v38 = vrot.slane %v8821_v35, 1 }
 0x621   :  { %v8814_v54 = vsel %vm56_vm4, %v8812_v30, %v8813_v55  ;;  %vm27012_vm4 = vcmask 703488  }
 0x622   :  { %v8823_v52 = vsel %vm67_vm7, %v8821_v35, %v8822_v38  ;;  %8816 = vst.msk [vmem:[#allocation2 + $0x4] ss:$8 sm:$0x7] %vm18728_vm0, %v8814_v54  ;;  %v8830_v14 = vpop.permute.xlu1 %8829  ;;  %vm27015_vm7 = vcmask 556032  }
 0x623   :  { %8825 = vst.msk [vmem:[#allocation2 + $0x5] ss:$8 sm:$0x7] %vm18728_vm0, %v8823_v52  ;;  %v8839_v9 = vpop.permute.xlu0 %8838  ;;  %v8831_v42 = vrot.slane %v8830_v14, 1 }
 0x624   :  { %v8840_v28 = vrot.slane %v8839_v9, 1 }
 0x625   :  { %v8832_v59 = vsel %vm78_vm6, %v8830_v14, %v8831_v42  ;;  %vm27014_vm6 = vcmask 687104  }
 0x626   :  { %v8841_v45 = vsel %vm89_vm9, %v8839_v9, %v8840_v28  ;;  %8834 = vst.msk [vmem:[#allocation2 + $0x6] ss:$8 sm:$0x7] %vm18728_vm0, %v8832_v59  ;;  %v8848_v13 = vpop.permute.xlu1 %8847  ;;  %vm27017_vm9 = vcmask 539648  }
 0x627   :  { %8843 = vst.msk [vmem:[#allocation2 + $0x7] ss:$8 sm:$0x7] %vm18728_vm0, %v8841_v45  ;;  %v8857_v22 = vpop.permute.xlu0 %8856  ;;  %v8849_v7 = vrot.slane %v8848_v13, 1 }
 0x628   :  { %v8858_v51 = vrot.slane %v8857_v22, 1 }
 0x629   :  { %v8850_v39 = vsel %vm100_vm8, %v8848_v13, %v8849_v7  ;;  %vm27016_vm8 = vcmask 547840   ;;  %v9000_v13 = vld [vmem:[%s26962_s1 + $0x10] sm:$0xff] }
 0x62a   :  { %v8859_v49 = vsel %vm111_vm11, %v8857_v22, %v8858_v51  ;;  %8852 = vst.msk [vmem:[#allocation2 + $0x18] ss:$8 sm:$0x7] %vm18728_vm0, %v8850_v39  ;;  %v8866_v43 = vpop.permute.xlu1 %8865  ;;  %vm27018_vm11 = vcmask 531456  }
 0x62b   :  { %8861 = vst.msk [vmem:[#allocation2 + $0x19] ss:$8 sm:$0x7] %vm18728_vm0, %v8859_v49  ;;  %v8875_v61 = vpop.permute.xlu0 %8874  ;;  %v8867_v0 = vrot.slane %v8866_v43, 1 }
 0x62c   :  { %v8876_v40 = vrot.slane %v8875_v61, 1 }
 0x62d   :  { %v8868_v46 = vsel %vm27010_vm2, %v8866_v43, %v8867_v0  ;;  %vm27019_vm2 = vcmask 392192   ;;  %v9001_v43 = vld [vmem:[%s26962_s1 + $0x18] sm:$0x3f] }
 0x62e   :  { %v8877_v2 = vsel %vm27011_vm3, %v8875_v61, %v8876_v40  ;;  %8870 = vst.msk [vmem:[#allocation2 + $0x1a] ss:$8 sm:$0x7] %vm18728_vm0, %v8868_v46  ;;  %v8884_v1 = vpop.permute.xlu1 %8883  ;;  %v9003_v37 = vld [vmem:[#allocation2 + $0x8] sm:$0xff]  ;;  %v9004_v16 = vld [vmem:[#allocation2 + $0x10] sm:$0xff]  ;;  %v9002_v23 = vld [vmem:[#allocation2] sm:$0xff]  ;;  %v23086_v40 = vsub.f32 %v9018_v36, %v23057_v47 }
 0x62f   :  { %8879 = vst.msk [vmem:[#allocation2 + $0x1b] ss:$8 sm:$0x7] %vm18728_vm0, %v8877_v2  ;;  %v8893_v10 = vpop.permute.xlu0 %8892  ;;  %v8885_v53 = vrot.slane %v8884_v1, 1  ;;  %v9035_v30 = vand.u32 4294901760, %v9003_v37  ;;  %v9726_v55 = vand.u32 4294901760, %v9004_v16 }
 0x630   :  { %v8894_v8 = vrot.slane %v8893_v10, 1  ;;  %v9037_v42 = vand.u32 4294901760, %v9002_v23  ;;  %v9021_v46 = vsel %vm298_vm1, %v9000_v13, 0 }
 0x631   :  { %v8886_v31 = vsel %vm27012_vm4, %v8884_v1, %v8885_v53  ;;  %v9024_v53 = vsel %vm298_vm1, %v9001_v43, 0  ;;  %vm27021_vm1 = vcmask 359424   ;;  %vm27030_vm4 = vcmask 64512  }
 0x632   :  { %v8895_v34 = vsel %vm27013_vm5, %v8893_v10, %v8894_v8  ;;  %8888 = vst.msk [vmem:[#allocation2 + $0x1c] ss:$8 sm:$0x7] %vm18728_vm0, %v8886_v31  ;;  %v8902_v41 = vpop.permute.xlu1 %8901  ;;  %v23114_v27 = vsub.f32 %v9002_v23, %v9037_v42  ;;  %vm27031_vm5 = vmmov %vm27030_vm4 }
 0x633   :  { %8897 = vst.msk [vmem:[#allocation2 + $0x1d] ss:$8 sm:$0x7] %vm18728_vm0, %v8895_v34  ;;  %v8911_v5 = vpop.permute.xlu0 %8910  ;;  %v8903_v24 = vrot.slane %v8902_v41, 1  ;;  %v23096_v34 = vand.u32 4294901760, %v9021_v46 }
 0x634   :  { %v8912_v6 = vrot.slane %v8911_v5, 1  ;;  %v9160_v23 = vand.u32 4294901760, %v23114_v27 }
 0x635   :  { %v8904_v15 = vsel %vm27014_vm6, %v8902_v41, %v8903_v24  ;;  %v23105_v24 = vand.u32 4294901760, %v23086_v40  ;;  %vm27033_vm6 = vmmov %vm27030_vm4 }
 0x636   :  { %v8913_v20 = vsel %vm27015_vm7, %v8911_v5, %v8912_v6  ;;  %8906 = vst.msk [vmem:[#allocation2 + $0x1e] ss:$8 sm:$0x7] %vm18728_vm0, %v8904_v15  ;;  %v8920_v60 = vpop.permute.xlu1 %8919  ;;  %v23107_v6 = vsub.f32 %v9003_v37, %v9035_v30  ;;  %vm27034_vm7 = vmmov %vm27030_vm4 }
 0x637   :  { %8915 = vst.msk [vmem:[#allocation2 + $0x1f] ss:$8 sm:$0x7] %vm18728_vm0, %v8913_v20  ;;  %v8929_v4 = vpop.permute.xlu0 %8928  ;;  %v8921_v58 = vrot.slane %v8920_v60, 1  ;;  %v23109_v20 = vsub.f32 %v9004_v16, %v9726_v55 }
 0x638   :  { %v8930_v48 = vrot.slane %v8929_v4, 1  ;;  %v9154_v36 = vand.u32 4294901760, %v23107_v6 }
 0x639   :  { %v8922_v12 = vsel %vm27016_vm8, %v8920_v60, %v8921_v58  ;;  %v23111_v60 = vand.u32 4294901760, %v9024_v53  ;;  %vm27035_vm8 = vmmov %vm27030_vm4 }
 0x63a   :  { %v8931_v3 = vsel %vm27017_vm9, %v8929_v4, %v8930_v48  ;;  %8924 = vst.msk [vmem:[#allocation2 + $0x30] ss:$8 sm:$0x7] %vm18728_vm0, %v8922_v12  ;;  %v8938_v25 = vpop.permute.xlu1 %8937  ;;  %v23120_v12 = vsub.f32 %v9021_v46, %v23096_v34  ;;  %vm27036_vm9 = vmmov %vm27030_vm4 }
 0x63b   :  { %8933 = vst.msk [vmem:[#allocation2 + $0x31] ss:$8 sm:$0x7] %vm18728_vm0, %v8931_v3  ;;  %v8947_v32 = vpop.permute.xlu0 %8946  ;;  %v8939_v50 = vrot.slane %v8938_v25, 1  ;;  %v23130_v37 = vsub.f32 %v9024_v53, %v23111_v60 }
 0x63c   :  { %v8948_v21 = vrot.slane %v8947_v32, 1 }
 0x63d   :  { %v8940_v63 = vsel %vm27018_vm11, %v8938_v25, %v8939_v50  ;;  %v9837_v25 = vand.u32 4294901760, %v23109_v20  ;;  %vm27037_vm11 = vmmov %vm27030_vm4 }
 0x63e   :  { %v8949_v62 = vsel %vm221_vm13, %v8947_v32, %v8948_v21  ;;  %v9006_v19 = vld [vmem:[#allocation2 + $0x20] sm:$0xff]  ;;  %v9007_v35 = vld [vmem:[#allocation2 + $0x28] sm:$0xff]  ;;  %v9005_v38 = vld [vmem:[#allocation2 + $0x18] sm:$0xff]  ;;  %8942 = vst.msk [vmem:[#allocation2 + $0x32] ss:$8 sm:$0x7] %vm18728_vm0, %v8940_v63  ;;  %v8956_v54 = vpop.permute.xlu1 %8955  ;;  %v9122_v32 = vsub.f32 %v23086_v40, %v23105_v24 }
 0x63f   :  { %8951 = vst.msk [vmem:[#allocation2 + $0x33] ss:$8 sm:$0x7] %vm18728_vm0, %v8949_v62  ;;  %v8965_v52 = vpop.permute.xlu0 %8964  ;;  %v9039_v14 = vand.u32 4294901760, %v9006_v19  ;;  %v9729_v9 = vand.u32 4294901760, %v9007_v35  ;;  %v9041_v28 = vand.u32 4294901760, %v9005_v38 }
 0x640   :  { %v8957_v59 = vrot.slane %v8956_v54, 1  ;;  %v8966_v45 = vrot.slane %v8965_v52, 1  ;;  %v23138_v62 = vand.u32 4294901760, %v23120_v12 }
 0x641   :  { %v23068_v22 = vpack.c.bf16 %v9039_v14, %v9035_v30  ;;  %v23070_v7 = vpack.c.bf16 %v9729_v9, %v9726_v55  ;;  %v23072_v51 = vpack.c.bf16 %v9041_v28, %v9037_v42  ;;  %v23091_v10 = vsub.f32 %v9006_v19, %v9039_v14 }
 0x642   :  { %v8958_v39 = vsel %vm27019_vm2, %v8956_v54, %v8957_v59  ;;  %v8967_v49 = vsel %vm243_vm15, %v8965_v52, %v8966_v45  ;;  %v8974_v61 = vpop.permute.xlu1 %8973  ;;  %vm27020_vm15 = vcmask 367616   ;;  %v23102_v5 = vsub.f32 %v9007_v35, %v9729_v9  ;;  %vm27038_vm2 = vmmov %vm27030_vm4 }
 0x643   :  { %8960 = vst.msk [vmem:[#allocation2 + $0x34] ss:$8 sm:$0x7] %vm18728_vm0, %v8958_v39  ;;  %8969 = vst.msk [vmem:[#allocation2 + $0x35] ss:$8 sm:$0x7] %vm18728_vm0, %v8967_v49  ;;  %18384 = vmatprep.subr.bf16.mxu1 %v23068_v22  ;;  %18432 = vmatprep.subr.bf16.mxu0 %v23070_v7  ;;  %v8983_v0 = vpop.permute.xlu0 %8982  ;;  %v23116_v58 = vsub.f32 %v9005_v38, %v9041_v28  ;;  %v9155_v38 = vsub.f32 %v23107_v6, %v9154_v36 }
 0x644   :  { %v8975_v2 = vrot.slane %v8974_v61, 1  ;;  %v8984_v1 = vrot.slane %v8983_v0, 1  ;;  %18386 = vmatpush1.bf16.msra.mxu1 %v23072_v51  ;;  %18434 = vmatpush3.bf16.msra.mxu0 %v23070_v7  ;;  %v9166_v4 = vand.u32 4294901760, %v23091_v10  ;;  %v9844_v3 = vand.u32 4294901760, %v23102_v5 }
 0x645   :  { %v26998_v63 = vand.u32 4294901760, %v23116_v58  ;;  %v9838_v54 = vsub.f32 %v23109_v20, %v9837_v25  ;;  %v23149_v52 = vand.u32 4294901760, %v9122_v32  ;;  %v23152_v14 = vand.u32 4294901760, %v23130_v37 }
 0x646   :  { %v8976_v8 = vsel %vm254_vm14, %v8974_v61, %v8975_v2  ;;  %v8985_v31 = vsel %vm27020_vm15, %v8983_v0, %v8984_v1  ;;  %v8992_v41 = vpop.permute.xlu1 %8991  ;;  %v9167_v16 = vsub.f32 %v23091_v10, %v9166_v4  ;;  %v9845_v55 = vsub.f32 %v23102_v5, %v9844_v3  ;;  %vm27039_vm15 = vmmov %vm27038_vm2 }
 0x647   :  { %8978 = vst.msk [vmem:[#allocation2 + $0x36] ss:$8 sm:$0x7] %vm18728_vm0, %v8976_v8  ;;  %8987 = vst.msk [vmem:[#allocation2 + $0x37] ss:$8 sm:$0x7] %vm18728_vm0, %v8985_v31  ;;  %v9161_v49 = vsub.f32 %v23114_v27, %v9160_v23  ;;  %v9173_v43 = vsub.f32 %v23116_v58, %v26998_v63  ;;  %v9133_v61 = vsub.f32 %v23120_v12, %v23138_v62 }
 0x648   :  { %v8993_v15 = vrot.slane %v8992_v41, 1  ;;  %v9168_v28 = vand.u32 4294901760, %v9167_v16  ;;  %v9846_v1 = vand.u32 4294901760, %v9845_v55 }
 0x64a   :  { %v8994_v48 = vsel %vm27021_vm1, %v8992_v41, %v8993_v15  ;;  %v9156_v15 = vand.u32 4294901760, %v9155_v38  ;;  %vm27040_vm1 = vmmov %vm27038_vm2 }
 0x64b   :  { %8996 = vst.msk [vmem:[#allocation2 + $0x48] ss:$8 sm:$0x7] %vm18728_vm0, %v8994_v48  ;;  %vm27022_vm0 = vcmask 1040384   ;;  %v9839_v48 = vand.u32 4294901760, %v9838_v54 }
 0x64c   :  { %vm27023_vm14 = vmmov %vm27022_vm0  ;;  %v18391_v38 = vpack.c.bf16 %v9168_v28, %v9156_v15 }
 0x64d   :  { %vm27024_vm3 = vmmov %vm27022_vm0  ;;  %v18439_v54 = vpack.c.bf16 %v9846_v1, %v9839_v48 }
 0x64e   :  { %v9009_v50 = vld [vmem:[#allocation2 + $0x38] sm:$0xff]  ;;  %v9010_v21 = vld [vmem:[#allocation2 + $0x40] sm:$0xff]  ;;  %v9008_v11 = vld [vmem:[#allocation2 + $0x30] sm:$0xff] }
 0x64f   :  { %v9043_v19 = vand.u32 4294901760, %v9009_v50  ;;  %v9732_v30 = vand.u32 4294901760, %v9010_v21  ;;  %v9045_v35 = vand.u32 4294901760, %v9008_v11 }
 0x651   :  { %v23154_v9 = vsub.f32 %v9009_v50, %v9043_v19  ;;  %v23156_v42 = vsub.f32 %v9008_v11, %v9045_v35  ;;  %v23158_v59 = vsub.f32 %v9010_v21, %v9732_v30 }
 0x652   :  { %v9012_v45 = vld [vmem:[#allocation2 + $0x50] sm:$0x1]  ;;  %v9013_v13 = vld [vmem:[#allocation2 + $0x58] sm:$0x1]  ;;  %v9011_v39 = vld [vmem:[#allocation2 + $0x48] sm:$0x1] }
 0x653   :  { %v9030_v0 = vsel %vm27022_vm0, %v9012_v45, 0  ;;  %v9033_v46 = vsel %vm27023_vm14, %v9013_v13, 0  ;;  %v9027_v2 = vsel %vm27024_vm3, %v9011_v39, 0  ;;  %v27001_v41 = vand.u32 4294901760, %v23154_v9  ;;  %vm27041_vm0 = vmmov %vm27040_vm1 }
 0x654   :  { %v9047_v53 = vand.u32 4294901760, %v9030_v0  ;;  %v9735_v8 = vand.u32 4294901760, %v9033_v46  ;;  %v9049_v31 = vand.u32 4294901760, %v9027_v2  ;;  %v9851_v32 = vand.u32 4294901760, %v23158_v59  ;;  %vm27042_vm14 = vmmov %vm27041_vm0 }
 0x655   :  { %v26999_v16 = vand.u32 4294901760, %v23156_v42  ;;  %v9162_v13 = vand.u32 4294901760, %v9161_v49  ;;  %v9174_v39 = vand.u32 4294901760, %v9173_v43  ;;  %vm27043_vm3 = vmmov %vm27041_vm0 }
 0x656   :  { %v23174_v50 = vpack.c.bf16 %v9047_v53, %v9043_v19  ;;  %v23176_v21 = vsub.f32 %v9030_v0, %v9047_v53  ;;  %v23178_v11 = vpack.c.bf16 %v9735_v8, %v9732_v30  ;;  %v23180_v45 = vpack.c.bf16 %v9049_v31, %v9045_v35 }
 0x657   :  { %v23182_v55 = vsub.f32 %v9027_v2, %v9049_v31  ;;  %v23184_v63 = vsub.f32 %v9033_v46, %v9735_v8  ;;  %v9179_v19 = vsub.f32 %v23154_v9, %v27001_v41  ;;  %v9852_v35 = vsub.f32 %v23158_v59, %v9851_v32 }
 0x658   :  { %18388 = vmatprep.subr.bf16.mxu1 %v23174_v50  ;;  %18436 = vmatprep.subr.bf16.mxu0 %v23178_v11  ;;  %v27000_v30 = vand.u32 4294901760, %v23176_v21  ;;  %v9185_v28 = vsub.f32 %v23156_v42, %v26999_v16  ;;  %v9134_v46 = vand.u32 4294901760, %v9133_v61  ;;  %v9144_v2 = vsub.f32 %v23130_v37, %v23152_v14 }
 0x659   :  { %18390 = vmatpush1.bf16.msra.mxu1 %v23180_v45  ;;  %18438 = vmatpush3.bf16.msra.mxu0 %v23178_v11  ;;  %v9858_v49 = vand.u32 4294901760, %v23184_v63  ;;  %v9196_v43 = vand.u32 4294901760, %v23182_v55  ;;  %v18393_v1 = vpack.c.bf16 %v9174_v39, %v9162_v13  ;;  %v9180_v31 = vand.u32 4294901760, %v9179_v19 }
 0x65a   :  { %18392 = vmatprep.subr.bf16.mxu1 %v18391_v38  ;;  %18440 = vmatprep.subr.bf16.mxu0 %v18439_v54  ;;  %v9191_v0 = vsub.f32 %v23176_v21, %v27000_v30  ;;  %v9853_v61 = vand.u32 4294901760, %v9852_v35  ;;  %v9186_v38 = vand.u32 4294901760, %v9185_v28  ;;  %v9145_v16 = vand.u32 4294901760, %v9144_v2 }
 0x65b   :  { %v9859_v53 = vsub.f32 %v23184_v63, %v9858_v49  ;;  %v9197_v8 = vsub.f32 %v23182_v55, %v9196_v43  ;;  %v18403_v19 = vpack.c.bf16 %v23176_v21, %v23154_v9  ;;  %v18467_v35 = vpack.c.bf16 %v9858_v49, %v9851_v32 }
 0x65c   :  { %9113 = vmatmul.mubr.f32.vlgmr.msra.gmra.mrb[4].mxu1 %v22899_v44  ;;  %18212 = vmatmul.mubr.f32.vlgmr.msra.gmra.mrb[8].mxu0 %v23149_v52  ;;  %v9192_v15 = vand.u32 4294901760, %v9191_v0  ;;  %v18399_v44 = vpack.c.bf16 %v23091_v10, %v23107_v6  ;;  %v27026_v10 = vand.u32 4294901760, %v23154_v9 }
 0x65d   :  { %18394 = vmatpush1.bf16.msra.mxu1 %v18393_v1  ;;  %18442 = vmatpush3.bf16.msra.mxu0 %v18439_v54  ;;  %v9860_v48 = vand.u32 4294901760, %v9859_v53  ;;  %v9198_v13 = vand.u32 4294901760, %v9197_v8  ;;  %v18447_v54 = vpack.c.bf16 %v23102_v5, %v23109_v20  ;;  %v27027_v5 = vand.u32 4294901760, %v23176_v21 }
 0x65e   :  { %9118 = vmatprep.mubr.f32.mxu1 %v18664_v33  ;;  %v18395_v39 = vpack.c.bf16 %v9192_v15, %v9180_v31  ;;  %18214 = vmatprep.mubr.f32.mxu0 %v9134_v46  ;;  %v27028_v20 = vand.u32 4294901760, %v23156_v42 }
 0x65f   :  { %v18443_v30 = vpack.c.bf16 %v9860_v48, %v9853_v61  ;;  %v18397_v41 = vpack.c.bf16 %v9198_v13, %v9186_v38  ;;  %v18419_v6 = vpack.c.bf16 %v27027_v5, %v27026_v10 }
 0x660   :  { %9124 = vmatmul.mubr.f32.gmra.mrb[6].mxu1 %v23149_v52  ;;  %18396 = vmatprep.subr.bf16.mxu1 %v18395_v39  ;;  %v18451_v52 = vpack.c.bf16 %v23184_v63, %v23158_v59 }
 0x661   :  { %18444 = vmatprep.subr.bf16.mxu0 %v18443_v30  ;;  %18398 = vmatpush1.bf16.msra.mxu1 %v18397_v41  ;;  %v18401_v41 = vpack.c.bf16 %v23116_v58, %v23114_v27 }
 0x662   :  { %18215 = vmatmul.mubr.f32.gmra.mrb[10].mxu0 %v9145_v16  ;;  %18400 = vmatprep.subr.bf16.mxu1 %v18399_v44 }
 0x663   :  { %18446 = vmatpush3.bf16.msra.mxu0 %v18443_v30  ;;  %9129 = vmatprep.mubr.f32.mxu1 %v18664_v33  ;;  %v18463_v30 = vpack.c.bf16 %v9844_v3, %v9837_v25 }
 0x664   :  { %18448 = vmatprep.subr.bf16.mxu0 %v18447_v54  ;;  %9135 = vmatmul.mubr.f32.gmra.mrb[8].mxu1 %v9134_v46 }
 0x665   :  { %18225 = vmatprep.mubr.f32.mxu0 %v22873_v57  ;;  %9140 = vmatprep.mubr.f32.mxu1 %v18664_v33 }
 0x666   :  { %18226 = vmatmul.mubr.f32.vlgmr.msra.gmra.mrb[8].mxu0 %v23057_v47 }
 0x667   :  { %18450 = vmatpush3.bf16.msra.mxu0 %v18447_v54  ;;  %18228 = vmatprep.mubr.f32.mxu0 %v23096_v34 }
 0x668   :  { %18452 = vmatprep.subr.bf16.mxu0 %v18451_v52  ;;  %9146 = vmatmul.mubr.f32.gmra.mrb[10].mxu1 %v9145_v16  ;;  %v18405_v16 = vpack.c.bf16 %v23182_v55, %v23156_v42 }
 0x669   :  { %9256 = vmatprep.mubr.f32.mxu1 %v18664_v33 }
 0x66a   :  { %18229 = vmatmul.mubr.f32.gmra.mrb[10].mxu0 %v23111_v60 }
 0x66b   :  { %18454 = vmatpush3.bf16.msra.mxu0 %v18451_v52  ;;  %18239 = vmatprep.mubr.f32.mxu0 %v22876_v56 }
 0x66c   :  { %18456 = vmatprep.subr.bf16.mxu0 %v23070_v7  ;;  %9258 = vmatmul.mubr.f32.vlgmr.msra.gmra.mrb[4].mxu1 %v22873_v57 }
 0x66d   :  { %18402 = vmatpush1.bf16.msra.mxu1 %v18401_v41  ;;  %9263 = vmatprep.mubr.f32.mxu1 %v18664_v33 }
 0x66e   :  { %18404 = vmatprep.subr.bf16.mxu1 %v18403_v19  ;;  %18240 = vmatmul.mubr.f32.vlgmr.msra.gmra.mrb[8].mxu0 %v23086_v40 }
 0x66f   :  { %18458 = vmatpush3.bf16.msra.mxu0 %v23070_v7  ;;  %18242 = vmatprep.mubr.f32.mxu0 %v23120_v12 }
 0x670   :  { %18460 = vmatprep.subr.bf16.mxu0 %v23178_v11  ;;  %9265 = vmatmul.mubr.f32.gmra.mrb[6].mxu1 %v23057_v47 }
 0x671   :  { %18406 = vmatpush1.bf16.msra.mxu1 %v18405_v16  ;;  %9270 = vmatprep.mubr.f32.mxu1 %v18664_v33 }
 0x672   :  { %18408 = vmatprep.subr.bf16.mxu1 %v23068_v22  ;;  %18243 = vmatmul.mubr.f32.gmra.mrb[10].mxu0 %v23130_v37 }
 0x673   :  { %18462 = vmatpush3.bf16.msra.mxu0 %v23178_v11  ;;  %18253 = vmatprep.mubr.f32.mxu0 %v22887_v17 }
 0x674   :  { %18464 = vmatprep.subr.bf16.mxu0 %v18463_v30  ;;  %9272 = vmatmul.mubr.f32.gmra.mrb[8].mxu1 %v23096_v34 }
 0x675   :  { %9277 = vmatprep.mubr.f32.mxu1 %v18664_v33 }
 0x676   :  { %18254 = vmatmul.mubr.f32.vlgmr.msra.gmra.mrb[8].mxu0 %v23105_v24 }
 0x677   :  { %18466 = vmatpush3.bf16.msra.mxu0 %v18463_v30  ;;  %18256 = vmatprep.mubr.f32.mxu0 %v23138_v62 }
 0x678   :  { %18468 = vmatprep.subr.bf16.mxu0 %v18467_v35  ;;  %9279 = vmatmul.mubr.f32.gmra.mrb[10].mxu1 %v23111_v60 }
 0x679   :  { %9365 = vmatprep.mubr.f32.mxu1 %v18664_v33 }
 0x67a   :  { %18257 = vmatmul.mubr.f32.gmra.mrb[10].mxu0 %v23152_v14 }
 0x67b   :  { %18470 = vmatpush3.bf16.msra.mxu0 %v18467_v35  ;;  %18267 = vmatprep.mubr.f32.mxu0 %v22873_v57 }
 0x67c   :  { %18472 = vmatprep.subr.bf16.mxu0 %v23070_v7  ;;  %9368 = vmatmul.mubr.f32.vlgmr.msra.gmra.mrb[4].mxu1 %v22876_v56  ;;  %v18415_v56 = vpack.c.bf16 %v9166_v4, %v9154_v36  ;;  %v18421_v4 = vpack.c.bf16 %v9196_v43, %v27028_v20 }
 0x67d   :  { %18410 = vmatpush1.bf16.msra.mxu1 %v23072_v51  ;;  %9373 = vmatprep.mubr.f32.mxu1 %v18664_v33 }
 0x67e   :  { %18412 = vmatprep.subr.bf16.mxu1 %v23174_v50  ;;  %18268 = vmatmul.mubr.f32.vlgmr.msra.gmra.mrb[8].mxu0 %v23057_v47 }
 0x67f   :  { %18474 = vmatpush3.bf16.msra.mxu0 %v23070_v7  ;;  %18270 = vmatprep.mubr.f32.mxu0 %v23096_v34  ;;  %v27025_v7 = vand.u32 4294901760, %v23116_v58 }
 0x680   :  { %18476 = vmatprep.subr.bf16.mxu0 %v23178_v11  ;;  %9376 = vmatmul.mubr.f32.gmra.mrb[6].mxu1 %v23086_v40 }
 0x681   :  { %18414 = vmatpush1.bf16.msra.mxu1 %v23180_v45  ;;  %9381 = vmatprep.mubr.f32.mxu1 %v18664_v33  ;;  %v18417_v40 = vpack.c.bf16 %v27025_v7, %v9160_v23 }
 0x682   :  { %18416 = vmatprep.subr.bf16.mxu1 %v18415_v56  ;;  %18271 = vmatmul.mubr.f32.gmra.mrb[10].mxu0 %v23111_v60 }
 0x683   :  { %18478 = vmatpush3.bf16.msra.mxu0 %v23178_v11  ;;  %18281 = vmatprep.mubr.f32.mxu0 %v22873_v57 }
 0x684   :  { %9384 = vmatmul.mubr.f32.gmra.mrb[8].mxu1 %v23120_v12 }
 0x685   :  { %9389 = vmatprep.mubr.f32.mxu1 %v18664_v33 }
 0x686   :  { %18282 = vmatmul.mubr.f32.vlgmr.msra.gmra.mrb[8].mxu0 %v23057_v47 }
 0x687   :  { %18284 = vmatprep.mubr.f32.mxu0 %v23096_v34 }
 0x688   :  { %9392 = vmatmul.mubr.f32.gmra.mrb[10].mxu1 %v23130_v37 }
 0x689   :  { %9470 = vmatprep.mubr.f32.mxu1 %v18664_v33 }
 0x68a   :  { %18285 = vmatmul.mubr.f32.gmra.mrb[10].mxu0 %v23111_v60 }
 0x68c   :  { %9474 = vmatmul.mubr.f32.vlgmr.msra.gmra.mrb[4].mxu1 %v22887_v17 }
 0x68d   :  { %18418 = vmatpush1.bf16.msra.mxu1 %v18417_v40  ;;  %9479 = vmatprep.mubr.f32.mxu1 %v18664_v33 }
 0x68e   :  { %18420 = vmatprep.subr.bf16.mxu1 %v18419_v6 }
 0x690   :  { %9483 = vmatmul.mubr.f32.gmra.mrb[6].mxu1 %v23105_v24 }
 0x691   :  { %18422 = vmatpush1.bf16.msra.mxu1 %v18421_v4  ;;  %9488 = vmatprep.mubr.f32.mxu1 %v18664_v33 }
 0x692   :  { %18424 = vmatprep.subr.bf16.mxu1 %v23068_v22 }
 0x694   :  { %9492 = vmatmul.mubr.f32.gmra.mrb[8].mxu1 %v23138_v62 }
 0x695   :  { %9497 = vmatprep.mubr.f32.mxu1 %v18664_v33 }
 0x698   :  { %9501 = vmatmul.mubr.f32.gmra.mrb[10].mxu1 %v23152_v14 }
 0x699   :  { %9595 = vmatprep.mubr.f32.mxu1 %v18664_v33 }
 0x69c   :  { %9597 = vmatmul.mubr.f32.vlgmr.msra.gmra.mrb[4].mxu1 %v22873_v57 }
 0x69d   :  { %18426 = vmatpush1.bf16.msra.mxu1 %v23072_v51  ;;  %9602 = vmatprep.mubr.f32.mxu1 %v18664_v33 }
 0x69e   :  { %18428 = vmatprep.subr.bf16.mxu1 %v23174_v50 }
 0x6a0   :  { %9604 = vmatmul.mubr.f32.gmra.mrb[6].mxu1 %v23057_v47 }
 0x6a1   :  { %18430 = vmatpush1.bf16.msra.mxu1 %v23180_v45  ;;  %9609 = vmatprep.mubr.f32.mxu1 %v18664_v33 }
 0x6a4   :  { %9611 = vmatmul.mubr.f32.gmra.mrb[8].mxu1 %v23096_v34 }
 0x6a5   :  { %9616 = vmatprep.mubr.f32.mxu1 %v18664_v33 }
 0x6a8   :  { %9618 = vmatmul.mubr.f32.gmra.mrb[10].mxu1 %v23111_v60 }
 0x6a9   :  { %9696 = vmatprep.mubr.f32.mxu1 %v18664_v33 }
 0x6ac   :  { %9698 = vmatmul.mubr.f32.vlgmr.msra.gmra.mrb[4].mxu1 %v22873_v57 }
 0x6ad   :  { %9703 = vmatprep.mubr.f32.mxu1 %v18664_v33 }
 0x6b0   :  { %9705 = vmatmul.mubr.f32.gmra.mrb[6].mxu1 %v23057_v47 }
 0x6b1   :  { %9710 = vmatprep.mubr.f32.mxu1 %v18664_v33 }
 0x6b4   :  { %9712 = vmatmul.mubr.f32.gmra.mrb[8].mxu1 %v23096_v34 }
 0x6b5   :  { %9717 = vmatprep.mubr.f32.mxu1 %v18664_v33 }
 0x6b8   :  { %9719 = vmatmul.mubr.f32.gmra.mrb[10].mxu1 %v23111_v60 }
 0x77f   :  { %v9699_v17 = vpop.f32.mrb[4].mxu1 }
 0x780   :  { %v17531_v22 = vclamps-f32 %v9699_v17, 3.0  ;;  %v9701_v51 = vpop.f32.mrb[5].mxu1 }
 0x781   :  { %v17532_v24 = vclamps-f32 %v9701_v51, 3.0 }
 0x782   :  { %10363 = vst [vmem:[#allocation3] sm:$0xff] %v17531_v22  ;;  %v10383_v27 = vcombine.high %v17531_v22, %v17531_v22  ;;  %v10390_v57 = vrot.slane %v17531_v22, %v19147_v29 }
 0x783   :  { %10364 = vst [vmem:[#allocation3 + $0x8] sm:$0xff] %v17532_v24  ;;  %v9706_v58 = vpop.f32.mrb[6].mxu1 }
 0x784   :  { %v10397_v47 = vrot.slane %v10383_v27, %v19147_v29  ;;  %v10398_v12 = vcombine.high %v10390_v57, %v10390_v57  ;;  %v10406_v3 = vrot.slane %v10390_v57, %v19147_v29  ;;  %v17534_v34 = vclamps-f32 %v9706_v58, 3.0  ;;  %v9708_v36 = vpop.f32.mrb[7].mxu1 }
 0x785   :  { %v17535_v33 = vclamps-f32 %v9708_v36, 3.0 }
 0x786   :  { %v10399_v25 = vcombine.high %v10397_v47, %v10397_v47  ;;  %v23335_v60 = vrot.slane %v10397_v47, %v19147_v29  ;;  %v10420_v37 = vrot.slane %v10398_v12, %v19147_v29  ;;  %v10428_v23 = vcombine.high %v10406_v3, %v10406_v3  ;;  %17543 = vst.msk [vmem:[%s26963_s2 + $0x1e0] sm:$0x1] %vm1894_vm12, %v10406_v3 }
 0x787   :  { %10366 = vst [vmem:[#allocation3 + $0x18] sm:$0xff] %v17534_v34  ;;  %v10432_v63 = vcombine.high %v17534_v34, %v17534_v34  ;;  %v10439_v62 = vrot.slane %v17534_v34, %v19147_v29  ;;  %10367 = vst [vmem:[#allocation3 + $0x20] sm:$0xff] %v17535_v33  ;;  %v9713_v14 = vpop.f32.mrb[8].mxu1  ;;  %v23344_v9 = vrot.slane %v10406_v3, %v19158_v18 }
 0x788   :  { %v23347_v42 = vrot.slane %v10399_v25, %v19147_v29  ;;  %v23351_v59 = vcombine.high %v23335_v60, %v23335_v60  ;;  %v10430_v32 = vcombine.high %v10420_v37, %v10420_v37  ;;  %17544 = vst.msk [vmem:[%s26963_s2 + $0x1f0] sm:$0x1] %vm1894_vm12, %v10420_v37  ;;  %17545 = vst.msk [vmem:[%s26963_s2 + $0x200] sm:$0x1] %vm1894_vm12, %v10428_v23  ;;  %v17537_v50 = vclamps-f32 %v9713_v14, 3.0  ;;  %v9715_v21 = vpop.f32.mrb[9].mxu1 }
 0x789   :  { %17547 = vst.msk [vmem:[%s26963_s2 + $0x220] sm:$0x1] %vm1894_vm12, %v23335_v60  ;;  %v10446_v11 = vrot.slane %v10432_v63, %v19147_v29  ;;  %v10447_v45 = vcombine.high %v10439_v62, %v10439_v62  ;;  %v23368_v55 = vrot.slane %v10439_v62, %v19147_v29  ;;  %v17538_v49 = vclamps-f32 %v9715_v21, 3.0  ;;  %10960 = vrot.lane.b32.xlu0 %v23344_v9, %s18645_s26 }
 0x78a   :  { %v23374_v28 = vcombine.high %v23347_v42, %v23347_v42  ;;  %17546 = vst.msk [vmem:[%s26963_s2 + $0x210] sm:$0x1] %vm1894_vm12, %v10430_v32  ;;  %17548 = vst.msk [vmem:[%s26963_s2 + $0x230] sm:$0x1] %vm1894_vm12, %v23347_v42  ;;  %v10481_v43 = vcombine.high %v17537_v50, %v17537_v50  ;;  %v10488_v0 = vrot.slane %v17537_v50, %v19147_v29 }
 0x78b   :  { %17549 = vst.msk [vmem:[%s26963_s2 + $0x240] sm:$0x1] %vm1894_vm12, %v23351_v59  ;;  %10369 = vst [vmem:[#allocation3 + $0x30] sm:$0xff] %v17537_v50  ;;  %v23392_v46 = vrot.slane %v10420_v37, %v19158_v18  ;;  %v10448_v2 = vcombine.high %v10446_v11, %v10446_v11  ;;  %v23395_v1 = vrot.slane %v10446_v11, %v19147_v29  ;;  %v9720_v31 = vpop.f32.mrb[10].mxu1 }
 0x78c   :  { %v23398_v53 = vrot.slane %v10447_v45, %v19147_v29  ;;  %v23402_v8 = vcombine.high %v23368_v55, %v23368_v55  ;;  %17551 = vst.msk [vmem:[%s26963_s2 + $0x260] sm:$0x1] %vm1894_vm12, %v23368_v55  ;;  %10370 = vst [vmem:[#allocation3 + $0x38] sm:$0xff] %v17538_v49  ;;  %v10495_v15 = vrot.slane %v10481_v43, %v19147_v29  ;;  %v17540_v38 = vclamps-f32 %v9720_v31, 3.0  ;;  %v9722_v13 = vpop.f32.mrb[11].mxu1 }
 0x78d   :  { %17550 = vst.msk [vmem:[%s26963_s2 + $0x250] sm:$0x1] %vm1894_vm12, %v23374_v28  ;;  %v10496_v61 = vcombine.high %v10488_v0, %v10488_v0  ;;  %v23416_v48 = vrot.slane %v10488_v0, %v19147_v29  ;;  %10962 = vrot.lane.b32.xlu1 %v23392_v46, %s18645_s26  ;;  %v23421_v39 = vrot.slane %v10448_v2, %v19147_v29  ;;  %17555 = vst.msk [vmem:[%s26963_s2 + $0x2a0] sm:$0x1] %vm1894_vm12, %v23395_v1 }
 0x78e   :  { %v23425_v44 = vcombine.high %v23395_v1, %v23395_v1  ;;  %v23429_v54 = vcombine.high %v23398_v53, %v23398_v53  ;;  %17552 = vst.msk [vmem:[%s26963_s2 + $0x270] sm:$0x1] %vm1894_vm12, %v23398_v53  ;;  %17553 = vst.msk [vmem:[%s26963_s2 + $0x280] sm:$0x1] %vm1894_vm12, %v23402_v8  ;;  %v17541_v52 = vclamps-f32 %v9722_v13, 3.0  ;;  %v10497_v41 = vcombine.high %v10495_v15, %v10495_v15 }
 0x78f   :  { %v23447_v19 = vrot.slane %v10495_v15, %v19147_v29  ;;  %v23450_v16 = vrot.slane %v10496_v61, %v19147_v29  ;;  %v23454_v30 = vcombine.high %v23416_v48, %v23416_v48  ;;  %17559 = vst.msk [vmem:[%s26963_s2 + $0x2e0] sm:$0x1] %vm1894_vm12, %v23416_v48  ;;  %10372 = vst [vmem:[#allocation3 + $0x48] sm:$0x3f] %v17540_v38 }
 0x790   :  { %v10480_v35 = vcombine.high %v23421_v39, %v23421_v39  ;;  %17554 = vst.msk [vmem:[%s26963_s2 + $0x290] sm:$0x1] %vm1894_vm12, %v23429_v54  ;;  %17556 = vst.msk [vmem:[%s26963_s2 + $0x2b0] sm:$0x1] %vm1894_vm12, %v23421_v39  ;;  %v23479_v56 = vrot.slane %v10428_v23, %v19158_v18  ;;  %v23482_v7 = vrot.slane %v10430_v32, %v19158_v18 }
 0x791   :  { %17557 = vst.msk [vmem:[%s26963_s2 + $0x2c0] sm:$0x1] %vm1894_vm12, %v23425_v44  ;;  %10373 = vst [vmem:[#allocation3 + $0x50] sm:$0x3f] %v17541_v52  ;;  %v23485_v40 = vrot.slane %v10497_v41, %v19147_v29  ;;  %v23489_v10 = vcombine.high %v23447_v19, %v23447_v19  ;;  %v10528_v5 = vcombine.high %v23450_v16, %v23450_v16 }
 0x792   :  { %17560 = vst.msk [vmem:[%s26963_s2 + $0x2f0] sm:$0x1] %vm1894_vm12, %v23450_v16  ;;  %17561 = vst.msk [vmem:[%s26963_s2 + $0x300] sm:$0x1] %vm1894_vm12, %v23454_v30  ;;  %10964 = vrot.lane.b32.xlu0 %v23479_v56, %s18645_s26  ;;  %10966 = vrot.lane.b32.xlu1 %v23482_v7, %s18645_s26  ;;  %v23536_v20 = vrot.slane %v23335_v60, %v19158_v18  ;;  %v23540_v4 = vrot.slane %v23347_v42, %v19158_v18 }
 0x793   :  { %17563 = vst.msk [vmem:[%s26963_s2 + $0x320] sm:$0x1] %vm1894_vm12, %v23447_v19  ;;  %17558 = vst.msk [vmem:[%s26963_s2 + $0x2d0] sm:$0x1] %vm1894_vm12, %v10480_v35  ;;  %v23518_v6 = vcombine.high %v23485_v40, %v23485_v40  ;;  %v23554_v24 = vrot.slane %v23351_v59, %v19158_v18  ;;  %v23558_v27 = vrot.slane %v23374_v28, %v19158_v18 }
 0x794   :  { %17562 = vst.msk [vmem:[%s26963_s2 + $0x310] sm:$0x1] %vm1894_vm12, %v10528_v5  ;;  %17564 = vst.msk [vmem:[%s26963_s2 + $0x330] sm:$0x1] %vm1894_vm12, %v23485_v40  ;;  %v23574_v33 = vrot.slane %v23368_v55, %v19158_v18  ;;  %v23578_v25 = vrot.slane %v23398_v53, %v19158_v18  ;;  %v23607_v23 = vrot.slane %v23402_v8, %v19158_v18 }
 0x795   :  { %17565 = vst.msk [vmem:[%s26963_s2 + $0x340] sm:$0x1] %vm1894_vm12, %v23489_v10  ;;  %17566 = vst.msk [vmem:[%s26963_s2 + $0x350] sm:$0x1] %vm1894_vm12, %v23518_v6  ;;  %v23611_v63 = vrot.slane %v23429_v54, %v19158_v18  ;;  %v23619_v62 = vrot.slane %v23395_v1, %v19158_v18  ;;  %v23623_v14 = vrot.slane %v23421_v39, %v19158_v18 }
 0x796   :  { %v10378_v17 = vld [vmem:[#allocation3 + $0x48] sm:$0x3f]  ;;  %10968 = vrot.lane.b32.xlu0 %v23536_v20, %s18645_s26  ;;  %10970 = vrot.lane.b32.xlu1 %v23540_v4, %s18645_s26  ;;  %v23631_v42 = vrot.slane %v23425_v44, %v19158_v18  ;;  %v23634_v59 = vrot.slane %v10480_v35, %v19158_v18  ;;  %v23642_v32 = vrot.slane %v23416_v48, %v19158_v18 }
 0x797   :  { %v10530_v22 = vcombine.high %v10378_v17, %v10378_v17  ;;  %v10537_v51 = vrot.slane %v10378_v17, %v19147_v29  ;;  %v23646_v50 = vrot.slane %v23450_v16, %v19158_v18  ;;  %v10641_v21 = vld [vmem:[#allocation3 + $0x48] sm:$0x3f]  ;;  %v23654_v11 = vrot.slane %v23454_v30, %v19158_v18 }
 0x798   :  { %v23657_v45 = vrot.slane %v10528_v5, %v19158_v18  ;;  %v10800_v55 = vrot.slane %v10641_v21, %v19147_v29  ;;  %v23666_v49 = vrot.slane %v23447_v19, %v19158_v18  ;;  %v23670_v28 = vrot.slane %v23485_v40, %v19158_v18  ;;  %v11083_v16 = vld [vmem:[#allocation3 + $0x48] sm:$0x3f] }
 0x799   :  { %v10544_v57 = vrot.slane %v10530_v22, %v19147_v29  ;;  %v10545_v58 = vcombine.high %v10537_v51, %v10537_v51  ;;  %v10553_v47 = vrot.slane %v10537_v51, %v19147_v29  ;;  %v10793_v0 = vcombine.high %v10641_v21, %v10641_v21 }
 0x79a   :  { %10972 = vrot.lane.b32.xlu0 %v23554_v24, %s18645_s26  ;;  %10974 = vrot.lane.b32.xlu1 %v23558_v27, %s18645_s26  ;;  %v10808_v43 = vcombine.high %v10800_v55, %v10800_v55  ;;  %v10816_v2 = vrot.slane %v10800_v55, %v19147_v29  ;;  %v23679_v1 = vrot.slane %v23489_v10, %v19158_v18 }
 0x79b   :  { %v10546_v12 = vcombine.high %v10544_v57, %v10544_v57  ;;  %v10560_v3 = vrot.slane %v10544_v57, %v19147_v29  ;;  %v10567_v34 = vrot.slane %v10545_v58, %v19147_v29  ;;  %v10575_v36 = vcombine.high %v10553_v47, %v10553_v47  ;;  %17567 = vst.msk [vmem:[%s26963_s2 + $0x360] sm:$0x1] %vm1894_vm12, %v10553_v47 }
 0x79c   :  { %v23683_v53 = vrot.slane %v23518_v6, %v19158_v18  ;;  %v10830_v8 = vrot.slane %v10808_v43, %v19147_v29  ;;  %v10807_v31 = vrot.slane %v10793_v0, %v19147_v29  ;;  %v10939_v15 = vrot.slane %v10816_v2, %v19158_v18 }
 0x79d   :  { %v10574_v60 = vrot.slane %v10546_v12, %v19147_v29  ;;  %v10576_v37 = vcombine.high %v10567_v34, %v10567_v34  ;;  %17568 = vst.msk [vmem:[%s26963_s2 + $0x370] sm:$0x1] %vm1894_vm12, %v10567_v34  ;;  %17569 = vst.msk [vmem:[%s26963_s2 + $0x380] sm:$0x1] %vm1894_vm12, %v10575_v36  ;;  %v10838_v48 = vcombine.high %v10816_v2, %v10816_v2 }
 0x79e   :  { %17571 = vst.msk [vmem:[%s26963_s2 + $0x3a0] sm:$0x1] %vm1894_vm12, %v10560_v3  ;;  %10976 = vrot.lane.b32.xlu0 %v23574_v33, %s18645_s26  ;;  %10978 = vrot.lane.b32.xlu1 %v23578_v25, %s18645_s26  ;;  %v10943_v61 = vrot.slane %v10830_v8, %v19158_v18  ;;  %v10839_v38 = vcombine.high %v10830_v8, %v10830_v8  ;;  %v11525_v8 = vld [vmem:[#allocation3 + $0x48] sm:$0x3f] }
 0x79f   :  { %17570 = vst.msk [vmem:[%s26963_s2 + $0x390] sm:$0x1] %vm1894_vm12, %v10576_v37  ;;  %17572 = vst.msk [vmem:[%s26963_s2 + $0x3b0] sm:$0x1] %vm1894_vm12, %v10574_v60  ;;  %v10809_v13 = vcombine.high %v10807_v31, %v10807_v31  ;;  %v10947_v39 = vrot.slane %v10838_v48, %v19158_v18  ;;  %v10823_v54 = vrot.slane %v10807_v31, %v19147_v29 }
 0x7a0   :  { %v10951_v44 = vrot.slane %v10839_v38, %v19158_v18  ;;  %v11242_v30 = vrot.slane %v11083_v16, %v19147_v29  ;;  %v11235_v40 = vcombine.high %v11083_v16, %v11083_v16  ;;  %v11684_v31 = vrot.slane %v11525_v8, %v19147_v29 }
 0x7a1   :  { %v10837_v52 = vrot.slane %v10809_v13, %v19147_v29  ;;  %v10955_v41 = vrot.slane %v10823_v54, %v19158_v18 }
 0x7a2   :  { %10980 = vrot.lane.b32.xlu0 %v23607_v23, %s18645_s26  ;;  %10982 = vrot.lane.b32.xlu1 %v23611_v63, %s18645_s26  ;;  %v11250_v35 = vcombine.high %v11242_v30, %v11242_v30  ;;  %v11258_v10 = vrot.slane %v11242_v30, %v19147_v29  ;;  %v11249_v6 = vrot.slane %v11235_v40, %v19147_v29 }
 0x7a3   :  { %v10959_v19 = vrot.slane %v10837_v52, %v19158_v18 }
 0x7a4   :  { %v11272_v5 = vrot.slane %v11250_v35, %v19147_v29  ;;  %v11381_v17 = vrot.slane %v11258_v10, %v19158_v18  ;;  %v11280_v51 = vcombine.high %v11258_v10, %v11258_v10  ;;  %v11251_v58 = vcombine.high %v11249_v6, %v11249_v6 }
 0x7a5   :  { %v11265_v34 = vrot.slane %v11249_v6, %v19147_v29 }
 0x7a6   :  { %10984 = vrot.lane.b32.xlu0 %v23619_v62, %s18645_s26  ;;  %10986 = vrot.lane.b32.xlu1 %v23623_v14, %s18645_s26  ;;  %v11385_v22 = vrot.slane %v11272_v5, %v19158_v18  ;;  %v11281_v57 = vcombine.high %v11272_v5, %v11272_v5  ;;  %v11389_v47 = vrot.slane %v11280_v51, %v19158_v18 }
 0x7a7   :  { %v11279_v36 = vrot.slane %v11251_v58, %v19147_v29  ;;  %v11397_v37 = vrot.slane %v11265_v34, %v19158_v18 }
 0x7a8   :  { %v11393_v3 = vrot.slane %v11281_v57, %v19158_v18 }
 0x7a9   :  { %v11401_v21 = vrot.slane %v11279_v36, %v19158_v18 }
 0x7aa   :  { %10988 = vrot.lane.b32.xlu0 %v23631_v42, %s18645_s26  ;;  %10990 = vrot.lane.b32.xlu1 %v23634_v59, %s18645_s26 }
 0x7ae   :  { %10992 = vrot.lane.b32.xlu0 %v23642_v32, %s18645_s26  ;;  %10994 = vrot.lane.b32.xlu1 %v23646_v50, %s18645_s26 }
 0x7b2   :  { %10996 = vrot.lane.b32.xlu0 %v23654_v11, %s18645_s26  ;;  %10998 = vrot.lane.b32.xlu1 %v23657_v45, %s18645_s26 }
 0x7b6   :  { %11000 = vrot.lane.b32.xlu0 %v23666_v49, %s18645_s26  ;;  %11002 = vrot.lane.b32.xlu1 %v23670_v28, %s18645_s26 }
 0x7ba   :  { %11004 = vrot.lane.b32.xlu0 %v23679_v1, %s18645_s26  ;;  %11006 = vrot.lane.b32.xlu1 %v23683_v53, %s18645_s26 }
 0x7be   :  { %11008 = vrot.lane.b32.xlu0 %v10939_v15, %s18645_s26  ;;  %11010 = vrot.lane.b32.xlu1 %v10943_v61, %s18645_s26  ;;  %v11692_v15 = vcombine.high %v11684_v31, %v11684_v31  ;;  %v11677_v61 = vcombine.high %v11525_v8, %v11525_v8 }
 0x7c0   :  { %v11714_v38 = vrot.slane %v11692_v15, %v19147_v29  ;;  %v11691_v13 = vrot.slane %v11677_v61, %v19147_v29 }
 0x7c2   :  { %11012 = vrot.lane.b32.xlu0 %v10947_v39, %s18645_s26  ;;  %11014 = vrot.lane.b32.xlu1 %v10951_v44, %s18645_s26  ;;  %v23915_v39 = vld [vmem:[#allocation3] sm:$0xff]  ;;  %v11827_v52 = vrot.slane %v11714_v38, %v19158_v18  ;;  %v11693_v16 = vcombine.high %v11691_v13, %v11691_v13  ;;  %v11707_v5 = vrot.slane %v11691_v13, %v19147_v29 }
 0x7c4   :  { %v11721_v6 = vrot.slane %v11693_v16, %v19147_v29  ;;  %v11839_v51 = vrot.slane %v11707_v5, %v19158_v18 }
 0x7c6   :  { %11016 = vrot.lane.b32.xlu0 %v10955_v41, %s18645_s26  ;;  %11018 = vrot.lane.b32.xlu1 %v10959_v19, %s18645_s26  ;;  %v11723_v19 = vcombine.high %v11714_v38, %v11714_v38  ;;  %v11843_v58 = vrot.slane %v11721_v6, %v19158_v18 }
 0x7c8   :  { %v11835_v10 = vrot.slane %v11723_v19, %v19158_v18 }
 0x7ca   :  { %11402 = vrot.lane.b32.xlu0 %v23344_v9, %s18648_s9  ;;  %11404 = vrot.lane.b32.xlu1 %v23392_v46, %s18648_s9 }
 0x7ce   :  { %11406 = vrot.lane.b32.xlu0 %v23479_v56, %s18648_s9  ;;  %11408 = vrot.lane.b32.xlu1 %v23482_v7, %s18648_s9 }
 0x7d2   :  { %11410 = vrot.lane.b32.xlu0 %v23536_v20, %s18648_s9  ;;  %11412 = vrot.lane.b32.xlu1 %v23540_v4, %s18648_s9 }
 0x7d6   :  { %11414 = vrot.lane.b32.xlu0 %v23554_v24, %s18648_s9  ;;  %11416 = vrot.lane.b32.xlu1 %v23558_v27, %s18648_s9 }
 0x7da   :  { %11418 = vrot.lane.b32.xlu0 %v23574_v33, %s18648_s9  ;;  %11420 = vrot.lane.b32.xlu1 %v23578_v25, %s18648_s9 }
 0x7de   :  { %11422 = vrot.lane.b32.xlu0 %v23607_v23, %s18648_s9  ;;  %11424 = vrot.lane.b32.xlu1 %v23611_v63, %s18648_s9 }
 0x7e2   :  { %11426 = vrot.lane.b32.xlu0 %v23619_v62, %s18648_s9  ;;  %11428 = vrot.lane.b32.xlu1 %v23623_v14, %s18648_s9 }
 0x7e6   :  { %11430 = vrot.lane.b32.xlu0 %v23631_v42, %s18648_s9  ;;  %11432 = vrot.lane.b32.xlu1 %v23634_v59, %s18648_s9 }
 0x7ea   :  { %11434 = vrot.lane.b32.xlu0 %v23642_v32, %s18648_s9  ;;  %11436 = vrot.lane.b32.xlu1 %v23646_v50, %s18648_s9 }
 0x7ee   :  { %11438 = vrot.lane.b32.xlu0 %v23654_v11, %s18648_s9  ;;  %11440 = vrot.lane.b32.xlu1 %v23657_v45, %s18648_s9 }
 0x7f2   :  { %11442 = vrot.lane.b32.xlu0 %v23666_v49, %s18648_s9  ;;  %11444 = vrot.lane.b32.xlu1 %v23670_v28, %s18648_s9 }
 0x7f6   :  { %11446 = vrot.lane.b32.xlu0 %v23679_v1, %s18648_s9  ;;  %11448 = vrot.lane.b32.xlu1 %v23683_v53, %s18648_s9 }
 0x7fa   :  { %11450 = vrot.lane.b32.xlu0 %v11381_v17, %s18648_s9  ;;  %11452 = vrot.lane.b32.xlu1 %v11385_v22, %s18648_s9 }
 0x7fb   :  { %v10961_v12 = vpop.permute.xlu0 %10960 }
 0x7fc   :  { %17573 = vst.msk [vmem:[%s26963_s2 + $0x1e1] sm:$0x1] %vm1894_vm12, %v10961_v12 }
 0x7fe   :  { %11454 = vrot.lane.b32.xlu0 %v11389_v47, %s18648_s9  ;;  %11456 = vrot.lane.b32.xlu1 %v11393_v3, %s18648_s9 }
 0x7ff   :  { %v10963_v60 = vpop.permute.xlu1 %10962 }
 0x800   :  { %17574 = vst.msk [vmem:[%s26963_s2 + $0x1f1] sm:$0x1] %vm1894_vm12, %v10963_v60 }
 0x802   :  { %11458 = vrot.lane.b32.xlu0 %v11397_v37, %s18648_s9  ;;  %11460 = vrot.lane.b32.xlu1 %v11401_v21, %s18648_s9 }
 0x804   :  { %v10965_v55 = vpop.permute.xlu0 %10964  ;;  %v10967_v43 = vpop.permute.xlu1 %10966 }
 0x805   :  { %17575 = vst.msk [vmem:[%s26963_s2 + $0x201] sm:$0x1] %vm1894_vm12, %v10965_v55  ;;  %17576 = vst.msk [vmem:[%s26963_s2 + $0x211] sm:$0x1] %vm1894_vm12, %v10967_v43  ;;  %v23980_v43 = vld [vmem:[#allocation3 + $0x18] sm:$0xff] }
 0x806   :  { %11844 = vrot.lane.b32.xlu0 %v23344_v9, %s18655_s12  ;;  %11846 = vrot.lane.b32.xlu1 %v23392_v46, %s18655_s12 }
 0x808   :  { %v10969_v0 = vpop.permute.xlu0 %10968  ;;  %v10971_v2 = vpop.permute.xlu1 %10970 }
 0x809   :  { %17577 = vst.msk [vmem:[%s26963_s2 + $0x221] sm:$0x1] %vm1894_vm12, %v10969_v0  ;;  %17578 = vst.msk [vmem:[%s26963_s2 + $0x231] sm:$0x1] %vm1894_vm12, %v10971_v2  ;;  %v12028_v0 = vrot.slane %v23980_v43, %v19147_v29 }
 0x80a   :  { %11848 = vrot.lane.b32.xlu0 %v23479_v56, %s18655_s12  ;;  %11850 = vrot.lane.b32.xlu1 %v23482_v7, %s18655_s12 }
 0x80c   :  { %v10973_v9 = vpop.permute.xlu0 %10972  ;;  %v10975_v46 = vpop.permute.xlu1 %10974 }
 0x80d   :  { %17579 = vst.msk [vmem:[%s26963_s2 + $0x241] sm:$0x1] %vm1894_vm12, %v10973_v9  ;;  %17580 = vst.msk [vmem:[%s26963_s2 + $0x251] sm:$0x1] %vm1894_vm12, %v10975_v46 }
 0x80e   :  { %11852 = vrot.lane.b32.xlu0 %v23536_v20, %s18655_s12  ;;  %11854 = vrot.lane.b32.xlu1 %v23540_v4, %s18655_s12 }
 0x810   :  { %v10977_v56 = vpop.permute.xlu0 %10976  ;;  %v10979_v7 = vpop.permute.xlu1 %10978 }
 0x811   :  { %17581 = vst.msk [vmem:[%s26963_s2 + $0x261] sm:$0x1] %vm1894_vm12, %v10977_v56  ;;  %17582 = vst.msk [vmem:[%s26963_s2 + $0x271] sm:$0x1] %vm1894_vm12, %v10979_v7 }
 0x812   :  { %11856 = vrot.lane.b32.xlu0 %v23554_v24, %s18655_s12  ;;  %11858 = vrot.lane.b32.xlu1 %v23558_v27, %s18655_s12 }
 0x814   :  { %v10981_v20 = vpop.permute.xlu0 %10980  ;;  %v10983_v4 = vpop.permute.xlu1 %10982 }
 0x815   :  { %17583 = vst.msk [vmem:[%s26963_s2 + $0x281] sm:$0x1] %vm1894_vm12, %v10981_v20  ;;  %17584 = vst.msk [vmem:[%s26963_s2 + $0x291] sm:$0x1] %vm1894_vm12, %v10983_v4  ;;  %v12036_v4 = vcombine.high %v12028_v0, %v12028_v0 }
 0x816   :  { %11860 = vrot.lane.b32.xlu0 %v23574_v33, %s18655_s12  ;;  %11862 = vrot.lane.b32.xlu1 %v23578_v25, %s18655_s12 }
 0x818   :  { %v10985_v24 = vpop.permute.xlu0 %10984  ;;  %v10987_v27 = vpop.permute.xlu1 %10986 }
 0x819   :  { %17585 = vst.msk [vmem:[%s26963_s2 + $0x2a1] sm:$0x1] %vm1894_vm12, %v10985_v24  ;;  %17586 = vst.msk [vmem:[%s26963_s2 + $0x2b1] sm:$0x1] %vm1894_vm12, %v10987_v27  ;;  %v12021_v24 = vcombine.high %v23980_v43, %v23980_v43 }
 0x81a   :  { %11864 = vrot.lane.b32.xlu0 %v23607_v23, %s18655_s12  ;;  %11866 = vrot.lane.b32.xlu1 %v23611_v63, %s18655_s12 }
 0x81c   :  { %v10989_v33 = vpop.permute.xlu0 %10988  ;;  %v10991_v25 = vpop.permute.xlu1 %10990 }
 0x81d   :  { %17587 = vst.msk [vmem:[%s26963_s2 + $0x2c1] sm:$0x1] %vm1894_vm12, %v10989_v33  ;;  %17588 = vst.msk [vmem:[%s26963_s2 + $0x2d1] sm:$0x1] %vm1894_vm12, %v10991_v25 }
 0x81e   :  { %11868 = vrot.lane.b32.xlu0 %v23619_v62, %s18655_s12  ;;  %11870 = vrot.lane.b32.xlu1 %v23623_v14, %s18655_s12 }
 0x820   :  { %v10993_v23 = vpop.permute.xlu0 %10992  ;;  %v10995_v63 = vpop.permute.xlu1 %10994 }
 0x821   :  { %17589 = vst.msk [vmem:[%s26963_s2 + $0x2e1] sm:$0x1] %vm1894_vm12, %v10993_v23  ;;  %17590 = vst.msk [vmem:[%s26963_s2 + $0x2f1] sm:$0x1] %vm1894_vm12, %v10995_v63 }
 0x822   :  { %11872 = vrot.lane.b32.xlu0 %v23631_v42, %s18655_s12  ;;  %11874 = vrot.lane.b32.xlu1 %v23634_v59, %s18655_s12 }
 0x824   :  { %v10997_v62 = vpop.permute.xlu0 %10996  ;;  %v10999_v14 = vpop.permute.xlu1 %10998 }
 0x825   :  { %17591 = vst.msk [vmem:[%s26963_s2 + $0x301] sm:$0x1] %vm1894_vm12, %v10997_v62  ;;  %17592 = vst.msk [vmem:[%s26963_s2 + $0x311] sm:$0x1] %vm1894_vm12, %v10999_v14  ;;  %v12044_v14 = vrot.slane %v12028_v0, %v19147_v29 }
 0x826   :  { %11876 = vrot.lane.b32.xlu0 %v23642_v32, %s18655_s12  ;;  %11878 = vrot.lane.b32.xlu1 %v23646_v50, %s18655_s12 }
 0x827   :  { %v24058_v15 = vrot.slane %v12044_v14, %v19158_v18 }
 0x828   :  { %v11001_v42 = vpop.permute.xlu0 %11000  ;;  %v11003_v59 = vpop.permute.xlu1 %11002 }
 0x829   :  { %17593 = vst.msk [vmem:[%s26963_s2 + $0x321] sm:$0x1] %vm1894_vm12, %v11001_v42  ;;  %17594 = vst.msk [vmem:[%s26963_s2 + $0x331] sm:$0x1] %vm1894_vm12, %v11003_v59 }
 0x82a   :  { %11880 = vrot.lane.b32.xlu0 %v23654_v11, %s18655_s12  ;;  %11882 = vrot.lane.b32.xlu1 %v23657_v45, %s18655_s12  ;;  %v11700_v11 = vrot.slane %v11684_v31, %v19147_v29 }
 0x82c   :  { %v11005_v32 = vpop.permute.xlu0 %11004  ;;  %v11007_v50 = vpop.permute.xlu1 %11006  ;;  %v11722_v41 = vcombine.high %v11700_v11, %v11700_v11 }
 0x82d   :  { %17595 = vst.msk [vmem:[%s26963_s2 + $0x341] sm:$0x1] %vm1894_vm12, %v11005_v32  ;;  %17596 = vst.msk [vmem:[%s26963_s2 + $0x351] sm:$0x1] %vm1894_vm12, %v11007_v50  ;;  %v12058_v32 = vrot.slane %v12036_v4, %v19147_v29  ;;  %v12035_v50 = vrot.slane %v12021_v24, %v19147_v29 }
 0x82e   :  { %11884 = vrot.lane.b32.xlu0 %v23666_v49, %s18655_s12  ;;  %11886 = vrot.lane.b32.xlu1 %v23670_v28, %s18655_s12  ;;  %v11823_v49 = vrot.slane %v11700_v11, %v19158_v18  ;;  %v11979_v28 = vrot.slane %v23915_v39, %v19147_v29  ;;  %v11831_v35 = vrot.slane %v11722_v41, %v19158_v18 }
 0x82f   :  { %v12068_v38 = vcombine.high %v12058_v32, %v12058_v32  ;;  %v12037_v13 = vcombine.high %v12035_v50, %v12035_v50 }
 0x830   :  { %v11009_v45 = vpop.permute.xlu0 %11008  ;;  %v11011_v48 = vpop.permute.xlu1 %11010  ;;  %v11995_v17 = vrot.slane %v11979_v28, %v19147_v29 }
 0x831   :  { %17597 = vst.msk [vmem:[%s26963_s2 + $0x361] sm:$0x1] %vm1894_vm12, %v11009_v45  ;;  %17598 = vst.msk [vmem:[%s26963_s2 + $0x371] sm:$0x1] %vm1894_vm12, %v11011_v48  ;;  %v24061_v45 = vrot.slane %v12058_v32, %v19158_v18  ;;  %v12066_v48 = vcombine.high %v12044_v14, %v12044_v14  ;;  %v24082_v41 = vrot.slane %v12068_v38, %v19158_v18 }
 0x832   :  { %11888 = vrot.lane.b32.xlu0 %v23679_v1, %s18655_s12  ;;  %11890 = vrot.lane.b32.xlu1 %v23683_v53, %s18655_s12  ;;  %v11987_v1 = vcombine.high %v11979_v28, %v11979_v28  ;;  %v11972_v53 = vcombine.high %v23915_v39, %v23915_v39  ;;  %v23975_v3 = vrot.slane %v11995_v17, %v19158_v18 }
 0x833   :  { %v12017_v37 = vcombine.high %v11995_v17, %v11995_v17  ;;  %v12051_v28 = vrot.slane %v12035_v50, %v19147_v29  ;;  %v12065_v19 = vrot.slane %v12037_v13, %v19147_v29 }
 0x834   :  { %v11013_v44 = vpop.permute.xlu0 %11012  ;;  %v11015_v54 = vpop.permute.xlu1 %11014  ;;  %v12009_v47 = vrot.slane %v11987_v1, %v19147_v29  ;;  %v11986_v12 = vrot.slane %v11972_v53, %v19147_v29 }
 0x835   :  { %17599 = vst.msk [vmem:[%s26963_s2 + $0x381] sm:$0x1] %vm1894_vm12, %v11013_v44  ;;  %17600 = vst.msk [vmem:[%s26963_s2 + $0x391] sm:$0x1] %vm1894_vm12, %v11015_v54  ;;  %v23997_v9 = vrot.slane %v12017_v37, %v19158_v18  ;;  %v24079_v54 = vrot.slane %v12066_v48, %v19158_v18  ;;  %v24100_v1 = vrot.slane %v12051_v28, %v19158_v18 }
 0x836   :  { %11892 = vrot.lane.b32.xlu0 %v11823_v49, %s18655_s12  ;;  %11894 = vrot.lane.b32.xlu1 %v11827_v52, %s18655_s12  ;;  %v23978_v60 = vrot.slane %v12009_v47, %v19158_v18  ;;  %v12019_v21 = vcombine.high %v12009_v47, %v12009_v47  ;;  %v11988_v55 = vcombine.high %v11986_v12, %v11986_v12  ;;  %v24071_v49 = vld [vmem:[#allocation3 + $0x30] sm:$0xff] }
 0x837   :  { %v12002_v7 = vrot.slane %v11986_v12, %v19147_v29  ;;  %v12077_v16 = vrot.slane %v24071_v49, %v19147_v29  ;;  %v12067_v53 = vcombine.high %v12051_v28, %v12051_v28  ;;  %v12070_v6 = vcombine.high %v24071_v49, %v24071_v49 }
 0x838   :  { %v11017_v30 = vpop.permute.xlu0 %11016  ;;  %v11019_v40 = vpop.permute.xlu1 %11018  ;;  %v24000_v56 = vrot.slane %v12019_v21, %v19158_v18  ;;  %v12016_v20 = vrot.slane %v11988_v55, %v19147_v29 }
 0x839   :  { %17601 = vst.msk [vmem:[%s26963_s2 + $0x3a1] sm:$0x1] %vm1894_vm12, %v11017_v30  ;;  %17602 = vst.msk [vmem:[%s26963_s2 + $0x3b1] sm:$0x1] %vm1894_vm12, %v11019_v40  ;;  %v24019_v33 = vrot.slane %v12002_v7, %v19158_v18  ;;  %v12018_v63 = vcombine.high %v12002_v7, %v12002_v7  ;;  %v24103_v40 = vrot.slane %v12065_v19, %v19158_v18 }
 0x83a   :  { %11896 = vrot.lane.b32.xlu0 %v11831_v35, %s18655_s12  ;;  %11898 = vrot.lane.b32.xlu1 %v11835_v10, %s18655_s12  ;;  %v24022_v23 = vrot.slane %v12016_v20, %v19158_v18  ;;  %v12020_v62 = vcombine.high %v12016_v20, %v12016_v20  ;;  %v12069_v10 = vcombine.high %v12065_v19, %v12065_v19 }
 0x83b   :  { %v24038_v42 = vrot.slane %v12018_v63, %v19158_v18  ;;  %v12085_v5 = vcombine.high %v12077_v16, %v12077_v16  ;;  %v12093_v17 = vrot.slane %v12077_v16, %v19147_v29  ;;  %v12084_v12 = vrot.slane %v12070_v6, %v19147_v29 }
 0x83c   :  { %v11403_v22 = vpop.permute.xlu0 %11402  ;;  %v11405_v57 = vpop.permute.xlu1 %11404  ;;  %v24041_v31 = vrot.slane %v12020_v62, %v19158_v18 }
 0x83d   :  { %17603 = vst.msk [vmem:[%s26963_s2 + $0x1e2] sm:$0x1] %vm1894_vm12, %v11403_v22  ;;  %17604 = vst.msk [vmem:[%s26963_s2 + $0x1f2] sm:$0x1] %vm1894_vm12, %v11405_v57  ;;  %v12107_v47 = vrot.slane %v12085_v5, %v19147_v29  ;;  %v12115_v55 = vcombine.high %v12093_v17, %v12093_v17 }
 0x83e   :  { %11900 = vrot.lane.b32.xlu0 %v11839_v51, %s18655_s12  ;;  %11902 = vrot.lane.b32.xlu1 %v11843_v58, %s18655_s12  ;;  %v24121_v51 = vrot.slane %v12067_v53, %v19158_v18  ;;  %v24124_v58 = vrot.slane %v12069_v10, %v19158_v18 }
 0x83f   :  { %v24144_v21 = vrot.slane %v12107_v47, %v19158_v18  ;;  %v12117_v0 = vcombine.high %v12107_v47, %v12107_v47  ;;  %v24160_v4 = vrot.slane %v12115_v55, %v19158_v18 }
 0x840   :  { %v11407_v34 = vpop.permute.xlu0 %11406  ;;  %v11409_v36 = vpop.permute.xlu1 %11408 }
 0x841   :  { %17605 = vst.msk [vmem:[%s26963_s2 + $0x202] sm:$0x1] %vm1894_vm12, %v11407_v34  ;;  %17606 = vst.msk [vmem:[%s26963_s2 + $0x212] sm:$0x1] %vm1894_vm12, %v11409_v36  ;;  %v24141_v34 = vrot.slane %v12093_v17, %v19158_v18 }
 0x842   :  { %12286 = vrot.lane.b32.xlu0 %v23975_v3, %s18658_s7  ;;  %12288 = vrot.lane.b32.xlu1 %v23978_v60, %s18658_s7 }
 0x844   :  { %v11411_v2 = vpop.permute.xlu0 %11410  ;;  %v11413_v46 = vpop.permute.xlu1 %11412 }
 0x845   :  { %17607 = vst.msk [vmem:[%s26963_s2 + $0x222] sm:$0x1] %vm1894_vm12, %v11411_v2  ;;  %17608 = vst.msk [vmem:[%s26963_s2 + $0x232] sm:$0x1] %vm1894_vm12, %v11413_v46  ;;  %v12086_v2 = vcombine.high %v12084_v12, %v12084_v12  ;;  %v11967_v46 = vld [vmem:[#allocation3 + $0x48] sm:$0x3f] }
 0x846   :  { %12290 = vrot.lane.b32.xlu0 %v23997_v9, %s18658_s7  ;;  %12292 = vrot.lane.b32.xlu1 %v24000_v56, %s18658_s7  ;;  %v12126_v7 = vrot.slane %v11967_v46, %v19147_v29  ;;  %v12119_v14 = vcombine.high %v11967_v46, %v11967_v46 }
 0x847   :  { %v12114_v63 = vrot.slane %v12086_v2, %v19147_v29 }
 0x848   :  { %v11415_v27 = vpop.permute.xlu0 %11414  ;;  %v11417_v25 = vpop.permute.xlu1 %11416  ;;  %v12134_v62 = vcombine.high %v12126_v7, %v12126_v7  ;;  %v12142_v48 = vrot.slane %v12126_v7, %v19147_v29  ;;  %v12133_v19 = vrot.slane %v12119_v14, %v19147_v29 }
 0x849   :  { %17609 = vst.msk [vmem:[%s26963_s2 + $0x242] sm:$0x1] %vm1894_vm12, %v11415_v27  ;;  %17610 = vst.msk [vmem:[%s26963_s2 + $0x252] sm:$0x1] %vm1894_vm12, %v11417_v25  ;;  %v24163_v27 = vrot.slane %v12117_v0, %v19158_v18  ;;  %v12100_v25 = vrot.slane %v12084_v12, %v19147_v29  ;;  %v24183_v50 = vrot.slane %v12114_v63, %v19158_v18 }
 0x84a   :  { %12294 = vrot.lane.b32.xlu0 %v24019_v33, %s18658_s7  ;;  %12296 = vrot.lane.b32.xlu1 %v24022_v23, %s18658_s7  ;;  %v12265_v16 = vrot.slane %v12142_v48, %v19158_v18  ;;  %v12164_v10 = vcombine.high %v12142_v48, %v12142_v48  ;;  %v12135_v6 = vcombine.high %v12133_v19, %v12133_v19 }
 0x84b   :  { %v12149_v12 = vrot.slane %v12133_v19, %v19147_v29 }
 0x84c   :  { %v11419_v8 = vpop.permute.xlu0 %11418  ;;  %v11421_v59 = vpop.permute.xlu1 %11420 }
 0x84d   :  { %17611 = vst.msk [vmem:[%s26963_s2 + $0x262] sm:$0x1] %vm1894_vm12, %v11419_v8  ;;  %17612 = vst.msk [vmem:[%s26963_s2 + $0x272] sm:$0x1] %vm1894_vm12, %v11421_v59  ;;  %v24180_v59 = vrot.slane %v12100_v25, %v19158_v18  ;;  %v12281_v55 = vrot.slane %v12149_v12, %v19158_v18 }
 0x84e   :  { %12298 = vrot.lane.b32.xlu0 %v24038_v42, %s18658_s7  ;;  %12300 = vrot.lane.b32.xlu1 %v24041_v31, %s18658_s7 }
 0x850   :  { %v11423_v61 = vpop.permute.xlu0 %11422  ;;  %v11425_v11 = vpop.permute.xlu1 %11424 }
 0x851   :  { %17613 = vst.msk [vmem:[%s26963_s2 + $0x282] sm:$0x1] %vm1894_vm12, %v11423_v61  ;;  %17614 = vst.msk [vmem:[%s26963_s2 + $0x292] sm:$0x1] %vm1894_vm12, %v11425_v11  ;;  %v12116_v61 = vcombine.high %v12100_v25, %v12100_v25  ;;  %v12118_v11 = vcombine.high %v12114_v63, %v12114_v63  ;;  %v12409_v25 = vld [vmem:[#allocation3 + $0x48] sm:$0x3f] }
 0x852   :  { %12302 = vrot.lane.b32.xlu0 %v24058_v15, %s18658_s7  ;;  %12304 = vrot.lane.b32.xlu1 %v24061_v45, %s18658_s7  ;;  %v12568_v63 = vrot.slane %v12409_v25, %v19147_v29  ;;  %v12561_v14 = vcombine.high %v12409_v25, %v12409_v25 }
 0x853   :  { %v24199_v13 = vrot.slane %v12116_v61, %v19158_v18 }
 0x854   :  { %v11427_v44 = vpop.permute.xlu0 %11426  ;;  %v11429_v52 = vpop.permute.xlu1 %11428  ;;  %v12575_v61 = vrot.slane %v12561_v14, %v19147_v29 }
 0x855   :  { %17615 = vst.msk [vmem:[%s26963_s2 + $0x2a2] sm:$0x1] %vm1894_vm12, %v11427_v44  ;;  %17616 = vst.msk [vmem:[%s26963_s2 + $0x2b2] sm:$0x1] %vm1894_vm12, %v11429_v52  ;;  %v24202_v44 = vrot.slane %v12118_v11, %v19158_v18  ;;  %v12156_v52 = vrot.slane %v12134_v62, %v19147_v29  ;;  %v12576_v62 = vcombine.high %v12568_v63, %v12568_v63  ;;  %v24392_v11 = vld [vmem:[#allocation3 + $0x8] sm:$0xff] }
 0x856   :  { %12306 = vrot.lane.b32.xlu0 %v24079_v54, %s18658_s7  ;;  %12308 = vrot.lane.b32.xlu1 %v24082_v41, %s18658_s7 }
 0x857   :  { %v12165_v5 = vcombine.high %v12156_v52, %v12156_v52 }
 0x858   :  { %v11431_v30 = vpop.permute.xlu0 %11430  ;;  %v11433_v35 = vpop.permute.xlu1 %11432 }
 0x859   :  { %17617 = vst.msk [vmem:[%s26963_s2 + $0x2c2] sm:$0x1] %vm1894_vm12, %v11431_v30  ;;  %17618 = vst.msk [vmem:[%s26963_s2 + $0x2d2] sm:$0x1] %vm1894_vm12, %v11433_v35  ;;  %v12269_v35 = vrot.slane %v12156_v52, %v19158_v18  ;;  %v12277_v47 = vrot.slane %v12165_v5, %v19158_v18 }
 0x85a   :  { %12310 = vrot.lane.b32.xlu0 %v24100_v1, %s18658_s7  ;;  %12312 = vrot.lane.b32.xlu1 %v24103_v40, %s18658_s7 }
 0x85c   :  { %v11435_v22 = vpop.permute.xlu0 %11434  ;;  %v11437_v57 = vpop.permute.xlu1 %11436 }
 0x85d   :  { %17619 = vst.msk [vmem:[%s26963_s2 + $0x2e2] sm:$0x1] %vm1894_vm12, %v11435_v22  ;;  %17620 = vst.msk [vmem:[%s26963_s2 + $0x2f2] sm:$0x1] %vm1894_vm12, %v11437_v57  ;;  %v12273_v22 = vrot.slane %v12164_v10, %v19158_v18  ;;  %v12591_v10 = vrot.slane %v12575_v61, %v19147_v29 }
 0x85e   :  { %12314 = vrot.lane.b32.xlu0 %v24121_v51, %s18658_s7  ;;  %12316 = vrot.lane.b32.xlu1 %v24124_v58, %s18658_s7 }
 0x860   :  { %v11439_v36 = vpop.permute.xlu0 %11438  ;;  %v11441_v37 = vpop.permute.xlu1 %11440 }
 0x861   :  { %17621 = vst.msk [vmem:[%s26963_s2 + $0x302] sm:$0x1] %vm1894_vm12, %v11439_v36  ;;  %17622 = vst.msk [vmem:[%s26963_s2 + $0x312] sm:$0x1] %vm1894_vm12, %v11441_v37  ;;  %v12163_v36 = vrot.slane %v12135_v6, %v19147_v29 }
 0x862   :  { %12318 = vrot.lane.b32.xlu0 %v24141_v34, %s18658_s7  ;;  %12320 = vrot.lane.b32.xlu1 %v24144_v21, %s18658_s7 }
 0x863   :  { %v12285_v2 = vrot.slane %v12163_v36, %v19158_v18 }
 0x864   :  { %v11443_v20 = vpop.permute.xlu0 %11442  ;;  %v11445_v24 = vpop.permute.xlu1 %11444 }
 0x865   :  { %17623 = vst.msk [vmem:[%s26963_s2 + $0x322] sm:$0x1] %vm1894_vm12, %v11443_v20  ;;  %17624 = vst.msk [vmem:[%s26963_s2 + $0x332] sm:$0x1] %vm1894_vm12, %v11445_v24 }
 0x866   :  { %12322 = vrot.lane.b32.xlu0 %v24160_v4, %s18658_s7  ;;  %12324 = vrot.lane.b32.xlu1 %v24163_v27, %s18658_s7 }
 0x868   :  { %v11447_v8 = vpop.permute.xlu0 %11446  ;;  %v11449_v32 = vpop.permute.xlu1 %11448 }
 0x869   :  { %17625 = vst.msk [vmem:[%s26963_s2 + $0x342] sm:$0x1] %vm1894_vm12, %v11447_v8  ;;  %17626 = vst.msk [vmem:[%s26963_s2 + $0x352] sm:$0x1] %vm1894_vm12, %v11449_v32  ;;  %v12598_v32 = vrot.slane %v12576_v62, %v19147_v29 }
 0x86a   :  { %12326 = vrot.lane.b32.xlu0 %v24180_v59, %s18658_s7  ;;  %12328 = vrot.lane.b32.xlu1 %v24183_v50, %s18658_s7 }
 0x86b   :  { %v12607_v19 = vcombine.high %v12598_v32, %v12598_v32 }
 0x86c   :  { %v11451_v38 = vpop.permute.xlu0 %11450  ;;  %v11453_v28 = vpop.permute.xlu1 %11452 }
 0x86d   :  { %17627 = vst.msk [vmem:[%s26963_s2 + $0x362] sm:$0x1] %vm1894_vm12, %v11451_v38  ;;  %17628 = vst.msk [vmem:[%s26963_s2 + $0x372] sm:$0x1] %vm1894_vm12, %v11453_v28  ;;  %v12711_v28 = vrot.slane %v12598_v32, %v19158_v18 }
 0x86e   :  { %12330 = vrot.lane.b32.xlu0 %v24199_v13, %s18658_s7  ;;  %12332 = vrot.lane.b32.xlu1 %v24202_v44, %s18658_s7 }
 0x870   :  { %v11455_v53 = vpop.permute.xlu0 %11454  ;;  %v11457_v30 = vpop.permute.xlu1 %11456 }
 0x871   :  { %17629 = vst.msk [vmem:[%s26963_s2 + $0x382] sm:$0x1] %vm1894_vm12, %v11455_v53  ;;  %17630 = vst.msk [vmem:[%s26963_s2 + $0x392] sm:$0x1] %vm1894_vm12, %v11457_v30 }
 0x872   :  { %12334 = vrot.lane.b32.xlu0 %v12265_v16, %s18658_s7  ;;  %12336 = vrot.lane.b32.xlu1 %v12269_v35, %s18658_s7  ;;  %v12577_v16 = vcombine.high %v12575_v61, %v12575_v61  ;;  %v12719_v35 = vrot.slane %v12607_v19, %v19158_v18 }
 0x874   :  { %v11459_v17 = vpop.permute.xlu0 %11458  ;;  %v11461_v57 = vpop.permute.xlu1 %11460  ;;  %v12605_v5 = vrot.slane %v12577_v16, %v19147_v29 }
 0x875   :  { %17631 = vst.msk [vmem:[%s26963_s2 + $0x3a2] sm:$0x1] %vm1894_vm12, %v11459_v17  ;;  %17632 = vst.msk [vmem:[%s26963_s2 + $0x3b2] sm:$0x1] %vm1894_vm12, %v11461_v57  ;;  %v12723_v17 = vrot.slane %v12591_v10, %v19158_v18 }
 0x876   :  { %12338 = vrot.lane.b32.xlu0 %v12273_v22, %s18658_s7  ;;  %12340 = vrot.lane.b32.xlu1 %v12277_v47, %s18658_s7  ;;  %v12727_v57 = vrot.slane %v12605_v5, %v19158_v18 }
 0x878   :  { %v11845_v37 = vpop.permute.xlu0 %11844  ;;  %v11847_v0 = vpop.permute.xlu1 %11846 }
 0x879   :  { %17633 = vst.msk [vmem:[%s26963_s2 + $0x1e3] sm:$0x1] %vm1894_vm12, %v11845_v37  ;;  %17634 = vst.msk [vmem:[%s26963_s2 + $0x1f3] sm:$0x1] %vm1894_vm12, %v11847_v0 }
 0x87a   :  { %12342 = vrot.lane.b32.xlu0 %v12281_v55, %s18658_s7  ;;  %12344 = vrot.lane.b32.xlu1 %v12285_v2, %s18658_s7 }
 0x87c   :  { %v11849_v46 = vpop.permute.xlu0 %11848  ;;  %v11851_v7 = vpop.permute.xlu1 %11850 }
 0x87d   :  { %17635 = vst.msk [vmem:[%s26963_s2 + $0x203] sm:$0x1] %vm1894_vm12, %v11849_v46  ;;  %17636 = vst.msk [vmem:[%s26963_s2 + $0x213] sm:$0x1] %vm1894_vm12, %v11851_v7 }
 0x87e   :  { %12728 = vrot.lane.b32.xlu0 %v23975_v3, %s18666_s5  ;;  %12730 = vrot.lane.b32.xlu1 %v23978_v60, %s18666_s5 }
 0x880   :  { %v11853_v20 = vpop.permute.xlu0 %11852  ;;  %v11855_v24 = vpop.permute.xlu1 %11854 }
 0x881   :  { %17637 = vst.msk [vmem:[%s26963_s2 + $0x223] sm:$0x1] %vm1894_vm12, %v11853_v20  ;;  %17638 = vst.msk [vmem:[%s26963_s2 + $0x233] sm:$0x1] %vm1894_vm12, %v11855_v24 }
 0x882   :  { %12732 = vrot.lane.b32.xlu0 %v23997_v9, %s18666_s5  ;;  %12734 = vrot.lane.b32.xlu1 %v24000_v56, %s18666_s5 }
 0x884   :  { %v11857_v3 = vpop.permute.xlu0 %11856  ;;  %v11859_v60 = vpop.permute.xlu1 %11858 }
 0x885   :  { %17639 = vst.msk [vmem:[%s26963_s2 + $0x243] sm:$0x1] %vm1894_vm12, %v11857_v3  ;;  %17640 = vst.msk [vmem:[%s26963_s2 + $0x253] sm:$0x1] %vm1894_vm12, %v11859_v60  ;;  %v12865_v60 = vcombine.high %v23915_v39, %v24392_v11 }
 0x886   :  { %12736 = vrot.lane.b32.xlu0 %v24019_v33, %s18666_s5  ;;  %12738 = vrot.lane.b32.xlu1 %v24022_v23, %s18666_s5 }
 0x888   :  { %v11861_v9 = vpop.permute.xlu0 %11860  ;;  %v11863_v56 = vpop.permute.xlu1 %11862 }
 0x889   :  { %17641 = vst.msk [vmem:[%s26963_s2 + $0x263] sm:$0x1] %vm1894_vm12, %v11861_v9  ;;  %17642 = vst.msk [vmem:[%s26963_s2 + $0x273] sm:$0x1] %vm1894_vm12, %v11863_v56 }
 0x88a   :  { %12740 = vrot.lane.b32.xlu0 %v24038_v42, %s18666_s5  ;;  %12742 = vrot.lane.b32.xlu1 %v24041_v31, %s18666_s5 }
 0x88c   :  { %v11865_v33 = vpop.permute.xlu0 %11864  ;;  %v11867_v23 = vpop.permute.xlu1 %11866 }
 0x88d   :  { %17643 = vst.msk [vmem:[%s26963_s2 + $0x283] sm:$0x1] %vm1894_vm12, %v11865_v33  ;;  %17644 = vst.msk [vmem:[%s26963_s2 + $0x293] sm:$0x1] %vm1894_vm12, %v11867_v23 }
 0x88e   :  { %12744 = vrot.lane.b32.xlu0 %v24058_v15, %s18666_s5  ;;  %12746 = vrot.lane.b32.xlu1 %v24061_v45, %s18666_s5 }
 0x890   :  { %v11869_v42 = vpop.permute.xlu0 %11868  ;;  %v11871_v31 = vpop.permute.xlu1 %11870 }
 0x891   :  { %17645 = vst.msk [vmem:[%s26963_s2 + $0x2a3] sm:$0x1] %vm1894_vm12, %v11869_v42  ;;  %17646 = vst.msk [vmem:[%s26963_s2 + $0x2b3] sm:$0x1] %vm1894_vm12, %v11871_v31  ;;  %v12879_v42 = vrot.slane %v12865_v60, %v19147_v29 }
 0x892   :  { %12748 = vrot.lane.b32.xlu0 %v24079_v54, %s18666_s5  ;;  %12750 = vrot.lane.b32.xlu1 %v24082_v41, %s18666_s5 }
 0x894   :  { %v11873_v15 = vpop.permute.xlu0 %11872  ;;  %v11875_v45 = vpop.permute.xlu1 %11874 }
 0x895   :  { %17647 = vst.msk [vmem:[%s26963_s2 + $0x2c3] sm:$0x1] %vm1894_vm12, %v11873_v15  ;;  %17648 = vst.msk [vmem:[%s26963_s2 + $0x2d3] sm:$0x1] %vm1894_vm12, %v11875_v45 }
 0x896   :  { %12752 = vrot.lane.b32.xlu0 %v24100_v1, %s18666_s5  ;;  %12754 = vrot.lane.b32.xlu1 %v24103_v40, %s18666_s5 }
 0x898   :  { %v11877_v54 = vpop.permute.xlu0 %11876  ;;  %v11879_v41 = vpop.permute.xlu1 %11878 }
 0x899   :  { %17649 = vst.msk [vmem:[%s26963_s2 + $0x2e3] sm:$0x1] %vm1894_vm12, %v11877_v54  ;;  %17650 = vst.msk [vmem:[%s26963_s2 + $0x2f3] sm:$0x1] %vm1894_vm12, %v11879_v41  ;;  %v12895_v41 = vrot.slane %v12879_v42, %v19147_v29 }
 0x89a   :  { %12756 = vrot.lane.b32.xlu0 %v24121_v51, %s18666_s5  ;;  %12758 = vrot.lane.b32.xlu1 %v24124_v58, %s18666_s5 }
 0x89b   :  { %v13097_v25 = vrot.slane %v12895_v41, %v19158_v18 }
 0x89c   :  { %v11881_v1 = vpop.permute.xlu0 %11880  ;;  %v11883_v40 = vpop.permute.xlu1 %11882 }
 0x89d   :  { %17651 = vst.msk [vmem:[%s26963_s2 + $0x303] sm:$0x1] %vm1894_vm12, %v11881_v1  ;;  %17652 = vst.msk [vmem:[%s26963_s2 + $0x313] sm:$0x1] %vm1894_vm12, %v11883_v40  ;;  %v12881_v1 = vcombine.high %v12879_v42, %v12879_v42  ;;  %v24620_v42 = vld [vmem:[#allocation3 + $0x38] sm:$0xff] }
 0x89e   :  { %12760 = vrot.lane.b32.xlu0 %v24141_v34, %s18666_s5  ;;  %12762 = vrot.lane.b32.xlu1 %v24144_v21, %s18666_s5 }
 0x8a0   :  { %v11885_v51 = vpop.permute.xlu0 %11884  ;;  %v11887_v58 = vpop.permute.xlu1 %11886 }
 0x8a1   :  { %17653 = vst.msk [vmem:[%s26963_s2 + $0x323] sm:$0x1] %vm1894_vm12, %v11885_v51  ;;  %17654 = vst.msk [vmem:[%s26963_s2 + $0x333] sm:$0x1] %vm1894_vm12, %v11887_v58  ;;  %v13101_v58 = vrot.slane %v12895_v41, %v19400_v26 }
 0x8a2   :  { %12764 = vrot.lane.b32.xlu0 %v24160_v4, %s18666_s5  ;;  %12766 = vrot.lane.b32.xlu1 %v24163_v27, %s18666_s5  ;;  %v12584_v4 = vrot.slane %v12568_v63, %v19147_v29  ;;  %v12909_v63 = vrot.slane %v12881_v1, %v19147_v29  ;;  %v12964_v1 = vcombine.low %v24071_v49, %v24620_v42 }
 0x8a4   :  { %v11889_v34 = vpop.permute.xlu0 %11888  ;;  %v11891_v21 = vpop.permute.xlu1 %11890  ;;  %v12606_v52 = vcombine.high %v12584_v4, %v12584_v4  ;;  %v13105_v62 = vrot.slane %v12909_v63, %v19158_v18 }
 0x8a5   :  { %17655 = vst.msk [vmem:[%s26963_s2 + $0x343] sm:$0x1] %vm1894_vm12, %v11889_v34  ;;  %17656 = vst.msk [vmem:[%s26963_s2 + $0x353] sm:$0x1] %vm1894_vm12, %v11891_v21  ;;  %v24512_v34 = vld [vmem:[#allocation3 + $0x20] sm:$0xff] }
 0x8a6   :  { %12768 = vrot.lane.b32.xlu0 %v24180_v59, %s18666_s5  ;;  %12770 = vrot.lane.b32.xlu1 %v24183_v50, %s18666_s5  ;;  %v12707_v59 = vrot.slane %v12584_v4, %v19158_v18  ;;  %v12864_v50 = vcombine.low %v23915_v39, %v24392_v11  ;;  %v12715_v53 = vrot.slane %v12606_v52, %v19158_v18 }
 0x8a7   :  { %v13109_v4 = vrot.slane %v12909_v63, %v19400_v26 }
 0x8a8   :  { %v11893_v27 = vpop.permute.xlu0 %11892  ;;  %v11895_v8 = vpop.permute.xlu1 %11894 }
 0x8a9   :  { %17657 = vst.msk [vmem:[%s26963_s2 + $0x363] sm:$0x1] %vm1894_vm12, %v11893_v27  ;;  %17658 = vst.msk [vmem:[%s26963_s2 + $0x373] sm:$0x1] %vm1894_vm12, %v11895_v8  ;;  %v12911_v27 = vcombine.high %v12895_v41, %v12895_v41  ;;  %v12914_v8 = vcombine.low %v23980_v43, %v24512_v34 }
 0x8aa   :  { %12772 = vrot.lane.b32.xlu0 %v24199_v13, %s18666_s5  ;;  %12774 = vrot.lane.b32.xlu1 %v24202_v44, %s18666_s5  ;;  %v12872_v13 = vrot.slane %v12864_v50, %v19147_v29 }
 0x8ab   :  { %v13113_v61 = vrot.slane %v12911_v27, %v19158_v18  ;;  %v13117_v50 = vrot.slane %v12911_v27, %v19400_v26 }
 0x8ac   :  { %v11897_v48 = vpop.permute.xlu0 %11896  ;;  %v11899_v38 = vpop.permute.xlu1 %11898  ;;  %v12888_v47 = vrot.slane %v12872_v13, %v19147_v29  ;;  %v12880_v12 = vcombine.high %v12872_v13, %v12872_v13 }
 0x8ad   :  { %17659 = vst.msk [vmem:[%s26963_s2 + $0x383] sm:$0x1] %vm1894_vm12, %v11897_v48  ;;  %17660 = vst.msk [vmem:[%s26963_s2 + $0x393] sm:$0x1] %vm1894_vm12, %v11899_v38  ;;  %v12913_v48 = vcombine.high %v12909_v63, %v12909_v63  ;;  %v12922_v38 = vrot.slane %v12914_v8, %v19147_v29 }
 0x8ae   :  { %12776 = vrot.lane.b32.xlu0 %v12707_v59, %s18666_s5  ;;  %12778 = vrot.lane.b32.xlu1 %v12711_v28, %s18666_s5  ;;  %v13065_v37 = vrot.slane %v12888_v47, %v19158_v18  ;;  %v13069_v0 = vrot.slane %v12888_v47, %v19400_v26  ;;  %v12902_v2 = vrot.slane %v12880_v12, %v19147_v29 }
 0x8af   :  { %v12910_v3 = vcombine.high %v12888_v47, %v12888_v47  ;;  %v13121_v52 = vrot.slane %v12913_v48, %v19158_v18  ;;  %v13125_v16 = vrot.slane %v12913_v48, %v19400_v26  ;;  %v12938_v13 = vrot.slane %v12922_v38, %v19147_v29 }
 0x8b0   :  { %v11901_v44 = vpop.permute.xlu0 %11900  ;;  %v11903_v30 = vpop.permute.xlu1 %11902  ;;  %v13073_v7 = vrot.slane %v12902_v2, %v19158_v18  ;;  %v13077_v24 = vrot.slane %v12902_v2, %v19400_v26  ;;  %v12912_v23 = vcombine.high %v12902_v2, %v12902_v2  ;;  %v12915_v12 = vcombine.high %v23980_v43, %v24512_v34 }
 0x8b1   :  { %17661 = vst.msk [vmem:[%s26963_s2 + $0x3a3] sm:$0x1] %vm1894_vm12, %v11901_v44  ;;  %17662 = vst.msk [vmem:[%s26963_s2 + $0x3b3] sm:$0x1] %vm1894_vm12, %v11903_v30  ;;  %v13081_v56 = vrot.slane %v12910_v3, %v19158_v18  ;;  %v13085_v39 = vrot.slane %v12910_v3, %v19400_v26  ;;  %v12930_v44 = vcombine.high %v12922_v38, %v12922_v38 }
 0x8b2   :  { %12780 = vrot.lane.b32.xlu0 %v12715_v53, %s18666_s5  ;;  %12782 = vrot.lane.b32.xlu1 %v12719_v35, %s18666_s5  ;;  %v13089_v15 = vrot.slane %v12912_v23, %v19158_v18  ;;  %v13093_v54 = vrot.slane %v12912_v23, %v19400_v26  ;;  %v13129_v30 = vrot.slane %v12938_v13, %v19158_v18 }
 0x8b3   :  { %v13133_v10 = vrot.slane %v12938_v13, %v19400_v26  ;;  %v12952_v5 = vrot.slane %v12930_v44, %v19147_v29  ;;  %v12960_v47 = vcombine.high %v12938_v13, %v12938_v13  ;;  %v12929_v2 = vrot.slane %v12915_v12, %v19147_v29 }
 0x8b4   :  { %v12287_v6 = vpop.permute.xlu0 %12286  ;;  %v12289_v22 = vpop.permute.xlu1 %12288  ;;  %v12965_v44 = vcombine.high %v24071_v49, %v24620_v42 }
 0x8b5   :  { %17663 = vst.msk [vmem:[%s26963_s2 + $0x1e4] sm:$0x1] %vm1894_vm12, %v12287_v6  ;;  %17664 = vst.msk [vmem:[%s26963_s2 + $0x1f4] sm:$0x1] %vm1894_vm12, %v12289_v22  ;;  %v13149_v43 = vrot.slane %v12960_v47, %v19400_v26  ;;  %v12945_v3 = vrot.slane %v12929_v2, %v19147_v29  ;;  %v12931_v60 = vcombine.high %v12929_v2, %v12929_v2 }
 0x8b6   :  { %12784 = vrot.lane.b32.xlu0 %v12723_v17, %s18666_s5  ;;  %12786 = vrot.lane.b32.xlu1 %v12727_v57, %s18666_s5  ;;  %v13137_v17 = vrot.slane %v12952_v5, %v19158_v18  ;;  %v13141_v57 = vrot.slane %v12952_v5, %v19400_v26 }
 0x8b7   :  { %v12959_v23 = vrot.slane %v12931_v60, %v19147_v29  ;;  %v12961_v41 = vcombine.high %v12945_v3, %v12945_v3 }
 0x8b8   :  { %v12291_v36 = vpop.permute.xlu0 %12290  ;;  %v12293_v55 = vpop.permute.xlu1 %12292 }
 0x8b9   :  { %17665 = vst.msk [vmem:[%s26963_s2 + $0x204] sm:$0x1] %vm1894_vm12, %v12291_v36  ;;  %17666 = vst.msk [vmem:[%s26963_s2 + $0x214] sm:$0x1] %vm1894_vm12, %v12293_v55  ;;  %v12963_v63 = vcombine.high %v12959_v23, %v12959_v23 }
 0x8ba   :  { %13302 = vrot.lane.b32.xlu0 %v13065_v37, %s27029_s21  ;;  %13304 = vrot.lane.b32.xlu1 %v13069_v0, %s27029_s21  ;;  %v13145_v37 = vrot.slane %v12960_v47, %v19158_v18  ;;  %v12962_v0 = vcombine.high %v12952_v5, %v12952_v5  ;;  %v12979_v5 = vrot.slane %v12965_v44, %v19147_v29 }
 0x8bb   :  { %v13189_v27 = vrot.slane %v12963_v63, %v19400_v26 }
 0x8bc   :  { %v12295_v46 = vpop.permute.xlu0 %12294  ;;  %v12297_v20 = vpop.permute.xlu1 %12296  ;;  %v12995_v47 = vrot.slane %v12979_v5, %v19147_v29  ;;  %v12981_v12 = vcombine.high %v12979_v5, %v12979_v5 }
 0x8bd   :  { %17667 = vst.msk [vmem:[%s26963_s2 + $0x224] sm:$0x1] %vm1894_vm12, %v12295_v46  ;;  %17668 = vst.msk [vmem:[%s26963_s2 + $0x234] sm:$0x1] %vm1894_vm12, %v12297_v20 }
 0x8be   :  { %13306 = vrot.lane.b32.xlu0 %v13073_v7, %s27029_s21  ;;  %13308 = vrot.lane.b32.xlu1 %v13077_v24, %s27029_s21  ;;  %v13153_v7 = vrot.slane %v12962_v0, %v19158_v18  ;;  %v13157_v24 = vrot.slane %v12962_v0, %v19400_v26  ;;  %v13009_v0 = vrot.slane %v12981_v12, %v19147_v29 }
 0x8c0   :  { %v12299_v9 = vpop.permute.xlu0 %12298  ;;  %v12301_v33 = vpop.permute.xlu1 %12300 }
 0x8c1   :  { %17669 = vst.msk [vmem:[%s26963_s2 + $0x244] sm:$0x1] %vm1894_vm12, %v12299_v9  ;;  %17670 = vst.msk [vmem:[%s26963_s2 + $0x254] sm:$0x1] %vm1894_vm12, %v12301_v33 }
 0x8c2   :  { %13310 = vrot.lane.b32.xlu0 %v13081_v56, %s27029_s21  ;;  %13312 = vrot.lane.b32.xlu1 %v13085_v39, %s27029_s21  ;;  %v13161_v56 = vrot.slane %v12945_v3, %v19158_v18  ;;  %v13165_v39 = vrot.slane %v12945_v3, %v19400_v26  ;;  %v18638_v3 = vld [vmem:[#allocation3 + $0x48] ss:$8 sps:$4 sm:$0xff]  }
 0x8c4   :  { %v12303_v31 = vpop.permute.xlu0 %12302  ;;  %v12305_v45 = vpop.permute.xlu1 %12304 }
 0x8c5   :  { %17671 = vst.msk [vmem:[%s26963_s2 + $0x264] sm:$0x1] %vm1894_vm12, %v12303_v31  ;;  %17672 = vst.msk [vmem:[%s26963_s2 + $0x274] sm:$0x1] %vm1894_vm12, %v12305_v45 }
 0x8c6   :  { %13314 = vrot.lane.b32.xlu0 %v13089_v15, %s27029_s21  ;;  %13316 = vrot.lane.b32.xlu1 %v13093_v54, %s27029_s21  ;;  %v13169_v15 = vrot.slane %v12959_v23, %v19158_v18  ;;  %v13173_v54 = vrot.slane %v12959_v23, %v19400_v26  ;;  %v13022_v23 = vrot.slane %v18638_v3, %v19147_v29 }
 0x8c8   :  { %v12307_v40 = vpop.permute.xlu0 %12306  ;;  %v12309_v51 = vpop.permute.xlu1 %12308 }
 0x8c9   :  { %17673 = vst.msk [vmem:[%s26963_s2 + $0x284] sm:$0x1] %vm1894_vm12, %v12307_v40  ;;  %17674 = vst.msk [vmem:[%s26963_s2 + $0x294] sm:$0x1] %vm1894_vm12, %v12309_v51 }
 0x8ca   :  { %13318 = vrot.lane.b32.xlu0 %v13097_v25, %s27029_s21  ;;  %13320 = vrot.lane.b32.xlu1 %v13101_v58, %s27029_s21  ;;  %v13177_v25 = vrot.slane %v12961_v41, %v19158_v18  ;;  %v13181_v58 = vrot.slane %v12961_v41, %v19400_v26  ;;  %v13038_v41 = vrot.slane %v13022_v23, %v19147_v29 }
 0x8cc   :  { %v12311_v21 = vpop.permute.xlu0 %12310  ;;  %v12313_v14 = vpop.permute.xlu1 %12312 }
 0x8cd   :  { %17675 = vst.msk [vmem:[%s26963_s2 + $0x2a4] sm:$0x1] %vm1894_vm12, %v12311_v21  ;;  %17676 = vst.msk [vmem:[%s26963_s2 + $0x2b4] sm:$0x1] %vm1894_vm12, %v12313_v14  ;;  %v12972_v21 = vrot.slane %v12964_v1, %v19147_v29  ;;  %v13185_v14 = vrot.slane %v12963_v63, %v19158_v18  ;;  %v13030_v1 = vcombine.high %v13022_v23, %v13022_v23 }
 0x8ce   :  { %13322 = vrot.lane.b32.xlu0 %v13105_v62, %s27029_s21  ;;  %13324 = vrot.lane.b32.xlu1 %v13109_v4, %s27029_s21 }
 0x8cf   :  { %v12988_v8 = vrot.slane %v12972_v21, %v19147_v29  ;;  %v13052_v63 = vrot.slane %v13030_v1, %v19147_v29 }
 0x8d0   :  { %v12315_v32 = vpop.permute.xlu0 %12314  ;;  %v12317_v59 = vpop.permute.xlu1 %12316 }
 0x8d1   :  { %17677 = vst.msk [vmem:[%s26963_s2 + $0x2c4] sm:$0x1] %vm1894_vm12, %v12315_v32  ;;  %17678 = vst.msk [vmem:[%s26963_s2 + $0x2d4] sm:$0x1] %vm1894_vm12, %v12317_v59  ;;  %v12980_v32 = vcombine.high %v12972_v21, %v12972_v21  ;;  %v13193_v59 = vrot.slane %v12988_v8, %v19158_v18  ;;  %v13197_v48 = vrot.slane %v12988_v8, %v19400_v26  ;;  %v12854_v21 = vld [vmem:[#allocation3 + $0x48] sm:$0x3f] }
 0x8d2   :  { %13326 = vrot.lane.b32.xlu0 %v13113_v61, %s27029_s21  ;;  %13328 = vrot.lane.b32.xlu1 %v13117_v50, %s27029_s21  ;;  %v13010_v13 = vcombine.high %v12988_v8, %v12988_v8  ;;  %v13269_v8 = vrot.slane %v13052_v63, %v19400_v26 }
 0x8d3   :  { %v13002_v38 = vrot.slane %v12980_v32, %v19147_v29  ;;  %v13060_v32 = vcombine.high %v13038_v41, %v13038_v41 }
 0x8d4   :  { %v12319_v28 = vpop.permute.xlu0 %12318  ;;  %v12321_v19 = vpop.permute.xlu1 %12320  ;;  %v13213_v49 = vrot.slane %v13010_v13, %v19400_v26 }
 0x8d5   :  { %17679 = vst.msk [vmem:[%s26963_s2 + $0x2e4] sm:$0x1] %vm1894_vm12, %v12319_v28  ;;  %17680 = vst.msk [vmem:[%s26963_s2 + $0x2f4] sm:$0x1] %vm1894_vm12, %v12321_v19 }
 0x8d6   :  { %13330 = vrot.lane.b32.xlu0 %v13121_v52, %s27029_s21  ;;  %13332 = vrot.lane.b32.xlu1 %v13125_v16, %s27029_s21  ;;  %v13201_v52 = vrot.slane %v13002_v38, %v19158_v18  ;;  %v13205_v16 = vrot.slane %v13002_v38, %v19400_v26 }
 0x8d8   :  { %v12323_v53 = vpop.permute.xlu0 %12322  ;;  %v12325_v35 = vpop.permute.xlu1 %12324 }
 0x8d9   :  { %17681 = vst.msk [vmem:[%s26963_s2 + $0x304] sm:$0x1] %vm1894_vm12, %v12323_v53  ;;  %17682 = vst.msk [vmem:[%s26963_s2 + $0x314] sm:$0x1] %vm1894_vm12, %v12325_v35 }
 0x8da   :  { %13334 = vrot.lane.b32.xlu0 %v13129_v30, %s27029_s21  ;;  %13336 = vrot.lane.b32.xlu1 %v13133_v10, %s27029_s21  ;;  %v13209_v30 = vrot.slane %v13010_v13, %v19158_v18  ;;  %v13012_v10 = vcombine.high %v13002_v38, %v13002_v38  ;;  %v13277_v38 = vrot.slane %v13060_v32, %v19400_v26 }
 0x8dc   :  { %v12327_v6 = vpop.permute.xlu0 %12326  ;;  %v12329_v22 = vpop.permute.xlu1 %12328 }
 0x8dd   :  { %17683 = vst.msk [vmem:[%s26963_s2 + $0x324] sm:$0x1] %vm1894_vm12, %v12327_v6  ;;  %17684 = vst.msk [vmem:[%s26963_s2 + $0x334] sm:$0x1] %vm1894_vm12, %v12329_v22 }
 0x8de   :  { %13338 = vrot.lane.b32.xlu0 %v13137_v17, %s27029_s21  ;;  %13340 = vrot.lane.b32.xlu1 %v13141_v57, %s27029_s21  ;;  %v13217_v17 = vrot.slane %v13012_v10, %v19158_v18  ;;  %v13221_v57 = vrot.slane %v13012_v10, %v19400_v26 }
 0x8e0   :  { %v12331_v36 = vpop.permute.xlu0 %12330  ;;  %v12333_v55 = vpop.permute.xlu1 %12332 }
 0x8e1   :  { %17685 = vst.msk [vmem:[%s26963_s2 + $0x344] sm:$0x1] %vm1894_vm12, %v12331_v36  ;;  %17686 = vst.msk [vmem:[%s26963_s2 + $0x354] sm:$0x1] %vm1894_vm12, %v12333_v55 }
 0x8e2   :  { %13342 = vrot.lane.b32.xlu0 %v13145_v37, %s27029_s21  ;;  %13344 = vrot.lane.b32.xlu1 %v13149_v43, %s27029_s21  ;;  %v13225_v37 = vrot.slane %v12995_v47, %v19158_v18  ;;  %v13229_v43 = vrot.slane %v12995_v47, %v19400_v26 }
 0x8e4   :  { %v12335_v46 = vpop.permute.xlu0 %12334  ;;  %v12337_v20 = vpop.permute.xlu1 %12336 }
 0x8e5   :  { %17687 = vst.msk [vmem:[%s26963_s2 + $0x364] sm:$0x1] %vm1894_vm12, %v12335_v46  ;;  %17688 = vst.msk [vmem:[%s26963_s2 + $0x374] sm:$0x1] %vm1894_vm12, %v12337_v20  ;;  %v13233_v46 = vrot.slane %v13009_v0, %v19158_v18  ;;  %v13237_v20 = vrot.slane %v13009_v0, %v19400_v26 }
 0x8e6   :  { %13346 = vrot.lane.b32.xlu0 %v13153_v7, %s27029_s21  ;;  %13348 = vrot.lane.b32.xlu1 %v13157_v24, %s27029_s21  ;;  %v13011_v24 = vcombine.high %v12995_v47, %v12995_v47 }
 0x8e8   :  { %v12339_v9 = vpop.permute.xlu0 %12338  ;;  %v12341_v33 = vpop.permute.xlu1 %12340 }
 0x8e9   :  { %17689 = vst.msk [vmem:[%s26963_s2 + $0x384] sm:$0x1] %vm1894_vm12, %v12339_v9  ;;  %17690 = vst.msk [vmem:[%s26963_s2 + $0x394] sm:$0x1] %vm1894_vm12, %v12341_v33  ;;  %v13241_v9 = vrot.slane %v13011_v24, %v19158_v18  ;;  %v13245_v33 = vrot.slane %v13011_v24, %v19400_v26 }
 0x8ea   :  { %13350 = vrot.lane.b32.xlu0 %v13161_v56, %s27029_s21  ;;  %13352 = vrot.lane.b32.xlu1 %v13165_v39, %s27029_s21  ;;  %v13013_v39 = vcombine.high %v13009_v0, %v13009_v0 }
 0x8ec   :  { %v12343_v31 = vpop.permute.xlu0 %12342  ;;  %v12345_v45 = vpop.permute.xlu1 %12344 }
 0x8ed   :  { %17691 = vst.msk [vmem:[%s26963_s2 + $0x3a4] sm:$0x1] %vm1894_vm12, %v12343_v31  ;;  %17692 = vst.msk [vmem:[%s26963_s2 + $0x3b4] sm:$0x1] %vm1894_vm12, %v12345_v45 }
 0x8ee   :  { %13354 = vrot.lane.b32.xlu0 %v13169_v15, %s27029_s21  ;;  %13356 = vrot.lane.b32.xlu1 %v13173_v54, %s27029_s21  ;;  %v13249_v15 = vrot.slane %v13013_v39, %v19158_v18  ;;  %v13253_v54 = vrot.slane %v13013_v39, %v19400_v26 }
 0x8f0   :  { %v12729_v40 = vpop.permute.xlu0 %12728  ;;  %v12731_v51 = vpop.permute.xlu1 %12730 }
 0x8f1   :  { %17693 = vst.msk [vmem:[%s26963_s2 + $0x1e5] sm:$0x1] %vm1894_vm12, %v12729_v40  ;;  %17694 = vst.msk [vmem:[%s26963_s2 + $0x1f5] sm:$0x1] %vm1894_vm12, %v12731_v51  ;;  %v13257_v51 = vrot.slane %v13038_v41, %v19158_v18 }
 0x8f2   :  { %13358 = vrot.lane.b32.xlu0 %v13177_v25, %s27029_s21  ;;  %13360 = vrot.lane.b32.xlu1 %v13181_v58, %s27029_s21  ;;  %v13261_v58 = vrot.slane %v13038_v41, %v19400_v26  ;;  %v13569_v41 = vcombine.high %v24512_v34, %v24512_v34 }
 0x8f4   :  { %v12733_v62 = vpop.permute.xlu0 %12732  ;;  %v12735_v4 = vpop.permute.xlu1 %12734 }
 0x8f5   :  { %17695 = vst.msk [vmem:[%s26963_s2 + $0x205] sm:$0x1] %vm1894_vm12, %v12733_v62  ;;  %17696 = vst.msk [vmem:[%s26963_s2 + $0x215] sm:$0x1] %vm1894_vm12, %v12735_v4  ;;  %v12855_v62 = vld [vmem:[#allocation3 + $0x50] sm:$0x3f] }
 0x8f6   :  { %13362 = vrot.lane.b32.xlu0 %v13185_v14, %s27029_s21  ;;  %13364 = vrot.lane.b32.xlu1 %v13189_v27, %s27029_s21  ;;  %v13265_v27 = vrot.slane %v13052_v63, %v19158_v18 }
 0x8f8   :  { %v12737_v61 = vpop.permute.xlu0 %12736  ;;  %v12739_v50 = vpop.permute.xlu1 %12738 }
 0x8f9   :  { %17697 = vst.msk [vmem:[%s26963_s2 + $0x225] sm:$0x1] %vm1894_vm12, %v12737_v61  ;;  %17698 = vst.msk [vmem:[%s26963_s2 + $0x235] sm:$0x1] %vm1894_vm12, %v12739_v50  ;;  %v13015_v61 = vcombine.high %v12854_v21, %v12855_v62 }
 0x8fa   :  { %13366 = vrot.lane.b32.xlu0 %v13193_v59, %s27029_s21  ;;  %13368 = vrot.lane.b32.xlu1 %v13197_v48, %s27029_s21  ;;  %v13273_v48 = vrot.slane %v13060_v32, %v19158_v18  ;;  %v13583_v32 = vrot.slane %v13569_v41, %v19147_v29 }
 0x8fc   :  { %v12741_v28 = vpop.permute.xlu0 %12740  ;;  %v12743_v19 = vpop.permute.xlu1 %12742 }
 0x8fd   :  { %17699 = vst.msk [vmem:[%s26963_s2 + $0x245] sm:$0x1] %vm1894_vm12, %v12741_v28  ;;  %17700 = vst.msk [vmem:[%s26963_s2 + $0x255] sm:$0x1] %vm1894_vm12, %v12743_v19  ;;  %v13061_v28 = vcombine.high %v13052_v63, %v13052_v63  ;;  %v13527_v19 = vrot.slane %v24392_v11, %v19147_v29 }
 0x8fe   :  { %13370 = vrot.lane.b32.xlu0 %v13201_v52, %s27029_s21  ;;  %13372 = vrot.lane.b32.xlu1 %v13205_v16, %s27029_s21  ;;  %v13029_v52 = vrot.slane %v13015_v61, %v19147_v29 }
 0x8ff   :  { %v13281_v44 = vrot.slane %v13061_v28, %v19158_v18 }
 0x900   :  { %v12745_v53 = vpop.permute.xlu0 %12744  ;;  %v12747_v35 = vpop.permute.xlu1 %12746 }
 0x901   :  { %17701 = vst.msk [vmem:[%s26963_s2 + $0x265] sm:$0x1] %vm1894_vm12, %v12745_v53  ;;  %17702 = vst.msk [vmem:[%s26963_s2 + $0x275] sm:$0x1] %vm1894_vm12, %v12747_v35  ;;  %v13285_v53 = vrot.slane %v13061_v28, %v19400_v26  ;;  %v13031_v35 = vcombine.high %v13029_v52, %v13029_v52 }
 0x902   :  { %13374 = vrot.lane.b32.xlu0 %v13209_v30, %s27029_s21  ;;  %13376 = vrot.lane.b32.xlu1 %v13213_v49, %s27029_s21  ;;  %v13045_v30 = vrot.slane %v13029_v52, %v19147_v29  ;;  %v13520_v49 = vcombine.high %v24392_v11, %v24392_v11  ;;  %v13543_v11 = vrot.slane %v13527_v19, %v19147_v29 }
 0x904   :  { %v12749_v6 = vpop.permute.xlu0 %12748  ;;  %v12751_v22 = vpop.permute.xlu1 %12750 }
 0x905   :  { %17703 = vst.msk [vmem:[%s26963_s2 + $0x285] sm:$0x1] %vm1894_vm12, %v12749_v6  ;;  %17704 = vst.msk [vmem:[%s26963_s2 + $0x295] sm:$0x1] %vm1894_vm12, %v12751_v22  ;;  %v13289_v6 = vrot.slane %v13045_v30, %v19158_v18  ;;  %v13059_v22 = vrot.slane %v13031_v35, %v19147_v29 }
 0x906   :  { %13378 = vrot.lane.b32.xlu0 %v13217_v17, %s27029_s21  ;;  %13380 = vrot.lane.b32.xlu1 %v13221_v57, %s27029_s21  ;;  %v13293_v17 = vrot.slane %v13045_v30, %v19400_v26  ;;  %v13535_v57 = vcombine.high %v13527_v19, %v13527_v19  ;;  %v13585_v19 = vcombine.high %v13583_v32, %v13583_v32 }
 0x908   :  { %v12753_v36 = vpop.permute.xlu0 %12752  ;;  %v12755_v55 = vpop.permute.xlu1 %12754 }
 0x909   :  { %17705 = vst.msk [vmem:[%s26963_s2 + $0x2a5] sm:$0x1] %vm1894_vm12, %v12753_v36  ;;  %17706 = vst.msk [vmem:[%s26963_s2 + $0x2b5] sm:$0x1] %vm1894_vm12, %v12755_v55  ;;  %v13297_v36 = vrot.slane %v13059_v22, %v19158_v18  ;;  %v13557_v55 = vrot.slane %v13535_v57, %v19147_v29 }
 0x90a   :  { %13382 = vrot.lane.b32.xlu0 %v13225_v37, %s27029_s21  ;;  %13384 = vrot.lane.b32.xlu1 %v13229_v43, %s27029_s21  ;;  %v13301_v37 = vrot.slane %v13059_v22, %v19400_v26  ;;  %v13534_v43 = vrot.slane %v13520_v49, %v19147_v29  ;;  %v13613_v49 = vrot.slane %v13585_v19, %v19147_v29 }
 0x90b   :  { %v13567_v24 = vcombine.high %v13557_v55, %v13557_v55 }
 0x90c   :  { %v12757_v2 = vpop.permute.xlu0 %12756  ;;  %v12759_v7 = vpop.permute.xlu1 %12758  ;;  %v13536_v3 = vcombine.high %v13534_v43, %v13534_v43 }
 0x90d   :  { %17707 = vst.msk [vmem:[%s26963_s2 + $0x2c5] sm:$0x1] %vm1894_vm12, %v12757_v2  ;;  %17708 = vst.msk [vmem:[%s26963_s2 + $0x2d5] sm:$0x1] %vm1894_vm12, %v12759_v7  ;;  %v24849_v2 = vrot.slane %v13543_v11, %v19158_v18  ;;  %v24852_v7 = vrot.slane %v13557_v55, %v19158_v18  ;;  %v24868_v23 = vrot.slane %v13567_v24, %v19158_v18 }
 0x90e   :  { %13386 = vrot.lane.b32.xlu0 %v13233_v46, %s27029_s21  ;;  %13388 = vrot.lane.b32.xlu1 %v13237_v20, %s27029_s21  ;;  %v13565_v20 = vcombine.high %v13543_v11, %v13543_v11  ;;  %v24955_v11 = vrot.slane %v13613_v49, %v19158_v18 }
 0x910   :  { %v12761_v60 = vpop.permute.xlu0 %12760  ;;  %v12763_v56 = vpop.permute.xlu1 %12762  ;;  %v24865_v39 = vrot.slane %v13565_v20, %v19158_v18 }
 0x911   :  { %17709 = vst.msk [vmem:[%s26963_s2 + $0x2e5] sm:$0x1] %vm1894_vm12, %v12761_v60  ;;  %17710 = vst.msk [vmem:[%s26963_s2 + $0x2f5] sm:$0x1] %vm1894_vm12, %v12763_v56 }
 0x912   :  { %13390 = vrot.lane.b32.xlu0 %v13241_v9, %s27029_s21  ;;  %13392 = vrot.lane.b32.xlu1 %v13245_v33, %s27029_s21  ;;  %v13550_v9 = vrot.slane %v13534_v43, %v19147_v29 }
 0x914   :  { %v12765_v31 = vpop.permute.xlu0 %12764  ;;  %v12767_v45 = vpop.permute.xlu1 %12766 }
 0x915   :  { %17711 = vst.msk [vmem:[%s26963_s2 + $0x305] sm:$0x1] %vm1894_vm12, %v12765_v31  ;;  %17712 = vst.msk [vmem:[%s26963_s2 + $0x315] sm:$0x1] %vm1894_vm12, %v12767_v45  ;;  %v13564_v31 = vrot.slane %v13536_v3, %v19147_v29 }
 0x916   :  { %13394 = vrot.lane.b32.xlu0 %v13249_v15, %s27029_s21  ;;  %13396 = vrot.lane.b32.xlu1 %v13253_v54, %s27029_s21  ;;  %v13576_v15 = vrot.slane %v24512_v34, %v19147_v29  ;;  %v24883_v54 = vrot.slane %v13550_v9, %v19158_v18 }
 0x918   :  { %v12769_v40 = vpop.permute.xlu0 %12768  ;;  %v12771_v25 = vpop.permute.xlu1 %12770  ;;  %v13584_v63 = vcombine.high %v13576_v15, %v13576_v15  ;;  %v13592_v34 = vrot.slane %v13576_v15, %v19147_v29 }
 0x919   :  { %17713 = vst.msk [vmem:[%s26963_s2 + $0x325] sm:$0x1] %vm1894_vm12, %v12769_v40  ;;  %17714 = vst.msk [vmem:[%s26963_s2 + $0x335] sm:$0x1] %vm1894_vm12, %v12771_v25  ;;  %v24888_v25 = vrot.slane %v13564_v31, %v19158_v18 }
 0x91a   :  { %13398 = vrot.lane.b32.xlu0 %v13257_v51, %s27029_s21  ;;  %13400 = vrot.lane.b32.xlu1 %v13261_v58, %s27029_s21  ;;  %v13566_v51 = vcombine.high %v13550_v9, %v13550_v9  ;;  %v13568_v58 = vcombine.high %v13564_v31, %v13564_v31  ;;  %v13614_v28 = vcombine.high %v13592_v34, %v13592_v34 }
 0x91c   :  { %v12773_v14 = vpop.permute.xlu0 %12772  ;;  %v12775_v4 = vpop.permute.xlu1 %12774  ;;  %v24934_v30 = vrot.slane %v13614_v28, %v19158_v18 }
 0x91d   :  { %17715 = vst.msk [vmem:[%s26963_s2 + $0x345] sm:$0x1] %vm1894_vm12, %v12773_v14  ;;  %17716 = vst.msk [vmem:[%s26963_s2 + $0x355] sm:$0x1] %vm1894_vm12, %v12775_v4  ;;  %v24901_v4 = vrot.slane %v13566_v51, %v19158_v18 }
 0x91e   :  { %13402 = vrot.lane.b32.xlu0 %v13265_v27, %s27029_s21  ;;  %13404 = vrot.lane.b32.xlu1 %v13269_v8, %s27029_s21  ;;  %v24904_v27 = vrot.slane %v13568_v58, %v19158_v18  ;;  %v13606_v8 = vrot.slane %v13584_v63, %v19147_v29 }
 0x920   :  { %v12777_v59 = vpop.permute.xlu0 %12776  ;;  %v12779_v50 = vpop.permute.xlu1 %12778  ;;  %v13616_v52 = vcombine.high %v13606_v8, %v13606_v8 }
 0x921   :  { %17717 = vst.msk [vmem:[%s26963_s2 + $0x365] sm:$0x1] %vm1894_vm12, %v12777_v59  ;;  %17718 = vst.msk [vmem:[%s26963_s2 + $0x375] sm:$0x1] %vm1894_vm12, %v12779_v50  ;;  %v24918_v59 = vrot.slane %v13592_v34, %v19158_v18 }
 0x922   :  { %13406 = vrot.lane.b32.xlu0 %v13273_v48, %s27029_s21  ;;  %13408 = vrot.lane.b32.xlu1 %v13277_v38, %s27029_s21  ;;  %v24921_v38 = vrot.slane %v13606_v8, %v19158_v18  ;;  %v24937_v35 = vrot.slane %v13616_v52, %v19158_v18 }
 0x924   :  { %v12781_v16 = vpop.permute.xlu0 %12780  ;;  %v12783_v13 = vpop.permute.xlu1 %12782 }
 0x925   :  { %17719 = vst.msk [vmem:[%s26963_s2 + $0x385] sm:$0x1] %vm1894_vm12, %v12781_v16  ;;  %17720 = vst.msk [vmem:[%s26963_s2 + $0x395] sm:$0x1] %vm1894_vm12, %v12783_v13  ;;  %v13599_v13 = vrot.slane %v13583_v32, %v19147_v29 }
 0x926   :  { %13410 = vrot.lane.b32.xlu0 %v13281_v44, %s27029_s21  ;;  %13412 = vrot.lane.b32.xlu1 %v13285_v53, %s27029_s21 }
 0x928   :  { %v12785_v10 = vpop.permute.xlu0 %12784  ;;  %v12787_v5 = vpop.permute.xlu1 %12786 }
 0x929   :  { %17721 = vst.msk [vmem:[%s26963_s2 + $0x3a5] sm:$0x1] %vm1894_vm12, %v12785_v10  ;;  %17722 = vst.msk [vmem:[%s26963_s2 + $0x3b5] sm:$0x1] %vm1894_vm12, %v12787_v5  ;;  %v13625_v10 = vrot.slane %v24620_v42, %v19147_v29 }
 0x92a   :  { %13414 = vrot.lane.b32.xlu0 %v13289_v6, %s27029_s21  ;;  %13416 = vrot.lane.b32.xlu1 %v13293_v17, %s27029_s21  ;;  %v24952_v6 = vrot.slane %v13599_v13, %v19158_v18  ;;  %v13615_v17 = vcombine.high %v13599_v13, %v13599_v13 }
 0x92b   :  { %v13641_v55 = vrot.slane %v13625_v10, %v19147_v29 }
 0x92c   :  { %v13303_v47 = vpop.permute.xlu0 %13302  ;;  %v13305_v12 = vpop.permute.xlu1 %13304 }
 0x92d   :  { %v13422_v0 = vsel %vm27030_vm4, %v13303_v47, %v13305_v12  ;;  %v13617_v47 = vcombine.high %v13613_v49, %v13613_v49  ;;  %v13633_v12 = vcombine.high %v13625_v10, %v13625_v10  ;;  %v24987_v3 = vrot.slane %v13641_v55, %v19158_v18  ;;  %vm27044_vm4 = vmmov %vm27041_vm0 }
 0x92e   :  { %17723 = vst.msk [vmem:[%s26963_s2 + $0x1e6] sm:$0x1] %vm1894_vm12, %v13422_v0  ;;  %13418 = vrot.lane.b32.xlu0 %v13297_v36, %s27029_s21  ;;  %13420 = vrot.lane.b32.xlu1 %v13301_v37, %s27029_s21  ;;  %v13618_v36 = vcombine.high %v24620_v42, %v24620_v42 }
 0x92f   :  { %v24973_v42 = vrot.slane %v13617_v47, %v19158_v18 }
 0x930   :  { %v13307_v46 = vpop.permute.xlu0 %13306  ;;  %v13309_v26 = vpop.permute.xlu1 %13308  ;;  %v13632_v20 = vrot.slane %v13618_v36, %v19147_v29 }
 0x931   :  { %v13423_v60 = vsel %vm27031_vm5, %v13307_v46, %v13309_v26  ;;  %v24970_v46 = vrot.slane %v13615_v17, %v19158_v18  ;;  %v13655_v26 = vrot.slane %v13633_v12, %v19147_v29  ;;  %vm27045_vm5 = vmmov %vm27041_vm0 }
 0x932   :  { %17724 = vst.msk [vmem:[%s26963_s2 + $0x1f6] sm:$0x1] %vm1894_vm12, %v13423_v60  ;;  %13834 = vrot.lane.b32.xlu0 %v24849_v2, %s27032_s22  ;;  %13836 = vrot.lane.b32.xlu1 %v24852_v7, %s27032_s22  ;;  %v13634_v15 = vcombine.high %v13632_v20, %v13632_v20 }
 0x933   :  { %v13665_v31 = vcombine.high %v13655_v26, %v13655_v26 }
 0x934   :  { %v13311_v56 = vpop.permute.xlu0 %13310  ;;  %v13313_v33 = vpop.permute.xlu1 %13312  ;;  %v13662_v34 = vrot.slane %v13634_v15, %v19147_v29 }
 0x935   :  { %v13424_v45 = vsel %vm27033_vm6, %v13311_v56, %v13313_v33  ;;  %v24990_v56 = vrot.slane %v13655_v26, %v19158_v18  ;;  %v13663_v33 = vcombine.high %v13641_v55, %v13641_v55  ;;  %v25006_v63 = vrot.slane %v13665_v31, %v19158_v18  ;;  %vm27046_vm6 = vmmov %vm27041_vm0 }
 0x936   :  { %17725 = vst.msk [vmem:[%s26963_s2 + $0x206] sm:$0x1] %vm1894_vm12, %v13424_v45  ;;  %13838 = vrot.lane.b32.xlu0 %v24865_v39, %s27032_s22  ;;  %13840 = vrot.lane.b32.xlu1 %v24868_v23, %s27032_s22  ;;  %v13515_v45 = vld [vmem:[#allocation3 + $0x50] sm:$0x3f]  ;;  %v13666_v52 = vcombine.high %v13662_v34, %v13662_v34 }
 0x937   :  { %v25003_v58 = vrot.slane %v13663_v33, %v19158_v18  ;;  %v13667_v8 = vcombine.high %v13515_v45, %v13515_v45 }
 0x938   :  { %v13315_v1 = vpop.permute.xlu0 %13314  ;;  %v13317_v40 = vpop.permute.xlu1 %13316  ;;  %v25039_v49 = vrot.slane %v13666_v52, %v19158_v18 }
 0x939   :  { %v13425_v21 = vsel %vm27034_vm7, %v13315_v1, %v13317_v40  ;;  %v13674_v1 = vrot.slane %v13515_v45, %v19147_v29  ;;  %vm27047_vm7 = vmmov %vm27041_vm0 }
 0x93a   :  { %17726 = vst.msk [vmem:[%s26963_s2 + $0x216] sm:$0x1] %vm1894_vm12, %v13425_v21  ;;  %13842 = vrot.lane.b32.xlu0 %v24883_v54, %s27032_s22  ;;  %13844 = vrot.lane.b32.xlu1 %v24888_v25, %s27032_s22  ;;  %v13648_v21 = vrot.slane %v13632_v20, %v19147_v29 }
 0x93c   :  { %v13319_v62 = vpop.permute.xlu0 %13318  ;;  %v13321_v14 = vpop.permute.xlu1 %13320  ;;  %v13664_v28 = vcombine.high %v13648_v21, %v13648_v21 }
 0x93d   :  { %v13426_v61 = vsel %vm27035_vm8, %v13319_v62, %v13321_v14  ;;  %v13682_v14 = vcombine.high %v13674_v1, %v13674_v1  ;;  %vm27049_vm8 = vmmov %vm27041_vm0 }
 0x93e   :  { %17727 = vst.msk [vmem:[%s26963_s2 + $0x226] sm:$0x1] %vm1894_vm12, %v13426_v61  ;;  %13846 = vrot.lane.b32.xlu0 %v24901_v4, %s27032_s22  ;;  %13848 = vrot.lane.b32.xlu1 %v24904_v27, %s27032_s22 }
 0x93f   :  { %v13704_v10 = vrot.slane %v13682_v14, %v19147_v29 }
 0x940   :  { %v13323_v50 = vpop.permute.xlu0 %13322  ;;  %v13325_v48 = vpop.permute.xlu1 %13324 }
 0x941   :  { %v13427_v16 = vsel %vm27036_vm9, %v13323_v50, %v13325_v48  ;;  %v25020_v50 = vrot.slane %v13648_v21, %v19158_v18  ;;  %v25023_v48 = vrot.slane %v13662_v34, %v19158_v18  ;;  %v13817_v12 = vrot.slane %v13704_v10, %v19158_v18  ;;  %vm27050_vm9 = vmmov %vm27041_vm0 }
 0x942   :  { %17728 = vst.msk [vmem:[%s26963_s2 + $0x236] sm:$0x1] %vm1894_vm12, %v13427_v16  ;;  %13850 = vrot.lane.b32.xlu0 %v24918_v59, %s27032_s22  ;;  %13852 = vrot.lane.b32.xlu1 %v24921_v38, %s27032_s22  ;;  %v13690_v16 = vrot.slane %v13674_v1, %v19147_v29 }
 0x944   :  { %v13327_v44 = vpop.permute.xlu0 %13326  ;;  %v13329_v53 = vpop.permute.xlu1 %13328  ;;  %v13712_v36 = vcombine.high %v13690_v16, %v13690_v16 }
 0x945   :  { %v13428_v5 = vsel %vm27037_vm11, %v13327_v44, %v13329_v53  ;;  %v25036_v53 = vrot.slane %v13664_v28, %v19158_v18  ;;  %vm27051_vm11 = vmmov %vm27041_vm0 }
 0x946   :  { %17729 = vst.msk [vmem:[%s26963_s2 + $0x246] sm:$0x1] %vm1894_vm12, %v13428_v5  ;;  %13854 = vrot.lane.b32.xlu0 %v24934_v30, %s27032_s22  ;;  %13856 = vrot.lane.b32.xlu1 %v24937_v35, %s27032_s22  ;;  %v13681_v5 = vrot.slane %v13667_v8, %v19147_v29  ;;  %v13821_v20 = vrot.slane %v13712_v36, %v19158_v18  ;;  %v14396_v36 = vld [vmem:[#allocation3 + $0x8] sm:$0xff] }
 0x948   :  { %v13331_v22 = vpop.permute.xlu0 %13330  ;;  %v13333_v57 = vpop.permute.xlu1 %13332  ;;  %v13683_v55 = vcombine.high %v13681_v5, %v13681_v5 }
 0x949   :  { %v13429_v37 = vsel %vm27038_vm2, %v13331_v22, %v13333_v57  ;;  %v13813_v22 = vrot.slane %v13690_v16, %v19158_v18  ;;  %vm27052_vm2 = vmmov %vm27041_vm0 }
 0x94a   :  { %17730 = vst.msk [vmem:[%s26963_s2 + $0x256] sm:$0x1] %vm1894_vm12, %v13429_v37  ;;  %13858 = vrot.lane.b32.xlu0 %v24952_v6, %s27032_s22  ;;  %13860 = vrot.lane.b32.xlu1 %v24955_v11, %s27032_s22  ;;  %v13713_v37 = vcombine.high %v13704_v10, %v13704_v10 }
 0x94c   :  { %v13335_v43 = vpop.permute.xlu0 %13334  ;;  %v13337_v0 = vpop.permute.xlu1 %13336 }
 0x94d   :  { %v13430_v24 = vsel %vm27039_vm15, %v13335_v43, %v13337_v0  ;;  %vm27053_vm15 = vmmov %vm27041_vm0 }
 0x94e   :  { %17731 = vst.msk [vmem:[%s26963_s2 + $0x266] sm:$0x1] %vm1894_vm12, %v13430_v24  ;;  %13862 = vrot.lane.b32.xlu0 %v24970_v46, %s27032_s22  ;;  %13864 = vrot.lane.b32.xlu1 %v24973_v42, %s27032_s22  ;;  %v13825_v24 = vrot.slane %v13713_v37, %v19158_v18 }
 0x950   :  { %v13339_v60 = vpop.permute.xlu0 %13338  ;;  %v13341_v9 = vpop.permute.xlu1 %13340 }
 0x951   :  { %v13431_v41 = vsel %vm27040_vm1, %v13339_v60, %v13341_v9  ;;  %v13697_v60 = vrot.slane %v13681_v5, %v19147_v29  ;;  %v13711_v9 = vrot.slane %v13683_v55, %v19147_v29  ;;  %vm27054_vm1 = vmmov %vm27041_vm0 }
 0x952   :  { %17732 = vst.msk [vmem:[%s26963_s2 + $0x276] sm:$0x1] %vm1894_vm12, %v13431_v41  ;;  %13866 = vrot.lane.b32.xlu0 %v24987_v3, %s27032_s22  ;;  %13868 = vrot.lane.b32.xlu1 %v24990_v56, %s27032_s22 }
 0x953   :  { %v13829_v45 = vrot.slane %v13697_v60, %v19158_v18  ;;  %v13833_v41 = vrot.slane %v13711_v9, %v19158_v18 }
 0x954   :  { %v13343_v40 = vpop.permute.xlu0 %13342  ;;  %v13345_v51 = vpop.permute.xlu1 %13344 }
 0x955   :  { %v13432_v62 = vsel %vm27041_vm0, %v13343_v40, %v13345_v51 }
 0x956   :  { %17733 = vst.msk [vmem:[%s26963_s2 + $0x286] sm:$0x1] %vm1894_vm12, %v13432_v62  ;;  %13870 = vrot.lane.b32.xlu0 %v25003_v58, %s27032_s22  ;;  %13872 = vrot.lane.b32.xlu1 %v25006_v63, %s27032_s22 }
 0x958   :  { %v13347_v32 = vpop.permute.xlu0 %13346  ;;  %v13349_v61 = vpop.permute.xlu1 %13348 }
 0x959   :  { %v13433_v19 = vsel %vm27042_vm14, %v13347_v32, %v13349_v61  ;;  %vm27055_vm14 = vmmov %vm27041_vm0 }
 0x95a   :  { %17734 = vst.msk [vmem:[%s26963_s2 + $0x296] sm:$0x1] %vm1894_vm12, %v13433_v19  ;;  %13874 = vrot.lane.b32.xlu0 %v25020_v50, %s27032_s22  ;;  %13876 = vrot.lane.b32.xlu1 %v25023_v48, %s27032_s22 }
 0x95c   :  { %v13351_v13 = vpop.permute.xlu0 %13350  ;;  %v13353_v44 = vpop.permute.xlu1 %13352 }
 0x95d   :  { %v13434_v17 = vsel %vm27043_vm3, %v13351_v13, %v13353_v44  ;;  %vm27056_vm3 = vmmov %vm27041_vm0 }
 0x95e   :  { %17735 = vst.msk [vmem:[%s26963_s2 + $0x2a6] sm:$0x1] %vm1894_vm12, %v13434_v17  ;;  %13878 = vrot.lane.b32.xlu0 %v25036_v53, %s27032_s22  ;;  %13880 = vrot.lane.b32.xlu1 %v25039_v49, %s27032_s22 }
 0x960   :  { %v13355_v57 = vpop.permute.xlu0 %13354  ;;  %v13357_v47 = vpop.permute.xlu1 %13356 }
 0x961   :  { %v13435_v43 = vsel %vm27044_vm4, %v13355_v57, %v13357_v47  ;;  %vm27057_vm4 = vmmov %vm27041_vm0 }
 0x962   :  { %17736 = vst.msk [vmem:[%s26963_s2 + $0x2b6] sm:$0x1] %vm1894_vm12, %v13435_v43  ;;  %13882 = vrot.lane.b32.xlu0 %v13813_v22, %s27032_s22  ;;  %13884 = vrot.lane.b32.xlu1 %v13817_v12, %s27032_s22 }
 0x964   :  { %v13359_v0 = vpop.permute.xlu0 %13358  ;;  %v13361_v26 = vpop.permute.xlu1 %13360 }
 0x965   :  { %v13436_v33 = vsel %vm27045_vm5, %v13359_v0, %v13361_v26  ;;  %vm27058_vm5 = vmmov %vm27041_vm0 }
 0x966   :  { %17737 = vst.msk [vmem:[%s26963_s2 + $0x2c6] sm:$0x1] %vm1894_vm12, %v13436_v33  ;;  %13886 = vrot.lane.b32.xlu0 %v13821_v20, %s27032_s22  ;;  %13888 = vrot.lane.b32.xlu1 %v13825_v24, %s27032_s22 }
 0x968   :  { %v13363_v31 = vpop.permute.xlu0 %13362  ;;  %v13365_v15 = vpop.permute.xlu1 %13364 }
 0x969   :  { %v13437_v1 = vsel %vm27046_vm6, %v13363_v31, %v13365_v15  ;;  %vm27059_vm6 = vmmov %vm27041_vm0 }
 0x96a   :  { %17738 = vst.msk [vmem:[%s26963_s2 + $0x2d6] sm:$0x1] %vm1894_vm12, %v13437_v1  ;;  %13890 = vrot.lane.b32.xlu0 %v13829_v45, %s27032_s22  ;;  %13892 = vrot.lane.b32.xlu1 %v13833_v41, %s27032_s22 }
 0x96c   :  { %v13367_v40 = vpop.permute.xlu0 %13366  ;;  %v13369_v51 = vpop.permute.xlu1 %13368 }
 0x96d   :  { %v13438_v21 = vsel %vm27047_vm7, %v13367_v40, %v13369_v51  ;;  %vm27060_vm7 = vmmov %vm27041_vm0 }
 0x96e   :  { %17739 = vst.msk [vmem:[%s26963_s2 + $0x2e6] sm:$0x1] %vm1894_vm12, %v13438_v21  ;;  %14276 = vrot.lane.b32.xlu0 %v24849_v2, %s27048_s8  ;;  %14278 = vrot.lane.b32.xlu1 %v24852_v7, %s27048_s8 }
 0x970   :  { %v13371_v34 = vpop.permute.xlu0 %13370  ;;  %v13373_v62 = vpop.permute.xlu1 %13372 }
 0x971   :  { %v13439_v14 = vsel %vm27049_vm8, %v13371_v34, %v13373_v62 }
 0x972   :  { %17740 = vst.msk [vmem:[%s26963_s2 + $0x2f6] sm:$0x1] %vm1894_vm12, %v13439_v14  ;;  %14280 = vrot.lane.b32.xlu0 %v24865_v39, %s27048_s8  ;;  %14282 = vrot.lane.b32.xlu1 %v24868_v23, %s27048_s8 }
 0x974   :  { %v13375_v8 = vpop.permute.xlu0 %13374  ;;  %v13377_v2 = vpop.permute.xlu1 %13376 }
 0x975   :  { %v13440_v32 = vsel %vm27050_vm9, %v13375_v8, %v13377_v2 }
 0x976   :  { %17741 = vst.msk [vmem:[%s26963_s2 + $0x306] sm:$0x1] %vm1894_vm12, %v13440_v32  ;;  %14284 = vrot.lane.b32.xlu0 %v24883_v54, %s27048_s8  ;;  %14286 = vrot.lane.b32.xlu1 %v24888_v25, %s27048_s8 }
 0x978   :  { %v13379_v7 = vpop.permute.xlu0 %13378  ;;  %v13381_v39 = vpop.permute.xlu1 %13380 }
 0x979   :  { %v13441_v61 = vsel %vm27051_vm11, %v13379_v7, %v13381_v39 }
 0x97a   :  { %17742 = vst.msk [vmem:[%s26963_s2 + $0x316] sm:$0x1] %vm1894_vm12, %v13441_v61  ;;  %14288 = vrot.lane.b32.xlu0 %v24901_v4, %s27048_s8  ;;  %14290 = vrot.lane.b32.xlu1 %v24904_v27, %s27048_s8 }
 0x97c   :  { %v13383_v23 = vpop.permute.xlu0 %13382  ;;  %v13385_v54 = vpop.permute.xlu1 %13384 }
 0x97d   :  { %v13442_v28 = vsel %vm27052_vm2, %v13383_v23, %v13385_v54 }
 0x97e   :  { %17743 = vst.msk [vmem:[%s26963_s2 + $0x326] sm:$0x1] %vm1894_vm12, %v13442_v28  ;;  %14292 = vrot.lane.b32.xlu0 %v24918_v59, %s27048_s8  ;;  %14294 = vrot.lane.b32.xlu1 %v24921_v38, %s27048_s8  ;;  %v14397_v28 = vld [vmem:[#allocation3 + $0x20] sm:$0xff] }
 0x980   :  { %v13387_v25 = vpop.permute.xlu0 %13386  ;;  %v13389_v4 = vpop.permute.xlu1 %13388 }
 0x981   :  { %v13443_v52 = vsel %vm27053_vm15, %v13387_v25, %v13389_v4 }
 0x982   :  { %17744 = vst.msk [vmem:[%s26963_s2 + $0x336] sm:$0x1] %vm1894_vm12, %v13443_v52  ;;  %14296 = vrot.lane.b32.xlu0 %v24934_v30, %s27048_s8  ;;  %14298 = vrot.lane.b32.xlu1 %v24937_v35, %s27048_s8 }
 0x984   :  { %v13391_v27 = vpop.permute.xlu0 %13390  ;;  %v13393_v59 = vpop.permute.xlu1 %13392 }
 0x985   :  { %v13444_v19 = vsel %vm27054_vm1, %v13391_v27, %v13393_v59 }
 0x986   :  { %17745 = vst.msk [vmem:[%s26963_s2 + $0x346] sm:$0x1] %vm1894_vm12, %v13444_v19  ;;  %14300 = vrot.lane.b32.xlu0 %v24952_v6, %s27048_s8  ;;  %14302 = vrot.lane.b32.xlu1 %v24955_v11, %s27048_s8  ;;  %v13957_v11 = vld [vmem:[#allocation3 + $0x50] sm:$0x3f] }
 0x987   :  { %v14109_v17 = vcombine.high %v13957_v11, %v13957_v11 }
 0x988   :  { %v13395_v38 = vpop.permute.xlu0 %13394  ;;  %v13397_v30 = vpop.permute.xlu1 %13396 }
 0x989   :  { %v13445_v16 = vsel %vm27041_vm0, %v13395_v38, %v13397_v30  ;;  %v14123_v12 = vrot.slane %v14109_v17, %v19147_v29  ;;  %v14460_v38 = vrot.slane %v14397_v28, %v19147_v29 }
 0x98a   :  { %17746 = vst.msk [vmem:[%s26963_s2 + $0x356] sm:$0x1] %vm1894_vm12, %v13445_v16  ;;  %14304 = vrot.lane.b32.xlu0 %v24970_v46, %s27048_s8  ;;  %14306 = vrot.lane.b32.xlu1 %v24973_v42, %s27048_s8  ;;  %v14116_v42 = vrot.slane %v13957_v11, %v19147_v29  ;;  %v14453_v16 = vcombine.high %v14397_v28, %v14397_v28  ;;  %v14399_v28 = vld [vmem:[#allocation3 + $0x50] sm:$0x3f] }
 0x98b   :  { %v14125_v24 = vcombine.high %v14123_v12, %v14123_v12  ;;  %v14139_v45 = vrot.slane %v14123_v12, %v19147_v29 }
 0x98c   :  { %v13399_v35 = vpop.permute.xlu0 %13398  ;;  %v13401_v6 = vpop.permute.xlu1 %13400 }
 0x98d   :  { %v13446_v13 = vsel %vm27055_vm14, %v13399_v35, %v13401_v6  ;;  %v14153_v41 = vrot.slane %v14125_v24, %v19147_v29  ;;  %v14271_v34 = vrot.slane %v14139_v45, %v19158_v18 }
 0x98e   :  { %17747 = vst.msk [vmem:[%s26963_s2 + $0x366] sm:$0x1] %vm1894_vm12, %v13446_v13  ;;  %14308 = vrot.lane.b32.xlu0 %v24987_v3, %s27048_s8  ;;  %14310 = vrot.lane.b32.xlu1 %v24990_v56, %s27048_s8  ;;  %v14124_v56 = vcombine.high %v14116_v42, %v14116_v42 }
 0x98f   :  { %v14275_v62 = vrot.slane %v14153_v41, %v19158_v18 }
 0x990   :  { %v13403_v46 = vpop.permute.xlu0 %13402  ;;  %v13405_v44 = vpop.permute.xlu1 %13404  ;;  %v14146_v47 = vrot.slane %v14124_v56, %v19147_v29 }
 0x991   :  { %v13447_v10 = vsel %vm27056_vm3, %v13403_v46, %v13405_v44  ;;  %v14468_v44 = vcombine.high %v14460_v38, %v14460_v38 }
 0x992   :  { %17748 = vst.msk [vmem:[%s26963_s2 + $0x376] sm:$0x1] %vm1894_vm12, %v13447_v10  ;;  %14312 = vrot.lane.b32.xlu0 %v25003_v58, %s27048_s8  ;;  %14314 = vrot.lane.b32.xlu1 %v25006_v63, %s27048_s8  ;;  %v14132_v58 = vrot.slane %v14116_v42, %v19147_v29  ;;  %v14259_v0 = vrot.slane %v14146_v47, %v19158_v18 }
 0x993   :  { %v14155_v20 = vcombine.high %v14146_v47, %v14146_v47  ;;  %v14476_v42 = vrot.slane %v14460_v38, %v19147_v29  ;;  %v14490_v17 = vrot.slane %v14468_v44, %v19147_v29 }
 0x994   :  { %v13407_v3 = vpop.permute.xlu0 %13406  ;;  %v13409_v5 = vpop.permute.xlu1 %13408  ;;  %v14154_v26 = vcombine.high %v14132_v58, %v14132_v58 }
 0x995   :  { %v13448_v22 = vsel %vm27057_vm4, %v13407_v3, %v13409_v5  ;;  %v14267_v15 = vrot.slane %v14155_v20, %v19158_v18  ;;  %v25311_v47 = vrot.slane %v14490_v17, %v19158_v18  ;;  %v14498_v12 = vcombine.high %v14476_v42, %v14476_v42 }
 0x996   :  { %17749 = vst.msk [vmem:[%s26963_s2 + $0x386] sm:$0x1] %vm1894_vm12, %v13448_v22  ;;  %14316 = vrot.lane.b32.xlu0 %v25020_v50, %s27048_s8  ;;  %14318 = vrot.lane.b32.xlu1 %v25023_v48, %s27048_s8  ;;  %v14255_v50 = vrot.slane %v14132_v58, %v19158_v18  ;;  %v14411_v48 = vrot.slane %v14396_v36, %v19147_v29 }
 0x997   :  { %v14263_v31 = vrot.slane %v14154_v26, %v19158_v18  ;;  %v14467_v22 = vrot.slane %v14453_v16, %v19147_v29  ;;  %v25308_v58 = vrot.slane %v14476_v42, %v19158_v18 }
 0x998   :  { %v13411_v63 = vpop.permute.xlu0 %13410  ;;  %v13413_v57 = vpop.permute.xlu1 %13412  ;;  %v14427_v40 = vrot.slane %v14411_v48, %v19147_v29 }
 0x999   :  { %v13449_v37 = vsel %vm27058_vm5, %v13411_v63, %v13413_v57 }
 0x99a   :  { %17750 = vst.msk [vmem:[%s26963_s2 + $0x396] sm:$0x1] %vm1894_vm12, %v13449_v37  ;;  %14320 = vrot.lane.b32.xlu0 %v25036_v53, %s27048_s8  ;;  %14322 = vrot.lane.b32.xlu1 %v25039_v49, %s27048_s8  ;;  %v14419_v53 = vcombine.high %v14411_v48, %v14411_v48  ;;  %v14404_v49 = vcombine.high %v14396_v36, %v14396_v36 }
 0x99b   :  { %v25230_v2 = vrot.slane %v14427_v40, %v19158_v18  ;;  %v14449_v61 = vcombine.high %v14427_v40, %v14427_v40  ;;  %v14500_v36 = vcombine.high %v14490_v17, %v14490_v17  ;;  %v14469_v37 = vcombine.high %v14467_v22, %v14467_v22 }
 0x99c   :  { %v13415_v55 = vpop.permute.xlu0 %13414  ;;  %v13417_v43 = vpop.permute.xlu1 %13416  ;;  %v14441_v14 = vrot.slane %v14419_v53, %v19147_v29  ;;  %v14418_v8 = vrot.slane %v14404_v49, %v19147_v29  ;;  %v14483_v48 = vrot.slane %v14467_v22, %v19147_v29 }
 0x99d   :  { %v13450_v60 = vsel %vm27059_vm6, %v13415_v55, %v13417_v43  ;;  %v25249_v27 = vrot.slane %v14449_v61, %v19158_v18  ;;  %v25330_v26 = vrot.slane %v14500_v36, %v19158_v18  ;;  %v14497_v20 = vrot.slane %v14469_v37, %v19147_v29 }
 0x99e   :  { %17751 = vst.msk [vmem:[%s26963_s2 + $0x3a6] sm:$0x1] %vm1894_vm12, %v13450_v60  ;;  %14324 = vrot.lane.b32.xlu0 %v14255_v50, %s27048_s8  ;;  %14326 = vrot.lane.b32.xlu1 %v14259_v0, %s27048_s8  ;;  %v25233_v39 = vrot.slane %v14441_v14, %v19158_v18  ;;  %v14451_v23 = vcombine.high %v14441_v14, %v14441_v14  ;;  %v14398_v50 = vld [vmem:[#allocation3 + $0x38] sm:$0xff] }
 0x99f   :  { %v14420_v54 = vcombine.high %v14418_v8, %v14418_v8  ;;  %v14434_v25 = vrot.slane %v14418_v8, %v19147_v29  ;;  %v25327_v0 = vrot.slane %v14498_v12, %v19158_v18  ;;  %v14509_v24 = vrot.slane %v14398_v50, %v19147_v29 }
 0x9a0   :  { %v13419_v9 = vpop.permute.xlu0 %13418  ;;  %v13421_v33 = vpop.permute.xlu1 %13420  ;;  %v25252_v59 = vrot.slane %v14451_v23, %v19158_v18  ;;  %v25347_v60 = vrot.slane %v14483_v48, %v19158_v18  ;;  %v14502_v53 = vcombine.high %v14398_v50, %v14398_v50 }
 0x9a1   :  { %v13451_v1 = vsel %vm27060_vm7, %v13419_v9, %v13421_v33  ;;  %v14448_v19 = vrot.slane %v14420_v54, %v19147_v29  ;;  %v25269_v30 = vrot.slane %v14434_v25, %v19158_v18  ;;  %v14450_v11 = vcombine.high %v14434_v25, %v14434_v25 }
 0x9a2   :  { %17752 = vst.msk [vmem:[%s26963_s2 + $0x3b6] sm:$0x1] %vm1894_vm12, %v13451_v1  ;;  %14328 = vrot.lane.b32.xlu0 %v14263_v31, %s27048_s8  ;;  %14330 = vrot.lane.b32.xlu1 %v14267_v15, %s27048_s8  ;;  %v25350_v33 = vrot.slane %v14497_v20, %v19158_v18  ;;  %v14499_v31 = vcombine.high %v14483_v48, %v14483_v48 }
 0x9a3   :  { %v25272_v13 = vrot.slane %v14448_v19, %v19158_v18  ;;  %v14452_v46 = vcombine.high %v14448_v19, %v14448_v19  ;;  %v25288_v5 = vrot.slane %v14450_v11, %v19158_v18  ;;  %v14501_v15 = vcombine.high %v14497_v20, %v14497_v20 }
 0x9a4   :  { %v13835_v51 = vpop.permute.xlu0 %13834  ;;  %v13837_v21 = vpop.permute.xlu1 %13836  ;;  %v14517_v45 = vcombine.high %v14509_v24, %v14509_v24  ;;  %v14525_v41 = vrot.slane %v14509_v24, %v19147_v29  ;;  %v14551_v11 = vcombine.high %v14399_v28, %v14399_v28 }
 0x9a5   :  { %17753 = vst.msk [vmem:[%s26963_s2 + $0x1e7] sm:$0x1] %vm1894_vm12, %v13835_v51  ;;  %17754 = vst.msk [vmem:[%s26963_s2 + $0x1f7] sm:$0x1] %vm1894_vm12, %v13837_v21  ;;  %v25291_v56 = vrot.slane %v14452_v46, %v19158_v18  ;;  %v25366_v51 = vrot.slane %v14499_v31, %v19158_v18  ;;  %v25369_v21 = vrot.slane %v14501_v15, %v19158_v18 }
 0x9a6   :  { %14332 = vrot.lane.b32.xlu0 %v14271_v34, %s27048_s8  ;;  %14334 = vrot.lane.b32.xlu1 %v14275_v62, %s27048_s8  ;;  %s27061_s8 = smov 76   ;;  %v14539_v34 = vrot.slane %v14517_v45, %v19147_v29  ;;  %v14516_v62 = vrot.slane %v14502_v53, %v19147_v29  ;;  %v25386_v14 = vrot.slane %v14525_v41, %v19158_v18 }
 0x9a7   :  { %v14547_v61 = vcombine.high %v14525_v41, %v14525_v41  ;;  %v14565_v50 = vrot.slane %v14551_v11, %v19147_v29 }
 0x9a8   :  { %v13839_v32 = vpop.permute.xlu0 %13838  ;;  %v13841_v7 = vpop.permute.xlu1 %13840  ;;  %v14549_v23 = vcombine.high %v14539_v34, %v14539_v34  ;;  %v14518_v54 = vcombine.high %v14516_v62, %v14516_v62  ;;  %v14532_v25 = vrot.slane %v14516_v62, %v19147_v29 }
 0x9a9   :  { %17755 = vst.msk [vmem:[%s26963_s2 + $0x207] sm:$0x1] %vm1894_vm12, %v13839_v32  ;;  %17756 = vst.msk [vmem:[%s26963_s2 + $0x217] sm:$0x1] %vm1894_vm12, %v13841_v7  ;;  %v25389_v7 = vrot.slane %v14539_v34, %v19158_v18  ;;  %v25405_v19 = vrot.slane %v14547_v61, %v19158_v18  ;;  %v14581_v41 = vrot.slane %v14565_v50, %v19147_v29 }
 0x9aa   :  { %14718 = vrot.lane.b32.xlu0 %v25230_v2, %s27061_s8  ;;  %14720 = vrot.lane.b32.xlu1 %v25233_v39, %s27061_s8  ;;  %v25408_v38 = vrot.slane %v14549_v23, %v19158_v18  ;;  %v14546_v16 = vrot.slane %v14518_v54, %v19147_v29 }
 0x9ac   :  { %v13843_v4 = vpop.permute.xlu0 %13842  ;;  %v13845_v52 = vpop.permute.xlu1 %13844  ;;  %v25428_v42 = vrot.slane %v14546_v16, %v19158_v18 }
 0x9ad   :  { %17757 = vst.msk [vmem:[%s26963_s2 + $0x227] sm:$0x1] %vm1894_vm12, %v13843_v4  ;;  %17758 = vst.msk [vmem:[%s26963_s2 + $0x237] sm:$0x1] %vm1894_vm12, %v13845_v52 }
 0x9ae   :  { %14722 = vrot.lane.b32.xlu0 %v25249_v27, %s27061_s8  ;;  %14724 = vrot.lane.b32.xlu1 %v25252_v59, %s27061_s8 }
 0x9b0   :  { %v13847_v35 = vpop.permute.xlu0 %13846  ;;  %v13849_v6 = vpop.permute.xlu1 %13848 }
 0x9b1   :  { %17759 = vst.msk [vmem:[%s26963_s2 + $0x247] sm:$0x1] %vm1894_vm12, %v13847_v35  ;;  %17760 = vst.msk [vmem:[%s26963_s2 + $0x257] sm:$0x1] %vm1894_vm12, %v13849_v6  ;;  %v14558_v35 = vrot.slane %v14399_v28, %v19147_v29  ;;  %v25425_v6 = vrot.slane %v14532_v25, %v19158_v18 }
 0x9b2   :  { %14726 = vrot.lane.b32.xlu0 %v25269_v30, %s27061_s8  ;;  %14728 = vrot.lane.b32.xlu1 %v25272_v13, %s27061_s8 }
 0x9b3   :  { %v14566_v17 = vcombine.high %v14558_v35, %v14558_v35  ;;  %v14574_v22 = vrot.slane %v14558_v35, %v19147_v29 }
 0x9b4   :  { %v13851_v10 = vpop.permute.xlu0 %13850  ;;  %v13853_v3 = vpop.permute.xlu1 %13852 }
 0x9b5   :  { %17761 = vst.msk [vmem:[%s26963_s2 + $0x267] sm:$0x1] %vm1894_vm12, %v13851_v10  ;;  %17762 = vst.msk [vmem:[%s26963_s2 + $0x277] sm:$0x1] %vm1894_vm12, %v13853_v3  ;;  %v14548_v10 = vcombine.high %v14532_v25, %v14532_v25  ;;  %v14550_v3 = vcombine.high %v14546_v16, %v14546_v16  ;;  %v14588_v37 = vrot.slane %v14566_v17, %v19147_v29 }
 0x9b6   :  { %14730 = vrot.lane.b32.xlu0 %v25288_v5, %s27061_s8  ;;  %14732 = vrot.lane.b32.xlu1 %v25291_v56, %s27061_s8  ;;  %v14697_v48 = vrot.slane %v14574_v22, %v19158_v18  ;;  %v14596_v24 = vcombine.high %v14574_v22, %v14574_v22 }
 0x9b7   :  { %v25444_v12 = vrot.slane %v14548_v10, %v19158_v18  ;;  %v25447_v36 = vrot.slane %v14550_v3, %v19158_v18  ;;  %v14701_v20 = vrot.slane %v14588_v37, %v19158_v18  ;;  %v14597_v53 = vcombine.high %v14588_v37, %v14588_v37 }
 0x9b8   :  { %v13855_v63 = vpop.permute.xlu0 %13854  ;;  %v13857_v57 = vpop.permute.xlu1 %13856  ;;  %v14705_v15 = vrot.slane %v14596_v24, %v19158_v18 }
 0x9b9   :  { %17763 = vst.msk [vmem:[%s26963_s2 + $0x287] sm:$0x1] %vm1894_vm12, %v13855_v63  ;;  %17764 = vst.msk [vmem:[%s26963_s2 + $0x297] sm:$0x1] %vm1894_vm12, %v13857_v57  ;;  %v14709_v45 = vrot.slane %v14597_v53, %v19158_v18  ;;  %v14841_v53 = vld [vmem:[#allocation3 + $0x50] sm:$0x3f] }
 0x9ba   :  { %14734 = vrot.lane.b32.xlu0 %v25308_v58, %s27061_s8  ;;  %14736 = vrot.lane.b32.xlu1 %v25311_v47, %s27061_s8 }
 0x9bc   :  { %v13859_v55 = vpop.permute.xlu0 %13858  ;;  %v13861_v43 = vpop.permute.xlu1 %13860 }
 0x9bd   :  { %17765 = vst.msk [vmem:[%s26963_s2 + $0x2a7] sm:$0x1] %vm1894_vm12, %v13859_v55  ;;  %17766 = vst.msk [vmem:[%s26963_s2 + $0x2b7] sm:$0x1] %vm1894_vm12, %v13861_v43 }
 0x9be   :  { %14738 = vrot.lane.b32.xlu0 %v25327_v0, %s27061_s8  ;;  %14740 = vrot.lane.b32.xlu1 %v25330_v26, %s27061_s8 }
 0x9c0   :  { %v13863_v49 = vpop.permute.xlu0 %13862  ;;  %v13865_v9 = vpop.permute.xlu1 %13864 }
 0x9c1   :  { %17767 = vst.msk [vmem:[%s26963_s2 + $0x2c7] sm:$0x1] %vm1894_vm12, %v13863_v49  ;;  %17768 = vst.msk [vmem:[%s26963_s2 + $0x2d7] sm:$0x1] %vm1894_vm12, %v13865_v9  ;;  %v14567_v49 = vcombine.high %v14565_v50, %v14565_v50 }
 0x9c2   :  { %14742 = vrot.lane.b32.xlu0 %v25347_v60, %s27061_s8  ;;  %14744 = vrot.lane.b32.xlu1 %v25350_v33, %s27061_s8 }
 0x9c4   :  { %v13867_v1 = vpop.permute.xlu0 %13866  ;;  %v13869_v40 = vpop.permute.xlu1 %13868 }
 0x9c5   :  { %17769 = vst.msk [vmem:[%s26963_s2 + $0x2e7] sm:$0x1] %vm1894_vm12, %v13867_v1  ;;  %17770 = vst.msk [vmem:[%s26963_s2 + $0x2f7] sm:$0x1] %vm1894_vm12, %v13869_v40  ;;  %v14595_v1 = vrot.slane %v14567_v49, %v19147_v29  ;;  %v18283_v40 = vpop.f32.mrb[8].mxu0 }
 0x9c6   :  { %14746 = vrot.lane.b32.xlu0 %v25366_v51, %s27061_s8  ;;  %14748 = vrot.lane.b32.xlu1 %v25369_v21, %s27061_s8  ;;  %v17536_v34 = vclamps-f32 %v18283_v40, 3.0  ;;  %v10317_v23 = vpop.f32.mrb[9].mxu0 }
 0x9c7   :  { %v14717_v61 = vrot.slane %v14595_v1, %v19158_v18  ;;  %v17533_v54 = vclamps-f32 %v10317_v23, 3.0  ;;  %v18286_v28 = vpop.f32.mrb[10].mxu0  ;;  %v14993_v1 = vcombine.high %v14841_v53, %v14841_v53 }
 0x9c8   :  { %v13871_v8 = vpop.permute.xlu0 %13870  ;;  %v13873_v32 = vpop.permute.xlu1 %13872  ;;  %10368 = vst.msk [vmem:[#allocation3 + $0x28] sm:$0xff] %vm221_vm13, %v17536_v34  ;;  %v17542_v25 = vclamps-f32 %v18286_v28, 3.0 }
 0x9c9   :  { %17771 = vst.msk [vmem:[%s26963_s2 + $0x307] sm:$0x1] %vm1894_vm12, %v13871_v8  ;;  %17772 = vst.msk [vmem:[%s26963_s2 + $0x317] sm:$0x1] %vm1894_vm12, %v13873_v32  ;;  %v14713_v32 = vrot.slane %v14581_v41, %v19158_v18  ;;  %v10329_v16 = vpop.f32.mrb[11].mxu0 }
 0x9ca   :  { %14750 = vrot.lane.b32.xlu0 %v25386_v14, %s27061_s8  ;;  %14752 = vrot.lane.b32.xlu1 %v25389_v7, %s27061_s8  ;;  %10365 = vst.msk [vmem:[#allocation3 + $0x10] sm:$0xff] %vm221_vm13, %v17533_v54  ;;  %v17539_v35 = vclamps-f32 %v10329_v16, 3.0 }
 0x9cb   :  { %10374 = vst.msk [vmem:[#allocation3 + $0x58] sm:$0x3f] %vm1660_vm10, %v17542_v25 }
 0x9cc   :  { %v13875_v4 = vpop.permute.xlu0 %13874  ;;  %v13877_v52 = vpop.permute.xlu1 %13876  ;;  %10371 = vst.msk [vmem:[#allocation3 + $0x40] sm:$0xff] %vm221_vm13, %v17539_v35 }
 0x9cd   :  { %17773 = vst.msk [vmem:[%s26963_s2 + $0x327] sm:$0x1] %vm1894_vm12, %v13875_v4  ;;  %17774 = vst.msk [vmem:[%s26963_s2 + $0x337] sm:$0x1] %vm1894_vm12, %v13877_v52 }
 0x9ce   :  { %14754 = vrot.lane.b32.xlu0 %v25405_v19, %s27061_s8  ;;  %14756 = vrot.lane.b32.xlu1 %v25408_v38, %s27061_s8 }
 0x9d0   :  { %v13879_v46 = vpop.permute.xlu0 %13878  ;;  %v13881_v44 = vpop.permute.xlu1 %13880 }
 0x9d1   :  { %17775 = vst.msk [vmem:[%s26963_s2 + $0x347] sm:$0x1] %vm1894_vm12, %v13879_v46  ;;  %17776 = vst.msk [vmem:[%s26963_s2 + $0x357] sm:$0x1] %vm1894_vm12, %v13881_v44 }
 0x9d2   :  { %14758 = vrot.lane.b32.xlu0 %v25425_v6, %s27061_s8  ;;  %14760 = vrot.lane.b32.xlu1 %v25428_v42, %s27061_s8 }
 0x9d4   :  { %v13883_v63 = vpop.permute.xlu0 %13882  ;;  %v13885_v57 = vpop.permute.xlu1 %13884 }
 0x9d5   :  { %17777 = vst.msk [vmem:[%s26963_s2 + $0x367] sm:$0x1] %vm1894_vm12, %v13883_v63  ;;  %17778 = vst.msk [vmem:[%s26963_s2 + $0x377] sm:$0x1] %vm1894_vm12, %v13885_v57 }
 0x9d6   :  { %14762 = vrot.lane.b32.xlu0 %v25444_v12, %s27061_s8  ;;  %14764 = vrot.lane.b32.xlu1 %v25447_v36, %s27061_s8 }
 0x9d8   :  { %v13887_v55 = vpop.permute.xlu0 %13886  ;;  %v13889_v43 = vpop.permute.xlu1 %13888 }
 0x9d9   :  { %17779 = vst.msk [vmem:[%s26963_s2 + $0x387] sm:$0x1] %vm1894_vm12, %v13887_v55  ;;  %17780 = vst.msk [vmem:[%s26963_s2 + $0x397] sm:$0x1] %vm1894_vm12, %v13889_v43 }
 0x9da   :  { %14766 = vrot.lane.b32.xlu0 %v14697_v48, %s27061_s8  ;;  %14768 = vrot.lane.b32.xlu1 %v14701_v20, %s27061_s8 }
 0x9dc   :  { %v13891_v9 = vpop.permute.xlu0 %13890  ;;  %v13893_v31 = vpop.permute.xlu1 %13892 }
 0x9dd   :  { %17781 = vst.msk [vmem:[%s26963_s2 + $0x3a7] sm:$0x1] %vm1894_vm12, %v13891_v9  ;;  %17782 = vst.msk [vmem:[%s26963_s2 + $0x3b7] sm:$0x1] %vm1894_vm12, %v13893_v31  ;;  %v15000_v31 = vrot.slane %v14841_v53, %v19147_v29 }
 0x9de   :  { %14770 = vrot.lane.b32.xlu0 %v14705_v15, %s27061_s8  ;;  %14772 = vrot.lane.b32.xlu1 %v14709_v45, %s27061_s8 }
 0x9df   :  { %v15008_v41 = vcombine.high %v15000_v31, %v15000_v31  ;;  %v15016_v40 = vrot.slane %v15000_v31, %v19147_v29  ;;  %v15722_v31 = vld [vmem:[#allocation3 + $0x8] sm:$0xff] }
 0x9e0   :  { %v14277_v62 = vpop.permute.xlu0 %14276  ;;  %v14279_v8 = vpop.permute.xlu1 %14278 }
 0x9e1   :  { %17783 = vst.msk [vmem:[%s26963_s2 + $0x1e8] sm:$0x1] %vm1894_vm12, %v14277_v62  ;;  %17784 = vst.msk [vmem:[%s26963_s2 + $0x1f8] sm:$0x1] %vm1894_vm12, %v14279_v8  ;;  %v15030_v8 = vrot.slane %v15008_v41, %v19147_v29  ;;  %v15038_v25 = vcombine.high %v15016_v40, %v15016_v40 }
 0x9e2   :  { %14774 = vrot.lane.b32.xlu0 %v14713_v32, %s27061_s8  ;;  %14776 = vrot.lane.b32.xlu1 %v14717_v61, %s27061_s8  ;;  %s27062_s8 = smov 56   ;;  %v15007_v32 = vrot.slane %v14993_v1, %v19147_v29  ;;  %v15139_v61 = vrot.slane %v15016_v40, %v19158_v18 }
 0x9e3   :  { %v15143_v28 = vrot.slane %v15030_v8, %v19158_v18 }
 0x9e4   :  { %v14281_v4 = vpop.permute.xlu0 %14280  ;;  %v14283_v52 = vpop.permute.xlu1 %14282 }
 0x9e5   :  { %17785 = vst.msk [vmem:[%s26963_s2 + $0x208] sm:$0x1] %vm1894_vm12, %v14281_v4  ;;  %17786 = vst.msk [vmem:[%s26963_s2 + $0x218] sm:$0x1] %vm1894_vm12, %v14283_v52  ;;  %v15039_v4 = vcombine.high %v15030_v8, %v15030_v8  ;;  %v15009_v52 = vcombine.high %v15007_v32, %v15007_v32 }
 0x9e6   :  { %15160 = vrot.lane.b32.xlu0 %v25230_v2, %s27062_s8  ;;  %15162 = vrot.lane.b32.xlu1 %v25233_v39, %s27062_s8 }
 0x9e8   :  { %v14285_v11 = vpop.permute.xlu0 %14284  ;;  %v14287_v46 = vpop.permute.xlu1 %14286 }
 0x9e9   :  { %17787 = vst.msk [vmem:[%s26963_s2 + $0x228] sm:$0x1] %vm1894_vm12, %v14285_v11  ;;  %17788 = vst.msk [vmem:[%s26963_s2 + $0x238] sm:$0x1] %vm1894_vm12, %v14287_v46  ;;  %v15147_v11 = vrot.slane %v15038_v25, %v19158_v18  ;;  %v15151_v46 = vrot.slane %v15039_v4, %v19158_v18 }
 0x9ea   :  { %15164 = vrot.lane.b32.xlu0 %v25249_v27, %s27062_s8  ;;  %15166 = vrot.lane.b32.xlu1 %v25252_v59, %s27062_s8 }
 0x9ec   :  { %v14289_v44 = vpop.permute.xlu0 %14288  ;;  %v14291_v10 = vpop.permute.xlu1 %14290 }
 0x9ed   :  { %17789 = vst.msk [vmem:[%s26963_s2 + $0x248] sm:$0x1] %vm1894_vm12, %v14289_v44  ;;  %17790 = vst.msk [vmem:[%s26963_s2 + $0x258] sm:$0x1] %vm1894_vm12, %v14291_v10  ;;  %v15023_v44 = vrot.slane %v15007_v32, %v19147_v29  ;;  %v15037_v10 = vrot.slane %v15009_v52, %v19147_v29 }
 0x9ee   :  { %15168 = vrot.lane.b32.xlu0 %v25269_v30, %s27062_s8  ;;  %15170 = vrot.lane.b32.xlu1 %v25272_v13, %s27062_s8 }
 0x9f0   :  { %v14293_v3 = vpop.permute.xlu0 %14292  ;;  %v14295_v17 = vpop.permute.xlu1 %14294 }
 0x9f1   :  { %17791 = vst.msk [vmem:[%s26963_s2 + $0x268] sm:$0x1] %vm1894_vm12, %v14293_v3  ;;  %17792 = vst.msk [vmem:[%s26963_s2 + $0x278] sm:$0x1] %vm1894_vm12, %v14295_v17 }
 0x9f2   :  { %15172 = vrot.lane.b32.xlu0 %v25288_v5, %s27062_s8  ;;  %15174 = vrot.lane.b32.xlu1 %v25291_v56, %s27062_s8 }
 0x9f4   :  { %v14297_v22 = vpop.permute.xlu0 %14296  ;;  %v14299_v63 = vpop.permute.xlu1 %14298 }
 0x9f5   :  { %17793 = vst.msk [vmem:[%s26963_s2 + $0x288] sm:$0x1] %vm1894_vm12, %v14297_v22  ;;  %17794 = vst.msk [vmem:[%s26963_s2 + $0x298] sm:$0x1] %vm1894_vm12, %v14299_v63  ;;  %v15155_v22 = vrot.slane %v15023_v44, %v19158_v18  ;;  %v15159_v63 = vrot.slane %v15037_v10, %v19158_v18 }
 0x9f6   :  { %15176 = vrot.lane.b32.xlu0 %v25308_v58, %s27062_s8  ;;  %15178 = vrot.lane.b32.xlu1 %v25311_v47, %s27062_s8 }
 0x9f8   :  { %v14301_v57 = vpop.permute.xlu0 %14300  ;;  %v14303_v37 = vpop.permute.xlu1 %14302 }
 0x9f9   :  { %17795 = vst.msk [vmem:[%s26963_s2 + $0x2a8] sm:$0x1] %vm1894_vm12, %v14301_v57  ;;  %17796 = vst.msk [vmem:[%s26963_s2 + $0x2b8] sm:$0x1] %vm1894_vm12, %v14303_v37 }
 0x9fa   :  { %15180 = vrot.lane.b32.xlu0 %v25327_v0, %s27062_s8  ;;  %15182 = vrot.lane.b32.xlu1 %v25330_v26, %s27062_s8 }
 0x9fc   :  { %v14305_v50 = vpop.permute.xlu0 %14304  ;;  %v14307_v48 = vpop.permute.xlu1 %14306 }
 0x9fd   :  { %17797 = vst.msk [vmem:[%s26963_s2 + $0x2c8] sm:$0x1] %vm1894_vm12, %v14305_v50  ;;  %17798 = vst.msk [vmem:[%s26963_s2 + $0x2d8] sm:$0x1] %vm1894_vm12, %v14307_v48 }
 0x9fe   :  { %15184 = vrot.lane.b32.xlu0 %v25347_v60, %s27062_s8  ;;  %15186 = vrot.lane.b32.xlu1 %v25350_v33, %s27062_s8 }
 0xa00   :  { %v14309_v55 = vpop.permute.xlu0 %14308  ;;  %v14311_v43 = vpop.permute.xlu1 %14310 }
 0xa01   :  { %17799 = vst.msk [vmem:[%s26963_s2 + $0x2e8] sm:$0x1] %vm1894_vm12, %v14309_v55  ;;  %17800 = vst.msk [vmem:[%s26963_s2 + $0x2f8] sm:$0x1] %vm1894_vm12, %v14311_v43  ;;  %v15283_v55 = vld [vmem:[#allocation3 + $0x50] sm:$0x3f] }
 0xa02   :  { %15188 = vrot.lane.b32.xlu0 %v25366_v51, %s27062_s8  ;;  %15190 = vrot.lane.b32.xlu1 %v25369_v21, %s27062_s8  ;;  %v15442_v43 = vrot.slane %v15283_v55, %v19147_v29 }
 0xa04   :  { %v14313_v20 = vpop.permute.xlu0 %14312  ;;  %v14315_v24 = vpop.permute.xlu1 %14314 }
 0xa05   :  { %17801 = vst.msk [vmem:[%s26963_s2 + $0x308] sm:$0x1] %vm1894_vm12, %v14313_v20  ;;  %17802 = vst.msk [vmem:[%s26963_s2 + $0x318] sm:$0x1] %vm1894_vm12, %v14315_v24  ;;  %v15450_v20 = vcombine.high %v15442_v43, %v15442_v43  ;;  %v15435_v24 = vcombine.high %v15283_v55, %v15283_v55 }
 0xa06   :  { %15192 = vrot.lane.b32.xlu0 %v25386_v14, %s27062_s8  ;;  %15194 = vrot.lane.b32.xlu1 %v25389_v7, %s27062_s8 }
 0xa08   :  { %v14317_v49 = vpop.permute.xlu0 %14316  ;;  %v14319_v9 = vpop.permute.xlu1 %14318 }
 0xa09   :  { %17803 = vst.msk [vmem:[%s26963_s2 + $0x328] sm:$0x1] %vm1894_vm12, %v14317_v49  ;;  %17804 = vst.msk [vmem:[%s26963_s2 + $0x338] sm:$0x1] %vm1894_vm12, %v14319_v9  ;;  %v15472_v49 = vrot.slane %v15450_v20, %v19147_v29  ;;  %v15449_v9 = vrot.slane %v15435_v24, %v19147_v29 }
 0xa0a   :  { %15196 = vrot.lane.b32.xlu0 %v25405_v19, %s27062_s8  ;;  %15198 = vrot.lane.b32.xlu1 %v25408_v38, %s27062_s8 }
 0xa0b   :  { %v15585_v1 = vrot.slane %v15472_v49, %v19158_v18  ;;  %v15481_v40 = vcombine.high %v15472_v49, %v15472_v49 }
 0xa0c   :  { %v14321_v15 = vpop.permute.xlu0 %14320  ;;  %v14323_v45 = vpop.permute.xlu1 %14322 }
 0xa0d   :  { %17805 = vst.msk [vmem:[%s26963_s2 + $0x348] sm:$0x1] %vm1894_vm12, %v14321_v15  ;;  %17806 = vst.msk [vmem:[%s26963_s2 + $0x358] sm:$0x1] %vm1894_vm12, %v14323_v45  ;;  %v15593_v32 = vrot.slane %v15481_v40, %v19158_v18 }
 0xa0e   :  { %15200 = vrot.lane.b32.xlu0 %v25425_v6, %s27062_s8  ;;  %15202 = vrot.lane.b32.xlu1 %v25428_v42, %s27062_s8 }
 0xa10   :  { %v14325_v34 = vpop.permute.xlu0 %14324  ;;  %v14327_v62 = vpop.permute.xlu1 %14326 }
 0xa11   :  { %17807 = vst.msk [vmem:[%s26963_s2 + $0x368] sm:$0x1] %vm1894_vm12, %v14325_v34  ;;  %17808 = vst.msk [vmem:[%s26963_s2 + $0x378] sm:$0x1] %vm1894_vm12, %v14327_v62  ;;  %v15451_v34 = vcombine.high %v15449_v9, %v15449_v9 }
 0xa12   :  { %15204 = vrot.lane.b32.xlu0 %v25444_v12, %s27062_s8  ;;  %15206 = vrot.lane.b32.xlu1 %v25447_v36, %s27062_s8 }
 0xa14   :  { %v14329_v23 = vpop.permute.xlu0 %14328  ;;  %v14331_v54 = vpop.permute.xlu1 %14330 }
 0xa15   :  { %17809 = vst.msk [vmem:[%s26963_s2 + $0x388] sm:$0x1] %vm1894_vm12, %v14329_v23  ;;  %17810 = vst.msk [vmem:[%s26963_s2 + $0x398] sm:$0x1] %vm1894_vm12, %v14331_v54  ;;  %v15730_v54 = vcombine.high %v15722_v31, %v15722_v31 }
 0xa16   :  { %15208 = vrot.lane.b32.xlu0 %v15139_v61, %s27062_s8  ;;  %15210 = vrot.lane.b32.xlu1 %v15143_v28, %s27062_s8  ;;  %v15479_v61 = vrot.slane %v15451_v34, %v19147_v29 }
 0xa18   :  { %v14333_v16 = vpop.permute.xlu0 %14332  ;;  %v14335_v35 = vpop.permute.xlu1 %14334 }
 0xa19   :  { %17811 = vst.msk [vmem:[%s26963_s2 + $0x3a8] sm:$0x1] %vm1894_vm12, %v14333_v16  ;;  %17812 = vst.msk [vmem:[%s26963_s2 + $0x3b8] sm:$0x1] %vm1894_vm12, %v14335_v35  ;;  %v15601_v16 = vrot.slane %v15479_v61, %v19158_v18 }
 0xa1a   :  { %15212 = vrot.lane.b32.xlu0 %v15147_v11, %s27062_s8  ;;  %15214 = vrot.lane.b32.xlu1 %v15151_v46, %s27062_s8  ;;  %v15744_v11 = vrot.slane %v15730_v54, %v19147_v29 }
 0xa1c   :  { %v14719_v3 = vpop.permute.xlu0 %14718  ;;  %v14721_v17 = vpop.permute.xlu1 %14720 }
 0xa1d   :  { %17813 = vst.msk [vmem:[%s26963_s2 + $0x1e9] sm:$0x1] %vm1894_vm12, %v14719_v3  ;;  %17814 = vst.msk [vmem:[%s26963_s2 + $0x1f9] sm:$0x1] %vm1894_vm12, %v14721_v17 }
 0xa1e   :  { %15216 = vrot.lane.b32.xlu0 %v15155_v22, %s27062_s8  ;;  %15218 = vrot.lane.b32.xlu1 %v15159_v63, %s27062_s8  ;;  %v15746_v63 = vcombine.high %v15744_v11, %v15744_v11 }
 0xa20   :  { %v14723_v57 = vpop.permute.xlu0 %14722  ;;  %v14725_v37 = vpop.permute.xlu1 %14724 }
 0xa21   :  { %17815 = vst.msk [vmem:[%s26963_s2 + $0x209] sm:$0x1] %vm1894_vm12, %v14723_v57  ;;  %17816 = vst.msk [vmem:[%s26963_s2 + $0x219] sm:$0x1] %vm1894_vm12, %v14725_v37  ;;  %v15723_v57 = vld [vmem:[#allocation3 + $0x20] sm:$0xff] }
 0xa22   :  { %15602 = vrot.lane.b32.xlu0 %v25230_v2, %s27063_s17  ;;  %15604 = vrot.lane.b32.xlu1 %v25233_v39, %s27063_s17  ;;  %v15786_v37 = vrot.slane %v15723_v57, %v19147_v29 }
 0xa24   :  { %v14727_v50 = vpop.permute.xlu0 %14726  ;;  %v14729_v48 = vpop.permute.xlu1 %14728 }
 0xa25   :  { %17817 = vst.msk [vmem:[%s26963_s2 + $0x229] sm:$0x1] %vm1894_vm12, %v14727_v50  ;;  %17818 = vst.msk [vmem:[%s26963_s2 + $0x239] sm:$0x1] %vm1894_vm12, %v14729_v48 }
 0xa26   :  { %15606 = vrot.lane.b32.xlu0 %v25249_v27, %s27063_s17  ;;  %15608 = vrot.lane.b32.xlu1 %v25252_v59, %s27063_s17 }
 0xa28   :  { %v14731_v2 = vpop.permute.xlu0 %14730  ;;  %v14733_v39 = vpop.permute.xlu1 %14732 }
 0xa29   :  { %17819 = vst.msk [vmem:[%s26963_s2 + $0x249] sm:$0x1] %vm1894_vm12, %v14731_v2  ;;  %17820 = vst.msk [vmem:[%s26963_s2 + $0x259] sm:$0x1] %vm1894_vm12, %v14733_v39 }
 0xa2a   :  { %15610 = vrot.lane.b32.xlu0 %v25269_v30, %s27063_s17  ;;  %15612 = vrot.lane.b32.xlu1 %v25272_v13, %s27063_s17 }
 0xa2c   :  { %v14735_v27 = vpop.permute.xlu0 %14734  ;;  %v14737_v59 = vpop.permute.xlu1 %14736 }
 0xa2d   :  { %17821 = vst.msk [vmem:[%s26963_s2 + $0x269] sm:$0x1] %vm1894_vm12, %v14735_v27  ;;  %17822 = vst.msk [vmem:[%s26963_s2 + $0x279] sm:$0x1] %vm1894_vm12, %v14737_v59  ;;  %v15760_v27 = vrot.slane %v15744_v11, %v19147_v29  ;;  %v15774_v59 = vrot.slane %v15746_v63, %v19147_v29 }
 0xa2e   :  { %15614 = vrot.lane.b32.xlu0 %v25288_v5, %s27063_s17  ;;  %15616 = vrot.lane.b32.xlu1 %v25291_v56, %s27063_s17 }
 0xa30   :  { %v14739_v30 = vpop.permute.xlu0 %14738  ;;  %v14741_v13 = vpop.permute.xlu1 %14740 }
 0xa31   :  { %17823 = vst.msk [vmem:[%s26963_s2 + $0x289] sm:$0x1] %vm1894_vm12, %v14739_v30  ;;  %17824 = vst.msk [vmem:[%s26963_s2 + $0x299] sm:$0x1] %vm1894_vm12, %v14741_v13  ;;  %v15794_v30 = vcombine.high %v15786_v37, %v15786_v37  ;;  %v15779_v13 = vcombine.high %v15723_v57, %v15723_v57 }
 0xa32   :  { %15618 = vrot.lane.b32.xlu0 %v25308_v58, %s27063_s17  ;;  %15620 = vrot.lane.b32.xlu1 %v25311_v47, %s27063_s17 }
 0xa34   :  { %v14743_v5 = vpop.permute.xlu0 %14742  ;;  %v14745_v56 = vpop.permute.xlu1 %14744 }
 0xa35   :  { %17825 = vst.msk [vmem:[%s26963_s2 + $0x2a9] sm:$0x1] %vm1894_vm12, %v14743_v5  ;;  %17826 = vst.msk [vmem:[%s26963_s2 + $0x2b9] sm:$0x1] %vm1894_vm12, %v14745_v56 }
 0xa36   :  { %15622 = vrot.lane.b32.xlu0 %v25327_v0, %s27063_s17  ;;  %15624 = vrot.lane.b32.xlu1 %v25330_v26, %s27063_s17 }
 0xa38   :  { %v14747_v58 = vpop.permute.xlu0 %14746  ;;  %v14749_v47 = vpop.permute.xlu1 %14748 }
 0xa39   :  { %17827 = vst.msk [vmem:[%s26963_s2 + $0x2c9] sm:$0x1] %vm1894_vm12, %v14747_v58  ;;  %17828 = vst.msk [vmem:[%s26963_s2 + $0x2d9] sm:$0x1] %vm1894_vm12, %v14749_v47  ;;  %v15943_v58 = vrot.slane %v15760_v27, %v19158_v18  ;;  %v15947_v47 = vrot.slane %v15774_v59, %v19158_v18 }
 0xa3a   :  { %15626 = vrot.lane.b32.xlu0 %v25347_v60, %s27063_s17  ;;  %15628 = vrot.lane.b32.xlu1 %v25350_v33, %s27063_s17 }
 0xa3c   :  { %v14751_v0 = vpop.permute.xlu0 %14750  ;;  %v14753_v26 = vpop.permute.xlu1 %14752 }
 0xa3d   :  { %17829 = vst.msk [vmem:[%s26963_s2 + $0x2e9] sm:$0x1] %vm1894_vm12, %v14751_v0  ;;  %17830 = vst.msk [vmem:[%s26963_s2 + $0x2f9] sm:$0x1] %vm1894_vm12, %v14753_v26  ;;  %v15776_v0 = vcombine.high %v15760_v27, %v15760_v27  ;;  %v15778_v26 = vcombine.high %v15774_v59, %v15774_v59 }
 0xa3e   :  { %15630 = vrot.lane.b32.xlu0 %v25366_v51, %s27063_s17  ;;  %15632 = vrot.lane.b32.xlu1 %v25369_v21, %s27063_s17 }
 0xa40   :  { %v14755_v60 = vpop.permute.xlu0 %14754  ;;  %v14757_v33 = vpop.permute.xlu1 %14756 }
 0xa41   :  { %17831 = vst.msk [vmem:[%s26963_s2 + $0x309] sm:$0x1] %vm1894_vm12, %v14755_v60  ;;  %17832 = vst.msk [vmem:[%s26963_s2 + $0x319] sm:$0x1] %vm1894_vm12, %v14757_v33  ;;  %v15802_v60 = vrot.slane %v15786_v37, %v19147_v29 }
 0xa42   :  { %15634 = vrot.lane.b32.xlu0 %v25386_v14, %s27063_s17  ;;  %15636 = vrot.lane.b32.xlu1 %v25389_v7, %s27063_s17 }
 0xa44   :  { %v14759_v51 = vpop.permute.xlu0 %14758  ;;  %v14761_v21 = vpop.permute.xlu1 %14760 }
 0xa45   :  { %17833 = vst.msk [vmem:[%s26963_s2 + $0x329] sm:$0x1] %vm1894_vm12, %v14759_v51  ;;  %17834 = vst.msk [vmem:[%s26963_s2 + $0x339] sm:$0x1] %vm1894_vm12, %v14761_v21  ;;  %v15951_v51 = vrot.slane %v15776_v0, %v19158_v18  ;;  %v15955_v21 = vrot.slane %v15778_v26, %v19158_v18 }
 0xa46   :  { %15638 = vrot.lane.b32.xlu0 %v25405_v19, %s27063_s17  ;;  %15640 = vrot.lane.b32.xlu1 %v25408_v38, %s27063_s17  ;;  %v15458_v19 = vrot.slane %v15442_v43, %v19147_v29  ;;  %v15816_v43 = vrot.slane %v15794_v30, %v19147_v29 }
 0xa48   :  { %v14763_v14 = vpop.permute.xlu0 %14762  ;;  %v14765_v7 = vpop.permute.xlu1 %14764  ;;  %v15581_v41 = vrot.slane %v15458_v19, %v19158_v18 }
 0xa49   :  { %17835 = vst.msk [vmem:[%s26963_s2 + $0x349] sm:$0x1] %vm1894_vm12, %v14763_v14  ;;  %17836 = vst.msk [vmem:[%s26963_s2 + $0x359] sm:$0x1] %vm1894_vm12, %v14765_v7  ;;  %v15793_v14 = vrot.slane %v15779_v13, %v19147_v29  ;;  %v15959_v7 = vrot.slane %v15802_v60, %v19158_v18 }
 0xa4a   :  { %15642 = vrot.lane.b32.xlu0 %v25425_v6, %s27063_s17  ;;  %15644 = vrot.lane.b32.xlu1 %v25428_v42, %s27063_s17  ;;  %v15480_v6 = vcombine.high %v15458_v19, %v15458_v19  ;;  %v15737_v42 = vrot.slane %v15722_v31, %v19147_v29  ;;  %v15963_v19 = vrot.slane %v15816_v43, %v19158_v18 }
 0xa4b   :  { %v15795_v49 = vcombine.high %v15793_v14, %v15793_v14  ;;  %v15809_v31 = vrot.slane %v15793_v14, %v19147_v29 }
 0xa4c   :  { %v14767_v38 = vpop.permute.xlu0 %14766  ;;  %v14769_v53 = vpop.permute.xlu1 %14768  ;;  %v15745_v23 = vcombine.high %v15737_v42, %v15737_v42  ;;  %v15753_v28 = vrot.slane %v15737_v42, %v19147_v29 }
 0xa4d   :  { %17837 = vst.msk [vmem:[%s26963_s2 + $0x369] sm:$0x1] %vm1894_vm12, %v14767_v38  ;;  %17838 = vst.msk [vmem:[%s26963_s2 + $0x379] sm:$0x1] %vm1894_vm12, %v14769_v53  ;;  %v15824_v38 = vcombine.high %v15802_v60, %v15802_v60  ;;  %v15826_v53 = vcombine.high %v15816_v43, %v15816_v43  ;;  %v15975_v40 = vrot.slane %v15809_v31, %v19158_v18  ;;  %v16164_v43 = vld [vmem:[#allocation3 + $0x10] sm:$0xff] }
 0xa4e   :  { %15646 = vrot.lane.b32.xlu0 %v25444_v12, %s27063_s17  ;;  %15648 = vrot.lane.b32.xlu1 %v25447_v36, %s27063_s17  ;;  %v15589_v12 = vrot.slane %v15480_v6, %v19158_v18  ;;  %v15465_v36 = vrot.slane %v15449_v9, %v19147_v29  ;;  %v15767_v35 = vrot.slane %v15745_v23, %v19147_v29  ;;  %v15724_v9 = vld [vmem:[#allocation3 + $0x38] sm:$0xff] }
 0xa4f   :  { %v15927_v46 = vrot.slane %v15753_v28, %v19158_v18  ;;  %v15775_v17 = vcombine.high %v15753_v28, %v15753_v28  ;;  %v15825_v34 = vcombine.high %v15809_v31, %v15809_v31  ;;  %v15828_v61 = vcombine.high %v15724_v9, %v15724_v9 }
 0xa50   :  { %v14771_v15 = vpop.permute.xlu0 %14770  ;;  %v14773_v45 = vpop.permute.xlu1 %14772  ;;  %v15597_v52 = vrot.slane %v15465_v36, %v19158_v18  ;;  %v15931_v3 = vrot.slane %v15767_v35, %v19158_v18  ;;  %v15777_v22 = vcombine.high %v15767_v35, %v15767_v35 }
 0xa51   :  { %17839 = vst.msk [vmem:[%s26963_s2 + $0x389] sm:$0x1] %vm1894_vm12, %v14771_v15  ;;  %17840 = vst.msk [vmem:[%s26963_s2 + $0x399] sm:$0x1] %vm1894_vm12, %v14773_v45  ;;  %v15935_v2 = vrot.slane %v15775_v17, %v19158_v18  ;;  %v15967_v15 = vrot.slane %v15824_v38, %v19158_v18  ;;  %v15971_v45 = vrot.slane %v15826_v53, %v19158_v18 }
 0xa52   :  { %15650 = vrot.lane.b32.xlu0 %v15581_v41, %s27063_s17  ;;  %15652 = vrot.lane.b32.xlu1 %v15585_v1, %s27063_s17  ;;  %v15939_v39 = vrot.slane %v15777_v22, %v19158_v18  ;;  %v15823_v41 = vrot.slane %v15795_v49, %v19147_v29  ;;  %v15835_v1 = vrot.slane %v15724_v9, %v19147_v29  ;;  %v15725_v22 = vld [vmem:[#allocation3 + $0x50] sm:$0x3f] }
 0xa53   :  { %v15884_v63 = vrot.slane %v15725_v22, %v19147_v29  ;;  %v15877_v59 = vcombine.high %v15725_v22, %v15725_v22  ;;  %v16179_v49 = vrot.slane %v16164_v43, %v19147_v29 }
 0xa54   :  { %v14775_v62 = vpop.permute.xlu0 %14774  ;;  %v14777_v8 = vpop.permute.xlu1 %14776  ;;  %v15851_v23 = vrot.slane %v15835_v1, %v19147_v29 }
 0xa55   :  { %17841 = vst.msk [vmem:[%s26963_s2 + $0x3a9] sm:$0x1] %vm1894_vm12, %v14775_v62  ;;  %17842 = vst.msk [vmem:[%s26963_s2 + $0x3b9] sm:$0x1] %vm1894_vm12, %v14777_v8  ;;  %v15979_v62 = vrot.slane %v15823_v41, %v19158_v18  ;;  %v15827_v8 = vcombine.high %v15823_v41, %v15823_v41  ;;  %v15892_v27 = vcombine.high %v15884_v63, %v15884_v63 }
 0xa56   :  { %15654 = vrot.lane.b32.xlu0 %v15589_v12, %s27063_s17  ;;  %15656 = vrot.lane.b32.xlu1 %v15593_v32, %s27063_s17  ;;  %v15843_v32 = vcombine.high %v15835_v1, %v15835_v1  ;;  %v15991_v35 = vrot.slane %v15851_v23, %v19158_v18  ;;  %v15900_v0 = vrot.slane %v15884_v63, %v19147_v29 }
 0xa57   :  { %v16187_v41 = vcombine.high %v16179_v49, %v16179_v49  ;;  %v16172_v1 = vcombine.high %v16164_v43, %v16164_v43 }
 0xa58   :  { %v15161_v25 = vpop.permute.xlu0 %15160  ;;  %v15163_v4 = vpop.permute.xlu1 %15162  ;;  %v16023_v14 = vrot.slane %v15900_v0, %v19158_v18 }
 0xa59   :  { %17843 = vst.msk [vmem:[%s26963_s2 + $0x1ea] sm:$0x1] %vm1894_vm12, %v15161_v25  ;;  %17844 = vst.msk [vmem:[%s26963_s2 + $0x1fa] sm:$0x1] %vm1894_vm12, %v15163_v4  ;;  %v15983_v25 = vrot.slane %v15825_v34, %v19158_v18  ;;  %v15987_v4 = vrot.slane %v15827_v8, %v19158_v18  ;;  %v16209_v8 = vrot.slane %v16187_v41, %v19147_v29 }
 0xa5a   :  { %15658 = vrot.lane.b32.xlu0 %v15597_v52, %s27063_s17  ;;  %15660 = vrot.lane.b32.xlu1 %v15601_v16, %s27063_s17  ;;  %s27064_s17 = smov 16   ;;  %v15865_v52 = vrot.slane %v15843_v32, %v19147_v29  ;;  %v15842_v16 = vrot.slane %v15828_v61, %v19147_v29  ;;  %v16186_v32 = vrot.slane %v16172_v1, %v19147_v29 }
 0xa5c   :  { %v15165_v44 = vpop.permute.xlu0 %15164  ;;  %v15167_v10 = vpop.permute.xlu1 %15166  ;;  %v15844_v17 = vcombine.high %v15842_v16, %v15842_v16 }
 0xa5d   :  { %17845 = vst.msk [vmem:[%s26963_s2 + $0x20a] sm:$0x1] %vm1894_vm12, %v15165_v44  ;;  %17846 = vst.msk [vmem:[%s26963_s2 + $0x21a] sm:$0x1] %vm1894_vm12, %v15167_v10  ;;  %v15995_v44 = vrot.slane %v15865_v52, %v19158_v18  ;;  %v15873_v10 = vcombine.high %v15851_v23, %v15851_v23 }
 0xa5e   :  { %16044 = vrot.lane.b32.xlu0 %v15927_v46, %s27064_s17  ;;  %16046 = vrot.lane.b32.xlu1 %v15931_v3, %s27064_s17  ;;  %v15875_v3 = vcombine.high %v15865_v52, %v15865_v52  ;;  %v16188_v52 = vcombine.high %v16186_v32, %v16186_v32 }
 0xa60   :  { %v15169_v50 = vpop.permute.xlu0 %15168  ;;  %v15171_v48 = vpop.permute.xlu1 %15170 }
 0xa61   :  { %17847 = vst.msk [vmem:[%s26963_s2 + $0x22a] sm:$0x1] %vm1894_vm12, %v15169_v50  ;;  %17848 = vst.msk [vmem:[%s26963_s2 + $0x23a] sm:$0x1] %vm1894_vm12, %v15171_v48  ;;  %v15999_v50 = vrot.slane %v15873_v10, %v19158_v18  ;;  %v16003_v48 = vrot.slane %v15875_v3, %v19158_v18  ;;  %v16216_v3 = vrot.slane %v16188_v52, %v19147_v29 }
 0xa62   :  { %16048 = vrot.lane.b32.xlu0 %v15935_v2, %s27064_s17  ;;  %16050 = vrot.lane.b32.xlu1 %v15939_v39, %s27064_s17  ;;  %v15858_v2 = vrot.slane %v15842_v16, %v19147_v29  ;;  %v15872_v39 = vrot.slane %v15844_v17, %v19147_v29  ;;  %v16165_v16 = vld [vmem:[#allocation3 + $0x28] sm:$0xff] }
 0xa63   :  { %v16228_v17 = vrot.slane %v16165_v16, %v19147_v29 }
 0xa64   :  { %v15173_v5 = vpop.permute.xlu0 %15172  ;;  %v15175_v56 = vpop.permute.xlu1 %15174 }
 0xa65   :  { %17849 = vst.msk [vmem:[%s26963_s2 + $0x24a] sm:$0x1] %vm1894_vm12, %v15173_v5  ;;  %17850 = vst.msk [vmem:[%s26963_s2 + $0x25a] sm:$0x1] %vm1894_vm12, %v15175_v56  ;;  %v16007_v5 = vrot.slane %v15858_v2, %v19158_v18  ;;  %v16011_v56 = vrot.slane %v15872_v39, %v19158_v18 }
 0xa66   :  { %16052 = vrot.lane.b32.xlu0 %v15943_v58, %s27064_s17  ;;  %16054 = vrot.lane.b32.xlu1 %v15947_v47, %s27064_s17  ;;  %v15874_v58 = vcombine.high %v15858_v2, %v15858_v2  ;;  %v15876_v47 = vcombine.high %v15872_v39, %v15872_v39  ;;  %v16236_v2 = vcombine.high %v16228_v17, %v16228_v17 }
 0xa67   :  { %v16221_v39 = vcombine.high %v16165_v16, %v16165_v16  ;;  %v16167_v16 = vld [vmem:[#allocation3 + $0x58] sm:$0x3f] }
 0xa68   :  { %v15177_v33 = vpop.permute.xlu0 %15176  ;;  %v15179_v55 = vpop.permute.xlu1 %15178 }
 0xa69   :  { %17851 = vst.msk [vmem:[%s26963_s2 + $0x26a] sm:$0x1] %vm1894_vm12, %v15177_v33  ;;  %17852 = vst.msk [vmem:[%s26963_s2 + $0x27a] sm:$0x1] %vm1894_vm12, %v15179_v55  ;;  %v16015_v33 = vrot.slane %v15874_v58, %v19158_v18  ;;  %v16019_v55 = vrot.slane %v15876_v47, %v19158_v18  ;;  %v16235_v58 = vrot.slane %v16221_v39, %v19147_v29 }
 0xa6a   :  { %16056 = vrot.lane.b32.xlu0 %v15951_v51, %s27064_s17  ;;  %16058 = vrot.lane.b32.xlu1 %v15955_v21, %s27064_s17  ;;  %v15914_v51 = vrot.slane %v15892_v27, %v19147_v29  ;;  %v15891_v21 = vrot.slane %v15877_v59, %v19147_v29  ;;  %v16244_v27 = vrot.slane %v16228_v17, %v19147_v29 }
 0xa6b   :  { %v16251_v43 = vrot.slane %v16235_v58, %v19147_v29 }
 0xa6c   :  { %v15181_v20 = vpop.permute.xlu0 %15180  ;;  %v15183_v24 = vpop.permute.xlu1 %15182  ;;  %v15923_v38 = vcombine.high %v15914_v51, %v15914_v51  ;;  %v15893_v53 = vcombine.high %v15891_v21, %v15891_v21  ;;  %v15907_v31 = vrot.slane %v15891_v21, %v19147_v29  ;;  %v26164_v47 = vrot.slane %v16244_v27, %v19158_v18  ;;  %v16166_v21 = vld [vmem:[#allocation3 + $0x40] sm:$0xff] }
 0xa6d   :  { %17853 = vst.msk [vmem:[%s26963_s2 + $0x28a] sm:$0x1] %vm1894_vm12, %v15181_v20  ;;  %17854 = vst.msk [vmem:[%s26963_s2 + $0x29a] sm:$0x1] %vm1894_vm12, %v15183_v24 }
 0xa6e   :  { %16060 = vrot.lane.b32.xlu0 %v15959_v7, %s27064_s17  ;;  %16062 = vrot.lane.b32.xlu1 %v15963_v19, %s27064_s17  ;;  %v15922_v7 = vcombine.high %v15900_v0, %v15900_v0  ;;  %v16027_v19 = vrot.slane %v15914_v51, %v19158_v18  ;;  %v16237_v51 = vcombine.high %v16235_v58, %v16235_v58 }
 0xa70   :  { %v15185_v6 = vpop.permute.xlu0 %15184  ;;  %v15187_v42 = vpop.permute.xlu1 %15186  ;;  %v16031_v9 = vrot.slane %v15922_v7, %v19158_v18 }
 0xa71   :  { %17855 = vst.msk [vmem:[%s26963_s2 + $0x2aa] sm:$0x1] %vm1894_vm12, %v15185_v6  ;;  %17856 = vst.msk [vmem:[%s26963_s2 + $0x2ba] sm:$0x1] %vm1894_vm12, %v15187_v42 }
 0xa72   :  { %16064 = vrot.lane.b32.xlu0 %v15967_v15, %s27064_s17  ;;  %16066 = vrot.lane.b32.xlu1 %v15971_v45, %s27064_s17  ;;  %v16035_v15 = vrot.slane %v15923_v38, %v19158_v18  ;;  %v15921_v45 = vrot.slane %v15893_v53, %v19147_v29  ;;  %v16277_v38 = vrot.slane %v16166_v21, %v19147_v29 }
 0xa73   :  { %v26203_v53 = vrot.slane %v16251_v43, %v19158_v18 }
 0xa74   :  { %v15189_v12 = vpop.permute.xlu0 %15188  ;;  %v15191_v36 = vpop.permute.xlu1 %15190  ;;  %v16293_v41 = vrot.slane %v16277_v38, %v19147_v29 }
 0xa75   :  { %17857 = vst.msk [vmem:[%s26963_s2 + $0x2ca] sm:$0x1] %vm1894_vm12, %v15189_v12  ;;  %17858 = vst.msk [vmem:[%s26963_s2 + $0x2da] sm:$0x1] %vm1894_vm12, %v15191_v36  ;;  %v16039_v36 = vrot.slane %v15907_v31, %v19158_v18 }
 0xa76   :  { %16068 = vrot.lane.b32.xlu0 %v15975_v40, %s27064_s17  ;;  %16070 = vrot.lane.b32.xlu1 %v15979_v62, %s27064_s17  ;;  %v16195_v40 = vrot.slane %v16179_v49, %v19147_v29  ;;  %v16043_v62 = vrot.slane %v15921_v45, %v19158_v18  ;;  %v16267_v49 = vcombine.high %v16251_v43, %v16251_v43 }
 0xa77   :  { %v16270_v45 = vcombine.high %v16166_v21, %v16166_v21 }
 0xa78   :  { %v15193_v54 = vpop.permute.xlu0 %15192  ;;  %v15195_v28 = vpop.permute.xlu1 %15194  ;;  %v26086_v61 = vrot.slane %v16195_v40, %v19158_v18 }
 0xa79   :  { %17859 = vst.msk [vmem:[%s26963_s2 + $0x2ea] sm:$0x1] %vm1894_vm12, %v15193_v54  ;;  %17860 = vst.msk [vmem:[%s26963_s2 + $0x2fa] sm:$0x1] %vm1894_vm12, %v15195_v28  ;;  %v26089_v28 = vrot.slane %v16209_v8, %v19158_v18 }
 0xa7a   :  { %16072 = vrot.lane.b32.xlu0 %v15983_v25, %s27064_s17  ;;  %16074 = vrot.lane.b32.xlu1 %v15987_v4, %s27064_s17  ;;  %v16217_v25 = vcombine.high %v16195_v40, %v16195_v40  ;;  %v16219_v4 = vcombine.high %v16209_v8, %v16209_v8  ;;  %v26242_v8 = vrot.slane %v16293_v41, %v19158_v18 }
 0xa7c   :  { %v15197_v11 = vpop.permute.xlu0 %15196  ;;  %v15199_v46 = vpop.permute.xlu1 %15198  ;;  %v26108_v10 = vrot.slane %v16219_v4, %v19158_v18 }
 0xa7d   :  { %17861 = vst.msk [vmem:[%s26963_s2 + $0x30a] sm:$0x1] %vm1894_vm12, %v15197_v11  ;;  %17862 = vst.msk [vmem:[%s26963_s2 + $0x31a] sm:$0x1] %vm1894_vm12, %v15199_v46 }
 0xa7e   :  { %16076 = vrot.lane.b32.xlu0 %v15991_v35, %s27064_s17  ;;  %16078 = vrot.lane.b32.xlu1 %v15995_v44, %s27064_s17  ;;  %v16202_v35 = vrot.slane %v16186_v32, %v19147_v29  ;;  %v26105_v44 = vrot.slane %v16217_v25, %v19158_v18  ;;  %v16315_v25 = vcombine.high %v16293_v41, %v16293_v41 }
 0xa80   :  { %v15201_v57 = vpop.permute.xlu0 %15200  ;;  %v15203_v37 = vpop.permute.xlu1 %15202  ;;  %v26125_v22 = vrot.slane %v16202_v35, %v19158_v18  ;;  %v16218_v63 = vcombine.high %v16202_v35, %v16202_v35 }
 0xa81   :  { %17863 = vst.msk [vmem:[%s26963_s2 + $0x32a] sm:$0x1] %vm1894_vm12, %v15201_v57  ;;  %17864 = vst.msk [vmem:[%s26963_s2 + $0x33a] sm:$0x1] %vm1894_vm12, %v15203_v37 }
 0xa82   :  { %16080 = vrot.lane.b32.xlu0 %v15999_v50, %s27064_s17  ;;  %16082 = vrot.lane.b32.xlu1 %v16003_v48, %s27064_s17  ;;  %v26128_v50 = vrot.slane %v16216_v3, %v19158_v18  ;;  %v16220_v48 = vcombine.high %v16216_v3, %v16216_v3  ;;  %v26261_v3 = vrot.slane %v16315_v25, %v19158_v18 }
 0xa84   :  { %v15205_v30 = vpop.permute.xlu0 %15204  ;;  %v15207_v13 = vpop.permute.xlu1 %15206 }
 0xa85   :  { %17865 = vst.msk [vmem:[%s26963_s2 + $0x34a] sm:$0x1] %vm1894_vm12, %v15205_v30  ;;  %17866 = vst.msk [vmem:[%s26963_s2 + $0x35a] sm:$0x1] %vm1894_vm12, %v15207_v13  ;;  %v26144_v13 = vrot.slane %v16218_v63, %v19158_v18 }
 0xa86   :  { %16084 = vrot.lane.b32.xlu0 %v16007_v5, %s27064_s17  ;;  %16086 = vrot.lane.b32.xlu1 %v16011_v56, %s27064_s17  ;;  %v26147_v5 = vrot.slane %v16220_v48, %v19158_v18  ;;  %v16258_v56 = vrot.slane %v16236_v2, %v19147_v29 }
 0xa88   :  { %v15209_v26 = vpop.permute.xlu0 %15208  ;;  %v15211_v60 = vpop.permute.xlu1 %15210 }
 0xa89   :  { %17867 = vst.msk [vmem:[%s26963_s2 + $0x36a] sm:$0x1] %vm1894_vm12, %v15209_v26  ;;  %17868 = vst.msk [vmem:[%s26963_s2 + $0x37a] sm:$0x1] %vm1894_vm12, %v15211_v60  ;;  %v26167_v60 = vrot.slane %v16258_v56, %v19158_v18 }
 0xa8a   :  { %16088 = vrot.lane.b32.xlu0 %v16015_v33, %s27064_s17  ;;  %16090 = vrot.lane.b32.xlu1 %v16019_v55, %s27064_s17  ;;  %v16266_v33 = vcombine.high %v16244_v27, %v16244_v27  ;;  %v16268_v55 = vcombine.high %v16258_v56, %v16258_v56  ;;  %v16319_v56 = vcombine.high %v16167_v16, %v16167_v16 }
 0xa8c   :  { %v15213_v20 = vpop.permute.xlu0 %15212  ;;  %v15215_v24 = vpop.permute.xlu1 %15214  ;;  %v16333_v21 = vrot.slane %v16319_v56, %v19147_v29 }
 0xa8d   :  { %17869 = vst.msk [vmem:[%s26963_s2 + $0x38a] sm:$0x1] %vm1894_vm12, %v15213_v20  ;;  %17870 = vst.msk [vmem:[%s26963_s2 + $0x39a] sm:$0x1] %vm1894_vm12, %v15215_v24  ;;  %v26183_v20 = vrot.slane %v16266_v33, %v19158_v18  ;;  %v26186_v24 = vrot.slane %v16268_v55, %v19158_v18 }
 0xa8e   :  { %16092 = vrot.lane.b32.xlu0 %v16023_v14, %s27064_s17  ;;  %16094 = vrot.lane.b32.xlu1 %v16027_v19, %s27064_s17  ;;  %v16265_v19 = vrot.slane %v16237_v51, %v19147_v29  ;;  %v16349_v41 = vrot.slane %v16333_v21, %v19147_v29 }
 0xa90   :  { %v15217_v6 = vpop.permute.xlu0 %15216  ;;  %v15219_v42 = vpop.permute.xlu1 %15218 }
 0xa91   :  { %17871 = vst.msk [vmem:[%s26963_s2 + $0x3aa] sm:$0x1] %vm1894_vm12, %v15217_v6  ;;  %17872 = vst.msk [vmem:[%s26963_s2 + $0x3ba] sm:$0x1] %vm1894_vm12, %v15219_v42  ;;  %v26206_v6 = vrot.slane %v16265_v19, %v19158_v18  ;;  %v16269_v42 = vcombine.high %v16265_v19, %v16265_v19 }
 0xa92   :  { %16096 = vrot.lane.b32.xlu0 %v16031_v9, %s27064_s17  ;;  %16098 = vrot.lane.b32.xlu1 %v16035_v15, %s27064_s17  ;;  %v16285_v15 = vcombine.high %v16277_v38, %v16277_v38 }
 0xa94   :  { %v15603_v34 = vpop.permute.xlu0 %15602  ;;  %v15605_v12 = vpop.permute.xlu1 %15604 }
 0xa95   :  { %17873 = vst.msk [vmem:[%s26963_s2 + $0x1eb] sm:$0x1] %vm1894_vm12, %v15603_v34  ;;  %17874 = vst.msk [vmem:[%s26963_s2 + $0x1fb] sm:$0x1] %vm1894_vm12, %v15605_v12  ;;  %v26222_v34 = vrot.slane %v16267_v49, %v19158_v18  ;;  %v26225_v12 = vrot.slane %v16269_v42, %v19158_v18 }
 0xa96   :  { %16100 = vrot.lane.b32.xlu0 %v16039_v36, %s27064_s17  ;;  %16102 = vrot.lane.b32.xlu1 %v16043_v62, %s27064_s17  ;;  %v16307_v36 = vrot.slane %v16285_v15, %v19147_v29  ;;  %v16284_v62 = vrot.slane %v16270_v45, %v19147_v29 }
 0xa98   :  { %v15607_v23 = vpop.permute.xlu0 %15606  ;;  %v15609_v54 = vpop.permute.xlu1 %15608  ;;  %v16317_v4 = vcombine.high %v16307_v36, %v16307_v36  ;;  %v16286_v52 = vcombine.high %v16284_v62, %v16284_v62  ;;  %v16300_v35 = vrot.slane %v16284_v62, %v19147_v29  ;;  %v16481_v62 = vrot.slane %v16349_v41, %v19158_v18 }
 0xa99   :  { %17875 = vst.msk [vmem:[%s26963_s2 + $0x20b] sm:$0x1] %vm1894_vm12, %v15607_v23  ;;  %17876 = vst.msk [vmem:[%s26963_s2 + $0x21b] sm:$0x1] %vm1894_vm12, %v15609_v54  ;;  %v26245_v54 = vrot.slane %v16307_v36, %v19158_v18 }
 0xa9a   :  { %16486 = vrot.lane.b32.xlu0 %v26086_v61, %s18642_s19  ;;  %16488 = vrot.lane.b32.xlu1 %v26089_v28, %s18642_s19  ;;  %v26264_v17 = vrot.slane %v16317_v4, %v19158_v18  ;;  %v16314_v63 = vrot.slane %v16286_v52, %v19147_v29  ;;  %v16316_v48 = vcombine.high %v16300_v35, %v16300_v35 }
 0xa9c   :  { %v15611_v11 = vpop.permute.xlu0 %15610  ;;  %v15613_v46 = vpop.permute.xlu1 %15612  ;;  %v26284_v27 = vrot.slane %v16314_v63, %v19158_v18  ;;  %v26300_v33 = vrot.slane %v16316_v48, %v19158_v18 }
 0xa9d   :  { %17877 = vst.msk [vmem:[%s26963_s2 + $0x22b] sm:$0x1] %vm1894_vm12, %v15611_v11  ;;  %17878 = vst.msk [vmem:[%s26963_s2 + $0x23b] sm:$0x1] %vm1894_vm12, %v15613_v46 }
 0xa9e   :  { %16490 = vrot.lane.b32.xlu0 %v26105_v44, %s18642_s19  ;;  %16492 = vrot.lane.b32.xlu1 %v26108_v10, %s18642_s19 }
 0xaa0   :  { %v15615_v57 = vpop.permute.xlu0 %15614  ;;  %v15617_v37 = vpop.permute.xlu1 %15616 }
 0xaa1   :  { %17879 = vst.msk [vmem:[%s26963_s2 + $0x24b] sm:$0x1] %vm1894_vm12, %v15615_v57  ;;  %17880 = vst.msk [vmem:[%s26963_s2 + $0x25b] sm:$0x1] %vm1894_vm12, %v15617_v37  ;;  %v16326_v57 = vrot.slane %v16167_v16, %v19147_v29  ;;  %v26281_v37 = vrot.slane %v16300_v35, %v19158_v18 }
 0xaa2   :  { %16494 = vrot.lane.b32.xlu0 %v26125_v22, %s18642_s19  ;;  %16496 = vrot.lane.b32.xlu1 %v26128_v50, %s18642_s19 }
 0xaa3   :  { %v16342_v58 = vrot.slane %v16326_v57, %v19147_v29 }
 0xaa4   :  { %v15619_v59 = vpop.permute.xlu0 %15618  ;;  %v15621_v30 = vpop.permute.xlu1 %15620 }
 0xaa5   :  { %17881 = vst.msk [vmem:[%s26963_s2 + $0x26b] sm:$0x1] %vm1894_vm12, %v15619_v59  ;;  %17882 = vst.msk [vmem:[%s26963_s2 + $0x27b] sm:$0x1] %vm1894_vm12, %v15621_v30  ;;  %v16318_v59 = vcombine.high %v16314_v63, %v16314_v63  ;;  %v16334_v30 = vcombine.high %v16326_v57, %v16326_v57  ;;  %v16465_v43 = vrot.slane %v16342_v58, %v19158_v18 }
 0xaa6   :  { %16498 = vrot.lane.b32.xlu0 %v26144_v13, %s18642_s19  ;;  %16500 = vrot.lane.b32.xlu1 %v26147_v5, %s18642_s19  ;;  %v16364_v38 = vcombine.high %v16342_v58, %v16342_v58 }
 0xaa7   :  { %v26303_v55 = vrot.slane %v16318_v59, %v19158_v18  ;;  %v16356_v51 = vrot.slane %v16334_v30, %v19147_v29 }
 0xaa8   :  { %v15623_v0 = vpop.permute.xlu0 %15622  ;;  %v15625_v26 = vpop.permute.xlu1 %15624  ;;  %v16473_v15 = vrot.slane %v16364_v38, %v19158_v18 }
 0xaa9   :  { %17883 = vst.msk [vmem:[%s26963_s2 + $0x28b] sm:$0x1] %vm1894_vm12, %v15623_v0  ;;  %17884 = vst.msk [vmem:[%s26963_s2 + $0x29b] sm:$0x1] %vm1894_vm12, %v15625_v26  ;;  %v16469_v19 = vrot.slane %v16356_v51, %v19158_v18  ;;  %v16365_v49 = vcombine.high %v16356_v51, %v16356_v51 }
 0xaaa   :  { %16502 = vrot.lane.b32.xlu0 %v26164_v47, %s18642_s19  ;;  %16504 = vrot.lane.b32.xlu1 %v26167_v60, %s18642_s19 }
 0xaab   :  { %v16477_v45 = vrot.slane %v16365_v49, %v19158_v18 }
 0xaac   :  { %v15627_v14 = vpop.permute.xlu0 %15626  ;;  %v15629_v7 = vpop.permute.xlu1 %15628 }
 0xaad   :  { %17885 = vst.msk [vmem:[%s26963_s2 + $0x2ab] sm:$0x1] %vm1894_vm12, %v15627_v14  ;;  %17886 = vst.msk [vmem:[%s26963_s2 + $0x2bb] sm:$0x1] %vm1894_vm12, %v15629_v7 }
 0xaae   :  { %16506 = vrot.lane.b32.xlu0 %v26183_v20, %s18642_s19  ;;  %16508 = vrot.lane.b32.xlu1 %v26186_v24, %s18642_s19 }
 0xab0   :  { %v15631_v9 = vpop.permute.xlu0 %15630  ;;  %v15633_v31 = vpop.permute.xlu1 %15632 }
 0xab1   :  { %17887 = vst.msk [vmem:[%s26963_s2 + $0x2cb] sm:$0x1] %vm1894_vm12, %v15631_v9  ;;  %17888 = vst.msk [vmem:[%s26963_s2 + $0x2db] sm:$0x1] %vm1894_vm12, %v15633_v31  ;;  %v16335_v9 = vcombine.high %v16333_v21, %v16333_v21 }
 0xab2   :  { %16510 = vrot.lane.b32.xlu0 %v26203_v53, %s18642_s19  ;;  %16512 = vrot.lane.b32.xlu1 %v26206_v6, %s18642_s19 }
 0xab4   :  { %v15635_v1 = vpop.permute.xlu0 %15634  ;;  %v15637_v40 = vpop.permute.xlu1 %15636 }
 0xab5   :  { %17889 = vst.msk [vmem:[%s26963_s2 + $0x2eb] sm:$0x1] %vm1894_vm12, %v15635_v1  ;;  %17890 = vst.msk [vmem:[%s26963_s2 + $0x2fb] sm:$0x1] %vm1894_vm12, %v15637_v40  ;;  %v16363_v1 = vrot.slane %v16335_v9, %v19147_v29 }
 0xab6   :  { %16514 = vrot.lane.b32.xlu0 %v26222_v34, %s18642_s19  ;;  %16516 = vrot.lane.b32.xlu1 %v26225_v12, %s18642_s19 }
 0xab8   :  { %v15639_v32 = vpop.permute.xlu0 %15638  ;;  %v15641_v23 = vpop.permute.xlu1 %15640 }
 0xab9   :  { %17891 = vst.msk [vmem:[%s26963_s2 + $0x30b] sm:$0x1] %vm1894_vm12, %v15639_v32  ;;  %17892 = vst.msk [vmem:[%s26963_s2 + $0x31b] sm:$0x1] %vm1894_vm12, %v15641_v23  ;;  %v16485_v32 = vrot.slane %v16363_v1, %v19158_v18 }
 0xaba   :  { %16518 = vrot.lane.b32.xlu0 %v26242_v8, %s18642_s19  ;;  %16520 = vrot.lane.b32.xlu1 %v26245_v54, %s18642_s19 }
 0xabc   :  { %v15643_v11 = vpop.permute.xlu0 %15642  ;;  %v15645_v46 = vpop.permute.xlu1 %15644 }
 0xabd   :  { %17893 = vst.msk [vmem:[%s26963_s2 + $0x32b] sm:$0x1] %vm1894_vm12, %v15643_v11  ;;  %17894 = vst.msk [vmem:[%s26963_s2 + $0x33b] sm:$0x1] %vm1894_vm12, %v15645_v46 }
 0xabe   :  { %16522 = vrot.lane.b32.xlu0 %v26261_v3, %s18642_s19  ;;  %16524 = vrot.lane.b32.xlu1 %v26264_v17, %s18642_s19 }
 0xac0   :  { %v15647_v2 = vpop.permute.xlu0 %15646  ;;  %v15649_v39 = vpop.permute.xlu1 %15648 }
 0xac1   :  { %17895 = vst.msk [vmem:[%s26963_s2 + $0x34b] sm:$0x1] %vm1894_vm12, %v15647_v2  ;;  %17896 = vst.msk [vmem:[%s26963_s2 + $0x35b] sm:$0x1] %vm1894_vm12, %v15649_v39 }
 0xac2   :  { %16526 = vrot.lane.b32.xlu0 %v26281_v37, %s18642_s19  ;;  %16528 = vrot.lane.b32.xlu1 %v26284_v27, %s18642_s19 }
 0xac4   :  { %v15651_v0 = vpop.permute.xlu0 %15650  ;;  %v15653_v26 = vpop.permute.xlu1 %15652 }
 0xac5   :  { %17897 = vst.msk [vmem:[%s26963_s2 + $0x36b] sm:$0x1] %vm1894_vm12, %v15651_v0  ;;  %17898 = vst.msk [vmem:[%s26963_s2 + $0x37b] sm:$0x1] %vm1894_vm12, %v15653_v26  ;;  %v16609_v26 = vld [vmem:[#allocation3 + $0x58] sm:$0x3f] }
 0xac6   :  { %16530 = vrot.lane.b32.xlu0 %v26300_v33, %s18642_s19  ;;  %16532 = vrot.lane.b32.xlu1 %v26303_v55, %s18642_s19  ;;  %v16761_v38 = vcombine.high %v16609_v26, %v16609_v26 }
 0xac8   :  { %v15655_v14 = vpop.permute.xlu0 %15654  ;;  %v15657_v7 = vpop.permute.xlu1 %15656 }
 0xac9   :  { %17899 = vst.msk [vmem:[%s26963_s2 + $0x38b] sm:$0x1] %vm1894_vm12, %v15655_v14  ;;  %17900 = vst.msk [vmem:[%s26963_s2 + $0x39b] sm:$0x1] %vm1894_vm12, %v15657_v7 }
 0xaca   :  { %16534 = vrot.lane.b32.xlu0 %v16465_v43, %s18642_s19  ;;  %16536 = vrot.lane.b32.xlu1 %v16469_v19, %s18642_s19  ;;  %v16768_v43 = vrot.slane %v16609_v26, %v19147_v29 }
 0xacc   :  { %v15659_v31 = vpop.permute.xlu0 %15658  ;;  %v15661_v42 = vpop.permute.xlu1 %15660  ;;  %v16776_v19 = vcombine.high %v16768_v43, %v16768_v43  ;;  %v16784_v49 = vrot.slane %v16768_v43, %v19147_v29 }
 0xacd   :  { %17901 = vst.msk [vmem:[%s26963_s2 + $0x3ab] sm:$0x1] %vm1894_vm12, %v15659_v31  ;;  %17902 = vst.msk [vmem:[%s26963_s2 + $0x3bb] sm:$0x1] %vm1894_vm12, %v15661_v42 }
 0xace   :  { %16538 = vrot.lane.b32.xlu0 %v16473_v15, %s18642_s19  ;;  %16540 = vrot.lane.b32.xlu1 %v16477_v45, %s18642_s19  ;;  %v16798_v42 = vrot.slane %v16776_v19, %v19147_v29  ;;  %v16775_v15 = vrot.slane %v16761_v38, %v19147_v29  ;;  %v16907_v45 = vrot.slane %v16784_v49, %v19158_v18 }
 0xad0   :  { %v16045_v40 = vpop.permute.xlu0 %16044  ;;  %v16047_v36 = vpop.permute.xlu1 %16046 }
 0xad1   :  { %17903 = vst.msk [vmem:[%s26963_s2 + $0x1ec] sm:$0x1] %vm1894_vm12, %v16045_v40  ;;  %17904 = vst.msk [vmem:[%s26963_s2 + $0x1fc] sm:$0x1] %vm1894_vm12, %v16047_v36  ;;  %v16911_v40 = vrot.slane %v16798_v42, %v19158_v18  ;;  %v16806_v36 = vcombine.high %v16784_v49, %v16784_v49 }
 0xad2   :  { %16542 = vrot.lane.b32.xlu0 %v16481_v62, %s18642_s19  ;;  %16544 = vrot.lane.b32.xlu1 %v16485_v32, %s18642_s19  ;;  %v16807_v62 = vcombine.high %v16798_v42, %v16798_v42  ;;  %v16777_v32 = vcombine.high %v16775_v15, %v16775_v15 }
 0xad4   :  { %v16049_v23 = vpop.permute.xlu0 %16048  ;;  %v16051_v25 = vpop.permute.xlu1 %16050 }
 0xad5   :  { %17905 = vst.msk [vmem:[%s26963_s2 + $0x20c] sm:$0x1] %vm1894_vm12, %v16049_v23  ;;  %17906 = vst.msk [vmem:[%s26963_s2 + $0x21c] sm:$0x1] %vm1894_vm12, %v16051_v25 }
 0xad6   :  { %16928 = vrot.lane.b32.xlu0 %v26086_v61, %s18649_s10  ;;  %16930 = vrot.lane.b32.xlu1 %v26089_v28, %s18649_s10 }
 0xad8   :  { %v16053_v4 = vpop.permute.xlu0 %16052  ;;  %v16055_v52 = vpop.permute.xlu1 %16054 }
 0xad9   :  { %17907 = vst.msk [vmem:[%s26963_s2 + $0x22c] sm:$0x1] %vm1894_vm12, %v16053_v4  ;;  %17908 = vst.msk [vmem:[%s26963_s2 + $0x23c] sm:$0x1] %vm1894_vm12, %v16055_v52  ;;  %v16915_v4 = vrot.slane %v16806_v36, %v19158_v18  ;;  %v16919_v52 = vrot.slane %v16807_v62, %v19158_v18 }
 0xada   :  { %16932 = vrot.lane.b32.xlu0 %v26105_v44, %s18649_s10  ;;  %16934 = vrot.lane.b32.xlu1 %v26108_v10, %s18649_s10 }
 0xadc   :  { %v16057_v16 = vpop.permute.xlu0 %16056  ;;  %v16059_v35 = vpop.permute.xlu1 %16058 }
 0xadd   :  { %17909 = vst.msk [vmem:[%s26963_s2 + $0x24c] sm:$0x1] %vm1894_vm12, %v16057_v16  ;;  %17910 = vst.msk [vmem:[%s26963_s2 + $0x25c] sm:$0x1] %vm1894_vm12, %v16059_v35  ;;  %v16791_v16 = vrot.slane %v16775_v15, %v19147_v29  ;;  %v16805_v35 = vrot.slane %v16777_v32, %v19147_v29 }
 0xade   :  { %16936 = vrot.lane.b32.xlu0 %v26125_v22, %s18649_s10  ;;  %16938 = vrot.lane.b32.xlu1 %v26128_v50, %s18649_s10 }
 0xae0   :  { %v16061_v11 = vpop.permute.xlu0 %16060  ;;  %v16063_v46 = vpop.permute.xlu1 %16062 }
 0xae1   :  { %17911 = vst.msk [vmem:[%s26963_s2 + $0x26c] sm:$0x1] %vm1894_vm12, %v16061_v11  ;;  %17912 = vst.msk [vmem:[%s26963_s2 + $0x27c] sm:$0x1] %vm1894_vm12, %v16063_v46 }
 0xae2   :  { %16940 = vrot.lane.b32.xlu0 %v26144_v13, %s18649_s10  ;;  %16942 = vrot.lane.b32.xlu1 %v26147_v5, %s18649_s10 }
 0xae4   :  { %v16065_v63 = vpop.permute.xlu0 %16064  ;;  %v16067_v57 = vpop.permute.xlu1 %16066 }
 0xae5   :  { %17913 = vst.msk [vmem:[%s26963_s2 + $0x28c] sm:$0x1] %vm1894_vm12, %v16065_v63  ;;  %17914 = vst.msk [vmem:[%s26963_s2 + $0x29c] sm:$0x1] %vm1894_vm12, %v16067_v57  ;;  %v16923_v63 = vrot.slane %v16791_v16, %v19158_v18  ;;  %v16927_v57 = vrot.slane %v16805_v35, %v19158_v18 }
 0xae6   :  { %16944 = vrot.lane.b32.xlu0 %v26164_v47, %s18649_s10  ;;  %16946 = vrot.lane.b32.xlu1 %v26167_v60, %s18649_s10 }
 0xae8   :  { %v16069_v48 = vpop.permute.xlu0 %16068  ;;  %v16071_v2 = vpop.permute.xlu1 %16070 }
 0xae9   :  { %17915 = vst.msk [vmem:[%s26963_s2 + $0x2ac] sm:$0x1] %vm1894_vm12, %v16069_v48  ;;  %17916 = vst.msk [vmem:[%s26963_s2 + $0x2bc] sm:$0x1] %vm1894_vm12, %v16071_v2 }
 0xaea   :  { %16948 = vrot.lane.b32.xlu0 %v26183_v20, %s18649_s10  ;;  %16950 = vrot.lane.b32.xlu1 %v26186_v24, %s18649_s10 }
 0xaec   :  { %v16073_v39 = vpop.permute.xlu0 %16072  ;;  %v16075_v59 = vpop.permute.xlu1 %16074 }
 0xaed   :  { %17917 = vst.msk [vmem:[%s26963_s2 + $0x2cc] sm:$0x1] %vm1894_vm12, %v16073_v39  ;;  %17918 = vst.msk [vmem:[%s26963_s2 + $0x2dc] sm:$0x1] %vm1894_vm12, %v16075_v59 }
 0xaee   :  { %16952 = vrot.lane.b32.xlu0 %v26203_v53, %s18649_s10  ;;  %16954 = vrot.lane.b32.xlu1 %v26206_v6, %s18649_s10 }
 0xaf0   :  { %v16077_v30 = vpop.permute.xlu0 %16076  ;;  %v16079_v56 = vpop.permute.xlu1 %16078 }
 0xaf1   :  { %17919 = vst.msk [vmem:[%s26963_s2 + $0x2ec] sm:$0x1] %vm1894_vm12, %v16077_v30  ;;  %17920 = vst.msk [vmem:[%s26963_s2 + $0x2fc] sm:$0x1] %vm1894_vm12, %v16079_v56  ;;  %v17051_v30 = vld [vmem:[#allocation3 + $0x58] sm:$0x3f] }
 0xaf2   :  { %16956 = vrot.lane.b32.xlu0 %v26222_v34, %s18649_s10  ;;  %16958 = vrot.lane.b32.xlu1 %v26225_v12, %s18649_s10  ;;  %v17210_v56 = vrot.slane %v17051_v30, %v19147_v29 }
 0xaf4   :  { %v16081_v58 = vpop.permute.xlu0 %16080  ;;  %v16083_v0 = vpop.permute.xlu1 %16082 }
 0xaf5   :  { %17921 = vst.msk [vmem:[%s26963_s2 + $0x30c] sm:$0x1] %vm1894_vm12, %v16081_v58  ;;  %17922 = vst.msk [vmem:[%s26963_s2 + $0x31c] sm:$0x1] %vm1894_vm12, %v16083_v0  ;;  %v17218_v58 = vcombine.high %v17210_v56, %v17210_v56  ;;  %v17203_v0 = vcombine.high %v17051_v30, %v17051_v30 }
 0xaf6   :  { %16960 = vrot.lane.b32.xlu0 %v26242_v8, %s18649_s10  ;;  %16962 = vrot.lane.b32.xlu1 %v26245_v54, %s18649_s10 }
 0xaf8   :  { %v16085_v51 = vpop.permute.xlu0 %16084  ;;  %v16087_v21 = vpop.permute.xlu1 %16086 }
 0xaf9   :  { %17923 = vst.msk [vmem:[%s26963_s2 + $0x32c] sm:$0x1] %vm1894_vm12, %v16085_v51  ;;  %17924 = vst.msk [vmem:[%s26963_s2 + $0x33c] sm:$0x1] %vm1894_vm12, %v16087_v21  ;;  %v17240_v51 = vrot.slane %v17218_v58, %v19147_v29  ;;  %v17217_v21 = vrot.slane %v17203_v0, %v19147_v29 }
 0xafa   :  { %16964 = vrot.lane.b32.xlu0 %v26261_v3, %s18649_s10  ;;  %16966 = vrot.lane.b32.xlu1 %v26264_v17, %s18649_s10 }
 0xafb   :  { %v17249_v19 = vcombine.high %v17240_v51, %v17240_v51  ;;  %v17219_v38 = vcombine.high %v17217_v21, %v17217_v21 }
 0xafc   :  { %v16089_v14 = vpop.permute.xlu0 %16088  ;;  %v16091_v7 = vpop.permute.xlu1 %16090 }
 0xafd   :  { %17925 = vst.msk [vmem:[%s26963_s2 + $0x34c] sm:$0x1] %vm1894_vm12, %v16089_v14  ;;  %17926 = vst.msk [vmem:[%s26963_s2 + $0x35c] sm:$0x1] %vm1894_vm12, %v16091_v7  ;;  %v17353_v14 = vrot.slane %v17240_v51, %v19158_v18  ;;  %v17247_v42 = vrot.slane %v17219_v38, %v19147_v29 }
 0xafe   :  { %16968 = vrot.lane.b32.xlu0 %v26281_v37, %s18649_s10  ;;  %16970 = vrot.lane.b32.xlu1 %v26284_v27, %s18649_s10 }
 0xb00   :  { %v16093_v9 = vpop.permute.xlu0 %16092  ;;  %v16095_v31 = vpop.permute.xlu1 %16094 }
 0xb01   :  { %17927 = vst.msk [vmem:[%s26963_s2 + $0x36c] sm:$0x1] %vm1894_vm12, %v16093_v9  ;;  %17928 = vst.msk [vmem:[%s26963_s2 + $0x37c] sm:$0x1] %vm1894_vm12, %v16095_v31  ;;  %v17361_v9 = vrot.slane %v17249_v19, %v19158_v18  ;;  %v17233_v31 = vrot.slane %v17217_v21, %v19147_v29 }
 0xb02   :  { %16972 = vrot.lane.b32.xlu0 %v26300_v33, %s18649_s10  ;;  %16974 = vrot.lane.b32.xlu1 %v26303_v55, %s18649_s10 }
 0xb04   :  { %v16097_v41 = vpop.permute.xlu0 %16096  ;;  %v16099_v1 = vpop.permute.xlu1 %16098 }
 0xb05   :  { %17929 = vst.msk [vmem:[%s26963_s2 + $0x38c] sm:$0x1] %vm1894_vm12, %v16097_v41  ;;  %17930 = vst.msk [vmem:[%s26963_s2 + $0x39c] sm:$0x1] %vm1894_vm12, %v16099_v1  ;;  %v17365_v41 = vrot.slane %v17233_v31, %v19158_v18 }
 0xb06   :  { %16976 = vrot.lane.b32.xlu0 %v16907_v45, %s18649_s10  ;;  %16978 = vrot.lane.b32.xlu1 %v16911_v40, %s18649_s10 }
 0xb08   :  { %v16101_v23 = vpop.permute.xlu0 %16100  ;;  %v16103_v25 = vpop.permute.xlu1 %16102 }
 0xb09   :  { %17931 = vst.msk [vmem:[%s26963_s2 + $0x3ac] sm:$0x1] %vm1894_vm12, %v16101_v23  ;;  %17932 = vst.msk [vmem:[%s26963_s2 + $0x3bc] sm:$0x1] %vm1894_vm12, %v16103_v25 }
 0xb0a   :  { %16980 = vrot.lane.b32.xlu0 %v16915_v4, %s18649_s10  ;;  %16982 = vrot.lane.b32.xlu1 %v16919_v52, %s18649_s10 }
 0xb0c   :  { %v16487_v11 = vpop.permute.xlu0 %16486  ;;  %v16489_v46 = vpop.permute.xlu1 %16488 }
 0xb0d   :  { %17933 = vst.msk [vmem:[%s26963_s2 + $0x1ed] sm:$0x1] %vm1894_vm12, %v16487_v11  ;;  %17934 = vst.msk [vmem:[%s26963_s2 + $0x1fd] sm:$0x1] %vm1894_vm12, %v16489_v46 }
 0xb0e   :  { %16984 = vrot.lane.b32.xlu0 %v16923_v63, %s18649_s10  ;;  %16986 = vrot.lane.b32.xlu1 %v16927_v57, %s18649_s10 }
 0xb10   :  { %v16491_v48 = vpop.permute.xlu0 %16490  ;;  %v16493_v2 = vpop.permute.xlu1 %16492 }
 0xb11   :  { %17935 = vst.msk [vmem:[%s26963_s2 + $0x20d] sm:$0x1] %vm1894_vm12, %v16491_v48  ;;  %17936 = vst.msk [vmem:[%s26963_s2 + $0x21d] sm:$0x1] %vm1894_vm12, %v16493_v2 }
 0xb12   :  { %17370 = vrot.lane.b32.xlu0 %v26086_v61, %s18652_s29  ;;  %17372 = vrot.lane.b32.xlu1 %v26089_v28, %s18652_s29 }
 0xb14   :  { %v16495_v39 = vpop.permute.xlu0 %16494  ;;  %v16497_v59 = vpop.permute.xlu1 %16496 }
 0xb15   :  { %17937 = vst.msk [vmem:[%s26963_s2 + $0x22d] sm:$0x1] %vm1894_vm12, %v16495_v39  ;;  %17938 = vst.msk [vmem:[%s26963_s2 + $0x23d] sm:$0x1] %vm1894_vm12, %v16497_v59 }
 0xb16   :  { %17374 = vrot.lane.b32.xlu0 %v26105_v44, %s18652_s29  ;;  %17376 = vrot.lane.b32.xlu1 %v26108_v10, %s18652_s29 }
 0xb18   :  { %v16499_v61 = vpop.permute.xlu0 %16498  ;;  %v16501_v28 = vpop.permute.xlu1 %16500 }
 0xb19   :  { %17939 = vst.msk [vmem:[%s26963_s2 + $0x24d] sm:$0x1] %vm1894_vm12, %v16499_v61  ;;  %17940 = vst.msk [vmem:[%s26963_s2 + $0x25d] sm:$0x1] %vm1894_vm12, %v16501_v28 }
 0xb1a   :  { %17378 = vrot.lane.b32.xlu0 %v26125_v22, %s18652_s29  ;;  %17380 = vrot.lane.b32.xlu1 %v26128_v50, %s18652_s29 }
 0xb1c   :  { %v16503_v44 = vpop.permute.xlu0 %16502  ;;  %v16505_v10 = vpop.permute.xlu1 %16504 }
 0xb1d   :  { %17941 = vst.msk [vmem:[%s26963_s2 + $0x26d] sm:$0x1] %vm1894_vm12, %v16503_v44  ;;  %17942 = vst.msk [vmem:[%s26963_s2 + $0x27d] sm:$0x1] %vm1894_vm12, %v16505_v10 }
 0xb1e   :  { %17382 = vrot.lane.b32.xlu0 %v26144_v13, %s18652_s29  ;;  %17384 = vrot.lane.b32.xlu1 %v26147_v5, %s18652_s29 }
 0xb20   :  { %v16507_v22 = vpop.permute.xlu0 %16506  ;;  %v16509_v50 = vpop.permute.xlu1 %16508 }
 0xb21   :  { %17943 = vst.msk [vmem:[%s26963_s2 + $0x28d] sm:$0x1] %vm1894_vm12, %v16507_v22  ;;  %17944 = vst.msk [vmem:[%s26963_s2 + $0x29d] sm:$0x1] %vm1894_vm12, %v16509_v50 }
 0xb22   :  { %17386 = vrot.lane.b32.xlu0 %v26164_v47, %s18652_s29  ;;  %17388 = vrot.lane.b32.xlu1 %v26167_v60, %s18652_s29 }
 0xb24   :  { %v16511_v13 = vpop.permute.xlu0 %16510  ;;  %v16513_v5 = vpop.permute.xlu1 %16512 }
 0xb25   :  { %17945 = vst.msk [vmem:[%s26963_s2 + $0x2ad] sm:$0x1] %vm1894_vm12, %v16511_v13  ;;  %17946 = vst.msk [vmem:[%s26963_s2 + $0x2bd] sm:$0x1] %vm1894_vm12, %v16513_v5 }
 0xb26   :  { %17390 = vrot.lane.b32.xlu0 %v26183_v20, %s18652_s29  ;;  %17392 = vrot.lane.b32.xlu1 %v26186_v24, %s18652_s29 }
 0xb28   :  { %v16515_v47 = vpop.permute.xlu0 %16514  ;;  %v16517_v60 = vpop.permute.xlu1 %16516 }
 0xb29   :  { %17947 = vst.msk [vmem:[%s26963_s2 + $0x2cd] sm:$0x1] %vm1894_vm12, %v16515_v47  ;;  %17948 = vst.msk [vmem:[%s26963_s2 + $0x2dd] sm:$0x1] %vm1894_vm12, %v16517_v60 }
 0xb2a   :  { %17394 = vrot.lane.b32.xlu0 %v26203_v53, %s18652_s29  ;;  %17396 = vrot.lane.b32.xlu1 %v26206_v6, %s18652_s29 }
 0xb2c   :  { %v16519_v20 = vpop.permute.xlu0 %16518  ;;  %v16521_v24 = vpop.permute.xlu1 %16520 }
 0xb2d   :  { %17949 = vst.msk [vmem:[%s26963_s2 + $0x2ed] sm:$0x1] %vm1894_vm12, %v16519_v20  ;;  %17950 = vst.msk [vmem:[%s26963_s2 + $0x2fd] sm:$0x1] %vm1894_vm12, %v16521_v24 }
 0xb2e   :  { %17398 = vrot.lane.b32.xlu0 %v26222_v34, %s18652_s29  ;;  %17400 = vrot.lane.b32.xlu1 %v26225_v12, %s18652_s29 }
 0xb30   :  { %v16523_v53 = vpop.permute.xlu0 %16522  ;;  %v16525_v6 = vpop.permute.xlu1 %16524 }
 0xb31   :  { %17951 = vst.msk [vmem:[%s26963_s2 + $0x30d] sm:$0x1] %vm1894_vm12, %v16523_v53  ;;  %17952 = vst.msk [vmem:[%s26963_s2 + $0x31d] sm:$0x1] %vm1894_vm12, %v16525_v6 }
 0xb32   :  { %17402 = vrot.lane.b32.xlu0 %v26242_v8, %s18652_s29  ;;  %17404 = vrot.lane.b32.xlu1 %v26245_v54, %s18652_s29 }
 0xb34   :  { %v16527_v34 = vpop.permute.xlu0 %16526  ;;  %v16529_v12 = vpop.permute.xlu1 %16528 }
 0xb35   :  { %17953 = vst.msk [vmem:[%s26963_s2 + $0x32d] sm:$0x1] %vm1894_vm12, %v16527_v34  ;;  %17954 = vst.msk [vmem:[%s26963_s2 + $0x33d] sm:$0x1] %vm1894_vm12, %v16529_v12 }
 0xb36   :  { %17406 = vrot.lane.b32.xlu0 %v26261_v3, %s18652_s29  ;;  %17408 = vrot.lane.b32.xlu1 %v26264_v17, %s18652_s29  ;;  %v17226_v3 = vrot.slane %v17210_v56, %v19147_v29  ;;  %v17369_v29 = vrot.slane %v17247_v42, %v19158_v18 }
 0xb38   :  { %v16531_v8 = vpop.permute.xlu0 %16530  ;;  %v16533_v54 = vpop.permute.xlu1 %16532  ;;  %v17248_v7 = vcombine.high %v17226_v3, %v17226_v3 }
 0xb39   :  { %17955 = vst.msk [vmem:[%s26963_s2 + $0x34d] sm:$0x1] %vm1894_vm12, %v16531_v8  ;;  %17956 = vst.msk [vmem:[%s26963_s2 + $0x35d] sm:$0x1] %vm1894_vm12, %v16533_v54 }
 0xb3a   :  { %17410 = vrot.lane.b32.xlu0 %v26281_v37, %s18652_s29  ;;  %17412 = vrot.lane.b32.xlu1 %v26284_v27, %s18652_s29  ;;  %v17349_v37 = vrot.slane %v17226_v3, %v19158_v18  ;;  %v17357_v49 = vrot.slane %v17248_v7, %v19158_v18 }
 0xb3c   :  { %v16535_v17 = vpop.permute.xlu0 %16534  ;;  %v16537_v26 = vpop.permute.xlu1 %16536 }
 0xb3d   :  { %17957 = vst.msk [vmem:[%s26963_s2 + $0x36d] sm:$0x1] %vm1894_vm12, %v16535_v17  ;;  %17958 = vst.msk [vmem:[%s26963_s2 + $0x37d] sm:$0x1] %vm1894_vm12, %v16537_v26 }
 0xb3e   :  { %17414 = vrot.lane.b32.xlu0 %v26300_v33, %s18652_s29  ;;  %17416 = vrot.lane.b32.xlu1 %v26303_v55, %s18652_s29 }
 0xb40   :  { %v16539_v27 = vpop.permute.xlu0 %16538  ;;  %v16541_v43 = vpop.permute.xlu1 %16540 }
 0xb41   :  { %17959 = vst.msk [vmem:[%s26963_s2 + $0x38d] sm:$0x1] %vm1894_vm12, %v16539_v27  ;;  %17960 = vst.msk [vmem:[%s26963_s2 + $0x39d] sm:$0x1] %vm1894_vm12, %v16541_v43 }
 0xb42   :  { %17418 = vrot.lane.b32.xlu0 %v17349_v37, %s18652_s29  ;;  %17420 = vrot.lane.b32.xlu1 %v17353_v14, %s18652_s29 }
 0xb44   :  { %v16543_v33 = vpop.permute.xlu0 %16542  ;;  %v16545_v55 = vpop.permute.xlu1 %16544 }
 0xb45   :  { %17961 = vst.msk [vmem:[%s26963_s2 + $0x3ad] sm:$0x1] %vm1894_vm12, %v16543_v33  ;;  %17962 = vst.msk [vmem:[%s26963_s2 + $0x3bd] sm:$0x1] %vm1894_vm12, %v16545_v55 }
 0xb46   :  { %17422 = vrot.lane.b32.xlu0 %v17357_v49, %s18652_s29  ;;  %17424 = vrot.lane.b32.xlu1 %v17361_v9, %s18652_s29 }
 0xb48   :  { %v16929_v15 = vpop.permute.xlu0 %16928  ;;  %v16931_v45 = vpop.permute.xlu1 %16930 }
 0xb49   :  { %17963 = vst.msk [vmem:[%s26963_s2 + $0x1ee] sm:$0x1] %vm1894_vm12, %v16929_v15  ;;  %17964 = vst.msk [vmem:[%s26963_s2 + $0x1fe] sm:$0x1] %vm1894_vm12, %v16931_v45 }
 0xb4a   :  { %17426 = vrot.lane.b32.xlu0 %v17365_v41, %s18652_s29  ;;  %17428 = vrot.lane.b32.xlu1 %v17369_v29, %s18652_s29 }
 0xb4c   :  { %v16933_v1 = vpop.permute.xlu0 %16932  ;;  %v16935_v40 = vpop.permute.xlu1 %16934 }
 0xb4d   :  { %17965 = vst.msk [vmem:[%s26963_s2 + $0x20e] sm:$0x1] %vm1894_vm12, %v16933_v1  ;;  %17966 = vst.msk [vmem:[%s26963_s2 + $0x21e] sm:$0x1] %vm1894_vm12, %v16935_v40 }
 0xb50   :  { %v16937_v18 = vpop.permute.xlu0 %16936  ;;  %v16939_v36 = vpop.permute.xlu1 %16938 }
 0xb51   :  { %17967 = vst.msk [vmem:[%s26963_s2 + $0x22e] sm:$0x1] %vm1894_vm12, %v16937_v18  ;;  %17968 = vst.msk [vmem:[%s26963_s2 + $0x23e] sm:$0x1] %vm1894_vm12, %v16939_v36 }
 0xb54   :  { %v16941_v62 = vpop.permute.xlu0 %16940  ;;  %v16943_v32 = vpop.permute.xlu1 %16942 }
 0xb55   :  { %17969 = vst.msk [vmem:[%s26963_s2 + $0x24e] sm:$0x1] %vm1894_vm12, %v16941_v62  ;;  %17970 = vst.msk [vmem:[%s26963_s2 + $0x25e] sm:$0x1] %vm1894_vm12, %v16943_v32 }
 0xb58   :  { %v16945_v23 = vpop.permute.xlu0 %16944  ;;  %v16947_v25 = vpop.permute.xlu1 %16946 }
 0xb59   :  { %17971 = vst.msk [vmem:[%s26963_s2 + $0x26e] sm:$0x1] %vm1894_vm12, %v16945_v23  ;;  %17972 = vst.msk [vmem:[%s26963_s2 + $0x27e] sm:$0x1] %vm1894_vm12, %v16947_v25 }
 0xb5c   :  { %v16949_v4 = vpop.permute.xlu0 %16948  ;;  %v16951_v52 = vpop.permute.xlu1 %16950 }
 0xb5d   :  { %17973 = vst.msk [vmem:[%s26963_s2 + $0x28e] sm:$0x1] %vm1894_vm12, %v16949_v4  ;;  %17974 = vst.msk [vmem:[%s26963_s2 + $0x29e] sm:$0x1] %vm1894_vm12, %v16951_v52 }
 0xb60   :  { %v16953_v16 = vpop.permute.xlu0 %16952  ;;  %v16955_v35 = vpop.permute.xlu1 %16954 }
 0xb61   :  { %17975 = vst.msk [vmem:[%s26963_s2 + $0x2ae] sm:$0x1] %vm1894_vm12, %v16953_v16  ;;  %17976 = vst.msk [vmem:[%s26963_s2 + $0x2be] sm:$0x1] %vm1894_vm12, %v16955_v35 }
 0xb64   :  { %v16957_v11 = vpop.permute.xlu0 %16956  ;;  %v16959_v46 = vpop.permute.xlu1 %16958 }
 0xb65   :  { %17977 = vst.msk [vmem:[%s26963_s2 + $0x2ce] sm:$0x1] %vm1894_vm12, %v16957_v11  ;;  %17978 = vst.msk [vmem:[%s26963_s2 + $0x2de] sm:$0x1] %vm1894_vm12, %v16959_v46 }
 0xb68   :  { %v16961_v63 = vpop.permute.xlu0 %16960  ;;  %v16963_v57 = vpop.permute.xlu1 %16962 }
 0xb69   :  { %17979 = vst.msk [vmem:[%s26963_s2 + $0x2ee] sm:$0x1] %vm1894_vm12, %v16961_v63  ;;  %17980 = vst.msk [vmem:[%s26963_s2 + $0x2fe] sm:$0x1] %vm1894_vm12, %v16963_v57 }
 0xb6c   :  { %v16965_v48 = vpop.permute.xlu0 %16964  ;;  %v16967_v2 = vpop.permute.xlu1 %16966 }
 0xb6d   :  { %17981 = vst.msk [vmem:[%s26963_s2 + $0x30e] sm:$0x1] %vm1894_vm12, %v16965_v48  ;;  %17982 = vst.msk [vmem:[%s26963_s2 + $0x31e] sm:$0x1] %vm1894_vm12, %v16967_v2 }
 0xb70   :  { %v16969_v39 = vpop.permute.xlu0 %16968  ;;  %v16971_v59 = vpop.permute.xlu1 %16970 }
 0xb71   :  { %17983 = vst.msk [vmem:[%s26963_s2 + $0x32e] sm:$0x1] %vm1894_vm12, %v16969_v39  ;;  %17984 = vst.msk [vmem:[%s26963_s2 + $0x33e] sm:$0x1] %vm1894_vm12, %v16971_v59 }
 0xb74   :  { %v16973_v61 = vpop.permute.xlu0 %16972  ;;  %v16975_v28 = vpop.permute.xlu1 %16974 }
 0xb75   :  { %17985 = vst.msk [vmem:[%s26963_s2 + $0x34e] sm:$0x1] %vm1894_vm12, %v16973_v61  ;;  %17986 = vst.msk [vmem:[%s26963_s2 + $0x35e] sm:$0x1] %vm1894_vm12, %v16975_v28 }
 0xb78   :  { %v16977_v44 = vpop.permute.xlu0 %16976  ;;  %v16979_v10 = vpop.permute.xlu1 %16978 }
 0xb79   :  { %17987 = vst.msk [vmem:[%s26963_s2 + $0x36e] sm:$0x1] %vm1894_vm12, %v16977_v44  ;;  %17988 = vst.msk [vmem:[%s26963_s2 + $0x37e] sm:$0x1] %vm1894_vm12, %v16979_v10 }
 0xb7c   :  { %v16981_v22 = vpop.permute.xlu0 %16980  ;;  %v16983_v50 = vpop.permute.xlu1 %16982 }
 0xb7d   :  { %17989 = vst.msk [vmem:[%s26963_s2 + $0x38e] sm:$0x1] %vm1894_vm12, %v16981_v22  ;;  %17990 = vst.msk [vmem:[%s26963_s2 + $0x39e] sm:$0x1] %vm1894_vm12, %v16983_v50 }
 0xb80   :  { %v16985_v13 = vpop.permute.xlu0 %16984  ;;  %v16987_v5 = vpop.permute.xlu1 %16986 }
 0xb81   :  { %17991 = vst.msk [vmem:[%s26963_s2 + $0x3ae] sm:$0x1] %vm1894_vm12, %v16985_v13  ;;  %17992 = vst.msk [vmem:[%s26963_s2 + $0x3be] sm:$0x1] %vm1894_vm12, %v16987_v5 }
 0xb84   :  { %v17371_v47 = vpop.permute.xlu0 %17370  ;;  %v17373_v60 = vpop.permute.xlu1 %17372 }
 0xb85   :  { %17993 = vst.msk [vmem:[%s26963_s2 + $0x1ef] sm:$0x1] %vm1894_vm12, %v17371_v47  ;;  %17994 = vst.msk [vmem:[%s26963_s2 + $0x1ff] sm:$0x1] %vm1894_vm12, %v17373_v60 }
 0xb88   :  { %v17375_v20 = vpop.permute.xlu0 %17374  ;;  %v17377_v24 = vpop.permute.xlu1 %17376 }
 0xb89   :  { %17995 = vst.msk [vmem:[%s26963_s2 + $0x20f] sm:$0x1] %vm1894_vm12, %v17375_v20  ;;  %17996 = vst.msk [vmem:[%s26963_s2 + $0x21f] sm:$0x1] %vm1894_vm12, %v17377_v24 }
 0xb8c   :  { %v17379_v53 = vpop.permute.xlu0 %17378  ;;  %v17381_v6 = vpop.permute.xlu1 %17380 }
 0xb8d   :  { %17997 = vst.msk [vmem:[%s26963_s2 + $0x22f] sm:$0x1] %vm1894_vm12, %v17379_v53  ;;  %17998 = vst.msk [vmem:[%s26963_s2 + $0x23f] sm:$0x1] %vm1894_vm12, %v17381_v6 }
 0xb90   :  { %v17383_v30 = vpop.permute.xlu0 %17382  ;;  %v17385_v34 = vpop.permute.xlu1 %17384 }
 0xb91   :  { %17999 = vst.msk [vmem:[%s26963_s2 + $0x24f] sm:$0x1] %vm1894_vm12, %v17383_v30  ;;  %18000 = vst.msk [vmem:[%s26963_s2 + $0x25f] sm:$0x1] %vm1894_vm12, %v17385_v34 }
 0xb94   :  { %v17387_v12 = vpop.permute.xlu0 %17386  ;;  %v17389_v56 = vpop.permute.xlu1 %17388 }
 0xb95   :  { %18001 = vst.msk [vmem:[%s26963_s2 + $0x26f] sm:$0x1] %vm1894_vm12, %v17387_v12  ;;  %18002 = vst.msk [vmem:[%s26963_s2 + $0x27f] sm:$0x1] %vm1894_vm12, %v17389_v56 }
 0xb98   :  { %v17391_v8 = vpop.permute.xlu0 %17390  ;;  %v17393_v54 = vpop.permute.xlu1 %17392 }
 0xb99   :  { %18003 = vst.msk [vmem:[%s26963_s2 + $0x28f] sm:$0x1] %vm1894_vm12, %v17391_v8  ;;  %18004 = vst.msk [vmem:[%s26963_s2 + $0x29f] sm:$0x1] %vm1894_vm12, %v17393_v54 }
 0xb9c   :  { %v17395_v58 = vpop.permute.xlu0 %17394  ;;  %v17397_v0 = vpop.permute.xlu1 %17396 }
 0xb9d   :  { %18005 = vst.msk [vmem:[%s26963_s2 + $0x2af] sm:$0x1] %vm1894_vm12, %v17395_v58  ;;  %18006 = vst.msk [vmem:[%s26963_s2 + $0x2bf] sm:$0x1] %vm1894_vm12, %v17397_v0 }
 0xba0   :  { %v17399_v3 = vpop.permute.xlu0 %17398  ;;  %v17401_v17 = vpop.permute.xlu1 %17400 }
 0xba1   :  { %18007 = vst.msk [vmem:[%s26963_s2 + $0x2cf] sm:$0x1] %vm1894_vm12, %v17399_v3  ;;  %18008 = vst.msk [vmem:[%s26963_s2 + $0x2df] sm:$0x1] %vm1894_vm12, %v17401_v17 }
 0xba4   :  { %v17403_v26 = vpop.permute.xlu0 %17402  ;;  %v17405_v51 = vpop.permute.xlu1 %17404 }
 0xba5   :  { %18009 = vst.msk [vmem:[%s26963_s2 + $0x2ef] sm:$0x1] %vm1894_vm12, %v17403_v26  ;;  %18010 = vst.msk [vmem:[%s26963_s2 + $0x2ff] sm:$0x1] %vm1894_vm12, %v17405_v51 }
 0xba8   :  { %v17407_v21 = vpop.permute.xlu0 %17406  ;;  %v17409_v37 = vpop.permute.xlu1 %17408 }
 0xba9   :  { %18011 = vst.msk [vmem:[%s26963_s2 + $0x30f] sm:$0x1] %vm1894_vm12, %v17407_v21  ;;  %18012 = vst.msk [vmem:[%s26963_s2 + $0x31f] sm:$0x1] %vm1894_vm12, %v17409_v37 }
 0xbac   :  { %v17411_v27 = vpop.permute.xlu0 %17410  ;;  %v17413_v43 = vpop.permute.xlu1 %17412 }
 0xbad   :  { %18013 = vst.msk [vmem:[%s26963_s2 + $0x32f] sm:$0x1] %vm1894_vm12, %v17411_v27  ;;  %18014 = vst.msk [vmem:[%s26963_s2 + $0x33f] sm:$0x1] %vm1894_vm12, %v17413_v43 }
 0xbb0   :  { %v17415_v14 = vpop.permute.xlu0 %17414  ;;  %v17417_v7 = vpop.permute.xlu1 %17416 }
 0xbb1   :  { %18015 = vst.msk [vmem:[%s26963_s2 + $0x34f] sm:$0x1] %vm1894_vm12, %v17415_v14  ;;  %18016 = vst.msk [vmem:[%s26963_s2 + $0x35f] sm:$0x1] %vm1894_vm12, %v17417_v7 }
 0xbb4   :  { %v17419_v19 = vpop.permute.xlu0 %17418  ;;  %v17421_v38 = vpop.permute.xlu1 %17420 }
 0xbb5   :  { %18017 = vst.msk [vmem:[%s26963_s2 + $0x36f] sm:$0x1] %vm1894_vm12, %v17419_v19  ;;  %18018 = vst.msk [vmem:[%s26963_s2 + $0x37f] sm:$0x1] %vm1894_vm12, %v17421_v38 }
 0xbb8   :  { %v17423_v33 = vpop.permute.xlu0 %17422  ;;  %v17425_v55 = vpop.permute.xlu1 %17424 }
 0xbb9   :  { %18019 = vst.msk [vmem:[%s26963_s2 + $0x38f] sm:$0x1] %vm1894_vm12, %v17423_v33  ;;  %18020 = vst.msk [vmem:[%s26963_s2 + $0x39f] sm:$0x1] %vm1894_vm12, %v17425_v55 }
 0xbbc   :  { %v17427_v49 = vpop.permute.xlu0 %17426  ;;  %v17429_v9 = vpop.permute.xlu1 %17428 }
 0xbbd   :  { %18021 = vst.msk [vmem:[%s26963_s2 + $0x3af] sm:$0x1] %vm1894_vm12, %v17427_v49  ;;  %18022 = vst.msk [vmem:[%s26963_s2 + $0x3bf] sm:$0x1] %vm1894_vm12, %v17429_v9 }

</bundles_post_ra>
